<compile_context>
chip_gen: v6e
topology: v6e:2x2x1
jax: 0.10.0
libtpu: 0.0.40
codegen_flags: <defaults>
</compile_context>

<pallas_src>
import jax
import jax.numpy as jnp
from jax import lax
from jax.experimental import pallas as pl
from jax.experimental.pallas import tpu as pltpu


def linear_kernel(x_ref, w_ref, b_ref, o_ref):
    # x_ref: (Mp, K) full activation slab
    # w_ref: (TN, K) tile of weight in native PyTorch (Cout, Cin) layout
    # b_ref: (1, TN) bias tile
    acc = lax.dot_general(
        x_ref[...],
        w_ref[...],
        dimension_numbers=(((1,), (1,)), ((), ())),  # contract K against K
        preferred_element_type=jnp.float32,
    )
    o_ref[...] = (acc + b_ref[...]).astype(o_ref.dtype)


def _default_tn_and_vmem():
    """Pick output-tile width per TPU generation."""
    try:
        kind = jax.devices()[0].device_kind.lower()
    except Exception:
        kind = ""
    if "v7" in kind:
        # 2 TCs share the grid: keep >=2 grid steps per core for DMA overlap.
        return 256, None
    # v5e / v6e (and unknown): larger tile amortizes per-step overhead.
    # Bump scoped VMEM so double-buffered 8 MiB weight tiles fit on v5e
    # (harmless on v6e, whose default is already 32 MiB).
    return 512, 24 << 20


def linear_permute(x, weight, bias, *, tn=None, vmem_limit_bytes=None):
    """x: [B, H, W, Cin]; weight: [Cout, Cin] (PyTorch Linear layout); bias: [Cout].

    Returns [B, Cout, H, W] (equivalent to torch Linear followed by
    permute([0, 3, 1, 2])).
    """
    B, H, W, Cin = x.shape
    Cout = weight.shape[0]
    M = B * H * W

    if tn is None:
        tn, auto_vmem = _default_tn_and_vmem()
        if vmem_limit_bytes is None:
            vmem_limit_bytes = auto_vmem
    assert Cout % tn == 0, (Cout, tn)

    # Pad rows up to a sublane multiple (8) -> unmasked stores in the kernel.
    Mp = (M + 7) // 8 * 8
    x2d = x.reshape(M, Cin)
    if Mp != M:
        x2d = jnp.pad(x2d, ((0, Mp - M), (0, 0)))

    bias2d = bias.reshape(1, Cout)

    grid = (Cout // tn,)
    out2d = pl.pallas_call(
        linear_kernel,
        out_shape=jax.ShapeDtypeStruct((Mp, Cout), x.dtype),
        grid_spec=pltpu.PrefetchScalarGridSpec(
            num_scalar_prefetch=0,
            grid=grid,
            in_specs=[
                pl.BlockSpec((Mp, Cin), lambda j: (0, 0)),   # full activation slab
                pl.BlockSpec((tn, Cin), lambda j: (j, 0)),   # native (Cout, Cin) weight tile
                pl.BlockSpec((1, tn), lambda j: (0, j)),     # lane-dense bias tile
            ],
            out_specs=pl.BlockSpec((Mp, tn), lambda j: (0, j)),
        ),
        compiler_params=pltpu.CompilerParams(
            dimension_semantics=("parallel",),
            vmem_limit_bytes=vmem_limit_bytes,
        ),
    )(x2d, weight, bias2d)

    # Drop row padding, then NHWC -> NCHW permute (layout glue, outside kernel)
    out = out2d[:M].reshape(B, H, W, Cout)
    return jnp.transpose(out, (0, 3, 1, 2))


if __name__ == "__main__":
    key = jax.random.PRNGKey(0)
    kx, kw, kb = jax.random.split(key, 3)

    B, H, W, Cin, Cout = 1, 7, 7, 4096, 1024

    x = jax.random.normal(kx, (B, H, W, Cin), dtype=jnp.float32)
    # Deterministic parameter init (synthetic, mimics Linear(4096, 1024) shapes)
    weight = jax.random.normal(kw, (Cout, Cin), dtype=jnp.float32) * 0.02
    bias = jax.random.normal(kb, (Cout,), dtype=jnp.float32) * 0.02

    out = linear_permute(x, weight, bias)
    out = jax.block_until_ready(out)

    # Correctness check against plain-JAX reference
    ref = jnp.transpose(
        (x.reshape(-1, Cin) @ weight.T + bias).reshape(B, H, W, Cout),
        (0, 3, 1, 2),
    )
    assert out.shape == (B, Cout, H, W), out.shape
    assert jnp.allclose(out, ref, atol=1e-3, rtol=1e-3)

    print("KERNEL_OK")
</pallas_src>

<mosaic_0001>
module attributes {stable_mosaic.version = 11 : i64} {
  func.func @linear_kernel(%arg0: i32, %arg1: memref<56x4096xf32, #tpu.memory_space<vmem>>, %arg2: memref<512x4096xf32, #tpu.memory_space<vmem>>, %arg3: memref<1x512xf32, #tpu.memory_space<vmem>>, %arg4: memref<56x512xf32, #tpu.memory_space<vmem>>) attributes {dimension_semantics = [#tpu.dimension_semantics<parallel>], iteration_bounds = array<i64: 2>, scalar_prefetch = 0 : i64, scratch_operands = 0 : i64, tpu.core_type = #tpu.core_type<tc>, window_params = [{pipeline_mode = #tpu.pipeline_mode<synchronous>, transform_indices = @transform_0, window_bounds = array<i64: 56, 4096>}, {transform_indices = @transform_1, window_bounds = array<i64: 512, 4096>}, {transform_indices = @transform_2, window_bounds = array<i64: 1, 512>}, {transform_indices = @transform_3, window_bounds = array<i64: 56, 512>}]} {
    %c0 = arith.constant 0 : index
    %c0_0 = arith.constant 0 : index
    %0 = vector.load %arg1[%c0, %c0_0] : memref<56x4096xf32, #tpu.memory_space<vmem>>, vector<56x4096xf32>
    %c0_1 = arith.constant 0 : index
    %c0_2 = arith.constant 0 : index
    %1 = vector.load %arg2[%c0_1, %c0_2] : memref<512x4096xf32, #tpu.memory_space<vmem>>, vector<512x4096xf32>
    %cst = arith.constant dense<0.000000e+00> : vector<56x512xf32>
    %2 = tpu.matmul %0, %1, %cst {dimension_numbers = #tpu.dot_dimension_numbers<[1], [1], [0], [0], [0, 0, 1, 0], [], []>} : vector<56x4096xf32>, vector<512x4096xf32>, vector<56x512xf32> -> vector<56x512xf32>
    %c0_3 = arith.constant 0 : index
    %c0_4 = arith.constant 0 : index
    %3 = vector.load %arg3[%c0_3, %c0_4] : memref<1x512xf32, #tpu.memory_space<vmem>>, vector<1x512xf32>
    %4 = vector.broadcast %3 : vector<1x512xf32> to vector<56x512xf32>
    %5 = arith.addf %2, %4 : vector<56x512xf32>
    %c0_5 = arith.constant 0 : index
    %c0_6 = arith.constant 0 : index
    %6 = vector.load %arg4[%c0_5, %c0_6] : memref<56x512xf32, #tpu.memory_space<vmem>>, vector<56x512xf32>
    tpu.vector_store %arg4[%c0_5, %c0_6], %5 {strides = array<i32>} : memref<56x512xf32, #tpu.memory_space<vmem>>, vector<56x512xf32>,
    return
  }
  func.func @transform_0(%arg0: i32) -> (i32, i32) {
    %c0_i32 = arith.constant 0 : i32
    %c0_i32_0 = arith.constant 0 : i32
    %c0_i32_1 = arith.constant 0 : i32
    return %c0_i32, %c0_i32_0 : i32, i32
  }
  func.func @transform_1(%arg0: i32) -> (i32, i32) {
    %c0_i32 = arith.constant 0 : i32
    %c0_i32_0 = arith.constant 0 : i32
    return %arg0, %c0_i32 : i32, i32
  }
  func.func @transform_2(%arg0: i32) -> (i32, i32) {
    %c0_i32 = arith.constant 0 : i32
    %c0_i32_0 = arith.constant 0 : i32
    return %c0_i32, %arg0 : i32, i32
  }
  func.func @transform_3(%arg0: i32) -> (i32, i32) {
    %c0_i32 = arith.constant 0 : i32
    %c0_i32_0 = arith.constant 0 : i32
    return %c0_i32, %arg0 : i32, i32
  }
}

</mosaic_0001>

<bundles_post_ra>
// kernel: tpu_custom_call.1
= control target key start
LH: loop header
LB: loop body
LE: loop exit
PB: predicated region body
PF: predicated region fallthrough
CT: control target
= control target key end

     0   :  { %8 = vsyncpa [#allocation3], 0  ;;  %s9787_s0 = inlined_call_operand.hbm [shape: f32[56,4096], index: 0, kind: input, shape index: {}]   ;;  %s9788_s1 = inlined_call_operand.hbm [shape: f32[1024,4096], index: 1, kind: input, shape index: {}]   ;;  %s9789_s2 = inlined_call_operand.hbm [shape: f32[1,1024], index: 2, kind: input, shape index: {}]   ;;  %s9790_s3 = inlined_call_operand.hbm [shape: f32[56,1024], index: 3, kind: output, shape index: {}]  }
   0x1   :  { %9 = vsyncpa [#allocation6], 0 }
   0x2   :  { %11 = vsyncpa [#allocation6 + $0x1], 0 }
   0x3   :  { %12 = vsyncpa [#allocation4], 0 }
   0x4   :  { %14 = vsyncpa [#allocation4 + $0x1], 0  ;;  %s6606_s12 = smov 0   ;;  %s6608_s13 = smov 0  }
   0x5   :  { %s6610_s14 = smov 0   ;;  %s6612_s15 = smov 0  }
   0x6 LB: > { %s6627_s16 = sadd.s32 1, %s6575_s15   ;;  %s48_s17 = sadd.s32 1, %s6571_s14  ;;  %s6575_s15 = sphi %s6612_s15, %s9989_s15   ;;  %s6571_s14 = sphi %s6610_s14, %s9988_s14   ;;  %s6567_s13 = sphi %s6608_s13, %s9987_s13   ;;  %s6563_s12 = sphi %s6606_s12, %s9986_s12  }
   0x7   : > { %s45_s18 = ssub.s32 %s6575_s15, %s6627_s16  ;;  %p55_p0 = scmp.ne.s32.totalorder %s6571_s14, %s6567_s13 }
   0x8   : > { %p46_p1 = scmp.eq.s32.totalorder %s45_s18, 0  ;;  %p56_p2 = scmp.eq.s32.totalorder %s6575_s15, 0 }
   0x9   : > { %p6158_p5 = scmp.lt.s32.totalorder %s6575_s15, 2  ;;  %s150_s20 = sand.u32 1, %s6575_s15  }
   0xa   : > { %s6636_s19 = scalar_select %p46_p1, %s6571_s14, %s48_s17  }
   0xb   : > { %p57_p3 = por %p56_p2, %p55_p0  ;;  %s152_s21 = sand.u32 1, %s6571_s14  }
   0xc   : > { %s6112_s22 = sshll.u32 %s152_s21, 14  ;;  %s6128_s23 = sshll.u32 %s6575_s15, 18 }
   0xd   : > { %s6651_s26 = scalar_lea.hbm %s9788_s1, %s6128_s23  ;;  %s154_s27 = scalar_lea.vmem [#allocation5], %s6112_s22 }
   0xe   : > { %s162_s28 = sshll.u32 %s154_s27, 4  ;;  %p6653_p6 = pnand %p6158_p5, %p57_p3  ;;  %s6657_s28 = int_to_ptr.vmem [resolvable:$true] %s162_s28 }
   0xf   : > { %s6659_s30 = scalar_lea.sflag [#allocation6], %s150_s20  ;;  %s6425_s4 = scalar_lea.hbm %s6651_s26, 262144 }
  0x10   : > { %p6426_p7 = scmp.ne.s32.totalorder %s6651_s26, %s6425_s4  ;;  %p6427_p8 = pneg %p6653_p6 }
  0x11   : > { %s6430_s7 = scalar_lea.hbm %s9788_s1, 524288  ;;  %p6431_p11 = scmp.lt.s32.totalorder %s6651_s26, %s9788_s1 }
  0x12   : > { %p6428_p9 = pnand %p6427_p8, %p6426_p7  ;;  %p6432_p12 = scmp.lt.s32.totalorder %s6430_s7, %s6425_s4 }
  0x14   : > { %p6429_p10 = pneg %p6428_p9  ;;  %p6433_p13 = por %p6432_p12, %p6431_p11 }
  0x16   : > { %p6434_p1 = pnand %p6433_p13, %p6429_p10 }
  0x18   : > { %6437 = shalt.err (!%p6434_p1)
}
  0x19   : > { %s6438_s10 = scalar_lea.vmem %s6657_s28, 262144  ;;  %s6577_s11 = smov [#allocation5]  }
  0x1a   : > { %p6439_p2 = scmp.ne.s32.totalorder %s6657_s28, %s6438_s10  ;;  %s6443_s17 = sshll.u32 %s6577_s11, 4  ;;  %s6444_s17 = int_to_ptr.vmem [resolvable:$false] %s6443_s17 }
  0x1b   : > { %s6445_s18 = scalar_lea.vmem %s6444_s17, 524288  ;;  %p6446_p7 = scmp.lt.s32.totalorder %s6657_s28, %s6444_s17 }
  0x1c   : > { %p6441_p3 = pnand %p6439_p2, %p6427_p8  ;;  %p6447_p9 = scmp.lt.s32.totalorder %s6445_s18, %s6438_s10 }
  0x1e   : > { %p6442_p5 = pneg %p6441_p3  ;;  %p6448_p4 = por %p6447_p9, %p6446_p7 }
  0x20   : > { %p6449_p11 = pnand %p6448_p4, %p6442_p5 }
  0x22   : > { %6452 = shalt.err (!%p6449_p11)
}
  0x23   : > { %s9793_s20 = smov 4096   ;;  %s6579_s22 = smov 256  }
  0x24   : > { %6149 = dma.hbm_to_vmem [thread:$0]  (!%p6653_p6), %s6651_s26, 262144, %s6657_s28, %s6659_s30, %s9793_s20, %s9793_s20, %s6579_s22  }
  0x25   : > { %s6690_s23 = sadd.s32 4294967295, %s6575_s15   ;;  %s6108_s24 = sadd.s32 4294967294, %s6575_s15  }
  0x26   : > { %p61_p4 = scmp.ne.s32.totalorder %s6567_s13, %s6563_s12  ;;  %p9791_p10 = scmp.eq.s32.totalorder %s6690_s23, 0 }
  0x27   : > { %p111_p12 = scmp.eq.s32.totalorder %s6690_s23, 1  ;;  %p117_p13 = scmp.eq.s32.totalorder %s6108_s24, 1 }
  0x28   : > { %p6699_p1 = por %p9791_p10, %p61_p4  ;;  %p6109_p2 = scmp.ge.s32.totalorder %s6575_s15, 1 }
  0x29   : > { %p6707_p3 = por %p111_p12, %p55_p0  ;;  %p6711_p5 = por %p117_p13, %p61_p4 }
  0x2a   : > { %s9800_s25 = scalar_select %p6699_p1, 1, 0 }
  0x2b   : > { %s9801_s26 = scalar_select %p6707_p3, 1, 0 }
  0x2c   : > { %s9802_s27 = scalar_select %p6711_p5, 1, 0 }
  0x2d   : > { %p124_p7 = scmp.lt.s32.totalorder %s6575_s15, 3  ;;  %s6116_s28 = sshll.u32 %s152_s21, 2 }
  0x2e   : > { %s6580_s5 = smov [#allocation2]   ;;  %s6129_s7 = sshll.u32 %s6575_s15, 6 }
  0x2f   : > { %p6718_p9 = pnand %p6109_p2, %p124_p7  ;;  %s136_s6 = sshll.u32 %s6580_s5, 4  ;;  %s6722_s6 = int_to_ptr.vmem [resolvable:$true] %s136_s6 }
  0x30   : > { %s6730_s10 = scalar_lea.hbm %s9789_s2, %s6129_s7  ;;  %s176_s21 = scalar_lea.vmem [#allocation7], %s6116_s28 }
  0x31   : > { %s9803_s4 = scalar_select %p6718_p9, 1, 0 }
  0x32   : > { %p6142_p0 = pneg %p6718_p9  ;;  %s184_s11 = sshll.u32 %s176_s21, 4  ;;  %s185_s11 = int_to_ptr.vmem [resolvable:$true] %s184_s11 }
  0x33   : > { %s6453_s18 = scalar_lea.hbm %s6730_s10, 64  ;;  %s6458_s7 = scalar_lea.hbm %s9789_s2, 128 }
  0x34   : > { %p6734_p11 = pnand %p6142_p0, %p9791_p10  ;;  %p6454_p4 = scmp.ne.s32.totalorder %s6730_s10, %s6453_s18 }
  0x35   : > { %p6459_p2 = scmp.lt.s32.totalorder %s6730_s10, %s9789_s2  ;;  %p6460_p7 = scmp.lt.s32.totalorder %s6458_s7, %s6453_s18 }
  0x36   : > { %s9804_s17 = scalar_select %p6734_p11, 1, 0 }
  0x37   : > { %p6456_p12 = pnand %p6454_p4, %p6427_p8  ;;  %p6461_p0 = por %p6460_p7, %p6459_p2 }
  0x39   : > { %p6457_p13 = pneg %p6456_p12 }
  0x3b   : > { %p6462_p10 = pnand %p6461_p0, %p6457_p13 }
  0x3d   : > { %6465 = shalt.err (!%p6462_p10)
}
  0x3e   : > { %s6466_s28 = scalar_lea.vmem %s185_s11, 64  ;;  %s6581_s21 = smov [#allocation7]  }
  0x3f   : > { %p6467_p5 = scmp.ne.s32.totalorder %s185_s11, %s6466_s28  ;;  %s6471_s20 = sshll.u32 %s6581_s21, 4  ;;  %s6472_s20 = int_to_ptr.vmem [resolvable:$false] %s6471_s20 }
  0x40   : > { %s6473_s24 = scalar_lea.vmem %s6472_s20, 128  ;;  %p6474_p12 = scmp.lt.s32.totalorder %s185_s11, %s6472_s20 }
  0x41   : > { %p6469_p3 = pnand %p6467_p5, %p6427_p8  ;;  %p6475_p1 = scmp.lt.s32.totalorder %s6473_s24, %s6466_s28 }
  0x43   : > { %p6470_p4 = pneg %p6469_p3  ;;  %p6476_p9 = por %p6475_p1, %p6474_p12 }
  0x45   : > { %p6477_p11 = pnand %p6476_p9, %p6470_p4 }
  0x47   : > { %6480 = shalt.err (!%p6477_p11)
}
  0x48   : > { %6152 = dma.hbm_to_vmem [thread:$0]  (!%p6653_p6), %s6730_s10, 64, %s185_s11, %s6659_s30  }
  0x49   : > { %p9805_p8 = scmp.ne.s32.totalorder %s9804_s17, 0  ;;  %s6492_s18 = scalar_lea.vmem %s6722_s6, 28672 }
  0x4a   : > { %p6493_p3 = scmp.ne.s32.totalorder %s6722_s6, %s6492_s18  ;;  %p6500_p2 = scmp.lt.s32.totalorder %s6722_s6, %s6722_s6 }
  0x4b   : > { %p6483_p10 = pneg %p9805_p8  ;;  %p6501_p1 = scmp.lt.s32.totalorder %s6492_s18, %s6492_s18 }
  0x4d   : > { %p6495_p5 = pnand %p6493_p3, %p6483_p10  ;;  %p6502_p9 = por %p6501_p1, %p6500_p2 }
  0x4f   : > { %p6496_p13 = pneg %p6495_p5 }
  0x51   : > { %p6503_p11 = pnand %p6502_p9, %p6496_p13 }
  0x53   : > { %6506 = shalt.err (!%p6503_p11)
}
  0x54   : > { %s9806_s29 = smov 4096   ;;  %p9807_p6 = scmp.ne.s32.totalorder %s9803_s4, 0 }
  0x55   : > { %6145 = dma.hbm_to_vmem [thread:$0]  (!%p9805_p8), %s9787_s0, 28672, %s6722_s6, [#allocation3], %s9806_s29, %s9806_s29, %s6579_s22  }
  0x56   : > { %193 = sbr.rel (%p9807_p6) target bundleno = 2386 (0x952), region = 32 }
  0x5b   : > { %p9808_p7 = scmp.eq.s32.totalorder %s6690_s23, 0 }
  0x5d   : > { %6550 = dma.done.wait (%p9808_p7), [#allocation3], 28672   ;;  %p9809_p0 = pmov %p9808_p7 }
  0x5e   : > { %s199_s10 = sand.u32 1, %s6690_s23   ;;  %s6780_s11 = sand.u32 1, %s6567_s13  }
  0x5f   : > { %6552 = vsyncadd (%p9809_p0), [#allocation3], 4294938624  ;;  %s6121_s17 = sshll.u32 %s6780_s11, 14  ;;  %s200_s5 = scalar_lea.sflag [#allocation6], %s199_s10 }
  0x60   : > { %s6783_s7 = scalar_lea.vmem [#allocation5], %s6121_s17  ;;  %p9810_p4 = scmp.ne.s32.totalorder %s9800_s25, 0 }
  0x62   : > { %6554 = dma.done.wait (%p9810_p4), %s200_s5, 262208  }
  0x63   : > { %6556 = vsyncadd (%p9810_p4), %s200_s5, 4294705088  ;;  %v948_v0 = vld [vmem:[%s6783_s7 + $0xf08] sm:$0xff]  ;;  %v950_v1 = vld [vmem:[%s6783_s7 + $0xf18] sm:$0xff]  ;;  %s6122_s22 = sshll.u32 %s6780_s11, 2  ;;  %s6131_s4 = smul.u32 224, %s6780_s11 }
  0x64   : > { %v947_v2 = vld [vmem:[%s6783_s7 + $0xf00] sm:$0xff]  ;;  %2537 = vmatprep.subr.mxu0 %v948_v0  ;;  %2644 = vmatprep.subr.mxu1 %v950_v1  ;;  %v949_v3 = vld [vmem:[%s6783_s7 + $0xf10] sm:$0xff]  ;;  %v916_v4 = vld [vmem:[%s6783_s7 + $0xe08] sm:$0xff]  ;;  %s7113_s25 = scalar_lea.vmem [#allocation7], %s6122_s22  ;;  %s6130_s8 = sshll.u32 %s6690_s23, 9 }
  0x65   : > { %v918_v5 = vld [vmem:[%s6783_s7 + $0xe18] sm:$0xff]  ;;  %2538 = vmatpush1.xpose.msra.mxu0 %v947_v2  ;;  %2645 = vmatpush1.xpose.msra.mxu1 %v949_v3  ;;  %v915_v6 = vld [vmem:[%s6783_s7 + $0xe00] sm:$0xff]  ;;  %v917_v7 = vld [vmem:[%s6783_s7 + $0xe10] sm:$0xff]  ;;  %s8493_s6 = scalar_lea.vmem [#allocation8], %s6131_s4  ;;  %s9740_s24 = scalar_lea.hbm %s9790_s3, %s6130_s8 }
  0x66   : > { %2539 = vmatprep.subr.mxu0 %v916_v4  ;;  %2646 = vmatprep.subr.mxu1 %v918_v5  ;;  %v884_v8 = vld [vmem:[%s6783_s7 + $0xd08] sm:$0xff]  ;;  %v886_v9 = vld [vmem:[%s6783_s7 + $0xd18] sm:$0xff]  ;;  %v883_v10 = vld [vmem:[%s6783_s7 + $0xd00] sm:$0xff]  ;;  %s6003_s9 = sshll.u32 %s8493_s6, 4  ;;  %s5990_s23 = scalar_lea.sflag [#allocation4], %s6780_s11  ;;  %s9742_s9 = int_to_ptr.vmem [resolvable:$true] %s6003_s9 }
  0x67   : > { %v885_v11 = vld [vmem:[%s6783_s7 + $0xd10] sm:$0xff]  ;;  %v852_v12 = vld [vmem:[%s6783_s7 + $0xc08] sm:$0xff]  ;;  %v854_v13 = vld [vmem:[%s6783_s7 + $0xc18] sm:$0xff]  ;;  %s6507_s18 = scalar_lea.vmem %s9742_s9, 3584  ;;  %p9983_p8 = scmp.ne.s32.totalorder %s9801_s26, 0 }
  0x68   : > { %v851_v14 = vld [vmem:[%s6783_s7 + $0xc00] sm:$0xff]  ;;  %v853_v15 = vld [vmem:[%s6783_s7 + $0xc10] sm:$0xff]  ;;  %v820_v16 = vld [vmem:[%s6783_s7 + $0xb08] sm:$0xff]  ;;  %p6508_p12 = scmp.ne.s32.totalorder %s9742_s9, %s6507_s18  ;;  %s6582_s29 = smov [#allocation8]  }
  0x69   : > { %2540 = vmatpush1.xpose.msra.mxu0 %v915_v6  ;;  %2647 = vmatpush1.xpose.msra.mxu1 %v917_v7  ;;  %v822_v17 = vld [vmem:[%s6783_s7 + $0xb18] sm:$0xff]  ;;  %v819_v18 = vld [vmem:[%s6783_s7 + $0xb00] sm:$0xff]  ;;  %v821_v19 = vld [vmem:[%s6783_s7 + $0xb10] sm:$0xff]  ;;  %s6511_s20 = sshll.u32 %s6582_s29, 4  ;;  %s6512_s20 = int_to_ptr.vmem [resolvable:$false] %s6511_s20 }
  0x6a   : > { %2541 = vmatprep.subr.mxu0 %v884_v8  ;;  %2648 = vmatprep.subr.mxu1 %v886_v9  ;;  %v788_v20 = vld [vmem:[%s6783_s7 + $0xa08] sm:$0xff]  ;;  %v790_v21 = vld [vmem:[%s6783_s7 + $0xa18] sm:$0xff]  ;;  %v787_v22 = vld [vmem:[%s6783_s7 + $0xa00] sm:$0xff]  ;;  %p6509_p10 = pnand %p6508_p12, %p9983_p8  ;;  %s6513_s30 = scalar_lea.vmem %s6512_s20, 7168 }
  0x6b   : > { %v789_v23 = vld [vmem:[%s6783_s7 + $0xa10] sm:$0xff]  ;;  %v756_v24 = vld [vmem:[%s6783_s7 + $0x908] sm:$0xff]  ;;  %v758_v25 = vld [vmem:[%s6783_s7 + $0x918] sm:$0xff]  ;;  %p6514_p5 = scmp.lt.s32.totalorder %s9742_s9, %s6512_s20  ;;  %p6515_p13 = scmp.lt.s32.totalorder %s6513_s30, %s6507_s18 }
  0x6c   : > { %v755_v26 = vld [vmem:[%s6783_s7 + $0x900] sm:$0xff]  ;;  %v757_v27 = vld [vmem:[%s6783_s7 + $0x910] sm:$0xff]  ;;  %v724_v28 = vld [vmem:[%s6783_s7 + $0x808] sm:$0xff]  ;;  %p6510_p3 = pneg %p6509_p10 }
  0x6d   : > { %2542 = vmatpush1.xpose.msra.mxu0 %v883_v10  ;;  %2649 = vmatpush1.xpose.msra.mxu1 %v885_v11  ;;  %v726_v29 = vld [vmem:[%s6783_s7 + $0x818] sm:$0xff]  ;;  %v723_v30 = vld [vmem:[%s6783_s7 + $0x800] sm:$0xff]  ;;  %v725_v31 = vld [vmem:[%s6783_s7 + $0x810] sm:$0xff]  ;;  %p6516_p2 = por %p6515_p13, %p6514_p5 }
  0x6e   : > { %2543 = vmatprep.subr.mxu0 %v852_v12  ;;  %2650 = vmatprep.subr.mxu1 %v854_v13  ;;  %v692_v32 = vld [vmem:[%s6783_s7 + $0x708] sm:$0xff]  ;;  %v694_v33 = vld [vmem:[%s6783_s7 + $0x718] sm:$0xff]  ;;  %v691_v34 = vld [vmem:[%s6783_s7 + $0x700] sm:$0xff] }
  0x6f   : > { %v693_v35 = vld [vmem:[%s6783_s7 + $0x710] sm:$0xff]  ;;  %v660_v36 = vld [vmem:[%s6783_s7 + $0x608] sm:$0xff]  ;;  %v662_v37 = vld [vmem:[%s6783_s7 + $0x618] sm:$0xff]  ;;  %p6517_p1 = pnand %p6516_p2, %p6510_p3 }
  0x70   : > { %v659_v38 = vld [vmem:[%s6783_s7 + $0x600] sm:$0xff]  ;;  %v661_v39 = vld [vmem:[%s6783_s7 + $0x610] sm:$0xff]  ;;  %v628_v40 = vld [vmem:[%s6783_s7 + $0x508] sm:$0xff] }
  0x71   : > { %2544 = vmatpush1.xpose.msra.mxu0 %v851_v14  ;;  %2651 = vmatpush1.xpose.msra.mxu1 %v853_v15  ;;  %v630_v41 = vld [vmem:[%s6783_s7 + $0x518] sm:$0xff]  ;;  %v627_v42 = vld [vmem:[%s6783_s7 + $0x500] sm:$0xff]  ;;  %v629_v43 = vld [vmem:[%s6783_s7 + $0x510] sm:$0xff] }
  0x72   : > { %2545 = vmatprep.subr.mxu0 %v820_v16  ;;  %2652 = vmatprep.subr.mxu1 %v822_v17  ;;  %v596_v44 = vld [vmem:[%s6783_s7 + $0x408] sm:$0xff]  ;;  %v598_v45 = vld [vmem:[%s6783_s7 + $0x418] sm:$0xff]  ;;  %v595_v47 = vld [vmem:[%s6783_s7 + $0x400] sm:$0xff] }
  0x73   : > { %v244_v46 = vld [vmem:[#allocation2 + $0x8] sm:$0xff]  ;;  %v597_v48 = vld [vmem:[%s6783_s7 + $0x410] sm:$0xff]  ;;  %v246_v49 = vld [vmem:[#allocation2 + $0x18] sm:$0xff] }
  0x74   : > { %v564_v50 = vld [vmem:[%s6783_s7 + $0x308] sm:$0xff]  ;;  %v566_v51 = vld [vmem:[%s6783_s7 + $0x318] sm:$0xff]  ;;  %2601 = vmatprep.mubr.f32.mxu0 %v244_v46  ;;  %2708 = vmatprep.mubr.f32.mxu1 %v246_v49  ;;  %v563_v52 = vld [vmem:[%s6783_s7 + $0x300] sm:$0xff] }
  0x75   : > { %2546 = vmatpush1.xpose.msra.mxu0 %v819_v18  ;;  %2653 = vmatpush1.xpose.msra.mxu1 %v821_v19  ;;  %v565_v53 = vld [vmem:[%s6783_s7 + $0x310] sm:$0xff]  ;;  %v532_v54 = vld [vmem:[%s6783_s7 + $0x208] sm:$0xff]  ;;  %v534_v55 = vld [vmem:[%s6783_s7 + $0x218] sm:$0xff] }
  0x76   : > { %2547 = vmatprep.subr.mxu0 %v788_v20  ;;  %2654 = vmatprep.subr.mxu1 %v790_v21  ;;  %v531_v56 = vld [vmem:[%s6783_s7 + $0x200] sm:$0xff]  ;;  %v533_v57 = vld [vmem:[%s6783_s7 + $0x210] sm:$0xff]  ;;  %v500_v58 = vld [vmem:[%s6783_s7 + $0x108] sm:$0xff] }
  0x77   : > { %v502_v59 = vld [vmem:[%s6783_s7 + $0x118] sm:$0xff]  ;;  %v499_v60 = vld [vmem:[%s6783_s7 + $0x100] sm:$0xff]  ;;  %v501_v61 = vld [vmem:[%s6783_s7 + $0x110] sm:$0xff] }
  0x78   : > { %v468_v62 = vld [vmem:[%s6783_s7 + $0x8] sm:$0xff]  ;;  %v470_v63 = vld [vmem:[%s6783_s7 + $0x18] sm:$0xff]  ;;  %v467_v0 = vld [vmem:[%s6783_s7] sm:$0xff] }
  0x79   : > { %2548 = vmatpush1.xpose.msra.mxu0 %v787_v22  ;;  %2655 = vmatpush1.xpose.msra.mxu1 %v789_v23  ;;  %v469_v1 = vld [vmem:[%s6783_s7 + $0x10] sm:$0xff]  ;;  %v1460_v2 = vld [vmem:[%s6783_s7 + $0x1f08] sm:$0xff]  ;;  %v1462_v3 = vld [vmem:[%s6783_s7 + $0x1f18] sm:$0xff] }
  0x7a   : > { %2549 = vmatprep.subr.mxu0 %v756_v24  ;;  %2656 = vmatprep.subr.mxu1 %v758_v25  ;;  %v1459_v4 = vld [vmem:[%s6783_s7 + $0x1f00] sm:$0xff]  ;;  %v1461_v5 = vld [vmem:[%s6783_s7 + $0x1f10] sm:$0xff]  ;;  %v1428_v6 = vld [vmem:[%s6783_s7 + $0x1e08] sm:$0xff] }
  0x7b   : > { %v1430_v7 = vld [vmem:[%s6783_s7 + $0x1e18] sm:$0xff]  ;;  %v1427_v8 = vld [vmem:[%s6783_s7 + $0x1e00] sm:$0xff]  ;;  %v1429_v9 = vld [vmem:[%s6783_s7 + $0x1e10] sm:$0xff] }
  0x7c   : > { %v1396_v10 = vld [vmem:[%s6783_s7 + $0x1d08] sm:$0xff]  ;;  %v1398_v11 = vld [vmem:[%s6783_s7 + $0x1d18] sm:$0xff]  ;;  %v1395_v12 = vld [vmem:[%s6783_s7 + $0x1d00] sm:$0xff] }
  0x7d   : > { %2550 = vmatpush1.xpose.msra.mxu0 %v755_v26  ;;  %2657 = vmatpush1.xpose.msra.mxu1 %v757_v27  ;;  %v1397_v13 = vld [vmem:[%s6783_s7 + $0x1d10] sm:$0xff]  ;;  %v1364_v14 = vld [vmem:[%s6783_s7 + $0x1c08] sm:$0xff]  ;;  %v1366_v15 = vld [vmem:[%s6783_s7 + $0x1c18] sm:$0xff] }
  0x7e   : > { %2551 = vmatprep.subr.mxu0 %v724_v28  ;;  %2658 = vmatprep.subr.mxu1 %v726_v29  ;;  %v1363_v16 = vld [vmem:[%s6783_s7 + $0x1c00] sm:$0xff]  ;;  %v1365_v17 = vld [vmem:[%s6783_s7 + $0x1c10] sm:$0xff]  ;;  %v1332_v18 = vld [vmem:[%s6783_s7 + $0x1b08] sm:$0xff] }
  0x7f   : > { %v1334_v19 = vld [vmem:[%s6783_s7 + $0x1b18] sm:$0xff]  ;;  %v1331_v20 = vld [vmem:[%s6783_s7 + $0x1b00] sm:$0xff]  ;;  %v1333_v21 = vld [vmem:[%s6783_s7 + $0x1b10] sm:$0xff] }
  0x80   : > { %v1300_v22 = vld [vmem:[%s6783_s7 + $0x1a08] sm:$0xff]  ;;  %v1302_v23 = vld [vmem:[%s6783_s7 + $0x1a18] sm:$0xff]  ;;  %v1299_v24 = vld [vmem:[%s6783_s7 + $0x1a00] sm:$0xff] }
  0x81   : > { %2552 = vmatpush1.xpose.msra.mxu0 %v723_v30  ;;  %2659 = vmatpush1.xpose.msra.mxu1 %v725_v31  ;;  %v1301_v25 = vld [vmem:[%s6783_s7 + $0x1a10] sm:$0xff]  ;;  %v1268_v26 = vld [vmem:[%s6783_s7 + $0x1908] sm:$0xff]  ;;  %v1270_v27 = vld [vmem:[%s6783_s7 + $0x1918] sm:$0xff] }
  0x82   : > { %2553 = vmatprep.subr.mxu0 %v692_v32  ;;  %2660 = vmatprep.subr.mxu1 %v694_v33  ;;  %v1267_v28 = vld [vmem:[%s6783_s7 + $0x1900] sm:$0xff]  ;;  %v1269_v29 = vld [vmem:[%s6783_s7 + $0x1910] sm:$0xff]  ;;  %v1236_v30 = vld [vmem:[%s6783_s7 + $0x1808] sm:$0xff] }
  0x83   : > { %v1238_v31 = vld [vmem:[%s6783_s7 + $0x1818] sm:$0xff]  ;;  %v1235_v32 = vld [vmem:[%s6783_s7 + $0x1800] sm:$0xff]  ;;  %v1237_v33 = vld [vmem:[%s6783_s7 + $0x1810] sm:$0xff] }
  0x84   : > { %v1108_v46 = vld [vmem:[%s6783_s7 + $0x1408] sm:$0xff]  ;;  %v1109_v49 = vld [vmem:[%s6783_s7 + $0x1410] sm:$0xff] }
  0x85   : > { %2554 = vmatpush1.xpose.msra.mxu0 %v691_v34  ;;  %2661 = vmatpush1.xpose.msra.mxu1 %v693_v35  ;;  %v1204_v34 = vld [vmem:[%s6783_s7 + $0x1708] sm:$0xff]  ;;  %v1206_v35 = vld [vmem:[%s6783_s7 + $0x1718] sm:$0xff] }
  0x86   : > { %2555 = vmatprep.subr.mxu0 %v660_v36  ;;  %2662 = vmatprep.subr.mxu1 %v662_v37  ;;  %v1203_v36 = vld [vmem:[%s6783_s7 + $0x1700] sm:$0xff]  ;;  %v1205_v37 = vld [vmem:[%s6783_s7 + $0x1710] sm:$0xff] }
  0x89   : > { %2556 = vmatpush1.xpose.msra.mxu0 %v659_v38  ;;  %2663 = vmatpush1.xpose.msra.mxu1 %v661_v39  ;;  %v1172_v38 = vld [vmem:[%s6783_s7 + $0x1608] sm:$0xff]  ;;  %v1174_v39 = vld [vmem:[%s6783_s7 + $0x1618] sm:$0xff] }
  0x8a   : > { %2557 = vmatprep.subr.mxu0 %v628_v40  ;;  %2664 = vmatprep.subr.mxu1 %v630_v41  ;;  %v1171_v40 = vld [vmem:[%s6783_s7 + $0x1600] sm:$0xff]  ;;  %v1173_v41 = vld [vmem:[%s6783_s7 + $0x1610] sm:$0xff] }
  0x8d   : > { %2558 = vmatpush1.xpose.msra.mxu0 %v627_v42  ;;  %2665 = vmatpush1.xpose.msra.mxu1 %v629_v43  ;;  %v1140_v42 = vld [vmem:[%s6783_s7 + $0x1508] sm:$0xff]  ;;  %v1142_v43 = vld [vmem:[%s6783_s7 + $0x1518] sm:$0xff] }
  0x8e   : > { %2559 = vmatprep.subr.mxu0 %v596_v44  ;;  %2666 = vmatprep.subr.mxu1 %v598_v45  ;;  %v1139_v44 = vld [vmem:[%s6783_s7 + $0x1500] sm:$0xff]  ;;  %v1141_v45 = vld [vmem:[%s6783_s7 + $0x1510] sm:$0xff] }
  0x91   : > { %2560 = vmatpush1.xpose.msra.mxu0 %v595_v47  ;;  %2667 = vmatpush1.xpose.msra.mxu1 %v597_v48  ;;  %v1110_v47 = vld [vmem:[%s6783_s7 + $0x1418] sm:$0xff]  ;;  %v1107_v48 = vld [vmem:[%s6783_s7 + $0x1400] sm:$0xff] }
  0x92   : > { %2561 = vmatprep.subr.mxu0 %v564_v50  ;;  %2668 = vmatprep.subr.mxu1 %v566_v51  ;;  %v1076_v50 = vld [vmem:[%s6783_s7 + $0x1308] sm:$0xff]  ;;  %v1078_v51 = vld [vmem:[%s6783_s7 + $0x1318] sm:$0xff] }
  0x95   : > { %2562 = vmatpush1.xpose.msra.mxu0 %v563_v52  ;;  %2669 = vmatpush1.xpose.msra.mxu1 %v565_v53  ;;  %v1075_v52 = vld [vmem:[%s6783_s7 + $0x1300] sm:$0xff]  ;;  %v1077_v53 = vld [vmem:[%s6783_s7 + $0x1310] sm:$0xff] }
  0x96   : > { %2563 = vmatprep.subr.mxu0 %v532_v54  ;;  %2670 = vmatprep.subr.mxu1 %v534_v55  ;;  %v1044_v54 = vld [vmem:[%s6783_s7 + $0x1208] sm:$0xff]  ;;  %v1046_v55 = vld [vmem:[%s6783_s7 + $0x1218] sm:$0xff] }
  0x99   : > { %2564 = vmatpush1.xpose.msra.mxu0 %v531_v56  ;;  %2671 = vmatpush1.xpose.msra.mxu1 %v533_v57  ;;  %v1043_v56 = vld [vmem:[%s6783_s7 + $0x1200] sm:$0xff]  ;;  %v1045_v57 = vld [vmem:[%s6783_s7 + $0x1210] sm:$0xff] }
  0x9a   : > { %2565 = vmatprep.subr.mxu0 %v500_v58  ;;  %2672 = vmatprep.subr.mxu1 %v502_v59  ;;  %v1012_v58 = vld [vmem:[%s6783_s7 + $0x1108] sm:$0xff]  ;;  %v1014_v59 = vld [vmem:[%s6783_s7 + $0x1118] sm:$0xff] }
  0x9d   : > { %2566 = vmatpush1.xpose.msra.mxu0 %v499_v60  ;;  %2673 = vmatpush1.xpose.msra.mxu1 %v501_v61  ;;  %v1011_v60 = vld [vmem:[%s6783_s7 + $0x1100] sm:$0xff]  ;;  %v1013_v61 = vld [vmem:[%s6783_s7 + $0x1110] sm:$0xff] }
  0x9e   : > { %2567 = vmatprep.subr.mxu0 %v468_v62  ;;  %2674 = vmatprep.subr.mxu1 %v470_v63  ;;  %v980_v62 = vld [vmem:[%s6783_s7 + $0x1008] sm:$0xff]  ;;  %v982_v63 = vld [vmem:[%s6783_s7 + $0x1018] sm:$0xff] }
  0xa1   : > { %2568 = vmatpush1.xpose.msra.mxu0 %v467_v0  ;;  %2675 = vmatpush1.xpose.msra.mxu1 %v469_v1  ;;  %v979_v0 = vld [vmem:[%s6783_s7 + $0x1000] sm:$0xff]  ;;  %v981_v1 = vld [vmem:[%s6783_s7 + $0x1010] sm:$0xff] }
  0xa2   : > { %2569 = vmatprep.subr.mxu0 %v1460_v2  ;;  %2676 = vmatprep.subr.mxu1 %v1462_v3  ;;  %v952_v2 = vld [vmem:[%s6783_s7 + $0xf28] sm:$0xff]  ;;  %v954_v3 = vld [vmem:[%s6783_s7 + $0xf38] sm:$0xff] }
  0xa5   : > { %2570 = vmatpush2.xpose.msra.mxu0 %v1459_v4  ;;  %2677 = vmatpush2.xpose.msra.mxu1 %v1461_v5  ;;  %v243_v4 = vld [vmem:[#allocation2] sm:$0xff]  ;;  %v245_v5 = vld [vmem:[#allocation2 + $0x10] sm:$0xff] }
  0xa6   : > { %2571 = vmatprep.subr.mxu0 %v1428_v6  ;;  %2678 = vmatprep.subr.mxu1 %v1430_v7  ;;  %v951_v6 = vld [vmem:[%s6783_s7 + $0xf20] sm:$0xff]  ;;  %v953_v7 = vld [vmem:[%s6783_s7 + $0xf30] sm:$0xff] }
  0xa9   : > { %2572 = vmatpush2.xpose.msra.mxu0 %v1427_v8  ;;  %2679 = vmatpush2.xpose.msra.mxu1 %v1429_v9  ;;  %v920_v8 = vld [vmem:[%s6783_s7 + $0xe28] sm:$0xff]  ;;  %v922_v9 = vld [vmem:[%s6783_s7 + $0xe38] sm:$0xff] }
  0xaa   : > { %2573 = vmatprep.subr.mxu0 %v1396_v10  ;;  %2680 = vmatprep.subr.mxu1 %v1398_v11  ;;  %v276_v10 = vld [vmem:[#allocation2 + $0x108] sm:$0xff]  ;;  %v278_v11 = vld [vmem:[#allocation2 + $0x118] sm:$0xff] }
  0xad   : > { %2574 = vmatpush2.xpose.msra.mxu0 %v1395_v12  ;;  %2681 = vmatpush2.xpose.msra.mxu1 %v1397_v13  ;;  %v275_v12 = vld [vmem:[#allocation2 + $0x100] sm:$0xff]  ;;  %v277_v13 = vld [vmem:[#allocation2 + $0x110] sm:$0xff] }
  0xae   : > { %2575 = vmatprep.subr.mxu0 %v1364_v14  ;;  %2682 = vmatprep.subr.mxu1 %v1366_v15  ;;  %v919_v14 = vld [vmem:[%s6783_s7 + $0xe20] sm:$0xff]  ;;  %v921_v15 = vld [vmem:[%s6783_s7 + $0xe30] sm:$0xff] }
  0xb1   : > { %2576 = vmatpush2.xpose.msra.mxu0 %v1363_v16  ;;  %2683 = vmatpush2.xpose.msra.mxu1 %v1365_v17  ;;  %v888_v16 = vld [vmem:[%s6783_s7 + $0xd28] sm:$0xff]  ;;  %v890_v17 = vld [vmem:[%s6783_s7 + $0xd38] sm:$0xff] }
  0xb2   : > { %2577 = vmatprep.subr.mxu0 %v1332_v18  ;;  %2684 = vmatprep.subr.mxu1 %v1334_v19  ;;  %v308_v18 = vld [vmem:[#allocation2 + $0x208] sm:$0xff]  ;;  %v310_v19 = vld [vmem:[#allocation2 + $0x218] sm:$0xff] }
  0xb5   : > { %2578 = vmatpush2.xpose.msra.mxu0 %v1331_v20  ;;  %2685 = vmatpush2.xpose.msra.mxu1 %v1333_v21  ;;  %v307_v20 = vld [vmem:[#allocation2 + $0x200] sm:$0xff]  ;;  %v309_v21 = vld [vmem:[#allocation2 + $0x210] sm:$0xff] }
  0xb6   : > { %2579 = vmatprep.subr.mxu0 %v1300_v22  ;;  %2686 = vmatprep.subr.mxu1 %v1302_v23  ;;  %v887_v22 = vld [vmem:[%s6783_s7 + $0xd20] sm:$0xff]  ;;  %v889_v23 = vld [vmem:[%s6783_s7 + $0xd30] sm:$0xff] }
  0xb9   : > { %2580 = vmatpush2.xpose.msra.mxu0 %v1299_v24  ;;  %2687 = vmatpush2.xpose.msra.mxu1 %v1301_v25  ;;  %v856_v24 = vld [vmem:[%s6783_s7 + $0xc28] sm:$0xff]  ;;  %v858_v25 = vld [vmem:[%s6783_s7 + $0xc38] sm:$0xff] }
  0xba   : > { %2581 = vmatprep.subr.mxu0 %v1268_v26  ;;  %2688 = vmatprep.subr.mxu1 %v1270_v27  ;;  %v340_v26 = vld [vmem:[#allocation2 + $0x308] sm:$0xff]  ;;  %v342_v27 = vld [vmem:[#allocation2 + $0x318] sm:$0xff] }
  0xbd   : > { %2582 = vmatpush2.xpose.msra.mxu0 %v1267_v28  ;;  %2689 = vmatpush2.xpose.msra.mxu1 %v1269_v29  ;;  %v339_v28 = vld [vmem:[#allocation2 + $0x300] sm:$0xff]  ;;  %v341_v29 = vld [vmem:[#allocation2 + $0x310] sm:$0xff] }
  0xbe   : > { %2583 = vmatprep.subr.mxu0 %v1236_v30  ;;  %2690 = vmatprep.subr.mxu1 %v1238_v31  ;;  %v855_v30 = vld [vmem:[%s6783_s7 + $0xc20] sm:$0xff]  ;;  %v857_v31 = vld [vmem:[%s6783_s7 + $0xc30] sm:$0xff] }
  0xc1   : > { %2584 = vmatpush2.xpose.msra.mxu0 %v1235_v32  ;;  %2691 = vmatpush2.xpose.msra.mxu1 %v1237_v33  ;;  %v824_v32 = vld [vmem:[%s6783_s7 + $0xb28] sm:$0xff]  ;;  %v826_v33 = vld [vmem:[%s6783_s7 + $0xb38] sm:$0xff] }
  0xc2   : > { %2585 = vmatprep.subr.mxu0 %v1204_v34  ;;  %2692 = vmatprep.subr.mxu1 %v1206_v35  ;;  %v372_v34 = vld [vmem:[#allocation2 + $0x408] sm:$0xff]  ;;  %v374_v35 = vld [vmem:[#allocation2 + $0x418] sm:$0xff] }
  0xc5   : > { %2586 = vmatpush2.xpose.msra.mxu0 %v1203_v36  ;;  %2693 = vmatpush2.xpose.msra.mxu1 %v1205_v37  ;;  %v371_v36 = vld [vmem:[#allocation2 + $0x400] sm:$0xff]  ;;  %v373_v37 = vld [vmem:[#allocation2 + $0x410] sm:$0xff] }
  0xc6   : > { %2587 = vmatprep.subr.mxu0 %v1172_v38  ;;  %2694 = vmatprep.subr.mxu1 %v1174_v39  ;;  %v823_v38 = vld [vmem:[%s6783_s7 + $0xb20] sm:$0xff]  ;;  %v825_v39 = vld [vmem:[%s6783_s7 + $0xb30] sm:$0xff] }
  0xc9   : > { %2588 = vmatpush2.xpose.msra.mxu0 %v1171_v40  ;;  %2695 = vmatpush2.xpose.msra.mxu1 %v1173_v41  ;;  %v792_v40 = vld [vmem:[%s6783_s7 + $0xa28] sm:$0xff]  ;;  %v794_v41 = vld [vmem:[%s6783_s7 + $0xa38] sm:$0xff] }
  0xca   : > { %2589 = vmatprep.subr.mxu0 %v1140_v42  ;;  %2696 = vmatprep.subr.mxu1 %v1142_v43  ;;  %v404_v42 = vld [vmem:[#allocation2 + $0x508] sm:$0xff]  ;;  %v406_v43 = vld [vmem:[#allocation2 + $0x518] sm:$0xff] }
  0xcd   : > { %2590 = vmatpush2.xpose.msra.mxu0 %v1139_v44  ;;  %2697 = vmatpush2.xpose.msra.mxu1 %v1141_v45  ;;  %v403_v44 = vld [vmem:[#allocation2 + $0x500] sm:$0xff]  ;;  %v405_v45 = vld [vmem:[#allocation2 + $0x510] sm:$0xff] }
  0xce   : > { %2591 = vmatprep.subr.mxu0 %v1108_v46  ;;  %2698 = vmatprep.subr.mxu1 %v1110_v47  ;;  %v791_v46 = vld [vmem:[%s6783_s7 + $0xa20] sm:$0xff]  ;;  %v793_v47 = vld [vmem:[%s6783_s7 + $0xa30] sm:$0xff] }
  0xd1   : > { %2592 = vmatpush2.xpose.msra.mxu0 %v1107_v48  ;;  %2699 = vmatpush2.xpose.msra.mxu1 %v1109_v49  ;;  %v760_v48 = vld [vmem:[%s6783_s7 + $0x928] sm:$0xff]  ;;  %v762_v49 = vld [vmem:[%s6783_s7 + $0x938] sm:$0xff] }
  0xd2   : > { %2593 = vmatprep.subr.mxu0 %v1076_v50  ;;  %2700 = vmatprep.subr.mxu1 %v1078_v51  ;;  %v436_v50 = vld [vmem:[#allocation2 + $0x608] sm:$0xff]  ;;  %v438_v51 = vld [vmem:[#allocation2 + $0x618] sm:$0xff] }
  0xd5   : > { %2594 = vmatpush2.xpose.msra.mxu0 %v1075_v52  ;;  %2701 = vmatpush2.xpose.msra.mxu1 %v1077_v53  ;;  %v435_v52 = vld [vmem:[#allocation2 + $0x600] sm:$0xff]  ;;  %v437_v53 = vld [vmem:[#allocation2 + $0x610] sm:$0xff] }
  0xd6   : > { %2595 = vmatprep.subr.mxu0 %v1044_v54  ;;  %2702 = vmatprep.subr.mxu1 %v1046_v55  ;;  %v759_v54 = vld [vmem:[%s6783_s7 + $0x920] sm:$0xff]  ;;  %v761_v55 = vld [vmem:[%s6783_s7 + $0x930] sm:$0xff] }
  0xd9   : > { %2596 = vmatpush2.xpose.msra.mxu0 %v1043_v56  ;;  %2703 = vmatpush2.xpose.msra.mxu1 %v1045_v57  ;;  %v728_v56 = vld [vmem:[%s6783_s7 + $0x828] sm:$0xff]  ;;  %v730_v57 = vld [vmem:[%s6783_s7 + $0x838] sm:$0xff] }
  0xda   : > { %2597 = vmatprep.subr.mxu0 %v1012_v58  ;;  %2704 = vmatprep.subr.mxu1 %v1014_v59  ;;  %v248_v58 = vld [vmem:[#allocation2 + $0x28] sm:$0xff]  ;;  %v250_v59 = vld [vmem:[#allocation2 + $0x38] sm:$0xff] }
  0xdd   : > { %2598 = vmatpush2.xpose.msra.mxu0 %v1011_v60  ;;  %2705 = vmatpush2.xpose.msra.mxu1 %v1013_v61  ;;  %v727_v60 = vld [vmem:[%s6783_s7 + $0x820] sm:$0xff]  ;;  %v729_v61 = vld [vmem:[%s6783_s7 + $0x830] sm:$0xff] }
  0xde   : > { %2599 = vmatprep.subr.mxu0 %v980_v62  ;;  %2706 = vmatprep.subr.mxu1 %v982_v63  ;;  %v696_v62 = vld [vmem:[%s6783_s7 + $0x728] sm:$0xff]  ;;  %v698_v63 = vld [vmem:[%s6783_s7 + $0x738] sm:$0xff] }
  0xe1   : > { %2600 = vmatpush2.xpose.msra.mxu0 %v979_v0  ;;  %2707 = vmatpush2.xpose.msra.mxu1 %v981_v1  ;;  %v695_v0 = vld [vmem:[%s6783_s7 + $0x720] sm:$0xff]  ;;  %v697_v1 = vld [vmem:[%s6783_s7 + $0x730] sm:$0xff] }
  0xe2   : > { %2751 = vmatprep.subr.mxu0 %v952_v2  ;;  %2858 = vmatprep.subr.mxu1 %v954_v3  ;;  %v664_v2 = vld [vmem:[%s6783_s7 + $0x628] sm:$0xff]  ;;  %v666_v3 = vld [vmem:[%s6783_s7 + $0x638] sm:$0xff] }
  0xe4   : > { %2602 = vmatmul.mubr.f32.vlgmr.msra.gmra.mxu0 %v243_v4  ;;  %2709 = vmatmul.mubr.f32.vlgmr.msra.gmra.mxu1 %v245_v5  ;;  %v663_v4 = vld [vmem:[%s6783_s7 + $0x620] sm:$0xff]  ;;  %v665_v5 = vld [vmem:[%s6783_s7 + $0x630] sm:$0xff] }
  0xe5   : > { %2752 = vmatpush1.xpose.msra.mxu0 %v951_v6  ;;  %2859 = vmatpush1.xpose.msra.mxu1 %v953_v7  ;;  %v632_v6 = vld [vmem:[%s6783_s7 + $0x528] sm:$0xff]  ;;  %v634_v7 = vld [vmem:[%s6783_s7 + $0x538] sm:$0xff] }
  0xe6   : > { %2753 = vmatprep.subr.mxu0 %v920_v8  ;;  %2860 = vmatprep.subr.mxu1 %v922_v9  ;;  %v631_v8 = vld [vmem:[%s6783_s7 + $0x520] sm:$0xff]  ;;  %v633_v9 = vld [vmem:[%s6783_s7 + $0x530] sm:$0xff] }
  0xe7   : > { %2607 = vmatprep.mubr.f32.mxu0 %v276_v10  ;;  %2714 = vmatprep.mubr.f32.mxu1 %v278_v11  ;;  %v600_v10 = vld [vmem:[%s6783_s7 + $0x428] sm:$0xff]  ;;  %v602_v11 = vld [vmem:[%s6783_s7 + $0x438] sm:$0xff] }
  0xe8   : > { %2608 = vmatmul.mubr.f32.gmra.mxu0 %v275_v12  ;;  %2715 = vmatmul.mubr.f32.gmra.mxu1 %v277_v13  ;;  %v599_v12 = vld [vmem:[%s6783_s7 + $0x420] sm:$0xff]  ;;  %v601_v13 = vld [vmem:[%s6783_s7 + $0x430] sm:$0xff] }
  0xe9   : > { %2754 = vmatpush1.xpose.msra.mxu0 %v919_v14  ;;  %2861 = vmatpush1.xpose.msra.mxu1 %v921_v15  ;;  %v568_v14 = vld [vmem:[%s6783_s7 + $0x328] sm:$0xff]  ;;  %v570_v15 = vld [vmem:[%s6783_s7 + $0x338] sm:$0xff] }
  0xea   : > { %2755 = vmatprep.subr.mxu0 %v888_v16  ;;  %2862 = vmatprep.subr.mxu1 %v890_v17  ;;  %v567_v16 = vld [vmem:[%s6783_s7 + $0x320] sm:$0xff]  ;;  %v569_v17 = vld [vmem:[%s6783_s7 + $0x330] sm:$0xff] }
  0xeb   : > { %2613 = vmatprep.mubr.f32.mxu0 %v308_v18  ;;  %2720 = vmatprep.mubr.f32.mxu1 %v310_v19  ;;  %v536_v18 = vld [vmem:[%s6783_s7 + $0x228] sm:$0xff]  ;;  %v538_v19 = vld [vmem:[%s6783_s7 + $0x238] sm:$0xff] }
  0xec   : > { %2614 = vmatmul.mubr.f32.gmra.mxu0 %v307_v20  ;;  %2721 = vmatmul.mubr.f32.gmra.mxu1 %v309_v21  ;;  %v535_v20 = vld [vmem:[%s6783_s7 + $0x220] sm:$0xff]  ;;  %v537_v21 = vld [vmem:[%s6783_s7 + $0x230] sm:$0xff] }
  0xed   : > { %2756 = vmatpush1.xpose.msra.mxu0 %v887_v22  ;;  %2863 = vmatpush1.xpose.msra.mxu1 %v889_v23  ;;  %v504_v22 = vld [vmem:[%s6783_s7 + $0x128] sm:$0xff]  ;;  %v506_v23 = vld [vmem:[%s6783_s7 + $0x138] sm:$0xff] }
  0xee   : > { %2757 = vmatprep.subr.mxu0 %v856_v24  ;;  %2864 = vmatprep.subr.mxu1 %v858_v25  ;;  %v503_v24 = vld [vmem:[%s6783_s7 + $0x120] sm:$0xff]  ;;  %v505_v25 = vld [vmem:[%s6783_s7 + $0x130] sm:$0xff] }
  0xef   : > { %2619 = vmatprep.mubr.f32.mxu0 %v340_v26  ;;  %2726 = vmatprep.mubr.f32.mxu1 %v342_v27  ;;  %v472_v26 = vld [vmem:[%s6783_s7 + $0x28] sm:$0xff]  ;;  %v474_v27 = vld [vmem:[%s6783_s7 + $0x38] sm:$0xff] }
  0xf0   : > { %2620 = vmatmul.mubr.f32.gmra.mxu0 %v339_v28  ;;  %2727 = vmatmul.mubr.f32.gmra.mxu1 %v341_v29  ;;  %v471_v28 = vld [vmem:[%s6783_s7 + $0x20] sm:$0xff]  ;;  %v473_v29 = vld [vmem:[%s6783_s7 + $0x30] sm:$0xff] }
  0xf1   : > { %2758 = vmatpush1.xpose.msra.mxu0 %v855_v30  ;;  %2865 = vmatpush1.xpose.msra.mxu1 %v857_v31  ;;  %v1464_v30 = vld [vmem:[%s6783_s7 + $0x1f28] sm:$0xff]  ;;  %v1466_v31 = vld [vmem:[%s6783_s7 + $0x1f38] sm:$0xff] }
  0xf2   : > { %2759 = vmatprep.subr.mxu0 %v824_v32  ;;  %2866 = vmatprep.subr.mxu1 %v826_v33  ;;  %v1463_v32 = vld [vmem:[%s6783_s7 + $0x1f20] sm:$0xff]  ;;  %v1465_v33 = vld [vmem:[%s6783_s7 + $0x1f30] sm:$0xff] }
  0xf3   : > { %2625 = vmatprep.mubr.f32.mxu0 %v372_v34  ;;  %2732 = vmatprep.mubr.f32.mxu1 %v374_v35  ;;  %v1432_v34 = vld [vmem:[%s6783_s7 + $0x1e28] sm:$0xff]  ;;  %v1434_v35 = vld [vmem:[%s6783_s7 + $0x1e38] sm:$0xff] }
  0xf4   : > { %2626 = vmatmul.mubr.f32.gmra.mxu0 %v371_v36  ;;  %2733 = vmatmul.mubr.f32.gmra.mxu1 %v373_v37  ;;  %v1431_v36 = vld [vmem:[%s6783_s7 + $0x1e20] sm:$0xff]  ;;  %v1433_v37 = vld [vmem:[%s6783_s7 + $0x1e30] sm:$0xff] }
  0xf5   : > { %2760 = vmatpush1.xpose.msra.mxu0 %v823_v38  ;;  %2867 = vmatpush1.xpose.msra.mxu1 %v825_v39  ;;  %v1400_v38 = vld [vmem:[%s6783_s7 + $0x1d28] sm:$0xff]  ;;  %v1402_v39 = vld [vmem:[%s6783_s7 + $0x1d38] sm:$0xff] }
  0xf6   : > { %2761 = vmatprep.subr.mxu0 %v792_v40  ;;  %2868 = vmatprep.subr.mxu1 %v794_v41  ;;  %v1399_v40 = vld [vmem:[%s6783_s7 + $0x1d20] sm:$0xff]  ;;  %v1401_v41 = vld [vmem:[%s6783_s7 + $0x1d30] sm:$0xff] }
  0xf7   : > { %2631 = vmatprep.mubr.f32.mxu0 %v404_v42  ;;  %2738 = vmatprep.mubr.f32.mxu1 %v406_v43  ;;  %v1368_v42 = vld [vmem:[%s6783_s7 + $0x1c28] sm:$0xff]  ;;  %v1370_v43 = vld [vmem:[%s6783_s7 + $0x1c38] sm:$0xff] }
  0xf8   : > { %2632 = vmatmul.mubr.f32.gmra.mxu0 %v403_v44  ;;  %2739 = vmatmul.mubr.f32.gmra.mxu1 %v405_v45  ;;  %v1367_v44 = vld [vmem:[%s6783_s7 + $0x1c20] sm:$0xff]  ;;  %v1369_v45 = vld [vmem:[%s6783_s7 + $0x1c30] sm:$0xff] }
  0xf9   : > { %2762 = vmatpush1.xpose.msra.mxu0 %v791_v46  ;;  %2869 = vmatpush1.xpose.msra.mxu1 %v793_v47  ;;  %v1336_v46 = vld [vmem:[%s6783_s7 + $0x1b28] sm:$0xff]  ;;  %v1338_v47 = vld [vmem:[%s6783_s7 + $0x1b38] sm:$0xff] }
  0xfa   : > { %2763 = vmatprep.subr.mxu0 %v760_v48  ;;  %2870 = vmatprep.subr.mxu1 %v762_v49  ;;  %v1335_v48 = vld [vmem:[%s6783_s7 + $0x1b20] sm:$0xff]  ;;  %v1337_v49 = vld [vmem:[%s6783_s7 + $0x1b30] sm:$0xff] }
  0xfb   : > { %2637 = vmatprep.mubr.f32.mxu0 %v436_v50  ;;  %2744 = vmatprep.mubr.f32.mxu1 %v438_v51  ;;  %v1304_v50 = vld [vmem:[%s6783_s7 + $0x1a28] sm:$0xff]  ;;  %v1306_v51 = vld [vmem:[%s6783_s7 + $0x1a38] sm:$0xff] }
  0xfc   : > { %2638 = vmatmul.mubr.f32.gmra.mxu0 %v435_v52  ;;  %2745 = vmatmul.mubr.f32.gmra.mxu1 %v437_v53  ;;  %v1303_v52 = vld [vmem:[%s6783_s7 + $0x1a20] sm:$0xff]  ;;  %v1305_v53 = vld [vmem:[%s6783_s7 + $0x1a30] sm:$0xff] }
  0xfd   : > { %2764 = vmatpush1.xpose.msra.mxu0 %v759_v54  ;;  %2871 = vmatpush1.xpose.msra.mxu1 %v761_v55  ;;  %v1272_v54 = vld [vmem:[%s6783_s7 + $0x1928] sm:$0xff]  ;;  %v1274_v55 = vld [vmem:[%s6783_s7 + $0x1938] sm:$0xff] }
  0xfe   : > { %2765 = vmatprep.subr.mxu0 %v728_v56  ;;  %2872 = vmatprep.subr.mxu1 %v730_v57  ;;  %v1271_v56 = vld [vmem:[%s6783_s7 + $0x1920] sm:$0xff]  ;;  %v1273_v57 = vld [vmem:[%s6783_s7 + $0x1930] sm:$0xff] }
  0xff   : > { %2815 = vmatprep.mubr.f32.mxu0 %v248_v58  ;;  %2922 = vmatprep.mubr.f32.mxu1 %v250_v59  ;;  %v1240_v58 = vld [vmem:[%s6783_s7 + $0x1828] sm:$0xff]  ;;  %v1242_v59 = vld [vmem:[%s6783_s7 + $0x1838] sm:$0xff] }
 0x101   : > { %2766 = vmatpush1.xpose.msra.mxu0 %v727_v60  ;;  %2873 = vmatpush1.xpose.msra.mxu1 %v729_v61  ;;  %v1239_v60 = vld [vmem:[%s6783_s7 + $0x1820] sm:$0xff]  ;;  %v1241_v61 = vld [vmem:[%s6783_s7 + $0x1830] sm:$0xff] }
 0x102   : > { %2767 = vmatprep.subr.mxu0 %v696_v62  ;;  %2874 = vmatprep.subr.mxu1 %v698_v63  ;;  %v1208_v62 = vld [vmem:[%s6783_s7 + $0x1728] sm:$0xff]  ;;  %v1210_v63 = vld [vmem:[%s6783_s7 + $0x1738] sm:$0xff] }
 0x105   : > { %2768 = vmatpush1.xpose.msra.mxu0 %v695_v0  ;;  %2875 = vmatpush1.xpose.msra.mxu1 %v697_v1  ;;  %v1207_v0 = vld [vmem:[%s6783_s7 + $0x1720] sm:$0xff]  ;;  %v1209_v1 = vld [vmem:[%s6783_s7 + $0x1730] sm:$0xff] }
 0x106   : > { %2769 = vmatprep.subr.mxu0 %v664_v2  ;;  %2876 = vmatprep.subr.mxu1 %v666_v3  ;;  %v1176_v2 = vld [vmem:[%s6783_s7 + $0x1628] sm:$0xff]  ;;  %v1178_v3 = vld [vmem:[%s6783_s7 + $0x1638] sm:$0xff] }
 0x109   : > { %2770 = vmatpush1.xpose.msra.mxu0 %v663_v4  ;;  %2877 = vmatpush1.xpose.msra.mxu1 %v665_v5  ;;  %v1175_v4 = vld [vmem:[%s6783_s7 + $0x1620] sm:$0xff]  ;;  %v1177_v5 = vld [vmem:[%s6783_s7 + $0x1630] sm:$0xff] }
 0x10a   : > { %2771 = vmatprep.subr.mxu0 %v632_v6  ;;  %2878 = vmatprep.subr.mxu1 %v634_v7  ;;  %v1144_v6 = vld [vmem:[%s6783_s7 + $0x1528] sm:$0xff]  ;;  %v1146_v7 = vld [vmem:[%s6783_s7 + $0x1538] sm:$0xff] }
 0x10d   : > { %2772 = vmatpush1.xpose.msra.mxu0 %v631_v8  ;;  %2879 = vmatpush1.xpose.msra.mxu1 %v633_v9  ;;  %v1143_v8 = vld [vmem:[%s6783_s7 + $0x1520] sm:$0xff]  ;;  %v1145_v9 = vld [vmem:[%s6783_s7 + $0x1530] sm:$0xff] }
 0x10e   : > { %2773 = vmatprep.subr.mxu0 %v600_v10  ;;  %2880 = vmatprep.subr.mxu1 %v602_v11  ;;  %v1112_v10 = vld [vmem:[%s6783_s7 + $0x1428] sm:$0xff]  ;;  %v1114_v11 = vld [vmem:[%s6783_s7 + $0x1438] sm:$0xff] }
 0x111   : > { %2774 = vmatpush1.xpose.msra.mxu0 %v599_v12  ;;  %2881 = vmatpush1.xpose.msra.mxu1 %v601_v13  ;;  %v1111_v12 = vld [vmem:[%s6783_s7 + $0x1420] sm:$0xff]  ;;  %v1113_v13 = vld [vmem:[%s6783_s7 + $0x1430] sm:$0xff] }
 0x112   : > { %2775 = vmatprep.subr.mxu0 %v568_v14  ;;  %2882 = vmatprep.subr.mxu1 %v570_v15  ;;  %v1080_v14 = vld [vmem:[%s6783_s7 + $0x1328] sm:$0xff]  ;;  %v1082_v15 = vld [vmem:[%s6783_s7 + $0x1338] sm:$0xff] }
 0x115   : > { %2776 = vmatpush1.xpose.msra.mxu0 %v567_v16  ;;  %2883 = vmatpush1.xpose.msra.mxu1 %v569_v17  ;;  %v1079_v16 = vld [vmem:[%s6783_s7 + $0x1320] sm:$0xff]  ;;  %v1081_v17 = vld [vmem:[%s6783_s7 + $0x1330] sm:$0xff] }
 0x116   : > { %2777 = vmatprep.subr.mxu0 %v536_v18  ;;  %2884 = vmatprep.subr.mxu1 %v538_v19  ;;  %v1048_v18 = vld [vmem:[%s6783_s7 + $0x1228] sm:$0xff]  ;;  %v1050_v19 = vld [vmem:[%s6783_s7 + $0x1238] sm:$0xff] }
 0x119   : > { %2778 = vmatpush1.xpose.msra.mxu0 %v535_v20  ;;  %2885 = vmatpush1.xpose.msra.mxu1 %v537_v21  ;;  %v1047_v20 = vld [vmem:[%s6783_s7 + $0x1220] sm:$0xff]  ;;  %v1049_v21 = vld [vmem:[%s6783_s7 + $0x1230] sm:$0xff] }
 0x11a   : > { %2779 = vmatprep.subr.mxu0 %v504_v22  ;;  %2886 = vmatprep.subr.mxu1 %v506_v23  ;;  %v1016_v22 = vld [vmem:[%s6783_s7 + $0x1128] sm:$0xff]  ;;  %v1018_v23 = vld [vmem:[%s6783_s7 + $0x1138] sm:$0xff] }
 0x11d   : > { %2780 = vmatpush1.xpose.msra.mxu0 %v503_v24  ;;  %2887 = vmatpush1.xpose.msra.mxu1 %v505_v25  ;;  %v1015_v24 = vld [vmem:[%s6783_s7 + $0x1120] sm:$0xff]  ;;  %v1017_v25 = vld [vmem:[%s6783_s7 + $0x1130] sm:$0xff] }
 0x11e   : > { %2781 = vmatprep.subr.mxu0 %v472_v26  ;;  %2888 = vmatprep.subr.mxu1 %v474_v27  ;;  %v984_v26 = vld [vmem:[%s6783_s7 + $0x1028] sm:$0xff]  ;;  %v986_v27 = vld [vmem:[%s6783_s7 + $0x1038] sm:$0xff] }
 0x121   : > { %2782 = vmatpush1.xpose.msra.mxu0 %v471_v28  ;;  %2889 = vmatpush1.xpose.msra.mxu1 %v473_v29  ;;  %v983_v28 = vld [vmem:[%s6783_s7 + $0x1020] sm:$0xff]  ;;  %v985_v29 = vld [vmem:[%s6783_s7 + $0x1030] sm:$0xff] }
 0x122   : > { %2783 = vmatprep.subr.mxu0 %v1464_v30  ;;  %2890 = vmatprep.subr.mxu1 %v1466_v31  ;;  %v956_v30 = vld [vmem:[%s6783_s7 + $0xf48] sm:$0xff]  ;;  %v958_v31 = vld [vmem:[%s6783_s7 + $0xf58] sm:$0xff] }
 0x125   : > { %2784 = vmatpush2.xpose.msra.mxu0 %v1463_v32  ;;  %2891 = vmatpush2.xpose.msra.mxu1 %v1465_v33  ;;  %v247_v32 = vld [vmem:[#allocation2 + $0x20] sm:$0xff]  ;;  %v249_v33 = vld [vmem:[#allocation2 + $0x30] sm:$0xff] }
 0x126   : > { %2785 = vmatprep.subr.mxu0 %v1432_v34  ;;  %2892 = vmatprep.subr.mxu1 %v1434_v35  ;;  %v955_v34 = vld [vmem:[%s6783_s7 + $0xf40] sm:$0xff]  ;;  %v957_v35 = vld [vmem:[%s6783_s7 + $0xf50] sm:$0xff] }
 0x129   : > { %2786 = vmatpush2.xpose.msra.mxu0 %v1431_v36  ;;  %2893 = vmatpush2.xpose.msra.mxu1 %v1433_v37  ;;  %v280_v36 = vld [vmem:[#allocation2 + $0x128] sm:$0xff] }
 0x12a   : > { %2787 = vmatprep.subr.mxu0 %v1400_v38  ;;  %2894 = vmatprep.subr.mxu1 %v1402_v39  ;;  %v924_v37 = vld [vmem:[%s6783_s7 + $0xe48] sm:$0xff]  ;;  %v926_v38 = vld [vmem:[%s6783_s7 + $0xe58] sm:$0xff] }
 0x12b   : > { %v282_v39 = vld [vmem:[#allocation2 + $0x138] sm:$0xff] }
 0x12d   : > { %2788 = vmatpush2.xpose.msra.mxu0 %v1399_v40  ;;  %2895 = vmatpush2.xpose.msra.mxu1 %v1401_v41  ;;  %v279_v40 = vld [vmem:[#allocation2 + $0x120] sm:$0xff]  ;;  %v281_v41 = vld [vmem:[#allocation2 + $0x130] sm:$0xff] }
 0x12e   : > { %2789 = vmatprep.subr.mxu0 %v1368_v42  ;;  %2896 = vmatprep.subr.mxu1 %v1370_v43  ;;  %v923_v42 = vld [vmem:[%s6783_s7 + $0xe40] sm:$0xff]  ;;  %v925_v43 = vld [vmem:[%s6783_s7 + $0xe50] sm:$0xff] }
 0x131   : > { %2790 = vmatpush2.xpose.msra.mxu0 %v1367_v44  ;;  %2897 = vmatpush2.xpose.msra.mxu1 %v1369_v45  ;;  %v312_v44 = vld [vmem:[#allocation2 + $0x228] sm:$0xff] }
 0x132   : > { %2791 = vmatprep.subr.mxu0 %v1336_v46  ;;  %2898 = vmatprep.subr.mxu1 %v1338_v47  ;;  %v892_v45 = vld [vmem:[%s6783_s7 + $0xd48] sm:$0xff]  ;;  %v894_v46 = vld [vmem:[%s6783_s7 + $0xd58] sm:$0xff] }
 0x133   : > { %v314_v47 = vld [vmem:[#allocation2 + $0x238] sm:$0xff] }
 0x135   : > { %2792 = vmatpush2.xpose.msra.mxu0 %v1335_v48  ;;  %2899 = vmatpush2.xpose.msra.mxu1 %v1337_v49  ;;  %v311_v48 = vld [vmem:[#allocation2 + $0x220] sm:$0xff]  ;;  %v313_v49 = vld [vmem:[#allocation2 + $0x230] sm:$0xff] }
 0x136   : > { %2793 = vmatprep.subr.mxu0 %v1304_v50  ;;  %2900 = vmatprep.subr.mxu1 %v1306_v51  ;;  %v891_v50 = vld [vmem:[%s6783_s7 + $0xd40] sm:$0xff]  ;;  %v893_v51 = vld [vmem:[%s6783_s7 + $0xd50] sm:$0xff] }
 0x139   : > { %2794 = vmatpush2.xpose.msra.mxu0 %v1303_v52  ;;  %2901 = vmatpush2.xpose.msra.mxu1 %v1305_v53  ;;  %v344_v52 = vld [vmem:[#allocation2 + $0x328] sm:$0xff] }
 0x13a   : > { %2795 = vmatprep.subr.mxu0 %v1272_v54  ;;  %2902 = vmatprep.subr.mxu1 %v1274_v55  ;;  %v860_v53 = vld [vmem:[%s6783_s7 + $0xc48] sm:$0xff]  ;;  %v862_v54 = vld [vmem:[%s6783_s7 + $0xc58] sm:$0xff] }
 0x13b   : > { %v346_v55 = vld [vmem:[#allocation2 + $0x338] sm:$0xff] }
 0x13d   : > { %2796 = vmatpush2.xpose.msra.mxu0 %v1271_v56  ;;  %2903 = vmatpush2.xpose.msra.mxu1 %v1273_v57  ;;  %v343_v56 = vld [vmem:[#allocation2 + $0x320] sm:$0xff]  ;;  %v345_v57 = vld [vmem:[#allocation2 + $0x330] sm:$0xff] }
 0x13e   : > { %2797 = vmatprep.subr.mxu0 %v1240_v58  ;;  %2904 = vmatprep.subr.mxu1 %v1242_v59  ;;  %v859_v58 = vld [vmem:[%s6783_s7 + $0xc40] sm:$0xff]  ;;  %v861_v59 = vld [vmem:[%s6783_s7 + $0xc50] sm:$0xff] }
 0x141   : > { %2798 = vmatpush2.xpose.msra.mxu0 %v1239_v60  ;;  %2905 = vmatpush2.xpose.msra.mxu1 %v1241_v61  ;;  %v376_v60 = vld [vmem:[#allocation2 + $0x428] sm:$0xff] }
 0x142   : > { %2799 = vmatprep.subr.mxu0 %v1208_v62  ;;  %2906 = vmatprep.subr.mxu1 %v1210_v63  ;;  %v828_v61 = vld [vmem:[%s6783_s7 + $0xb48] sm:$0xff]  ;;  %v830_v62 = vld [vmem:[%s6783_s7 + $0xb58] sm:$0xff] }
 0x143   : > { %v378_v63 = vld [vmem:[#allocation2 + $0x438] sm:$0xff] }
 0x145   : > { %2800 = vmatpush2.xpose.msra.mxu0 %v1207_v0  ;;  %2907 = vmatpush2.xpose.msra.mxu1 %v1209_v1  ;;  %v375_v0 = vld [vmem:[#allocation2 + $0x420] sm:$0xff]  ;;  %v377_v1 = vld [vmem:[#allocation2 + $0x430] sm:$0xff] }
 0x146   : > { %2801 = vmatprep.subr.mxu0 %v1176_v2  ;;  %2908 = vmatprep.subr.mxu1 %v1178_v3  ;;  %v827_v2 = vld [vmem:[%s6783_s7 + $0xb40] sm:$0xff]  ;;  %v829_v3 = vld [vmem:[%s6783_s7 + $0xb50] sm:$0xff] }
 0x149   : > { %2802 = vmatpush2.xpose.msra.mxu0 %v1175_v4  ;;  %2909 = vmatpush2.xpose.msra.mxu1 %v1177_v5  ;;  %v408_v4 = vld [vmem:[#allocation2 + $0x528] sm:$0xff] }
 0x14a   : > { %2803 = vmatprep.subr.mxu0 %v1144_v6  ;;  %2910 = vmatprep.subr.mxu1 %v1146_v7  ;;  %v796_v5 = vld [vmem:[%s6783_s7 + $0xa48] sm:$0xff]  ;;  %v798_v6 = vld [vmem:[%s6783_s7 + $0xa58] sm:$0xff] }
 0x14b   : > { %v410_v7 = vld [vmem:[#allocation2 + $0x538] sm:$0xff] }
 0x14d   : > { %2804 = vmatpush2.xpose.msra.mxu0 %v1143_v8  ;;  %2911 = vmatpush2.xpose.msra.mxu1 %v1145_v9  ;;  %v407_v8 = vld [vmem:[#allocation2 + $0x520] sm:$0xff]  ;;  %v409_v9 = vld [vmem:[#allocation2 + $0x530] sm:$0xff] }
 0x14e   : > { %2805 = vmatprep.subr.mxu0 %v1112_v10  ;;  %2912 = vmatprep.subr.mxu1 %v1114_v11  ;;  %v795_v10 = vld [vmem:[%s6783_s7 + $0xa40] sm:$0xff]  ;;  %v797_v11 = vld [vmem:[%s6783_s7 + $0xa50] sm:$0xff] }
 0x151   : > { %2806 = vmatpush2.xpose.msra.mxu0 %v1111_v12  ;;  %2913 = vmatpush2.xpose.msra.mxu1 %v1113_v13  ;;  %v440_v12 = vld [vmem:[#allocation2 + $0x628] sm:$0xff] }
 0x152   : > { %2807 = vmatprep.subr.mxu0 %v1080_v14  ;;  %2914 = vmatprep.subr.mxu1 %v1082_v15  ;;  %v764_v13 = vld [vmem:[%s6783_s7 + $0x948] sm:$0xff]  ;;  %v766_v14 = vld [vmem:[%s6783_s7 + $0x958] sm:$0xff] }
 0x153   : > { %v442_v15 = vld [vmem:[#allocation2 + $0x638] sm:$0xff] }
 0x155   : > { %2808 = vmatpush2.xpose.msra.mxu0 %v1079_v16  ;;  %2915 = vmatpush2.xpose.msra.mxu1 %v1081_v17  ;;  %v439_v16 = vld [vmem:[#allocation2 + $0x620] sm:$0xff]  ;;  %v441_v17 = vld [vmem:[#allocation2 + $0x630] sm:$0xff] }
 0x156   : > { %2809 = vmatprep.subr.mxu0 %v1048_v18  ;;  %2916 = vmatprep.subr.mxu1 %v1050_v19  ;;  %v763_v18 = vld [vmem:[%s6783_s7 + $0x940] sm:$0xff]  ;;  %v765_v19 = vld [vmem:[%s6783_s7 + $0x950] sm:$0xff] }
 0x159   : > { %2810 = vmatpush2.xpose.msra.mxu0 %v1047_v20  ;;  %2917 = vmatpush2.xpose.msra.mxu1 %v1049_v21  ;;  %v732_v20 = vld [vmem:[%s6783_s7 + $0x848] sm:$0xff]  ;;  %v734_v21 = vld [vmem:[%s6783_s7 + $0x858] sm:$0xff] }
 0x15a   : > { %2811 = vmatprep.subr.mxu0 %v1016_v22  ;;  %2918 = vmatprep.subr.mxu1 %v1018_v23  ;;  %v252_v22 = vld [vmem:[#allocation2 + $0x48] sm:$0xff]  ;;  %v254_v23 = vld [vmem:[#allocation2 + $0x58] sm:$0xff] }
 0x15d   : > { %2812 = vmatpush2.xpose.msra.mxu0 %v1015_v24  ;;  %2919 = vmatpush2.xpose.msra.mxu1 %v1017_v25  ;;  %v731_v24 = vld [vmem:[%s6783_s7 + $0x840] sm:$0xff]  ;;  %v733_v25 = vld [vmem:[%s6783_s7 + $0x850] sm:$0xff] }
 0x15e   : > { %2813 = vmatprep.subr.mxu0 %v984_v26  ;;  %2920 = vmatprep.subr.mxu1 %v986_v27  ;;  %v700_v26 = vld [vmem:[%s6783_s7 + $0x748] sm:$0xff]  ;;  %v702_v27 = vld [vmem:[%s6783_s7 + $0x758] sm:$0xff] }
 0x161   : > { %2814 = vmatpush2.xpose.msra.mxu0 %v983_v28  ;;  %2921 = vmatpush2.xpose.msra.mxu1 %v985_v29  ;;  %v699_v28 = vld [vmem:[%s6783_s7 + $0x740] sm:$0xff]  ;;  %v701_v29 = vld [vmem:[%s6783_s7 + $0x750] sm:$0xff] }
 0x162   : > { %2965 = vmatprep.subr.mxu0 %v956_v30  ;;  %3072 = vmatprep.subr.mxu1 %v958_v31  ;;  %v668_v30 = vld [vmem:[%s6783_s7 + $0x648] sm:$0xff]  ;;  %v670_v31 = vld [vmem:[%s6783_s7 + $0x658] sm:$0xff] }
 0x164   : > { %2816 = vmatmul.mubr.f32.vlgmr.msra.gmra.mxu0 %v247_v32  ;;  %2923 = vmatmul.mubr.f32.vlgmr.msra.gmra.mxu1 %v249_v33  ;;  %v667_v32 = vld [vmem:[%s6783_s7 + $0x640] sm:$0xff]  ;;  %v669_v33 = vld [vmem:[%s6783_s7 + $0x650] sm:$0xff] }
 0x165   : > { %2966 = vmatpush1.xpose.msra.mxu0 %v955_v34  ;;  %3073 = vmatpush1.xpose.msra.mxu1 %v957_v35  ;;  %v636_v34 = vld [vmem:[%s6783_s7 + $0x548] sm:$0xff]  ;;  %v638_v35 = vld [vmem:[%s6783_s7 + $0x558] sm:$0xff] }
 0x166   : > { %2821 = vmatprep.mubr.f32.mxu0 %v280_v36  ;;  %2967 = vmatprep.subr.mxu0 %v924_v37  ;;  %v635_v36 = vld [vmem:[%s6783_s7 + $0x540] sm:$0xff]  ;;  %v637_v37 = vld [vmem:[%s6783_s7 + $0x550] sm:$0xff] }
 0x167   : > { %3074 = vmatprep.subr.mxu1 %v926_v38  ;;  %2928 = vmatprep.mubr.f32.mxu1 %v282_v39  ;;  %v604_v38 = vld [vmem:[%s6783_s7 + $0x448] sm:$0xff]  ;;  %v606_v39 = vld [vmem:[%s6783_s7 + $0x458] sm:$0xff] }
 0x168   : > { %2822 = vmatmul.mubr.f32.gmra.mxu0 %v279_v40  ;;  %2929 = vmatmul.mubr.f32.gmra.mxu1 %v281_v41  ;;  %v603_v40 = vld [vmem:[%s6783_s7 + $0x440] sm:$0xff]  ;;  %v605_v41 = vld [vmem:[%s6783_s7 + $0x450] sm:$0xff] }
 0x169   : > { %2968 = vmatpush1.xpose.msra.mxu0 %v923_v42  ;;  %3075 = vmatpush1.xpose.msra.mxu1 %v925_v43  ;;  %v572_v42 = vld [vmem:[%s6783_s7 + $0x348] sm:$0xff]  ;;  %v574_v43 = vld [vmem:[%s6783_s7 + $0x358] sm:$0xff] }
 0x16a   : > { %2827 = vmatprep.mubr.f32.mxu0 %v312_v44  ;;  %2969 = vmatprep.subr.mxu0 %v892_v45  ;;  %v571_v44 = vld [vmem:[%s6783_s7 + $0x340] sm:$0xff]  ;;  %v573_v45 = vld [vmem:[%s6783_s7 + $0x350] sm:$0xff] }
 0x16b   : > { %3076 = vmatprep.subr.mxu1 %v894_v46  ;;  %2934 = vmatprep.mubr.f32.mxu1 %v314_v47  ;;  %v540_v46 = vld [vmem:[%s6783_s7 + $0x248] sm:$0xff]  ;;  %v542_v47 = vld [vmem:[%s6783_s7 + $0x258] sm:$0xff] }
 0x16c   : > { %2828 = vmatmul.mubr.f32.gmra.mxu0 %v311_v48  ;;  %2935 = vmatmul.mubr.f32.gmra.mxu1 %v313_v49  ;;  %v2517_v48 = vlaneseq  ;;  %v539_v49 = vld [vmem:[%s6783_s7 + $0x240] sm:$0xff] }
 0x16d   : > { %2970 = vmatpush1.xpose.msra.mxu0 %v891_v50  ;;  %3077 = vmatpush1.xpose.msra.mxu1 %v893_v51  ;;  %v541_v50 = vld [vmem:[%s6783_s7 + $0x250] sm:$0xff]  ;;  %v508_v51 = vld [vmem:[%s6783_s7 + $0x148] sm:$0xff] }
 0x16e   : > { %2833 = vmatprep.mubr.f32.mxu0 %v344_v52  ;;  %2971 = vmatprep.subr.mxu0 %v860_v53  ;;  %v510_v52 = vld [vmem:[%s6783_s7 + $0x158] sm:$0xff]  ;;  %v7104_v53 = vshrl.u32 %v2517_v48, 7  ;;  %v1307_v48 = vld [vmem:[%s6783_s7 + $0x1a40] sm:$0xff] }
 0x16f   : > { %3078 = vmatprep.subr.mxu1 %v862_v54  ;;  %2940 = vmatprep.mubr.f32.mxu1 %v346_v55  ;;  %v507_v54 = vld [vmem:[%s6783_s7 + $0x140] sm:$0xff]  ;;  %v509_v55 = vld [vmem:[%s6783_s7 + $0x150] sm:$0xff] }
 0x170   : > { %2834 = vmatmul.mubr.f32.gmra.mxu0 %v343_v56  ;;  %2941 = vmatmul.mubr.f32.gmra.mxu1 %v345_v57  ;;  %9811 = vst [vmem:[#allocation12_spill] sm:$0xff] %v7104_v53  ;;  %v476_v56 = vld [vmem:[%s6783_s7 + $0x48] sm:$0xff]  ;;  %v478_v57 = vld [vmem:[%s6783_s7 + $0x58] sm:$0xff] }
 0x171   : > { %2972 = vmatpush1.xpose.msra.mxu0 %v859_v58  ;;  %3079 = vmatpush1.xpose.msra.mxu1 %v861_v59  ;;  %v2519_v58 = vsub.s32 0, %v7104_v53  ;;  %v475_v59 = vld [vmem:[%s6783_s7 + $0x40] sm:$0xff] }
 0x172   : > { %2839 = vmatprep.mubr.f32.mxu0 %v376_v60  ;;  %2973 = vmatprep.subr.mxu0 %v828_v61  ;;  %v477_v60 = vld [vmem:[%s6783_s7 + $0x50] sm:$0xff]  ;;  %v2515_v61 = vld [vmem:[%s7113_s25] sm:$0xf] }
 0x173   : > { %3080 = vmatprep.subr.mxu1 %v830_v62  ;;  %2946 = vmatprep.mubr.f32.mxu1 %v378_v63  ;;  %v1468_v62 = vld [vmem:[%s6783_s7 + $0x1f48] sm:$0xff]  ;;  %v1470_v63 = vld [vmem:[%s6783_s7 + $0x1f58] sm:$0xff] }
 0x174   : > { %2840 = vmatmul.mubr.f32.gmra.mxu0 %v375_v0  ;;  %2947 = vmatmul.mubr.f32.gmra.mxu1 %v377_v1  ;;  %v7118_v0 = vrot.slane %v2515_v61, %v2519_v58  ;;  %v1467_v1 = vld [vmem:[%s6783_s7 + $0x1f40] sm:$0xff] }
 0x175   : > { %2974 = vmatpush1.xpose.msra.mxu0 %v827_v2  ;;  %3081 = vmatpush1.xpose.msra.mxu1 %v829_v3  ;;  %v1469_v2 = vld [vmem:[%s6783_s7 + $0x1f50] sm:$0xff]  ;;  %v1436_v3 = vld [vmem:[%s6783_s7 + $0x1e48] sm:$0xff] }
 0x176   : > { %2845 = vmatprep.mubr.f32.mxu0 %v408_v4  ;;  %2975 = vmatprep.subr.mxu0 %v796_v5  ;;  %v1438_v4 = vld [vmem:[%s6783_s7 + $0x1e58] sm:$0xff] }
 0x177   : > { %3082 = vmatprep.subr.mxu1 %v798_v6  ;;  %2952 = vmatprep.mubr.f32.mxu1 %v410_v7 }
 0x178   : > { %2846 = vmatmul.mubr.f32.gmra.mxu0 %v407_v8  ;;  %2953 = vmatmul.mubr.f32.gmra.mxu1 %v409_v9 }
 0x179   : > { %2976 = vmatpush1.xpose.msra.mxu0 %v795_v10  ;;  %3083 = vmatpush1.xpose.msra.mxu1 %v797_v11  ;;  %v1435_v10 = vld [vmem:[%s6783_s7 + $0x1e40] sm:$0xff]  ;;  %v1437_v11 = vld [vmem:[%s6783_s7 + $0x1e50] sm:$0xff] }
 0x17a   : > { %2851 = vmatprep.mubr.f32.mxu0 %v440_v12  ;;  %2977 = vmatprep.subr.mxu0 %v764_v13  ;;  %v1404_v13 = vld [vmem:[%s6783_s7 + $0x1d48] sm:$0xff] }
 0x17b   : > { %3084 = vmatprep.subr.mxu1 %v766_v14  ;;  %2958 = vmatprep.mubr.f32.mxu1 %v442_v15  ;;  %v1406_v14 = vld [vmem:[%s6783_s7 + $0x1d58] sm:$0xff] }
 0x17c   : > { %2852 = vmatmul.mubr.f32.gmra.mxu0 %v439_v16  ;;  %2959 = vmatmul.mubr.f32.gmra.mxu1 %v441_v17 }
 0x17d   : > { %2978 = vmatpush1.xpose.msra.mxu0 %v763_v18  ;;  %3085 = vmatpush1.xpose.msra.mxu1 %v765_v19  ;;  %v1403_v18 = vld [vmem:[%s6783_s7 + $0x1d40] sm:$0xff]  ;;  %v1405_v19 = vld [vmem:[%s6783_s7 + $0x1d50] sm:$0xff] }
 0x17e   : > { %2979 = vmatprep.subr.mxu0 %v732_v20  ;;  %3086 = vmatprep.subr.mxu1 %v734_v21 }
 0x17f   : > { %3029 = vmatprep.mubr.f32.mxu0 %v252_v22  ;;  %3136 = vmatprep.mubr.f32.mxu1 %v254_v23  ;;  %v1372_v22 = vld [vmem:[%s6783_s7 + $0x1c48] sm:$0xff]  ;;  %v1374_v23 = vld [vmem:[%s6783_s7 + $0x1c58] sm:$0xff] }
 0x181   : > { %2980 = vmatpush1.xpose.msra.mxu0 %v731_v24  ;;  %3087 = vmatpush1.xpose.msra.mxu1 %v733_v25 }
 0x182   : > { %2981 = vmatprep.subr.mxu0 %v700_v26  ;;  %3088 = vmatprep.subr.mxu1 %v702_v27 }
 0x185   : > { %2982 = vmatpush1.xpose.msra.mxu0 %v699_v28  ;;  %3089 = vmatpush1.xpose.msra.mxu1 %v701_v29  ;;  %v1371_v28 = vld [vmem:[%s6783_s7 + $0x1c40] sm:$0xff]  ;;  %v1373_v29 = vld [vmem:[%s6783_s7 + $0x1c50] sm:$0xff] }
 0x186   : > { %2983 = vmatprep.subr.mxu0 %v668_v30  ;;  %3090 = vmatprep.subr.mxu1 %v670_v31 }
 0x189   : > { %2984 = vmatpush1.xpose.msra.mxu0 %v667_v32  ;;  %3091 = vmatpush1.xpose.msra.mxu1 %v669_v33  ;;  %v1340_v32 = vld [vmem:[%s6783_s7 + $0x1b48] sm:$0xff]  ;;  %v1342_v33 = vld [vmem:[%s6783_s7 + $0x1b58] sm:$0xff] }
 0x18a   : > { %2985 = vmatprep.subr.mxu0 %v636_v34  ;;  %3092 = vmatprep.subr.mxu1 %v638_v35 }
 0x18d   : > { %2986 = vmatpush1.xpose.msra.mxu0 %v635_v36  ;;  %3093 = vmatpush1.xpose.msra.mxu1 %v637_v37 }
 0x18e   : > { %2987 = vmatprep.subr.mxu0 %v604_v38  ;;  %3094 = vmatprep.subr.mxu1 %v606_v39  ;;  %v1339_v38 = vld [vmem:[%s6783_s7 + $0x1b40] sm:$0xff]  ;;  %v1341_v39 = vld [vmem:[%s6783_s7 + $0x1b50] sm:$0xff] }
 0x191   : > { %2988 = vmatpush1.xpose.msra.mxu0 %v603_v40  ;;  %3095 = vmatpush1.xpose.msra.mxu1 %v605_v41 }
 0x192   : > { %2989 = vmatprep.subr.mxu0 %v572_v42  ;;  %3096 = vmatprep.subr.mxu1 %v574_v43  ;;  %v1308_v42 = vld [vmem:[%s6783_s7 + $0x1a48] sm:$0xff]  ;;  %v1310_v43 = vld [vmem:[%s6783_s7 + $0x1a58] sm:$0xff] }
 0x195   : > { %2990 = vmatpush1.xpose.msra.mxu0 %v571_v44  ;;  %3097 = vmatpush1.xpose.msra.mxu1 %v573_v45 }
 0x196   : > { %2991 = vmatprep.subr.mxu0 %v540_v46  ;;  %3098 = vmatprep.subr.mxu1 %v542_v47 }
 0x199   : > { %2992 = vmatpush1.xpose.msra.mxu0 %v539_v49  ;;  %3099 = vmatpush1.xpose.msra.mxu1 %v541_v50  ;;  %v1309_v49 = vld [vmem:[%s6783_s7 + $0x1a50] sm:$0xff] }
 0x19a   : > { %2993 = vmatprep.subr.mxu0 %v508_v51  ;;  %3100 = vmatprep.subr.mxu1 %v510_v52  ;;  %v1276_v52 = vld [vmem:[%s6783_s7 + $0x1948] sm:$0xff] }
 0x19d   : > { %2994 = vmatpush1.xpose.msra.mxu0 %v507_v54  ;;  %3101 = vmatpush1.xpose.msra.mxu1 %v509_v55  ;;  %v1278_v54 = vld [vmem:[%s6783_s7 + $0x1958] sm:$0xff] }
 0x19e   : > { %2995 = vmatprep.subr.mxu0 %v476_v56  ;;  %3102 = vmatprep.subr.mxu1 %v478_v57 }
 0x1a1   : > { %2996 = vmatpush1.xpose.msra.mxu0 %v475_v59  ;;  %3103 = vmatpush1.xpose.msra.mxu1 %v477_v60  ;;  %v1275_v59 = vld [vmem:[%s6783_s7 + $0x1940] sm:$0xff]  ;;  %v1277_v60 = vld [vmem:[%s6783_s7 + $0x1950] sm:$0xff] }
 0x1a2   : > { %2997 = vmatprep.subr.mxu0 %v1468_v62  ;;  %3104 = vmatprep.subr.mxu1 %v1470_v63  ;;  %v1244_v63 = vld [vmem:[%s6783_s7 + $0x1848] sm:$0xff] }
 0x1a4   : > { %v2603_v5 = vpop.f32.mrf.mxu0  ;;  %v2710_v6 = vpop.f32.mrf.mxu1 }
 0x1a5   : > { %v2604_v7 = vadd.f32 %v2603_v5, %v7118_v0  ;;  %2998 = vmatpush2.xpose.msra.mxu0 %v1467_v1  ;;  %3105 = vmatpush2.xpose.msra.mxu1 %v1469_v2  ;;  %v1246_v1 = vld [vmem:[%s6783_s7 + $0x1858] sm:$0xff]  ;;  %v1243_v5 = vld [vmem:[%s6783_s7 + $0x1840] sm:$0xff] }
 0x1a6   : > { %v7125_v8 = vpop.f32.mrf.mxu0  ;;  %v7127_v9 = vpop.f32.mrf.mxu1  ;;  %2999 = vmatprep.subr.mxu0 %v1436_v3  ;;  %3106 = vmatprep.subr.mxu1 %v1438_v4 }
 0x1a7   : > { %v7131_v12 = vadd.f32 %v2710_v6, %v2604_v7  ;;  %v1245_v6 = vld [vmem:[%s6783_s7 + $0x1850] sm:$0xff] }
 0x1a8   : > { %v2609_v15 = vpop.f32.mrf.mxu0  ;;  %v2716_v16 = vpop.f32.mrf.mxu1 }
 0x1a9   : > { %3000 = vmatpush2.xpose.msra.mxu0 %v1435_v10  ;;  %3107 = vmatpush2.xpose.msra.mxu1 %v1437_v11  ;;  %v2610_v17 = vadd.f32 %v2609_v15, %v7118_v0  ;;  %v1212_v10 = vld [vmem:[%s6783_s7 + $0x1748] sm:$0xff]  ;;  %v1214_v11 = vld [vmem:[%s6783_s7 + $0x1758] sm:$0xff] }
 0x1aa   : > { %3001 = vmatprep.subr.mxu0 %v1404_v13  ;;  %3108 = vmatprep.subr.mxu1 %v1406_v14  ;;  %v7138_v20 = vpop.f32.mrf.mxu0  ;;  %v7140_v21 = vpop.f32.mrf.mxu1  ;;  %v1211_v14 = vld [vmem:[%s6783_s7 + $0x1740] sm:$0xff]  ;;  %v1180_v15 = vld [vmem:[%s6783_s7 + $0x1648] sm:$0xff] }
 0x1ab   : > { %v7144_v24 = vadd.f32 %v2716_v16, %v2610_v17  ;;  %v1182_v16 = vld [vmem:[%s6783_s7 + $0x1658] sm:$0xff]  ;;  %v1179_v17 = vld [vmem:[%s6783_s7 + $0x1640] sm:$0xff] }
 0x1ac   : > { %v2615_v25 = vpop.f32.mrf.mxu0  ;;  %v2722_v26 = vpop.f32.mrf.mxu1 }
 0x1ad   : > { %3002 = vmatpush2.xpose.msra.mxu0 %v1403_v18  ;;  %3109 = vmatpush2.xpose.msra.mxu1 %v1405_v19  ;;  %v2616_v27 = vadd.f32 %v2615_v25, %v7118_v0  ;;  %v1181_v18 = vld [vmem:[%s6783_s7 + $0x1650] sm:$0xff]  ;;  %v1148_v19 = vld [vmem:[%s6783_s7 + $0x1548] sm:$0xff] }
 0x1ae   : > { %3003 = vmatprep.subr.mxu0 %v1372_v22  ;;  %3110 = vmatprep.subr.mxu1 %v1374_v23  ;;  %v7149_v30 = vpop.f32.mrf.mxu0  ;;  %v7151_v31 = vpop.f32.mrf.mxu1  ;;  %v1150_v22 = vld [vmem:[%s6783_s7 + $0x1558] sm:$0xff]  ;;  %v1147_v23 = vld [vmem:[%s6783_s7 + $0x1540] sm:$0xff]  ;;  %v1149_v25 = vld [vmem:[%s6783_s7 + $0x1550] sm:$0xff] }
 0x1af   : > { %v7155_v34 = vadd.f32 %v2722_v26, %v2616_v27  ;;  %v1116_v26 = vld [vmem:[%s6783_s7 + $0x1448] sm:$0xff]  ;;  %v1118_v27 = vld [vmem:[%s6783_s7 + $0x1458] sm:$0xff] }
 0x1b0   : > { %v2621_v35 = vpop.f32.mrf.mxu0  ;;  %v2728_v36 = vpop.f32.mrf.mxu1 }
 0x1b1   : > { %3004 = vmatpush2.xpose.msra.mxu0 %v1371_v28  ;;  %3111 = vmatpush2.xpose.msra.mxu1 %v1373_v29  ;;  %v2622_v37 = vadd.f32 %v2621_v35, %v7118_v0  ;;  %v1115_v28 = vld [vmem:[%s6783_s7 + $0x1440] sm:$0xff]  ;;  %v1117_v29 = vld [vmem:[%s6783_s7 + $0x1450] sm:$0xff] }
 0x1b2   : > { %3005 = vmatprep.subr.mxu0 %v1340_v32  ;;  %3112 = vmatprep.subr.mxu1 %v1342_v33  ;;  %v7160_v40 = vpop.f32.mrf.mxu0  ;;  %v7162_v41 = vpop.f32.mrf.mxu1  ;;  %v1084_v32 = vld [vmem:[%s6783_s7 + $0x1348] sm:$0xff]  ;;  %v1086_v33 = vld [vmem:[%s6783_s7 + $0x1358] sm:$0xff]  ;;  %v1083_v35 = vld [vmem:[%s6783_s7 + $0x1340] sm:$0xff] }
 0x1b3   : > { %v7166_v44 = vadd.f32 %v2728_v36, %v2622_v37  ;;  %v1085_v36 = vld [vmem:[%s6783_s7 + $0x1350] sm:$0xff]  ;;  %v1052_v37 = vld [vmem:[%s6783_s7 + $0x1248] sm:$0xff] }
 0x1b4   : > { %v2627_v45 = vpop.f32.mrf.mxu0  ;;  %v2734_v46 = vpop.f32.mrf.mxu1 }
 0x1b5   : > { %3006 = vmatpush2.xpose.msra.mxu0 %v1339_v38  ;;  %3113 = vmatpush2.xpose.msra.mxu1 %v1341_v39  ;;  %v2628_v47 = vadd.f32 %v2627_v45, %v7118_v0  ;;  %v1054_v38 = vld [vmem:[%s6783_s7 + $0x1258] sm:$0xff]  ;;  %v1051_v39 = vld [vmem:[%s6783_s7 + $0x1240] sm:$0xff] }
 0x1b6   : > { %3007 = vmatprep.subr.mxu0 %v1308_v42  ;;  %3114 = vmatprep.subr.mxu1 %v1310_v43  ;;  %v7171_v50 = vpop.f32.mrf.mxu0  ;;  %v7173_v51 = vpop.f32.mrf.mxu1  ;;  %v1053_v42 = vld [vmem:[%s6783_s7 + $0x1250] sm:$0xff]  ;;  %v1020_v43 = vld [vmem:[%s6783_s7 + $0x1148] sm:$0xff]  ;;  %v1022_v45 = vld [vmem:[%s6783_s7 + $0x1158] sm:$0xff] }
 0x1b7   : > { %v7177_v55 = vadd.f32 %v2734_v46, %v2628_v47  ;;  %v1019_v46 = vld [vmem:[%s6783_s7 + $0x1140] sm:$0xff]  ;;  %v1021_v47 = vld [vmem:[%s6783_s7 + $0x1150] sm:$0xff] }
 0x1b8   : > { %v2633_v56 = vpop.f32.mrf.mxu0  ;;  %v2740_v57 = vpop.f32.mrf.mxu1 }
 0x1b9   : > { %3008 = vmatpush2.xpose.msra.mxu0 %v1307_v48  ;;  %3115 = vmatpush2.xpose.msra.mxu1 %v1309_v49  ;;  %v2634_v58 = vadd.f32 %v2633_v56, %v7118_v0  ;;  %v988_v48 = vld [vmem:[%s6783_s7 + $0x1048] sm:$0xff]  ;;  %v990_v49 = vld [vmem:[%s6783_s7 + $0x1058] sm:$0xff] }
 0x1ba   : > { %3009 = vmatprep.subr.mxu0 %v1276_v52  ;;  %3116 = vmatprep.subr.mxu1 %v1278_v54  ;;  %v7182_v61 = vpop.f32.mrf.mxu0  ;;  %v7184_v62 = vpop.f32.mrf.mxu1  ;;  %v987_v52 = vld [vmem:[%s6783_s7 + $0x1040] sm:$0xff]  ;;  %v989_v54 = vld [vmem:[%s6783_s7 + $0x1050] sm:$0xff]  ;;  %v960_v56 = vld [vmem:[%s6783_s7 + $0xf68] sm:$0xff] }
 0x1bb   : > { %v7188_v2 = vadd.f32 %v2740_v57, %v2634_v58  ;;  %v962_v57 = vld [vmem:[%s6783_s7 + $0xf78] sm:$0xff]  ;;  %v251_v58 = vld [vmem:[#allocation2 + $0x40] sm:$0xff] }
 0x1bc   : > { %v2639_v3 = vpop.f32.mrf.mxu0  ;;  %v2746_v7 = vpop.f32.mrf.mxu1 }
 0x1bd   : > { %3010 = vmatpush2.xpose.msra.mxu0 %v1275_v59  ;;  %3117 = vmatpush2.xpose.msra.mxu1 %v1277_v60  ;;  %v2640_v4 = vadd.f32 %v2639_v3, %v7118_v0  ;;  %v1213_v0 = vld [vmem:[%s6783_s7 + $0x1750] sm:$0xff]  ;;  %v959_v60 = vld [vmem:[%s6783_s7 + $0xf60] sm:$0xff]  ;;  %v928_v3 = vld [vmem:[%s6783_s7 + $0xe68] sm:$0xff] }
 0x1be   : > { %3011 = vmatprep.subr.mxu0 %v1244_v63  ;;  %3118 = vmatprep.subr.mxu1 %v1246_v1  ;;  %v253_v59 = vld [vmem:[#allocation2 + $0x50] sm:$0xff]  ;;  %v284_v1 = vld [vmem:[#allocation2 + $0x148] sm:$0xff] }
 0x1bf   : > { %v7195_v13 = vadd.f32 %v2746_v7, %v2640_v4  ;;  %v961_v63 = vld [vmem:[%s6783_s7 + $0xf70] sm:$0xff]  ;;  %v930_v4 = vld [vmem:[%s6783_s7 + $0xe78] sm:$0xff] }
 0x1c0   : > { %v285_v7 = vld [vmem:[#allocation2 + $0x150] sm:$0xff] }
 0x1c1   : > { %3012 = vmatpush2.xpose.msra.mxu0 %v1243_v5  ;;  %3119 = vmatpush2.xpose.msra.mxu1 %v1245_v6  ;;  %v286_v5 = vld [vmem:[#allocation2 + $0x158] sm:$0xff]  ;;  %v283_v6 = vld [vmem:[#allocation2 + $0x140] sm:$0xff] }
 0x1c2   : > { %3013 = vmatprep.subr.mxu0 %v1212_v10  ;;  %3120 = vmatprep.subr.mxu1 %v1214_v11  ;;  %v927_v10 = vld [vmem:[%s6783_s7 + $0xe60] sm:$0xff]  ;;  %v929_v11 = vld [vmem:[%s6783_s7 + $0xe70] sm:$0xff] }
 0x1c5   : > { %3014 = vmatpush2.xpose.msra.mxu0 %v1211_v14  ;;  %3121 = vmatpush2.xpose.msra.mxu1 %v1213_v0  ;;  %v316_v14 = vld [vmem:[#allocation2 + $0x248] sm:$0xff] }
 0x1c6   : > { %3015 = vmatprep.subr.mxu0 %v1180_v15  ;;  %3122 = vmatprep.subr.mxu1 %v1182_v16  ;;  %v896_v0 = vld [vmem:[%s6783_s7 + $0xd68] sm:$0xff]  ;;  %v898_v15 = vld [vmem:[%s6783_s7 + $0xd78] sm:$0xff] }
 0x1c7   : > { %v318_v16 = vld [vmem:[#allocation2 + $0x258] sm:$0xff] }
 0x1c9   : > { %3016 = vmatpush2.xpose.msra.mxu0 %v1179_v17  ;;  %3123 = vmatpush2.xpose.msra.mxu1 %v1181_v18  ;;  %v315_v17 = vld [vmem:[#allocation2 + $0x240] sm:$0xff]  ;;  %v317_v18 = vld [vmem:[#allocation2 + $0x250] sm:$0xff] }
 0x1ca   : > { %3017 = vmatprep.subr.mxu0 %v1148_v19  ;;  %3124 = vmatprep.subr.mxu1 %v1150_v22  ;;  %v895_v19 = vld [vmem:[%s6783_s7 + $0xd60] sm:$0xff]  ;;  %v897_v22 = vld [vmem:[%s6783_s7 + $0xd70] sm:$0xff] }
 0x1cd   : > { %3018 = vmatpush2.xpose.msra.mxu0 %v1147_v23  ;;  %3125 = vmatpush2.xpose.msra.mxu1 %v1149_v25  ;;  %v348_v23 = vld [vmem:[#allocation2 + $0x348] sm:$0xff] }
 0x1ce   : > { %3019 = vmatprep.subr.mxu0 %v1116_v26  ;;  %3126 = vmatprep.subr.mxu1 %v1118_v27  ;;  %v864_v25 = vld [vmem:[%s6783_s7 + $0xc68] sm:$0xff]  ;;  %v866_v26 = vld [vmem:[%s6783_s7 + $0xc78] sm:$0xff] }
 0x1cf   : > { %v350_v27 = vld [vmem:[#allocation2 + $0x358] sm:$0xff] }
 0x1d1   : > { %3020 = vmatpush2.xpose.msra.mxu0 %v1115_v28  ;;  %3127 = vmatpush2.xpose.msra.mxu1 %v1117_v29  ;;  %v347_v28 = vld [vmem:[#allocation2 + $0x340] sm:$0xff]  ;;  %v349_v29 = vld [vmem:[#allocation2 + $0x350] sm:$0xff] }
 0x1d2   : > { %3021 = vmatprep.subr.mxu0 %v1084_v32  ;;  %3128 = vmatprep.subr.mxu1 %v1086_v33  ;;  %v863_v32 = vld [vmem:[%s6783_s7 + $0xc60] sm:$0xff]  ;;  %v865_v33 = vld [vmem:[%s6783_s7 + $0xc70] sm:$0xff] }
 0x1d5   : > { %3022 = vmatpush2.xpose.msra.mxu0 %v1083_v35  ;;  %3129 = vmatpush2.xpose.msra.mxu1 %v1085_v36  ;;  %v380_v35 = vld [vmem:[#allocation2 + $0x448] sm:$0xff] }
 0x1d6   : > { %3023 = vmatprep.subr.mxu0 %v1052_v37  ;;  %3130 = vmatprep.subr.mxu1 %v1054_v38  ;;  %v832_v36 = vld [vmem:[%s6783_s7 + $0xb68] sm:$0xff]  ;;  %v834_v37 = vld [vmem:[%s6783_s7 + $0xb78] sm:$0xff] }
 0x1d7   : > { %v382_v38 = vld [vmem:[#allocation2 + $0x458] sm:$0xff] }
 0x1d9   : > { %3024 = vmatpush2.xpose.msra.mxu0 %v1051_v39  ;;  %3131 = vmatpush2.xpose.msra.mxu1 %v1053_v42  ;;  %v379_v39 = vld [vmem:[#allocation2 + $0x440] sm:$0xff]  ;;  %v381_v42 = vld [vmem:[#allocation2 + $0x450] sm:$0xff] }
 0x1da   : > { %3025 = vmatprep.subr.mxu0 %v1020_v43  ;;  %3132 = vmatprep.subr.mxu1 %v1022_v45  ;;  %v831_v43 = vld [vmem:[%s6783_s7 + $0xb60] sm:$0xff]  ;;  %v833_v45 = vld [vmem:[%s6783_s7 + $0xb70] sm:$0xff] }
 0x1dd   : > { %3026 = vmatpush2.xpose.msra.mxu0 %v1019_v46  ;;  %3133 = vmatpush2.xpose.msra.mxu1 %v1021_v47  ;;  %v412_v46 = vld [vmem:[#allocation2 + $0x548] sm:$0xff] }
 0x1de   : > { %3027 = vmatprep.subr.mxu0 %v988_v48  ;;  %3134 = vmatprep.subr.mxu1 %v990_v49  ;;  %v800_v47 = vld [vmem:[%s6783_s7 + $0xa68] sm:$0xff]  ;;  %v802_v48 = vld [vmem:[%s6783_s7 + $0xa78] sm:$0xff] }
 0x1df   : > { %v414_v49 = vld [vmem:[#allocation2 + $0x558] sm:$0xff] }
 0x1e1   : > { %3028 = vmatpush2.xpose.msra.mxu0 %v987_v52  ;;  %3135 = vmatpush2.xpose.msra.mxu1 %v989_v54  ;;  %v411_v52 = vld [vmem:[#allocation2 + $0x540] sm:$0xff]  ;;  %v413_v54 = vld [vmem:[#allocation2 + $0x550] sm:$0xff] }
 0x1e2   : > { %3179 = vmatprep.subr.mxu0 %v960_v56  ;;  %3286 = vmatprep.subr.mxu1 %v962_v57  ;;  %v799_v56 = vld [vmem:[%s6783_s7 + $0xa60] sm:$0xff]  ;;  %v801_v57 = vld [vmem:[%s6783_s7 + $0xa70] sm:$0xff] }
 0x1e4   : > { %3030 = vmatmul.mubr.f32.vlgmr.msra.gmra.mxu0 %v251_v58  ;;  %3137 = vmatmul.mubr.f32.vlgmr.msra.gmra.mxu1 %v253_v59  ;;  %v444_v58 = vld [vmem:[#allocation2 + $0x648] sm:$0xff] }
 0x1e5   : > { %3180 = vmatpush1.xpose.msra.mxu0 %v959_v60  ;;  %3287 = vmatpush1.xpose.msra.mxu1 %v961_v63  ;;  %v768_v59 = vld [vmem:[%s6783_s7 + $0x968] sm:$0xff]  ;;  %v770_v60 = vld [vmem:[%s6783_s7 + $0x978] sm:$0xff] }
 0x1e6   : > { %3035 = vmatprep.mubr.f32.mxu0 %v284_v1  ;;  %3181 = vmatprep.subr.mxu0 %v928_v3  ;;  %v446_v63 = vld [vmem:[#allocation2 + $0x658] sm:$0xff]  ;;  %v443_v1 = vld [vmem:[#allocation2 + $0x640] sm:$0xff]  ;;  %v445_v3 = vld [vmem:[#allocation2 + $0x650] sm:$0xff] }
 0x1e7   : > { %3288 = vmatprep.subr.mxu1 %v930_v4  ;;  %3142 = vmatprep.mubr.f32.mxu1 %v286_v5  ;;  %v767_v4 = vld [vmem:[%s6783_s7 + $0x960] sm:$0xff]  ;;  %v769_v5 = vld [vmem:[%s6783_s7 + $0x970] sm:$0xff] }
 0x1e8   : > { %3036 = vmatmul.mubr.f32.gmra.mxu0 %v283_v6  ;;  %3143 = vmatmul.mubr.f32.gmra.mxu1 %v285_v7  ;;  %v736_v6 = vld [vmem:[%s6783_s7 + $0x868] sm:$0xff]  ;;  %v738_v7 = vld [vmem:[%s6783_s7 + $0x878] sm:$0xff] }
 0x1e9   : > { %3182 = vmatpush1.xpose.msra.mxu0 %v927_v10  ;;  %3289 = vmatpush1.xpose.msra.mxu1 %v929_v11  ;;  %v256_v10 = vld [vmem:[#allocation2 + $0x68] sm:$0xff]  ;;  %v258_v11 = vld [vmem:[#allocation2 + $0x78] sm:$0xff] }
 0x1ea   : > { %3041 = vmatprep.mubr.f32.mxu0 %v316_v14  ;;  %3183 = vmatprep.subr.mxu0 %v896_v0  ;;  %v735_v14 = vld [vmem:[%s6783_s7 + $0x860] sm:$0xff]  ;;  %v737_v0 = vld [vmem:[%s6783_s7 + $0x870] sm:$0xff] }
 0x1eb   : > { %3290 = vmatprep.subr.mxu1 %v898_v15  ;;  %3148 = vmatprep.mubr.f32.mxu1 %v318_v16  ;;  %v704_v15 = vld [vmem:[%s6783_s7 + $0x768] sm:$0xff]  ;;  %v706_v16 = vld [vmem:[%s6783_s7 + $0x778] sm:$0xff] }
 0x1ec   : > { %3042 = vmatmul.mubr.f32.gmra.mxu0 %v315_v17  ;;  %3149 = vmatmul.mubr.f32.gmra.mxu1 %v317_v18  ;;  %v703_v17 = vld [vmem:[%s6783_s7 + $0x760] sm:$0xff]  ;;  %v705_v18 = vld [vmem:[%s6783_s7 + $0x770] sm:$0xff] }
 0x1ed   : > { %3184 = vmatpush1.xpose.msra.mxu0 %v895_v19  ;;  %3291 = vmatpush1.xpose.msra.mxu1 %v897_v22  ;;  %v672_v19 = vld [vmem:[%s6783_s7 + $0x668] sm:$0xff]  ;;  %v674_v22 = vld [vmem:[%s6783_s7 + $0x678] sm:$0xff] }
 0x1ee   : > { %3047 = vmatprep.mubr.f32.mxu0 %v348_v23  ;;  %3185 = vmatprep.subr.mxu0 %v864_v25  ;;  %v671_v23 = vld [vmem:[%s6783_s7 + $0x660] sm:$0xff]  ;;  %v673_v25 = vld [vmem:[%s6783_s7 + $0x670] sm:$0xff] }
 0x1ef   : > { %3292 = vmatprep.subr.mxu1 %v866_v26  ;;  %3154 = vmatprep.mubr.f32.mxu1 %v350_v27  ;;  %v640_v26 = vld [vmem:[%s6783_s7 + $0x568] sm:$0xff]  ;;  %v642_v27 = vld [vmem:[%s6783_s7 + $0x578] sm:$0xff] }
 0x1f0   : > { %3048 = vmatmul.mubr.f32.gmra.mxu0 %v347_v28  ;;  %3155 = vmatmul.mubr.f32.gmra.mxu1 %v349_v29  ;;  %v639_v28 = vld [vmem:[%s6783_s7 + $0x560] sm:$0xff]  ;;  %v641_v29 = vld [vmem:[%s6783_s7 + $0x570] sm:$0xff] }
 0x1f1   : > { %3186 = vmatpush1.xpose.msra.mxu0 %v863_v32  ;;  %3293 = vmatpush1.xpose.msra.mxu1 %v865_v33  ;;  %v608_v32 = vld [vmem:[%s6783_s7 + $0x468] sm:$0xff]  ;;  %v610_v33 = vld [vmem:[%s6783_s7 + $0x478] sm:$0xff] }
 0x1f2   : > { %3053 = vmatprep.mubr.f32.mxu0 %v380_v35  ;;  %3187 = vmatprep.subr.mxu0 %v832_v36  ;;  %v607_v35 = vld [vmem:[%s6783_s7 + $0x460] sm:$0xff]  ;;  %v609_v36 = vld [vmem:[%s6783_s7 + $0x470] sm:$0xff] }
 0x1f3   : > { %3294 = vmatprep.subr.mxu1 %v834_v37  ;;  %3160 = vmatprep.mubr.f32.mxu1 %v382_v38  ;;  %v576_v37 = vld [vmem:[%s6783_s7 + $0x368] sm:$0xff]  ;;  %v578_v38 = vld [vmem:[%s6783_s7 + $0x378] sm:$0xff] }
 0x1f4   : > { %3054 = vmatmul.mubr.f32.gmra.mxu0 %v379_v39  ;;  %3161 = vmatmul.mubr.f32.gmra.mxu1 %v381_v42  ;;  %v575_v39 = vld [vmem:[%s6783_s7 + $0x360] sm:$0xff]  ;;  %v577_v42 = vld [vmem:[%s6783_s7 + $0x370] sm:$0xff] }
 0x1f5   : > { %3188 = vmatpush1.xpose.msra.mxu0 %v831_v43  ;;  %3295 = vmatpush1.xpose.msra.mxu1 %v833_v45  ;;  %v544_v43 = vld [vmem:[%s6783_s7 + $0x268] sm:$0xff]  ;;  %v546_v45 = vld [vmem:[%s6783_s7 + $0x278] sm:$0xff] }
 0x1f6   : > { %3059 = vmatprep.mubr.f32.mxu0 %v412_v46  ;;  %3189 = vmatprep.subr.mxu0 %v800_v47  ;;  %v543_v46 = vld [vmem:[%s6783_s7 + $0x260] sm:$0xff]  ;;  %v545_v47 = vld [vmem:[%s6783_s7 + $0x270] sm:$0xff] }
 0x1f7   : > { %3296 = vmatprep.subr.mxu1 %v802_v48  ;;  %3166 = vmatprep.mubr.f32.mxu1 %v414_v49  ;;  %v512_v48 = vld [vmem:[%s6783_s7 + $0x168] sm:$0xff]  ;;  %v514_v49 = vld [vmem:[%s6783_s7 + $0x178] sm:$0xff] }
 0x1f8   : > { %3060 = vmatmul.mubr.f32.gmra.mxu0 %v411_v52  ;;  %3167 = vmatmul.mubr.f32.gmra.mxu1 %v413_v54  ;;  %v511_v52 = vld [vmem:[%s6783_s7 + $0x160] sm:$0xff]  ;;  %v513_v54 = vld [vmem:[%s6783_s7 + $0x170] sm:$0xff] }
 0x1f9   : > { %3190 = vmatpush1.xpose.msra.mxu0 %v799_v56  ;;  %3297 = vmatpush1.xpose.msra.mxu1 %v801_v57  ;;  %v480_v56 = vld [vmem:[%s6783_s7 + $0x68] sm:$0xff]  ;;  %v482_v57 = vld [vmem:[%s6783_s7 + $0x78] sm:$0xff] }
 0x1fa   : > { %3065 = vmatprep.mubr.f32.mxu0 %v444_v58  ;;  %3191 = vmatprep.subr.mxu0 %v768_v59  ;;  %v479_v58 = vld [vmem:[%s6783_s7 + $0x60] sm:$0xff]  ;;  %v481_v59 = vld [vmem:[%s6783_s7 + $0x70] sm:$0xff] }
 0x1fb   : > { %3298 = vmatprep.subr.mxu1 %v770_v60  ;;  %3172 = vmatprep.mubr.f32.mxu1 %v446_v63  ;;  %v1472_v60 = vld [vmem:[%s6783_s7 + $0x1f68] sm:$0xff]  ;;  %v1474_v63 = vld [vmem:[%s6783_s7 + $0x1f78] sm:$0xff] }
 0x1fc   : > { %3066 = vmatmul.mubr.f32.gmra.mxu0 %v443_v1  ;;  %3173 = vmatmul.mubr.f32.gmra.mxu1 %v445_v3  ;;  %v7293_v1 = vpop.f32.mrf.mxu0  ;;  %v7295_v3 = vpop.f32.mrf.mxu1 }
 0x1fd   : > { %3192 = vmatpush1.xpose.msra.mxu0 %v767_v4  ;;  %3299 = vmatpush1.xpose.msra.mxu1 %v769_v5  ;;  %v1471_v4 = vld [vmem:[%s6783_s7 + $0x1f60] sm:$0xff]  ;;  %v1473_v5 = vld [vmem:[%s6783_s7 + $0x1f70] sm:$0xff] }
 0x1fe   : > { %3193 = vmatprep.subr.mxu0 %v736_v6  ;;  %3300 = vmatprep.subr.mxu1 %v738_v7  ;;  %v1440_v6 = vld [vmem:[%s6783_s7 + $0x1e68] sm:$0xff]  ;;  %v1442_v7 = vld [vmem:[%s6783_s7 + $0x1e78] sm:$0xff] }
 0x1ff   : > { %3243 = vmatprep.mubr.f32.mxu0 %v256_v10  ;;  %3350 = vmatprep.mubr.f32.mxu1 %v258_v11 }
 0x201   : > { %3194 = vmatpush1.xpose.msra.mxu0 %v735_v14  ;;  %3301 = vmatpush1.xpose.msra.mxu1 %v737_v0 }
 0x202   : > { %3195 = vmatprep.subr.mxu0 %v704_v15  ;;  %3302 = vmatprep.subr.mxu1 %v706_v16  ;;  %v1439_v16 = vld [vmem:[%s6783_s7 + $0x1e60] sm:$0xff] }
 0x205   : > { %3196 = vmatpush1.xpose.msra.mxu0 %v703_v17  ;;  %3303 = vmatpush1.xpose.msra.mxu1 %v705_v18  ;;  %v1441_v17 = vld [vmem:[%s6783_s7 + $0x1e70] sm:$0xff] }
 0x206   : > { %3197 = vmatprep.subr.mxu0 %v672_v19  ;;  %3304 = vmatprep.subr.mxu1 %v674_v22  ;;  %v1408_v19 = vld [vmem:[%s6783_s7 + $0x1d68] sm:$0xff]  ;;  %v1410_v22 = vld [vmem:[%s6783_s7 + $0x1d78] sm:$0xff] }
 0x209   : > { %3198 = vmatpush1.xpose.msra.mxu0 %v671_v23  ;;  %3305 = vmatpush1.xpose.msra.mxu1 %v673_v25 }
 0x20a   : > { %3199 = vmatprep.subr.mxu0 %v640_v26  ;;  %3306 = vmatprep.subr.mxu1 %v642_v27 }
 0x20d   : > { %3200 = vmatpush1.xpose.msra.mxu0 %v639_v28  ;;  %3307 = vmatpush1.xpose.msra.mxu1 %v641_v29  ;;  %v1407_v28 = vld [vmem:[%s6783_s7 + $0x1d60] sm:$0xff]  ;;  %v1409_v29 = vld [vmem:[%s6783_s7 + $0x1d70] sm:$0xff] }
 0x20e   : > { %3201 = vmatprep.subr.mxu0 %v608_v32  ;;  %3308 = vmatprep.subr.mxu1 %v610_v33  ;;  %v1376_v33 = vld [vmem:[%s6783_s7 + $0x1c68] sm:$0xff] }
 0x211   : > { %3202 = vmatpush1.xpose.msra.mxu0 %v607_v35  ;;  %3309 = vmatpush1.xpose.msra.mxu1 %v609_v36  ;;  %v1378_v35 = vld [vmem:[%s6783_s7 + $0x1c78] sm:$0xff] }
 0x212   : > { %3203 = vmatprep.subr.mxu0 %v576_v37  ;;  %3310 = vmatprep.subr.mxu1 %v578_v38 }
 0x215   : > { %3204 = vmatpush1.xpose.msra.mxu0 %v575_v39  ;;  %3311 = vmatpush1.xpose.msra.mxu1 %v577_v42  ;;  %v1375_v42 = vld [vmem:[%s6783_s7 + $0x1c60] sm:$0xff] }
 0x216   : > { %3205 = vmatprep.subr.mxu0 %v544_v43  ;;  %3312 = vmatprep.subr.mxu1 %v546_v45  ;;  %v1377_v43 = vld [vmem:[%s6783_s7 + $0x1c70] sm:$0xff] }
 0x219   : > { %3206 = vmatpush1.xpose.msra.mxu0 %v543_v46  ;;  %3313 = vmatpush1.xpose.msra.mxu1 %v545_v47  ;;  %v1344_v46 = vld [vmem:[%s6783_s7 + $0x1b68] sm:$0xff]  ;;  %v1346_v47 = vld [vmem:[%s6783_s7 + $0x1b78] sm:$0xff] }
 0x21a   : > { %3207 = vmatprep.subr.mxu0 %v512_v48  ;;  %3314 = vmatprep.subr.mxu1 %v514_v49 }
 0x21d   : > { %3208 = vmatpush1.xpose.msra.mxu0 %v511_v52  ;;  %3315 = vmatpush1.xpose.msra.mxu1 %v513_v54 }
 0x21e   : > { %3209 = vmatprep.subr.mxu0 %v480_v56  ;;  %3316 = vmatprep.subr.mxu1 %v482_v57  ;;  %v1343_v56 = vld [vmem:[%s6783_s7 + $0x1b60] sm:$0xff]  ;;  %v1345_v57 = vld [vmem:[%s6783_s7 + $0x1b70] sm:$0xff] }
 0x221   : > { %3210 = vmatpush1.xpose.msra.mxu0 %v479_v58  ;;  %3317 = vmatpush1.xpose.msra.mxu1 %v481_v59  ;;  %v1312_v59 = vld [vmem:[%s6783_s7 + $0x1a68] sm:$0xff] }
 0x222   : > { %3211 = vmatprep.subr.mxu0 %v1472_v60  ;;  %3318 = vmatprep.subr.mxu1 %v1474_v63  ;;  %v1314_v60 = vld [vmem:[%s6783_s7 + $0x1a78] sm:$0xff] }
 0x224   : > { %v2817_v10 = vpop.f32.mrf.mxu0  ;;  %v2924_v11 = vpop.f32.mrf.mxu1 }
 0x225   : > { %v2818_v14 = vadd.f32 %v2817_v10, %v7131_v12  ;;  %3212 = vmatpush2.xpose.msra.mxu0 %v1471_v4  ;;  %3319 = vmatpush2.xpose.msra.mxu1 %v1473_v5  ;;  %v1313_v10 = vld [vmem:[%s6783_s7 + $0x1a70] sm:$0xff] }
 0x226   : > { %v7302_v0 = vpop.f32.mrf.mxu0  ;;  %v7304_v15 = vpop.f32.mrf.mxu1  ;;  %3213 = vmatprep.subr.mxu0 %v1440_v6  ;;  %3320 = vmatprep.subr.mxu1 %v1442_v7  ;;  %v1311_v7 = vld [vmem:[%s6783_s7 + $0x1a60] sm:$0xff] }
 0x227   : > { %v7308_v18 = vadd.f32 %v2924_v11, %v2818_v14  ;;  %v1280_v14 = vld [vmem:[%s6783_s7 + $0x1968] sm:$0xff] }
 0x228   : > { %v2823_v23 = vpop.f32.mrf.mxu0  ;;  %v2930_v12 = vpop.f32.mrf.mxu1 }
 0x229   : > { %v2824_v25 = vadd.f32 %v2823_v23, %v7144_v24  ;;  %3214 = vmatpush2.xpose.msra.mxu0 %v1439_v16  ;;  %3321 = vmatpush2.xpose.msra.mxu1 %v1441_v17  ;;  %v1282_v16 = vld [vmem:[%s6783_s7 + $0x1978] sm:$0xff] }
 0x22a   : > { %v7313_v26 = vpop.f32.mrf.mxu0  ;;  %v7315_v27 = vpop.f32.mrf.mxu1  ;;  %3215 = vmatprep.subr.mxu0 %v1408_v19  ;;  %3322 = vmatprep.subr.mxu1 %v1410_v22 }
 0x22b   : > { %v7319_v32 = vadd.f32 %v2930_v12, %v2824_v25  ;;  %v1279_v12 = vld [vmem:[%s6783_s7 + $0x1960] sm:$0xff]  ;;  %v1281_v25 = vld [vmem:[%s6783_s7 + $0x1970] sm:$0xff] }
 0x22c   : > { %v2829_v36 = vpop.f32.mrf.mxu0  ;;  %v2936_v24 = vpop.f32.mrf.mxu1 }
 0x22d   : > { %v2830_v37 = vadd.f32 %v2829_v36, %v7155_v34  ;;  %3216 = vmatpush2.xpose.msra.mxu0 %v1407_v28  ;;  %3323 = vmatpush2.xpose.msra.mxu1 %v1409_v29  ;;  %v1248_v29 = vld [vmem:[%s6783_s7 + $0x1868] sm:$0xff] }
 0x22e   : > { %v7324_v38 = vpop.f32.mrf.mxu0  ;;  %v7326_v39 = vpop.f32.mrf.mxu1  ;;  %3217 = vmatprep.subr.mxu0 %v1376_v33  ;;  %3324 = vmatprep.subr.mxu1 %v1378_v35  ;;  %v1250_v33 = vld [vmem:[%s6783_s7 + $0x1878] sm:$0xff] }
 0x22f   : > { %v7330_v45 = vadd.f32 %v2936_v24, %v2830_v37  ;;  %v1247_v24 = vld [vmem:[%s6783_s7 + $0x1860] sm:$0xff]  ;;  %v1249_v37 = vld [vmem:[%s6783_s7 + $0x1870] sm:$0xff] }
 0x230   : > { %v2835_v48 = vpop.f32.mrf.mxu0  ;;  %v2942_v34 = vpop.f32.mrf.mxu1 }
 0x231   : > { %v2836_v49 = vadd.f32 %v2835_v48, %v7166_v44  ;;  %3218 = vmatpush2.xpose.msra.mxu0 %v1375_v42  ;;  %3325 = vmatpush2.xpose.msra.mxu1 %v1377_v43  ;;  %v1216_v43 = vld [vmem:[%s6783_s7 + $0x1768] sm:$0xff] }
 0x232   : > { %v7335_v52 = vpop.f32.mrf.mxu0  ;;  %v7337_v54 = vpop.f32.mrf.mxu1  ;;  %3219 = vmatprep.subr.mxu0 %v1344_v46  ;;  %3326 = vmatprep.subr.mxu1 %v1346_v47  ;;  %v1218_v46 = vld [vmem:[%s6783_s7 + $0x1778] sm:$0xff]  ;;  %v1217_v47 = vld [vmem:[%s6783_s7 + $0x1770] sm:$0xff]  ;;  %v1184_v48 = vld [vmem:[%s6783_s7 + $0x1668] sm:$0xff] }
 0x233   : > { %v7341_v58 = vadd.f32 %v2942_v34, %v2836_v49  ;;  %v1186_v34 = vld [vmem:[%s6783_s7 + $0x1678] sm:$0xff]  ;;  %v1183_v49 = vld [vmem:[%s6783_s7 + $0x1660] sm:$0xff] }
 0x234   : > { %v2841_v63 = vpop.f32.mrf.mxu0  ;;  %v2948_v44 = vpop.f32.mrf.mxu1 }
 0x235   : > { %v2842_v4 = vadd.f32 %v2841_v63, %v7177_v55  ;;  %3220 = vmatpush2.xpose.msra.mxu0 %v1343_v56  ;;  %3327 = vmatpush2.xpose.msra.mxu1 %v1345_v57  ;;  %v1185_v56 = vld [vmem:[%s6783_s7 + $0x1670] sm:$0xff]  ;;  %v1152_v57 = vld [vmem:[%s6783_s7 + $0x1568] sm:$0xff] }
 0x236   : > { %v7346_v5 = vpop.f32.mrf.mxu0  ;;  %v7348_v6 = vpop.f32.mrf.mxu1  ;;  %3221 = vmatprep.subr.mxu0 %v1312_v59  ;;  %3328 = vmatprep.subr.mxu1 %v1314_v60  ;;  %v1154_v59 = vld [vmem:[%s6783_s7 + $0x1578] sm:$0xff]  ;;  %v1151_v60 = vld [vmem:[%s6783_s7 + $0x1560] sm:$0xff]  ;;  %v1153_v63 = vld [vmem:[%s6783_s7 + $0x1570] sm:$0xff] }
 0x237   : > { %v7352_v11 = vadd.f32 %v2948_v44, %v2842_v4  ;;  %v1120_v44 = vld [vmem:[%s6783_s7 + $0x1468] sm:$0xff]  ;;  %v1122_v4 = vld [vmem:[%s6783_s7 + $0x1478] sm:$0xff] }
 0x238   : > { %v2847_v17 = vpop.f32.mrf.mxu0  ;;  %v2954_v55 = vpop.f32.mrf.mxu1 }
 0x239   : > { %v2848_v19 = vadd.f32 %v2847_v17, %v7188_v2  ;;  %3222 = vmatpush2.xpose.msra.mxu0 %v1311_v7  ;;  %3329 = vmatpush2.xpose.msra.mxu1 %v1313_v10  ;;  %v1119_v7 = vld [vmem:[%s6783_s7 + $0x1460] sm:$0xff]  ;;  %v1121_v10 = vld [vmem:[%s6783_s7 + $0x1470] sm:$0xff] }
 0x23a   : > { %v7357_v22 = vpop.f32.mrf.mxu0  ;;  %v7359_v23 = vpop.f32.mrf.mxu1  ;;  %3223 = vmatprep.subr.mxu0 %v1280_v14  ;;  %3330 = vmatprep.subr.mxu1 %v1282_v16  ;;  %v1088_v14 = vld [vmem:[%s6783_s7 + $0x1368] sm:$0xff]  ;;  %v1090_v16 = vld [vmem:[%s6783_s7 + $0x1378] sm:$0xff]  ;;  %v1087_v17 = vld [vmem:[%s6783_s7 + $0x1360] sm:$0xff] }
 0x23b   : > { %v7363_v28 = vadd.f32 %v2954_v55, %v2848_v19  ;;  %v1089_v55 = vld [vmem:[%s6783_s7 + $0x1370] sm:$0xff]  ;;  %v1056_v19 = vld [vmem:[%s6783_s7 + $0x1268] sm:$0xff] }
 0x23c   : > { %v2853_v35 = vpop.f32.mrf.mxu0  ;;  %v2960_v2 = vpop.f32.mrf.mxu1 }
 0x23d   : > { %v2854_v36 = vadd.f32 %v2853_v35, %v7195_v13  ;;  %3224 = vmatpush2.xpose.msra.mxu0 %v1279_v12  ;;  %3331 = vmatpush2.xpose.msra.mxu1 %v1281_v25  ;;  %v1215_v13 = vld [vmem:[%s6783_s7 + $0x1760] sm:$0xff]  ;;  %v1058_v12 = vld [vmem:[%s6783_s7 + $0x1278] sm:$0xff] }
 0x23e   : > { %3225 = vmatprep.subr.mxu0 %v1248_v29  ;;  %3332 = vmatprep.subr.mxu1 %v1250_v33  ;;  %v1055_v25 = vld [vmem:[%s6783_s7 + $0x1260] sm:$0xff]  ;;  %v1057_v29 = vld [vmem:[%s6783_s7 + $0x1270] sm:$0xff]  ;;  %v1024_v33 = vld [vmem:[%s6783_s7 + $0x1168] sm:$0xff] }
 0x23f   : > { %v7370_v42 = vadd.f32 %v2960_v2, %v2854_v36  ;;  %v1026_v35 = vld [vmem:[%s6783_s7 + $0x1178] sm:$0xff]  ;;  %v1023_v2 = vld [vmem:[%s6783_s7 + $0x1160] sm:$0xff]  ;;  %v1025_v36 = vld [vmem:[%s6783_s7 + $0x1170] sm:$0xff] }
 0x241   : > { %3226 = vmatpush2.xpose.msra.mxu0 %v1247_v24  ;;  %3333 = vmatpush2.xpose.msra.mxu1 %v1249_v37  ;;  %v992_v24 = vld [vmem:[%s6783_s7 + $0x1068] sm:$0xff]  ;;  %v994_v37 = vld [vmem:[%s6783_s7 + $0x1078] sm:$0xff] }
 0x242   : > { %3227 = vmatprep.subr.mxu0 %v1216_v43  ;;  %3334 = vmatprep.subr.mxu1 %v1218_v46  ;;  %v991_v43 = vld [vmem:[%s6783_s7 + $0x1060] sm:$0xff]  ;;  %v993_v46 = vld [vmem:[%s6783_s7 + $0x1070] sm:$0xff] }
 0x245   : > { %3228 = vmatpush2.xpose.msra.mxu0 %v1215_v13  ;;  %3335 = vmatpush2.xpose.msra.mxu1 %v1217_v47  ;;  %v964_v13 = vld [vmem:[%s6783_s7 + $0xf88] sm:$0xff]  ;;  %v966_v47 = vld [vmem:[%s6783_s7 + $0xf98] sm:$0xff] }
 0x246   : > { %3229 = vmatprep.subr.mxu0 %v1184_v48  ;;  %3336 = vmatprep.subr.mxu1 %v1186_v34  ;;  %v255_v48 = vld [vmem:[#allocation2 + $0x60] sm:$0xff]  ;;  %v257_v34 = vld [vmem:[#allocation2 + $0x70] sm:$0xff] }
 0x249   : > { %3230 = vmatpush2.xpose.msra.mxu0 %v1183_v49  ;;  %3337 = vmatpush2.xpose.msra.mxu1 %v1185_v56  ;;  %v963_v49 = vld [vmem:[%s6783_s7 + $0xf80] sm:$0xff]  ;;  %v965_v56 = vld [vmem:[%s6783_s7 + $0xf90] sm:$0xff] }
 0x24a   : > { %3231 = vmatprep.subr.mxu0 %v1152_v57  ;;  %3338 = vmatprep.subr.mxu1 %v1154_v59  ;;  %v288_v57 = vld [vmem:[#allocation2 + $0x168] sm:$0xff] }
 0x24b   : > { %v932_v59 = vld [vmem:[%s6783_s7 + $0xe88] sm:$0xff] }
 0x24d   : > { %3232 = vmatpush2.xpose.msra.mxu0 %v1151_v60  ;;  %3339 = vmatpush2.xpose.msra.mxu1 %v1153_v63  ;;  %v934_v60 = vld [vmem:[%s6783_s7 + $0xe98] sm:$0xff] }
 0x24e   : > { %3233 = vmatprep.subr.mxu0 %v1120_v44  ;;  %3340 = vmatprep.subr.mxu1 %v1122_v4  ;;  %v290_v63 = vld [vmem:[#allocation2 + $0x178] sm:$0xff]  ;;  %v287_v44 = vld [vmem:[#allocation2 + $0x160] sm:$0xff]  ;;  %v289_v4 = vld [vmem:[#allocation2 + $0x170] sm:$0xff] }
 0x251   : > { %3234 = vmatpush2.xpose.msra.mxu0 %v1119_v7  ;;  %3341 = vmatpush2.xpose.msra.mxu1 %v1121_v10  ;;  %v931_v7 = vld [vmem:[%s6783_s7 + $0xe80] sm:$0xff]  ;;  %v933_v10 = vld [vmem:[%s6783_s7 + $0xe90] sm:$0xff] }
 0x252   : > { %3235 = vmatprep.subr.mxu0 %v1088_v14  ;;  %3342 = vmatprep.subr.mxu1 %v1090_v16  ;;  %v320_v14 = vld [vmem:[#allocation2 + $0x268] sm:$0xff] }
 0x253   : > { %v900_v16 = vld [vmem:[%s6783_s7 + $0xd88] sm:$0xff] }
 0x255   : > { %3236 = vmatpush2.xpose.msra.mxu0 %v1087_v17  ;;  %3343 = vmatpush2.xpose.msra.mxu1 %v1089_v55  ;;  %v902_v17 = vld [vmem:[%s6783_s7 + $0xd98] sm:$0xff] }
 0x256   : > { %3237 = vmatprep.subr.mxu0 %v1056_v19  ;;  %3344 = vmatprep.subr.mxu1 %v1058_v12  ;;  %v322_v55 = vld [vmem:[#allocation2 + $0x278] sm:$0xff]  ;;  %v319_v19 = vld [vmem:[#allocation2 + $0x260] sm:$0xff]  ;;  %v321_v12 = vld [vmem:[#allocation2 + $0x270] sm:$0xff] }
 0x259   : > { %3238 = vmatpush2.xpose.msra.mxu0 %v1055_v25  ;;  %3345 = vmatpush2.xpose.msra.mxu1 %v1057_v29  ;;  %v899_v25 = vld [vmem:[%s6783_s7 + $0xd80] sm:$0xff]  ;;  %v901_v29 = vld [vmem:[%s6783_s7 + $0xd90] sm:$0xff] }
 0x25a   : > { %3239 = vmatprep.subr.mxu0 %v1024_v33  ;;  %3346 = vmatprep.subr.mxu1 %v1026_v35  ;;  %v352_v33 = vld [vmem:[#allocation2 + $0x368] sm:$0xff] }
 0x25b   : > { %v868_v35 = vld [vmem:[%s6783_s7 + $0xc88] sm:$0xff] }
 0x25d   : > { %3240 = vmatpush2.xpose.msra.mxu0 %v1023_v2  ;;  %3347 = vmatpush2.xpose.msra.mxu1 %v1025_v36  ;;  %v870_v2 = vld [vmem:[%s6783_s7 + $0xc98] sm:$0xff] }
 0x25e   : > { %3241 = vmatprep.subr.mxu0 %v992_v24  ;;  %3348 = vmatprep.subr.mxu1 %v994_v37  ;;  %v354_v36 = vld [vmem:[#allocation2 + $0x378] sm:$0xff]  ;;  %v351_v24 = vld [vmem:[#allocation2 + $0x360] sm:$0xff]  ;;  %v353_v37 = vld [vmem:[#allocation2 + $0x370] sm:$0xff] }
 0x261   : > { %3242 = vmatpush2.xpose.msra.mxu0 %v991_v43  ;;  %3349 = vmatpush2.xpose.msra.mxu1 %v993_v46  ;;  %v867_v43 = vld [vmem:[%s6783_s7 + $0xc80] sm:$0xff]  ;;  %v869_v46 = vld [vmem:[%s6783_s7 + $0xc90] sm:$0xff] }
 0x262   : > { %3393 = vmatprep.subr.mxu0 %v964_v13  ;;  %3500 = vmatprep.subr.mxu1 %v966_v47  ;;  %v384_v13 = vld [vmem:[#allocation2 + $0x468] sm:$0xff] }
 0x263   : > { %v836_v47 = vld [vmem:[%s6783_s7 + $0xb88] sm:$0xff] }
 0x264   : > { %3244 = vmatmul.mubr.f32.vlgmr.msra.gmra.mxu0 %v255_v48  ;;  %3351 = vmatmul.mubr.f32.vlgmr.msra.gmra.mxu1 %v257_v34  ;;  %v838_v48 = vld [vmem:[%s6783_s7 + $0xb98] sm:$0xff] }
 0x265   : > { %3394 = vmatpush1.xpose.msra.mxu0 %v963_v49  ;;  %3501 = vmatpush1.xpose.msra.mxu1 %v965_v56  ;;  %v386_v34 = vld [vmem:[#allocation2 + $0x478] sm:$0xff]  ;;  %v383_v49 = vld [vmem:[#allocation2 + $0x460] sm:$0xff]  ;;  %v385_v56 = vld [vmem:[#allocation2 + $0x470] sm:$0xff] }
 0x266   : > { %3249 = vmatprep.mubr.f32.mxu0 %v288_v57  ;;  %3395 = vmatprep.subr.mxu0 %v932_v59  ;;  %v835_v57 = vld [vmem:[%s6783_s7 + $0xb80] sm:$0xff]  ;;  %v837_v59 = vld [vmem:[%s6783_s7 + $0xb90] sm:$0xff] }
 0x267   : > { %3502 = vmatprep.subr.mxu1 %v934_v60  ;;  %3356 = vmatprep.mubr.f32.mxu1 %v290_v63  ;;  %v416_v60 = vld [vmem:[#allocation2 + $0x568] sm:$0xff] }
 0x268   : > { %3250 = vmatmul.mubr.f32.gmra.mxu0 %v287_v44  ;;  %3357 = vmatmul.mubr.f32.gmra.mxu1 %v289_v4  ;;  %v804_v63 = vld [vmem:[%s6783_s7 + $0xa88] sm:$0xff]  ;;  %v806_v44 = vld [vmem:[%s6783_s7 + $0xa98] sm:$0xff] }
 0x269   : > { %3396 = vmatpush1.xpose.msra.mxu0 %v931_v7  ;;  %3503 = vmatpush1.xpose.msra.mxu1 %v933_v10  ;;  %v418_v4 = vld [vmem:[#allocation2 + $0x578] sm:$0xff]  ;;  %v415_v7 = vld [vmem:[#allocation2 + $0x560] sm:$0xff]  ;;  %v417_v10 = vld [vmem:[#allocation2 + $0x570] sm:$0xff] }
 0x26a   : > { %3255 = vmatprep.mubr.f32.mxu0 %v320_v14  ;;  %3397 = vmatprep.subr.mxu0 %v900_v16  ;;  %v803_v14 = vld [vmem:[%s6783_s7 + $0xa80] sm:$0xff]  ;;  %v805_v16 = vld [vmem:[%s6783_s7 + $0xa90] sm:$0xff] }
 0x26b   : > { %3504 = vmatprep.subr.mxu1 %v902_v17  ;;  %3362 = vmatprep.mubr.f32.mxu1 %v322_v55  ;;  %v448_v17 = vld [vmem:[#allocation2 + $0x668] sm:$0xff] }
 0x26c   : > { %3256 = vmatmul.mubr.f32.gmra.mxu0 %v319_v19  ;;  %3363 = vmatmul.mubr.f32.gmra.mxu1 %v321_v12  ;;  %v772_v55 = vld [vmem:[%s6783_s7 + $0x988] sm:$0xff]  ;;  %v774_v19 = vld [vmem:[%s6783_s7 + $0x998] sm:$0xff] }
 0x26d   : > { %3398 = vmatpush1.xpose.msra.mxu0 %v899_v25  ;;  %3505 = vmatpush1.xpose.msra.mxu1 %v901_v29  ;;  %v450_v12 = vld [vmem:[#allocation2 + $0x678] sm:$0xff]  ;;  %v447_v25 = vld [vmem:[#allocation2 + $0x660] sm:$0xff]  ;;  %v449_v29 = vld [vmem:[#allocation2 + $0x670] sm:$0xff] }
 0x26e   : > { %3261 = vmatprep.mubr.f32.mxu0 %v352_v33  ;;  %3399 = vmatprep.subr.mxu0 %v868_v35  ;;  %v771_v33 = vld [vmem:[%s6783_s7 + $0x980] sm:$0xff]  ;;  %v773_v35 = vld [vmem:[%s6783_s7 + $0x990] sm:$0xff] }
 0x26f   : > { %3506 = vmatprep.subr.mxu1 %v870_v2  ;;  %3368 = vmatprep.mubr.f32.mxu1 %v354_v36  ;;  %v740_v2 = vld [vmem:[%s6783_s7 + $0x888] sm:$0xff]  ;;  %v742_v36 = vld [vmem:[%s6783_s7 + $0x898] sm:$0xff] }
 0x270   : > { %3262 = vmatmul.mubr.f32.gmra.mxu0 %v351_v24  ;;  %3369 = vmatmul.mubr.f32.gmra.mxu1 %v353_v37  ;;  %v260_v24 = vld [vmem:[#allocation2 + $0x88] sm:$0xff]  ;;  %v262_v37 = vld [vmem:[#allocation2 + $0x98] sm:$0xff] }
 0x271   : > { %3400 = vmatpush1.xpose.msra.mxu0 %v867_v43  ;;  %3507 = vmatpush1.xpose.msra.mxu1 %v869_v46  ;;  %v739_v43 = vld [vmem:[%s6783_s7 + $0x880] sm:$0xff]  ;;  %v741_v46 = vld [vmem:[%s6783_s7 + $0x890] sm:$0xff] }
 0x272   : > { %3267 = vmatprep.mubr.f32.mxu0 %v384_v13  ;;  %3401 = vmatprep.subr.mxu0 %v836_v47  ;;  %v708_v13 = vld [vmem:[%s6783_s7 + $0x788] sm:$0xff]  ;;  %v710_v47 = vld [vmem:[%s6783_s7 + $0x798] sm:$0xff] }
 0x273   : > { %3508 = vmatprep.subr.mxu1 %v838_v48  ;;  %3374 = vmatprep.mubr.f32.mxu1 %v386_v34  ;;  %v707_v48 = vld [vmem:[%s6783_s7 + $0x780] sm:$0xff]  ;;  %v709_v34 = vld [vmem:[%s6783_s7 + $0x790] sm:$0xff] }
 0x274   : > { %3268 = vmatmul.mubr.f32.gmra.mxu0 %v383_v49  ;;  %3375 = vmatmul.mubr.f32.gmra.mxu1 %v385_v56  ;;  %v676_v49 = vld [vmem:[%s6783_s7 + $0x688] sm:$0xff]  ;;  %v678_v56 = vld [vmem:[%s6783_s7 + $0x698] sm:$0xff] }
 0x275   : > { %3402 = vmatpush1.xpose.msra.mxu0 %v835_v57  ;;  %3509 = vmatpush1.xpose.msra.mxu1 %v837_v59  ;;  %v675_v57 = vld [vmem:[%s6783_s7 + $0x680] sm:$0xff]  ;;  %v677_v59 = vld [vmem:[%s6783_s7 + $0x690] sm:$0xff] }
 0x276   : > { %3273 = vmatprep.mubr.f32.mxu0 %v416_v60  ;;  %3403 = vmatprep.subr.mxu0 %v804_v63  ;;  %v644_v60 = vld [vmem:[%s6783_s7 + $0x588] sm:$0xff]  ;;  %v646_v63 = vld [vmem:[%s6783_s7 + $0x598] sm:$0xff] }
 0x277   : > { %3510 = vmatprep.subr.mxu1 %v806_v44  ;;  %3380 = vmatprep.mubr.f32.mxu1 %v418_v4  ;;  %v643_v44 = vld [vmem:[%s6783_s7 + $0x580] sm:$0xff]  ;;  %v645_v4 = vld [vmem:[%s6783_s7 + $0x590] sm:$0xff] }
 0x278   : > { %3274 = vmatmul.mubr.f32.gmra.mxu0 %v415_v7  ;;  %3381 = vmatmul.mubr.f32.gmra.mxu1 %v417_v10  ;;  %v612_v7 = vld [vmem:[%s6783_s7 + $0x488] sm:$0xff]  ;;  %v614_v10 = vld [vmem:[%s6783_s7 + $0x498] sm:$0xff] }
 0x279   : > { %3404 = vmatpush1.xpose.msra.mxu0 %v803_v14  ;;  %3511 = vmatpush1.xpose.msra.mxu1 %v805_v16  ;;  %v611_v14 = vld [vmem:[%s6783_s7 + $0x480] sm:$0xff]  ;;  %v613_v16 = vld [vmem:[%s6783_s7 + $0x490] sm:$0xff] }
 0x27a   : > { %3279 = vmatprep.mubr.f32.mxu0 %v448_v17  ;;  %3405 = vmatprep.subr.mxu0 %v772_v55  ;;  %v580_v17 = vld [vmem:[%s6783_s7 + $0x388] sm:$0xff]  ;;  %v582_v55 = vld [vmem:[%s6783_s7 + $0x398] sm:$0xff] }
 0x27b   : > { %3512 = vmatprep.subr.mxu1 %v774_v19  ;;  %3386 = vmatprep.mubr.f32.mxu1 %v450_v12  ;;  %v579_v19 = vld [vmem:[%s6783_s7 + $0x380] sm:$0xff]  ;;  %v581_v12 = vld [vmem:[%s6783_s7 + $0x390] sm:$0xff] }
 0x27c   : > { %3280 = vmatmul.mubr.f32.gmra.mxu0 %v447_v25  ;;  %3387 = vmatmul.mubr.f32.gmra.mxu1 %v449_v29  ;;  %v548_v25 = vld [vmem:[%s6783_s7 + $0x288] sm:$0xff]  ;;  %v550_v29 = vld [vmem:[%s6783_s7 + $0x298] sm:$0xff] }
 0x27d   : > { %3406 = vmatpush1.xpose.msra.mxu0 %v771_v33  ;;  %3513 = vmatpush1.xpose.msra.mxu1 %v773_v35  ;;  %v547_v33 = vld [vmem:[%s6783_s7 + $0x280] sm:$0xff]  ;;  %v549_v35 = vld [vmem:[%s6783_s7 + $0x290] sm:$0xff] }
 0x27e   : > { %3407 = vmatprep.subr.mxu0 %v740_v2  ;;  %3514 = vmatprep.subr.mxu1 %v742_v36  ;;  %v516_v2 = vld [vmem:[%s6783_s7 + $0x188] sm:$0xff]  ;;  %v518_v36 = vld [vmem:[%s6783_s7 + $0x198] sm:$0xff] }
 0x27f   : > { %3457 = vmatprep.mubr.f32.mxu0 %v260_v24  ;;  %3564 = vmatprep.mubr.f32.mxu1 %v262_v37  ;;  %v515_v24 = vld [vmem:[%s6783_s7 + $0x180] sm:$0xff]  ;;  %v517_v37 = vld [vmem:[%s6783_s7 + $0x190] sm:$0xff] }
 0x281   : > { %3408 = vmatpush1.xpose.msra.mxu0 %v739_v43  ;;  %3515 = vmatpush1.xpose.msra.mxu1 %v741_v46  ;;  %v484_v43 = vld [vmem:[%s6783_s7 + $0x88] sm:$0xff]  ;;  %v486_v46 = vld [vmem:[%s6783_s7 + $0x98] sm:$0xff] }
 0x282   : > { %3409 = vmatprep.subr.mxu0 %v708_v13  ;;  %3516 = vmatprep.subr.mxu1 %v710_v47  ;;  %v483_v13 = vld [vmem:[%s6783_s7 + $0x80] sm:$0xff]  ;;  %v485_v47 = vld [vmem:[%s6783_s7 + $0x90] sm:$0xff] }
 0x285   : > { %3410 = vmatpush1.xpose.msra.mxu0 %v707_v48  ;;  %3517 = vmatpush1.xpose.msra.mxu1 %v709_v34  ;;  %v1476_v48 = vld [vmem:[%s6783_s7 + $0x1f88] sm:$0xff]  ;;  %v1478_v34 = vld [vmem:[%s6783_s7 + $0x1f98] sm:$0xff] }
 0x286   : > { %3411 = vmatprep.subr.mxu0 %v676_v49  ;;  %3518 = vmatprep.subr.mxu1 %v678_v56  ;;  %v7470_v49 = vpop.f32.mrf.mxu0  ;;  %v7472_v56 = vpop.f32.mrf.mxu1 }
 0x289   : > { %3412 = vmatpush1.xpose.msra.mxu0 %v675_v57  ;;  %3519 = vmatpush1.xpose.msra.mxu1 %v677_v59  ;;  %v1475_v57 = vld [vmem:[%s6783_s7 + $0x1f80] sm:$0xff]  ;;  %v1477_v59 = vld [vmem:[%s6783_s7 + $0x1f90] sm:$0xff] }
 0x28a   : > { %3413 = vmatprep.subr.mxu0 %v644_v60  ;;  %3520 = vmatprep.subr.mxu1 %v646_v63  ;;  %v1444_v60 = vld [vmem:[%s6783_s7 + $0x1e88] sm:$0xff]  ;;  %v1446_v63 = vld [vmem:[%s6783_s7 + $0x1e98] sm:$0xff] }
 0x28d   : > { %3414 = vmatpush1.xpose.msra.mxu0 %v643_v44  ;;  %3521 = vmatpush1.xpose.msra.mxu1 %v645_v4 }
 0x28e   : > { %3415 = vmatprep.subr.mxu0 %v612_v7  ;;  %3522 = vmatprep.subr.mxu1 %v614_v10 }
 0x291   : > { %3416 = vmatpush1.xpose.msra.mxu0 %v611_v14  ;;  %3523 = vmatpush1.xpose.msra.mxu1 %v613_v16  ;;  %v1443_v16 = vld [vmem:[%s6783_s7 + $0x1e80] sm:$0xff] }
 0x292   : > { %3417 = vmatprep.subr.mxu0 %v580_v17  ;;  %3524 = vmatprep.subr.mxu1 %v582_v55  ;;  %v1445_v17 = vld [vmem:[%s6783_s7 + $0x1e90] sm:$0xff] }
 0x295   : > { %3418 = vmatpush1.xpose.msra.mxu0 %v579_v19  ;;  %3525 = vmatpush1.xpose.msra.mxu1 %v581_v12  ;;  %v1412_v19 = vld [vmem:[%s6783_s7 + $0x1d88] sm:$0xff]  ;;  %v1414_v12 = vld [vmem:[%s6783_s7 + $0x1d98] sm:$0xff] }
 0x296   : > { %3419 = vmatprep.subr.mxu0 %v548_v25  ;;  %3526 = vmatprep.subr.mxu1 %v550_v29 }
 0x299   : > { %3420 = vmatpush1.xpose.msra.mxu0 %v547_v33  ;;  %3527 = vmatpush1.xpose.msra.mxu1 %v549_v35 }
 0x29a   : > { %3421 = vmatprep.subr.mxu0 %v516_v2  ;;  %3528 = vmatprep.subr.mxu1 %v518_v36  ;;  %v1411_v2 = vld [vmem:[%s6783_s7 + $0x1d80] sm:$0xff]  ;;  %v1413_v36 = vld [vmem:[%s6783_s7 + $0x1d90] sm:$0xff] }
 0x29d   : > { %3422 = vmatpush1.xpose.msra.mxu0 %v515_v24  ;;  %3529 = vmatpush1.xpose.msra.mxu1 %v517_v37  ;;  %v1380_v37 = vld [vmem:[%s6783_s7 + $0x1c88] sm:$0xff] }
 0x29e   : > { %3423 = vmatprep.subr.mxu0 %v484_v43  ;;  %3530 = vmatprep.subr.mxu1 %v486_v46  ;;  %v1382_v43 = vld [vmem:[%s6783_s7 + $0x1c98] sm:$0xff] }
 0x2a1   : > { %3424 = vmatpush1.xpose.msra.mxu0 %v483_v13  ;;  %3531 = vmatpush1.xpose.msra.mxu1 %v485_v47 }
 0x2a2   : > { %3425 = vmatprep.subr.mxu0 %v1476_v48  ;;  %3532 = vmatprep.subr.mxu1 %v1478_v34  ;;  %v1379_v34 = vld [vmem:[%s6783_s7 + $0x1c80] sm:$0xff] }
 0x2a4   : > { %v3031_v44 = vpop.f32.mrf.mxu0  ;;  %v3138_v4 = vpop.f32.mrf.mxu1 }
 0x2a5   : > { %v3032_v7 = vadd.f32 %v3031_v44, %v7308_v18  ;;  %3426 = vmatpush2.xpose.msra.mxu0 %v1475_v57  ;;  %3533 = vmatpush2.xpose.msra.mxu1 %v1477_v59  ;;  %v1381_v57 = vld [vmem:[%s6783_s7 + $0x1c90] sm:$0xff] }
 0x2a6   : > { %v7479_v10 = vpop.f32.mrf.mxu0  ;;  %v7481_v14 = vpop.f32.mrf.mxu1  ;;  %3427 = vmatprep.subr.mxu0 %v1444_v60  ;;  %3534 = vmatprep.subr.mxu1 %v1446_v63  ;;  %v1348_v60 = vld [vmem:[%s6783_s7 + $0x1b88] sm:$0xff]  ;;  %v1350_v63 = vld [vmem:[%s6783_s7 + $0x1b98] sm:$0xff] }
 0x2a7   : > { %v7485_v55 = vadd.f32 %v3138_v4, %v3032_v7 }
 0x2a8   : > { %v3037_v25 = vpop.f32.mrf.mxu0  ;;  %v3144_v18 = vpop.f32.mrf.mxu1 }
 0x2a9   : > { %v3038_v29 = vadd.f32 %v3037_v25, %v7319_v32  ;;  %3428 = vmatpush2.xpose.msra.mxu0 %v1443_v16  ;;  %3535 = vmatpush2.xpose.msra.mxu1 %v1445_v17  ;;  %v1347_v17 = vld [vmem:[%s6783_s7 + $0x1b80] sm:$0xff]  ;;  %v1316_v25 = vld [vmem:[%s6783_s7 + $0x1a88] sm:$0xff] }
 0x2aa   : > { %v7490_v33 = vpop.f32.mrf.mxu0  ;;  %v7492_v35 = vpop.f32.mrf.mxu1  ;;  %3429 = vmatprep.subr.mxu0 %v1412_v19  ;;  %3536 = vmatprep.subr.mxu1 %v1414_v12  ;;  %v1349_v19 = vld [vmem:[%s6783_s7 + $0x1b90] sm:$0xff] }
 0x2ab   : > { %v7496_v24 = vadd.f32 %v3144_v18, %v3038_v29  ;;  %v1318_v18 = vld [vmem:[%s6783_s7 + $0x1a98] sm:$0xff] }
 0x2ac   : > { %v3043_v46 = vpop.f32.mrf.mxu0  ;;  %v3150_v32 = vpop.f32.mrf.mxu1 }
 0x2ad   : > { %v3044_v13 = vadd.f32 %v3043_v46, %v7330_v45  ;;  %3430 = vmatpush2.xpose.msra.mxu0 %v1411_v2  ;;  %3537 = vmatpush2.xpose.msra.mxu1 %v1413_v36  ;;  %v1317_v46 = vld [vmem:[%s6783_s7 + $0x1a90] sm:$0xff] }
 0x2ae   : > { %v7501_v47 = vpop.f32.mrf.mxu0  ;;  %v7503_v48 = vpop.f32.mrf.mxu1  ;;  %3431 = vmatprep.subr.mxu0 %v1380_v37  ;;  %3538 = vmatprep.subr.mxu1 %v1382_v43  ;;  %v1315_v43 = vld [vmem:[%s6783_s7 + $0x1a80] sm:$0xff] }
 0x2af   : > { %v7507_v59 = vadd.f32 %v3150_v32, %v3044_v13  ;;  %v1284_v13 = vld [vmem:[%s6783_s7 + $0x1988] sm:$0xff] }
 0x2b0   : > { %v3049_v44 = vpop.f32.mrf.mxu0  ;;  %v3156_v45 = vpop.f32.mrf.mxu1 }
 0x2b1   : > { %v3050_v4 = vadd.f32 %v3049_v44, %v7341_v58  ;;  %3432 = vmatpush2.xpose.msra.mxu0 %v1379_v34  ;;  %3539 = vmatpush2.xpose.msra.mxu1 %v1381_v57  ;;  %v1286_v34 = vld [vmem:[%s6783_s7 + $0x1998] sm:$0xff] }
 0x2b2   : > { %v7512_v7 = vpop.f32.mrf.mxu0  ;;  %v7514_v16 = vpop.f32.mrf.mxu1  ;;  %3433 = vmatprep.subr.mxu0 %v1348_v60  ;;  %3540 = vmatprep.subr.mxu1 %v1350_v63 }
 0x2b3   : > { %v7518_v12 = vadd.f32 %v3156_v45, %v3050_v4  ;;  %v1283_v45 = vld [vmem:[%s6783_s7 + $0x1980] sm:$0xff]  ;;  %v1285_v4 = vld [vmem:[%s6783_s7 + $0x1990] sm:$0xff] }
 0x2b4   : > { %v3055_v29 = vpop.f32.mrf.mxu0  ;;  %v3162_v58 = vpop.f32.mrf.mxu1 }
 0x2b5   : > { %v3056_v2 = vadd.f32 %v3055_v29, %v7352_v11  ;;  %3434 = vmatpush2.xpose.msra.mxu0 %v1347_v17  ;;  %3541 = vmatpush2.xpose.msra.mxu1 %v1349_v19  ;;  %v1252_v19 = vld [vmem:[%s6783_s7 + $0x1888] sm:$0xff] }
 0x2b6   : > { %v7523_v36 = vpop.f32.mrf.mxu0  ;;  %v7525_v37 = vpop.f32.mrf.mxu1  ;;  %3435 = vmatprep.subr.mxu0 %v1316_v25  ;;  %3542 = vmatprep.subr.mxu1 %v1318_v18  ;;  %v1254_v25 = vld [vmem:[%s6783_s7 + $0x1898] sm:$0xff] }
 0x2b7   : > { %9812 = vst [vmem:[#allocation13_spill] sm:$0xff] %v7523_v36  ;;  %9813 = vst [vmem:[#allocation14_spill] sm:$0xff] %v7525_v37  ;;  %v7529_v32 = vadd.f32 %v3162_v58, %v3056_v2  ;;  %v1251_v58 = vld [vmem:[%s6783_s7 + $0x1880] sm:$0xff]  ;;  %v1253_v2 = vld [vmem:[%s6783_s7 + $0x1890] sm:$0xff] }
 0x2b8   : > { %v3061_v57 = vpop.f32.mrf.mxu0  ;;  %v3168_v11 = vpop.f32.mrf.mxu1 }
 0x2b9   : > { %v3062_v60 = vadd.f32 %v3061_v57, %v7363_v28  ;;  %3436 = vmatpush2.xpose.msra.mxu0 %v1315_v43  ;;  %3543 = vmatpush2.xpose.msra.mxu1 %v1317_v46  ;;  %v1220_v46 = vld [vmem:[%s6783_s7 + $0x1788] sm:$0xff] }
 0x2ba   : > { %v7534_v63 = vpop.f32.mrf.mxu0  ;;  %v7536_v44 = vpop.f32.mrf.mxu1  ;;  %3437 = vmatprep.subr.mxu0 %v1284_v13  ;;  %3544 = vmatprep.subr.mxu1 %v1286_v34  ;;  %v1222_v13 = vld [vmem:[%s6783_s7 + $0x1798] sm:$0xff]  ;;  %v1221_v34 = vld [vmem:[%s6783_s7 + $0x1790] sm:$0xff]  ;;  %v1188_v57 = vld [vmem:[%s6783_s7 + $0x1688] sm:$0xff] }
 0x2bb   : > { %9814 = vst [vmem:[#allocation15_spill] sm:$0xff] %v7534_v63  ;;  %9815 = vst [vmem:[#allocation16_spill] sm:$0xff] %v7536_v44  ;;  %v7540_v17 = vadd.f32 %v3168_v11, %v3062_v60  ;;  %v1190_v11 = vld [vmem:[%s6783_s7 + $0x1698] sm:$0xff]  ;;  %v1187_v60 = vld [vmem:[%s6783_s7 + $0x1680] sm:$0xff] }
 0x2bc   : > { %v3067_v18 = vpop.f32.mrf.mxu0  ;;  %v3174_v28 = vpop.f32.mrf.mxu1  ;;  %v1386_v44 = vld [vmem:[%s6783_s7 + $0x1cb8] sm:$0xff] }
 0x2bd   : > { %v3068_v29 = vadd.f32 %v3067_v18, %v7370_v42  ;;  %3438 = vmatpush2.xpose.msra.mxu0 %v1283_v45  ;;  %3545 = vmatpush2.xpose.msra.mxu1 %v1285_v4  ;;  %v1219_v42 = vld [vmem:[%s6783_s7 + $0x1780] sm:$0xff]  ;;  %v1189_v45 = vld [vmem:[%s6783_s7 + $0x1690] sm:$0xff]  ;;  %v1156_v4 = vld [vmem:[%s6783_s7 + $0x1588] sm:$0xff] }
 0x2be   : > { %3439 = vmatprep.subr.mxu0 %v1252_v19  ;;  %3546 = vmatprep.subr.mxu1 %v1254_v25  ;;  %v1158_v19 = vld [vmem:[%s6783_s7 + $0x1598] sm:$0xff]  ;;  %v1155_v25 = vld [vmem:[%s6783_s7 + $0x1580] sm:$0xff]  ;;  %v1157_v18 = vld [vmem:[%s6783_s7 + $0x1590] sm:$0xff] }
 0x2bf   : > { %v7547_v43 = vadd.f32 %v3174_v28, %v3068_v29  ;;  %v1124_v28 = vld [vmem:[%s6783_s7 + $0x1488] sm:$0xff]  ;;  %v1126_v29 = vld [vmem:[%s6783_s7 + $0x1498] sm:$0xff] }
 0x2c1   : > { %3440 = vmatpush2.xpose.msra.mxu0 %v1251_v58  ;;  %3547 = vmatpush2.xpose.msra.mxu1 %v1253_v2  ;;  %v1123_v58 = vld [vmem:[%s6783_s7 + $0x1480] sm:$0xff]  ;;  %v1125_v2 = vld [vmem:[%s6783_s7 + $0x1490] sm:$0xff] }
 0x2c2   : > { %3441 = vmatprep.subr.mxu0 %v1220_v46  ;;  %3548 = vmatprep.subr.mxu1 %v1222_v13  ;;  %v1092_v46 = vld [vmem:[%s6783_s7 + $0x1388] sm:$0xff]  ;;  %v1094_v13 = vld [vmem:[%s6783_s7 + $0x1398] sm:$0xff] }
 0x2c5   : > { %3442 = vmatpush2.xpose.msra.mxu0 %v1219_v42  ;;  %3549 = vmatpush2.xpose.msra.mxu1 %v1221_v34  ;;  %v1091_v42 = vld [vmem:[%s6783_s7 + $0x1380] sm:$0xff]  ;;  %v1093_v34 = vld [vmem:[%s6783_s7 + $0x1390] sm:$0xff] }
 0x2c6   : > { %3443 = vmatprep.subr.mxu0 %v1188_v57  ;;  %3550 = vmatprep.subr.mxu1 %v1190_v11  ;;  %v1060_v57 = vld [vmem:[%s6783_s7 + $0x1288] sm:$0xff]  ;;  %v1062_v11 = vld [vmem:[%s6783_s7 + $0x1298] sm:$0xff] }
 0x2c9   : > { %3444 = vmatpush2.xpose.msra.mxu0 %v1187_v60  ;;  %3551 = vmatpush2.xpose.msra.mxu1 %v1189_v45  ;;  %v1059_v60 = vld [vmem:[%s6783_s7 + $0x1280] sm:$0xff]  ;;  %v1061_v45 = vld [vmem:[%s6783_s7 + $0x1290] sm:$0xff] }
 0x2ca   : > { %3445 = vmatprep.subr.mxu0 %v1156_v4  ;;  %3552 = vmatprep.subr.mxu1 %v1158_v19  ;;  %v1028_v4 = vld [vmem:[%s6783_s7 + $0x1188] sm:$0xff]  ;;  %v1030_v19 = vld [vmem:[%s6783_s7 + $0x1198] sm:$0xff] }
 0x2cd   : > { %3446 = vmatpush2.xpose.msra.mxu0 %v1155_v25  ;;  %3553 = vmatpush2.xpose.msra.mxu1 %v1157_v18  ;;  %v1027_v25 = vld [vmem:[%s6783_s7 + $0x1180] sm:$0xff]  ;;  %v1029_v18 = vld [vmem:[%s6783_s7 + $0x1190] sm:$0xff] }
 0x2ce   : > { %3447 = vmatprep.subr.mxu0 %v1124_v28  ;;  %3554 = vmatprep.subr.mxu1 %v1126_v29  ;;  %v996_v28 = vld [vmem:[%s6783_s7 + $0x1088] sm:$0xff]  ;;  %v998_v29 = vld [vmem:[%s6783_s7 + $0x1098] sm:$0xff] }
 0x2d1   : > { %3448 = vmatpush2.xpose.msra.mxu0 %v1123_v58  ;;  %3555 = vmatpush2.xpose.msra.mxu1 %v1125_v2  ;;  %v995_v58 = vld [vmem:[%s6783_s7 + $0x1080] sm:$0xff]  ;;  %v997_v2 = vld [vmem:[%s6783_s7 + $0x1090] sm:$0xff] }
 0x2d2   : > { %3449 = vmatprep.subr.mxu0 %v1092_v46  ;;  %3556 = vmatprep.subr.mxu1 %v1094_v13  ;;  %v968_v46 = vld [vmem:[%s6783_s7 + $0xfa8] sm:$0xff]  ;;  %v970_v13 = vld [vmem:[%s6783_s7 + $0xfb8] sm:$0xff] }
 0x2d5   : > { %3450 = vmatpush2.xpose.msra.mxu0 %v1091_v42  ;;  %3557 = vmatpush2.xpose.msra.mxu1 %v1093_v34  ;;  %v259_v42 = vld [vmem:[#allocation2 + $0x80] sm:$0xff]  ;;  %v261_v34 = vld [vmem:[#allocation2 + $0x90] sm:$0xff] }
 0x2d6   : > { %3451 = vmatprep.subr.mxu0 %v1060_v57  ;;  %3558 = vmatprep.subr.mxu1 %v1062_v11  ;;  %v967_v57 = vld [vmem:[%s6783_s7 + $0xfa0] sm:$0xff]  ;;  %v969_v11 = vld [vmem:[%s6783_s7 + $0xfb0] sm:$0xff] }
 0x2d9   : > { %3452 = vmatpush2.xpose.msra.mxu0 %v1059_v60  ;;  %3559 = vmatpush2.xpose.msra.mxu1 %v1061_v45  ;;  %v292_v60 = vld [vmem:[#allocation2 + $0x188] sm:$0xff] }
 0x2da   : > { %3453 = vmatprep.subr.mxu0 %v1028_v4  ;;  %3560 = vmatprep.subr.mxu1 %v1030_v19  ;;  %v936_v45 = vld [vmem:[%s6783_s7 + $0xea8] sm:$0xff]  ;;  %v938_v4 = vld [vmem:[%s6783_s7 + $0xeb8] sm:$0xff] }
 0x2db   : > { %v294_v19 = vld [vmem:[#allocation2 + $0x198] sm:$0xff] }
 0x2dd   : > { %3454 = vmatpush2.xpose.msra.mxu0 %v1027_v25  ;;  %3561 = vmatpush2.xpose.msra.mxu1 %v1029_v18  ;;  %v291_v25 = vld [vmem:[#allocation2 + $0x180] sm:$0xff]  ;;  %v293_v18 = vld [vmem:[#allocation2 + $0x190] sm:$0xff] }
 0x2de   : > { %3455 = vmatprep.subr.mxu0 %v996_v28  ;;  %3562 = vmatprep.subr.mxu1 %v998_v29  ;;  %v935_v28 = vld [vmem:[%s6783_s7 + $0xea0] sm:$0xff]  ;;  %v937_v29 = vld [vmem:[%s6783_s7 + $0xeb0] sm:$0xff] }
 0x2e1   : > { %3456 = vmatpush2.xpose.msra.mxu0 %v995_v58  ;;  %3563 = vmatpush2.xpose.msra.mxu1 %v997_v2  ;;  %v324_v58 = vld [vmem:[#allocation2 + $0x288] sm:$0xff] }
 0x2e2   : > { %3607 = vmatprep.subr.mxu0 %v968_v46  ;;  %3714 = vmatprep.subr.mxu1 %v970_v13  ;;  %v904_v2 = vld [vmem:[%s6783_s7 + $0xda8] sm:$0xff]  ;;  %v906_v46 = vld [vmem:[%s6783_s7 + $0xdb8] sm:$0xff] }
 0x2e3   : > { %v326_v13 = vld [vmem:[#allocation2 + $0x298] sm:$0xff] }
 0x2e4   : > { %3458 = vmatmul.mubr.f32.vlgmr.msra.gmra.mxu0 %v259_v42  ;;  %3565 = vmatmul.mubr.f32.vlgmr.msra.gmra.mxu1 %v261_v34  ;;  %v323_v42 = vld [vmem:[#allocation2 + $0x280] sm:$0xff]  ;;  %v325_v34 = vld [vmem:[#allocation2 + $0x290] sm:$0xff] }
 0x2e5   : > { %3608 = vmatpush1.xpose.msra.mxu0 %v967_v57  ;;  %3715 = vmatpush1.xpose.msra.mxu1 %v969_v11  ;;  %v903_v57 = vld [vmem:[%s6783_s7 + $0xda0] sm:$0xff]  ;;  %v905_v11 = vld [vmem:[%s6783_s7 + $0xdb0] sm:$0xff] }
 0x2e6   : > { %3463 = vmatprep.mubr.f32.mxu0 %v292_v60  ;;  %3609 = vmatprep.subr.mxu0 %v936_v45  ;;  %v356_v60 = vld [vmem:[#allocation2 + $0x388] sm:$0xff] }
 0x2e7   : > { %3716 = vmatprep.subr.mxu1 %v938_v4  ;;  %3570 = vmatprep.mubr.f32.mxu1 %v294_v19  ;;  %v872_v45 = vld [vmem:[%s6783_s7 + $0xca8] sm:$0xff]  ;;  %v874_v4 = vld [vmem:[%s6783_s7 + $0xcb8] sm:$0xff] }
 0x2e8   : > { %3464 = vmatmul.mubr.f32.gmra.mxu0 %v291_v25  ;;  %3571 = vmatmul.mubr.f32.gmra.mxu1 %v293_v18  ;;  %v358_v19 = vld [vmem:[#allocation2 + $0x398] sm:$0xff]  ;;  %v355_v25 = vld [vmem:[#allocation2 + $0x380] sm:$0xff]  ;;  %v357_v18 = vld [vmem:[#allocation2 + $0x390] sm:$0xff] }
 0x2e9   : > { %3610 = vmatpush1.xpose.msra.mxu0 %v935_v28  ;;  %3717 = vmatpush1.xpose.msra.mxu1 %v937_v29  ;;  %v871_v28 = vld [vmem:[%s6783_s7 + $0xca0] sm:$0xff]  ;;  %v873_v29 = vld [vmem:[%s6783_s7 + $0xcb0] sm:$0xff] }
 0x2ea   : > { %3469 = vmatprep.mubr.f32.mxu0 %v324_v58  ;;  %3611 = vmatprep.subr.mxu0 %v904_v2  ;;  %v388_v58 = vld [vmem:[#allocation2 + $0x488] sm:$0xff] }
 0x2eb   : > { %3718 = vmatprep.subr.mxu1 %v906_v46  ;;  %3576 = vmatprep.mubr.f32.mxu1 %v326_v13  ;;  %v840_v2 = vld [vmem:[%s6783_s7 + $0xba8] sm:$0xff]  ;;  %v842_v46 = vld [vmem:[%s6783_s7 + $0xbb8] sm:$0xff] }
 0x2ec   : > { %3470 = vmatmul.mubr.f32.gmra.mxu0 %v323_v42  ;;  %3577 = vmatmul.mubr.f32.gmra.mxu1 %v325_v34  ;;  %v390_v13 = vld [vmem:[#allocation2 + $0x498] sm:$0xff]  ;;  %v387_v42 = vld [vmem:[#allocation2 + $0x480] sm:$0xff]  ;;  %v389_v34 = vld [vmem:[#allocation2 + $0x490] sm:$0xff] }
 0x2ed   : > { %3612 = vmatpush1.xpose.msra.mxu0 %v903_v57  ;;  %3719 = vmatpush1.xpose.msra.mxu1 %v905_v11  ;;  %v839_v57 = vld [vmem:[%s6783_s7 + $0xba0] sm:$0xff]  ;;  %v841_v11 = vld [vmem:[%s6783_s7 + $0xbb0] sm:$0xff] }
 0x2ee   : > { %3475 = vmatprep.mubr.f32.mxu0 %v356_v60  ;;  %3613 = vmatprep.subr.mxu0 %v872_v45  ;;  %v420_v60 = vld [vmem:[#allocation2 + $0x588] sm:$0xff] }
 0x2ef   : > { %3720 = vmatprep.subr.mxu1 %v874_v4  ;;  %3582 = vmatprep.mubr.f32.mxu1 %v358_v19  ;;  %v808_v45 = vld [vmem:[%s6783_s7 + $0xaa8] sm:$0xff]  ;;  %v810_v4 = vld [vmem:[%s6783_s7 + $0xab8] sm:$0xff] }
 0x2f0   : > { %3476 = vmatmul.mubr.f32.gmra.mxu0 %v355_v25  ;;  %3583 = vmatmul.mubr.f32.gmra.mxu1 %v357_v18  ;;  %v422_v19 = vld [vmem:[#allocation2 + $0x598] sm:$0xff]  ;;  %v419_v25 = vld [vmem:[#allocation2 + $0x580] sm:$0xff]  ;;  %v421_v18 = vld [vmem:[#allocation2 + $0x590] sm:$0xff] }
 0x2f1   : > { %3614 = vmatpush1.xpose.msra.mxu0 %v871_v28  ;;  %3721 = vmatpush1.xpose.msra.mxu1 %v873_v29  ;;  %v807_v28 = vld [vmem:[%s6783_s7 + $0xaa0] sm:$0xff]  ;;  %v809_v29 = vld [vmem:[%s6783_s7 + $0xab0] sm:$0xff] }
 0x2f2   : > { %3481 = vmatprep.mubr.f32.mxu0 %v388_v58  ;;  %3615 = vmatprep.subr.mxu0 %v840_v2  ;;  %v452_v58 = vld [vmem:[#allocation2 + $0x688] sm:$0xff] }
 0x2f3   : > { %3722 = vmatprep.subr.mxu1 %v842_v46  ;;  %3588 = vmatprep.mubr.f32.mxu1 %v390_v13  ;;  %v776_v2 = vld [vmem:[%s6783_s7 + $0x9a8] sm:$0xff]  ;;  %v778_v46 = vld [vmem:[%s6783_s7 + $0x9b8] sm:$0xff] }
 0x2f4   : > { %3482 = vmatmul.mubr.f32.gmra.mxu0 %v387_v42  ;;  %3589 = vmatmul.mubr.f32.gmra.mxu1 %v389_v34  ;;  %v454_v13 = vld [vmem:[#allocation2 + $0x698] sm:$0xff]  ;;  %v451_v42 = vld [vmem:[#allocation2 + $0x680] sm:$0xff]  ;;  %v453_v34 = vld [vmem:[#allocation2 + $0x690] sm:$0xff] }
 0x2f5   : > { %3616 = vmatpush1.xpose.msra.mxu0 %v839_v57  ;;  %3723 = vmatpush1.xpose.msra.mxu1 %v841_v11  ;;  %v775_v57 = vld [vmem:[%s6783_s7 + $0x9a0] sm:$0xff]  ;;  %v777_v11 = vld [vmem:[%s6783_s7 + $0x9b0] sm:$0xff] }
 0x2f6   : > { %3487 = vmatprep.mubr.f32.mxu0 %v420_v60  ;;  %3617 = vmatprep.subr.mxu0 %v808_v45  ;;  %v744_v60 = vld [vmem:[%s6783_s7 + $0x8a8] sm:$0xff]  ;;  %v746_v45 = vld [vmem:[%s6783_s7 + $0x8b8] sm:$0xff] }
 0x2f7   : > { %3724 = vmatprep.subr.mxu1 %v810_v4  ;;  %3594 = vmatprep.mubr.f32.mxu1 %v422_v19  ;;  %v264_v4 = vld [vmem:[#allocation2 + $0xa8] sm:$0xff]  ;;  %v266_v19 = vld [vmem:[#allocation2 + $0xb8] sm:$0xff] }
 0x2f8   : > { %3488 = vmatmul.mubr.f32.gmra.mxu0 %v419_v25  ;;  %3595 = vmatmul.mubr.f32.gmra.mxu1 %v421_v18  ;;  %v743_v25 = vld [vmem:[%s6783_s7 + $0x8a0] sm:$0xff]  ;;  %v745_v18 = vld [vmem:[%s6783_s7 + $0x8b0] sm:$0xff] }
 0x2f9   : > { %3618 = vmatpush1.xpose.msra.mxu0 %v807_v28  ;;  %3725 = vmatpush1.xpose.msra.mxu1 %v809_v29  ;;  %v712_v28 = vld [vmem:[%s6783_s7 + $0x7a8] sm:$0xff]  ;;  %v714_v29 = vld [vmem:[%s6783_s7 + $0x7b8] sm:$0xff] }
 0x2fa   : > { %3493 = vmatprep.mubr.f32.mxu0 %v452_v58  ;;  %3619 = vmatprep.subr.mxu0 %v776_v2  ;;  %v711_v58 = vld [vmem:[%s6783_s7 + $0x7a0] sm:$0xff]  ;;  %v713_v2 = vld [vmem:[%s6783_s7 + $0x7b0] sm:$0xff] }
 0x2fb   : > { %3726 = vmatprep.subr.mxu1 %v778_v46  ;;  %3600 = vmatprep.mubr.f32.mxu1 %v454_v13  ;;  %v680_v46 = vld [vmem:[%s6783_s7 + $0x6a8] sm:$0xff]  ;;  %v682_v13 = vld [vmem:[%s6783_s7 + $0x6b8] sm:$0xff] }
 0x2fc   : > { %3494 = vmatmul.mubr.f32.gmra.mxu0 %v451_v42  ;;  %3601 = vmatmul.mubr.f32.gmra.mxu1 %v453_v34  ;;  %v679_v42 = vld [vmem:[%s6783_s7 + $0x6a0] sm:$0xff]  ;;  %v681_v34 = vld [vmem:[%s6783_s7 + $0x6b0] sm:$0xff] }
 0x2fd   : > { %3620 = vmatpush1.xpose.msra.mxu0 %v775_v57  ;;  %3727 = vmatpush1.xpose.msra.mxu1 %v777_v11  ;;  %v648_v57 = vld [vmem:[%s6783_s7 + $0x5a8] sm:$0xff]  ;;  %v650_v11 = vld [vmem:[%s6783_s7 + $0x5b8] sm:$0xff] }
 0x2fe   : > { %3621 = vmatprep.subr.mxu0 %v744_v60  ;;  %3728 = vmatprep.subr.mxu1 %v746_v45  ;;  %v647_v60 = vld [vmem:[%s6783_s7 + $0x5a0] sm:$0xff]  ;;  %v649_v45 = vld [vmem:[%s6783_s7 + $0x5b0] sm:$0xff] }
 0x2ff   : > { %3671 = vmatprep.mubr.f32.mxu0 %v264_v4  ;;  %3778 = vmatprep.mubr.f32.mxu1 %v266_v19  ;;  %v616_v4 = vld [vmem:[%s6783_s7 + $0x4a8] sm:$0xff]  ;;  %v618_v19 = vld [vmem:[%s6783_s7 + $0x4b8] sm:$0xff] }
 0x301   : > { %3622 = vmatpush1.xpose.msra.mxu0 %v743_v25  ;;  %3729 = vmatpush1.xpose.msra.mxu1 %v745_v18  ;;  %v615_v25 = vld [vmem:[%s6783_s7 + $0x4a0] sm:$0xff]  ;;  %v617_v18 = vld [vmem:[%s6783_s7 + $0x4b0] sm:$0xff] }
 0x302   : > { %3623 = vmatprep.subr.mxu0 %v712_v28  ;;  %3730 = vmatprep.subr.mxu1 %v714_v29  ;;  %v584_v28 = vld [vmem:[%s6783_s7 + $0x3a8] sm:$0xff]  ;;  %v586_v29 = vld [vmem:[%s6783_s7 + $0x3b8] sm:$0xff] }
 0x305   : > { %3624 = vmatpush1.xpose.msra.mxu0 %v711_v58  ;;  %3731 = vmatpush1.xpose.msra.mxu1 %v713_v2  ;;  %v583_v58 = vld [vmem:[%s6783_s7 + $0x3a0] sm:$0xff]  ;;  %v585_v2 = vld [vmem:[%s6783_s7 + $0x3b0] sm:$0xff] }
 0x306   : > { %3625 = vmatprep.subr.mxu0 %v680_v46  ;;  %3732 = vmatprep.subr.mxu1 %v682_v13  ;;  %v552_v46 = vld [vmem:[%s6783_s7 + $0x2a8] sm:$0xff]  ;;  %v554_v13 = vld [vmem:[%s6783_s7 + $0x2b8] sm:$0xff] }
 0x309   : > { %3626 = vmatpush1.xpose.msra.mxu0 %v679_v42  ;;  %3733 = vmatpush1.xpose.msra.mxu1 %v681_v34  ;;  %v551_v42 = vld [vmem:[%s6783_s7 + $0x2a0] sm:$0xff]  ;;  %v553_v34 = vld [vmem:[%s6783_s7 + $0x2b0] sm:$0xff] }
 0x30a   : > { %3627 = vmatprep.subr.mxu0 %v648_v57  ;;  %3734 = vmatprep.subr.mxu1 %v650_v11  ;;  %v520_v57 = vld [vmem:[%s6783_s7 + $0x1a8] sm:$0xff]  ;;  %v522_v11 = vld [vmem:[%s6783_s7 + $0x1b8] sm:$0xff] }
 0x30d   : > { %3628 = vmatpush1.xpose.msra.mxu0 %v647_v60  ;;  %3735 = vmatpush1.xpose.msra.mxu1 %v649_v45  ;;  %v519_v60 = vld [vmem:[%s6783_s7 + $0x1a0] sm:$0xff]  ;;  %v521_v45 = vld [vmem:[%s6783_s7 + $0x1b0] sm:$0xff] }
 0x30e   : > { %3629 = vmatprep.subr.mxu0 %v616_v4  ;;  %3736 = vmatprep.subr.mxu1 %v618_v19  ;;  %v488_v4 = vld [vmem:[%s6783_s7 + $0xa8] sm:$0xff]  ;;  %v490_v19 = vld [vmem:[%s6783_s7 + $0xb8] sm:$0xff] }
 0x311   : > { %3630 = vmatpush1.xpose.msra.mxu0 %v615_v25  ;;  %3737 = vmatpush1.xpose.msra.mxu1 %v617_v18  ;;  %v487_v25 = vld [vmem:[%s6783_s7 + $0xa0] sm:$0xff]  ;;  %v489_v18 = vld [vmem:[%s6783_s7 + $0xb0] sm:$0xff] }
 0x312   : > { %3631 = vmatprep.subr.mxu0 %v584_v28  ;;  %3738 = vmatprep.subr.mxu1 %v586_v29  ;;  %v1480_v28 = vld [vmem:[%s6783_s7 + $0x1fa8] sm:$0xff]  ;;  %v1482_v29 = vld [vmem:[%s6783_s7 + $0x1fb8] sm:$0xff] }
 0x315   : > { %3632 = vmatpush1.xpose.msra.mxu0 %v583_v58  ;;  %3739 = vmatpush1.xpose.msra.mxu1 %v585_v2  ;;  %v7647_v58 = vpop.f32.mrf.mxu0  ;;  %v7649_v2 = vpop.f32.mrf.mxu1 }
 0x316   : > { %3633 = vmatprep.subr.mxu0 %v552_v46  ;;  %3740 = vmatprep.subr.mxu1 %v554_v13  ;;  %9816 = vst [vmem:[#allocation17_spill] sm:$0xff] %v7647_v58  ;;  %9817 = vst [vmem:[#allocation18_spill] sm:$0xff] %v7649_v2  ;;  %v1479_v46 = vld [vmem:[%s6783_s7 + $0x1fa0] sm:$0xff]  ;;  %v1481_v13 = vld [vmem:[%s6783_s7 + $0x1fb0] sm:$0xff] }
 0x317   : > { %v1354_v58 = vld [vmem:[%s6783_s7 + $0x1bb8] sm:$0xff] }
 0x319   : > { %3634 = vmatpush1.xpose.msra.mxu0 %v551_v42  ;;  %3741 = vmatpush1.xpose.msra.mxu1 %v553_v34  ;;  %v1448_v42 = vld [vmem:[%s6783_s7 + $0x1ea8] sm:$0xff]  ;;  %v1450_v34 = vld [vmem:[%s6783_s7 + $0x1eb8] sm:$0xff] }
 0x31a   : > { %3635 = vmatprep.subr.mxu0 %v520_v57  ;;  %3742 = vmatprep.subr.mxu1 %v522_v11 }
 0x31d   : > { %3636 = vmatpush1.xpose.msra.mxu0 %v519_v60  ;;  %3743 = vmatpush1.xpose.msra.mxu1 %v521_v45 }
 0x31e   : > { %3637 = vmatprep.subr.mxu0 %v488_v4  ;;  %3744 = vmatprep.subr.mxu1 %v490_v19  ;;  %v1447_v19 = vld [vmem:[%s6783_s7 + $0x1ea0] sm:$0xff] }
 0x321   : > { %3638 = vmatpush1.xpose.msra.mxu0 %v487_v25  ;;  %3745 = vmatpush1.xpose.msra.mxu1 %v489_v18  ;;  %v1449_v25 = vld [vmem:[%s6783_s7 + $0x1eb0] sm:$0xff] }
 0x322   : > { %3639 = vmatprep.subr.mxu0 %v1480_v28  ;;  %3746 = vmatprep.subr.mxu1 %v1482_v29  ;;  %v1416_v28 = vld [vmem:[%s6783_s7 + $0x1da8] sm:$0xff]  ;;  %v1418_v29 = vld [vmem:[%s6783_s7 + $0x1db8] sm:$0xff] }
 0x324   : > { %v3245_v57 = vpop.f32.mrf.mxu0  ;;  %v3352_v11 = vpop.f32.mrf.mxu1 }
 0x325   : > { %v3246_v60 = vadd.f32 %v3245_v57, %v7485_v55  ;;  %3640 = vmatpush2.xpose.msra.mxu0 %v1479_v46  ;;  %3747 = vmatpush2.xpose.msra.mxu1 %v1481_v13  ;;  %v1417_v57 = vld [vmem:[%s6783_s7 + $0x1db0] sm:$0xff] }
 0x326   : > { %v7656_v45 = vpop.f32.mrf.mxu0  ;;  %v7658_v4 = vpop.f32.mrf.mxu1  ;;  %3641 = vmatprep.subr.mxu0 %v1448_v42  ;;  %3748 = vmatprep.subr.mxu1 %v1450_v34  ;;  %v1415_v34 = vld [vmem:[%s6783_s7 + $0x1da0] sm:$0xff] }
 0x327   : > { %v7662_v18 = vadd.f32 %v3352_v11, %v3246_v60  ;;  %v1384_v60 = vld [vmem:[%s6783_s7 + $0x1ca8] sm:$0xff] }
 0x328   : > { %v3251_v2 = vpop.f32.mrf.mxu0  ;;  %v3358_v55 = vpop.f32.mrf.mxu1 }
 0x329   : > { %v3252_v46 = vadd.f32 %v3251_v2, %v7496_v24  ;;  %3642 = vmatpush2.xpose.msra.mxu0 %v1447_v19  ;;  %3749 = vmatpush2.xpose.msra.mxu1 %v1449_v25 }
 0x32a   : > { %v7667_v13 = vpop.f32.mrf.mxu0  ;;  %v7669_v42 = vpop.f32.mrf.mxu1  ;;  %3643 = vmatprep.subr.mxu0 %v1416_v28  ;;  %3750 = vmatprep.subr.mxu1 %v1418_v29  ;;  %v1383_v28 = vld [vmem:[%s6783_s7 + $0x1ca0] sm:$0xff]  ;;  %v1385_v29 = vld [vmem:[%s6783_s7 + $0x1cb0] sm:$0xff] }
 0x32b   : > { %v7673_v11 = vadd.f32 %v3358_v55, %v3252_v46  ;;  %v1352_v46 = vld [vmem:[%s6783_s7 + $0x1ba8] sm:$0xff] }
 0x32c   : > { %v3257_v37 = vpop.f32.mrf.mxu0  ;;  %v3364_v24 = vpop.f32.mrf.mxu1 }
 0x32d   : > { %v3258_v2 = vadd.f32 %v3257_v37, %v7507_v59  ;;  %3644 = vmatpush2.xpose.msra.mxu0 %v1415_v34  ;;  %3751 = vmatpush2.xpose.msra.mxu1 %v1417_v57 }
 0x32e   : > { %v7678_v19 = vpop.f32.mrf.mxu0  ;;  %v7680_v25 = vpop.f32.mrf.mxu1  ;;  %3645 = vmatprep.subr.mxu0 %v1384_v60  ;;  %3752 = vmatprep.subr.mxu1 %v1386_v44  ;;  %v1351_v44 = vld [vmem:[%s6783_s7 + $0x1ba0] sm:$0xff]  ;;  %v1353_v60 = vld [vmem:[%s6783_s7 + $0x1bb0] sm:$0xff] }
 0x32f   : > { %9818 = vst [vmem:[#allocation19_spill] sm:$0xff] %v7680_v25  ;;  %v7684_v55 = vadd.f32 %v3364_v24, %v3258_v2  ;;  %v1320_v2 = vld [vmem:[%s6783_s7 + $0x1aa8] sm:$0xff]  ;;  %v1322_v25 = vld [vmem:[%s6783_s7 + $0x1ab8] sm:$0xff] }
 0x330   : > { %v3263_v63 = vpop.f32.mrf.mxu0  ;;  %v3370_v59 = vpop.f32.mrf.mxu1 }
 0x331   : > { %v3264_v37 = vadd.f32 %v3263_v63, %v7518_v12  ;;  %3646 = vmatpush2.xpose.msra.mxu0 %v1383_v28  ;;  %3753 = vmatpush2.xpose.msra.mxu1 %v1385_v29 }
 0x332   : > { %v7689_v34 = vpop.f32.mrf.mxu0  ;;  %v7691_v57 = vpop.f32.mrf.mxu1  ;;  %3647 = vmatprep.subr.mxu0 %v1352_v46  ;;  %3754 = vmatprep.subr.mxu1 %v1354_v58  ;;  %v1319_v58 = vld [vmem:[%s6783_s7 + $0x1aa0] sm:$0xff]  ;;  %v1321_v46 = vld [vmem:[%s6783_s7 + $0x1ab0] sm:$0xff] }
 0x333   : > { %9819 = vst [vmem:[#allocation20_spill] sm:$0xff] %v7689_v34  ;;  %9820 = vst [vmem:[#allocation21_spill] sm:$0xff] %v7691_v57  ;;  %v7695_v24 = vadd.f32 %v3370_v59, %v3264_v37  ;;  %v1288_v37 = vld [vmem:[%s6783_s7 + $0x19a8] sm:$0xff]  ;;  %v1290_v57 = vld [vmem:[%s6783_s7 + $0x19b8] sm:$0xff] }
 0x334   : > { %v3269_v36 = vpop.f32.mrf.mxu0  ;;  %v3376_v12 = vpop.f32.mrf.mxu1 }
 0x335   : > { %v3270_v63 = vadd.f32 %v3269_v36, %v7529_v32  ;;  %3648 = vmatpush2.xpose.msra.mxu0 %v1351_v44  ;;  %3755 = vmatpush2.xpose.msra.mxu1 %v1353_v60 }
 0x336   : > { %v7700_v28 = vpop.f32.mrf.mxu0  ;;  %v7702_v29 = vpop.f32.mrf.mxu1  ;;  %3649 = vmatprep.subr.mxu0 %v1320_v2  ;;  %3756 = vmatprep.subr.mxu1 %v1322_v25  ;;  %v1287_v25 = vld [vmem:[%s6783_s7 + $0x19a0] sm:$0xff]  ;;  %v1289_v2 = vld [vmem:[%s6783_s7 + $0x19b0] sm:$0xff] }
 0x337   : > { %9821 = vst [vmem:[#allocation22_spill] sm:$0xff] %v7700_v28  ;;  %9822 = vst [vmem:[#allocation23_spill] sm:$0xff] %v7702_v29  ;;  %v7706_v59 = vadd.f32 %v3376_v12, %v3270_v63  ;;  %v1256_v63 = vld [vmem:[%s6783_s7 + $0x18a8] sm:$0xff]  ;;  %v1258_v29 = vld [vmem:[%s6783_s7 + $0x18b8] sm:$0xff] }
 0x338   : > { %v3275_v34 = vpop.f32.mrf.mxu0  ;;  %v3382_v36 = vpop.f32.mrf.mxu1 }
 0x339   : > { %v3276_v32 = vadd.f32 %v3275_v34, %v7540_v17  ;;  %3650 = vmatpush2.xpose.msra.mxu0 %v1319_v58  ;;  %3757 = vmatpush2.xpose.msra.mxu1 %v1321_v46  ;;  %v1257_v58 = vld [vmem:[%s6783_s7 + $0x18b0] sm:$0xff] }
 0x33a   : > { %v7711_v44 = vpop.f32.mrf.mxu0  ;;  %v7713_v60 = vpop.f32.mrf.mxu1  ;;  %3651 = vmatprep.subr.mxu0 %v1288_v37  ;;  %3758 = vmatprep.subr.mxu1 %v1290_v57  ;;  %v1255_v57 = vld [vmem:[%s6783_s7 + $0x18a0] sm:$0xff]  ;;  %v1224_v37 = vld [vmem:[%s6783_s7 + $0x17a8] sm:$0xff] }
 0x33b   : > { %9823 = vst [vmem:[#allocation24_spill] sm:$0xff] %v7711_v44  ;;  %9824 = vst [vmem:[#allocation25_spill] sm:$0xff] %v7713_v60  ;;  %v7717_v12 = vadd.f32 %v3382_v36, %v3276_v32  ;;  %v1226_v36 = vld [vmem:[%s6783_s7 + $0x17b8] sm:$0xff]  ;;  %v1192_v32 = vld [vmem:[%s6783_s7 + $0x16a8] sm:$0xff] }
 0x33c   : > { %v3281_v28 = vpop.f32.mrf.mxu0  ;;  %v3388_v17 = vpop.f32.mrf.mxu1  ;;  %v908_v60 = vld [vmem:[%s6783_s7 + $0xdc8] sm:$0xff] }
 0x33d   : > { %v3282_v34 = vadd.f32 %v3281_v28, %v7547_v43  ;;  %3652 = vmatpush2.xpose.msra.mxu0 %v1287_v25  ;;  %3759 = vmatpush2.xpose.msra.mxu1 %v1289_v2  ;;  %v1223_v43 = vld [vmem:[%s6783_s7 + $0x17a0] sm:$0xff]  ;;  %v1225_v28 = vld [vmem:[%s6783_s7 + $0x17b0] sm:$0xff] }
 0x33e   : > { %3653 = vmatprep.subr.mxu0 %v1256_v63  ;;  %3760 = vmatprep.subr.mxu1 %v1258_v29  ;;  %v1194_v29 = vld [vmem:[%s6783_s7 + $0x16b8] sm:$0xff]  ;;  %v1191_v25 = vld [vmem:[%s6783_s7 + $0x16a0] sm:$0xff]  ;;  %v1193_v2 = vld [vmem:[%s6783_s7 + $0x16b0] sm:$0xff] }
 0x33f   : > { %v7724_v46 = vadd.f32 %v3388_v17, %v3282_v34  ;;  %v1160_v63 = vld [vmem:[%s6783_s7 + $0x15a8] sm:$0xff]  ;;  %v1162_v17 = vld [vmem:[%s6783_s7 + $0x15b8] sm:$0xff]  ;;  %v1159_v34 = vld [vmem:[%s6783_s7 + $0x15a0] sm:$0xff] }
 0x341   : > { %3654 = vmatpush2.xpose.msra.mxu0 %v1255_v57  ;;  %3761 = vmatpush2.xpose.msra.mxu1 %v1257_v58  ;;  %v1161_v57 = vld [vmem:[%s6783_s7 + $0x15b0] sm:$0xff]  ;;  %v1128_v58 = vld [vmem:[%s6783_s7 + $0x14a8] sm:$0xff] }
 0x342   : > { %3655 = vmatprep.subr.mxu0 %v1224_v37  ;;  %3762 = vmatprep.subr.mxu1 %v1226_v36  ;;  %v1130_v37 = vld [vmem:[%s6783_s7 + $0x14b8] sm:$0xff]  ;;  %v1127_v36 = vld [vmem:[%s6783_s7 + $0x14a0] sm:$0xff] }
 0x345   : > { %3656 = vmatpush2.xpose.msra.mxu0 %v1223_v43  ;;  %3763 = vmatpush2.xpose.msra.mxu1 %v1225_v28  ;;  %v1129_v43 = vld [vmem:[%s6783_s7 + $0x14b0] sm:$0xff]  ;;  %v1096_v28 = vld [vmem:[%s6783_s7 + $0x13a8] sm:$0xff] }
 0x346   : > { %3657 = vmatprep.subr.mxu0 %v1192_v32  ;;  %3764 = vmatprep.subr.mxu1 %v1194_v29  ;;  %v1098_v32 = vld [vmem:[%s6783_s7 + $0x13b8] sm:$0xff]  ;;  %v1095_v29 = vld [vmem:[%s6783_s7 + $0x13a0] sm:$0xff] }
 0x349   : > { %3658 = vmatpush2.xpose.msra.mxu0 %v1191_v25  ;;  %3765 = vmatpush2.xpose.msra.mxu1 %v1193_v2  ;;  %v1097_v25 = vld [vmem:[%s6783_s7 + $0x13b0] sm:$0xff]  ;;  %v1064_v2 = vld [vmem:[%s6783_s7 + $0x12a8] sm:$0xff] }
 0x34a   : > { %3659 = vmatprep.subr.mxu0 %v1160_v63  ;;  %3766 = vmatprep.subr.mxu1 %v1162_v17  ;;  %v1066_v63 = vld [vmem:[%s6783_s7 + $0x12b8] sm:$0xff]  ;;  %v1063_v17 = vld [vmem:[%s6783_s7 + $0x12a0] sm:$0xff] }
 0x34d   : > { %3660 = vmatpush2.xpose.msra.mxu0 %v1159_v34  ;;  %3767 = vmatpush2.xpose.msra.mxu1 %v1161_v57  ;;  %v1065_v34 = vld [vmem:[%s6783_s7 + $0x12b0] sm:$0xff]  ;;  %v1032_v57 = vld [vmem:[%s6783_s7 + $0x11a8] sm:$0xff] }
 0x34e   : > { %3661 = vmatprep.subr.mxu0 %v1128_v58  ;;  %3768 = vmatprep.subr.mxu1 %v1130_v37  ;;  %v1034_v58 = vld [vmem:[%s6783_s7 + $0x11b8] sm:$0xff]  ;;  %v1031_v37 = vld [vmem:[%s6783_s7 + $0x11a0] sm:$0xff] }
 0x351   : > { %3662 = vmatpush2.xpose.msra.mxu0 %v1127_v36  ;;  %3769 = vmatpush2.xpose.msra.mxu1 %v1129_v43  ;;  %v1033_v36 = vld [vmem:[%s6783_s7 + $0x11b0] sm:$0xff]  ;;  %v1000_v43 = vld [vmem:[%s6783_s7 + $0x10a8] sm:$0xff] }
 0x352   : > { %3663 = vmatprep.subr.mxu0 %v1096_v28  ;;  %3770 = vmatprep.subr.mxu1 %v1098_v32  ;;  %v1002_v28 = vld [vmem:[%s6783_s7 + $0x10b8] sm:$0xff]  ;;  %v999_v32 = vld [vmem:[%s6783_s7 + $0x10a0] sm:$0xff] }
 0x355   : > { %3664 = vmatpush2.xpose.msra.mxu0 %v1095_v29  ;;  %3771 = vmatpush2.xpose.msra.mxu1 %v1097_v25  ;;  %v1001_v29 = vld [vmem:[%s6783_s7 + $0x10b0] sm:$0xff]  ;;  %v972_v25 = vld [vmem:[%s6783_s7 + $0xfc8] sm:$0xff] }
 0x356   : > { %3665 = vmatprep.subr.mxu0 %v1064_v2  ;;  %3772 = vmatprep.subr.mxu1 %v1066_v63  ;;  %v974_v2 = vld [vmem:[%s6783_s7 + $0xfd8] sm:$0xff]  ;;  %v263_v63 = vld [vmem:[#allocation2 + $0xa0] sm:$0xff] }
 0x359   : > { %3666 = vmatpush2.xpose.msra.mxu0 %v1063_v17  ;;  %3773 = vmatpush2.xpose.msra.mxu1 %v1065_v34  ;;  %v265_v17 = vld [vmem:[#allocation2 + $0xb0] sm:$0xff]  ;;  %v971_v34 = vld [vmem:[%s6783_s7 + $0xfc0] sm:$0xff] }
 0x35a   : > { %3667 = vmatprep.subr.mxu0 %v1032_v57  ;;  %3774 = vmatprep.subr.mxu1 %v1034_v58  ;;  %v973_v57 = vld [vmem:[%s6783_s7 + $0xfd0] sm:$0xff]  ;;  %v296_v58 = vld [vmem:[#allocation2 + $0x1a8] sm:$0xff] }
 0x35d   : > { %3668 = vmatpush2.xpose.msra.mxu0 %v1031_v37  ;;  %3775 = vmatpush2.xpose.msra.mxu1 %v1033_v36  ;;  %v940_v37 = vld [vmem:[%s6783_s7 + $0xec8] sm:$0xff]  ;;  %v942_v36 = vld [vmem:[%s6783_s7 + $0xed8] sm:$0xff] }
 0x35e   : > { %3669 = vmatprep.subr.mxu0 %v1000_v43  ;;  %3776 = vmatprep.subr.mxu1 %v1002_v28  ;;  %v298_v43 = vld [vmem:[#allocation2 + $0x1b8] sm:$0xff]  ;;  %v295_v28 = vld [vmem:[#allocation2 + $0x1a0] sm:$0xff] }
 0x361   : > { %3670 = vmatpush2.xpose.msra.mxu0 %v999_v32  ;;  %3777 = vmatpush2.xpose.msra.mxu1 %v1001_v29  ;;  %v297_v32 = vld [vmem:[#allocation2 + $0x1b0] sm:$0xff]  ;;  %v939_v29 = vld [vmem:[%s6783_s7 + $0xec0] sm:$0xff] }
 0x362   : > { %3821 = vmatprep.subr.mxu0 %v972_v25  ;;  %3928 = vmatprep.subr.mxu1 %v974_v2  ;;  %v941_v25 = vld [vmem:[%s6783_s7 + $0xed0] sm:$0xff]  ;;  %v328_v2 = vld [vmem:[#allocation2 + $0x2a8] sm:$0xff] }
 0x364   : > { %3672 = vmatmul.mubr.f32.vlgmr.msra.gmra.mxu0 %v263_v63  ;;  %3779 = vmatmul.mubr.f32.vlgmr.msra.gmra.mxu1 %v265_v17  ;;  %v910_v63 = vld [vmem:[%s6783_s7 + $0xdd8] sm:$0xff] }
 0x365   : > { %3822 = vmatpush1.xpose.msra.mxu0 %v971_v34  ;;  %3929 = vmatpush1.xpose.msra.mxu1 %v973_v57  ;;  %v330_v17 = vld [vmem:[#allocation2 + $0x2b8] sm:$0xff]  ;;  %v327_v34 = vld [vmem:[#allocation2 + $0x2a0] sm:$0xff]  ;;  %v329_v57 = vld [vmem:[#allocation2 + $0x2b0] sm:$0xff] }
 0x366   : > { %3677 = vmatprep.mubr.f32.mxu0 %v296_v58  ;;  %3823 = vmatprep.subr.mxu0 %v940_v37  ;;  %v907_v58 = vld [vmem:[%s6783_s7 + $0xdc0] sm:$0xff]  ;;  %v909_v37 = vld [vmem:[%s6783_s7 + $0xdd0] sm:$0xff] }
 0x367   : > { %3930 = vmatprep.subr.mxu1 %v942_v36  ;;  %3784 = vmatprep.mubr.f32.mxu1 %v298_v43  ;;  %v360_v36 = vld [vmem:[#allocation2 + $0x3a8] sm:$0xff] }
 0x368   : > { %3678 = vmatmul.mubr.f32.gmra.mxu0 %v295_v28  ;;  %3785 = vmatmul.mubr.f32.gmra.mxu1 %v297_v32  ;;  %v876_v43 = vld [vmem:[%s6783_s7 + $0xcc8] sm:$0xff]  ;;  %v878_v28 = vld [vmem:[%s6783_s7 + $0xcd8] sm:$0xff] }
 0x369   : > { %3824 = vmatpush1.xpose.msra.mxu0 %v939_v29  ;;  %3931 = vmatpush1.xpose.msra.mxu1 %v941_v25  ;;  %v362_v32 = vld [vmem:[#allocation2 + $0x3b8] sm:$0xff]  ;;  %v359_v29 = vld [vmem:[#allocation2 + $0x3a0] sm:$0xff]  ;;  %v361_v25 = vld [vmem:[#allocation2 + $0x3b0] sm:$0xff] }
 0x36a   : > { %3683 = vmatprep.mubr.f32.mxu0 %v328_v2  ;;  %3825 = vmatprep.subr.mxu0 %v908_v60  ;;  %v875_v60 = vld [vmem:[%s6783_s7 + $0xcc0] sm:$0xff]  ;;  %v877_v2 = vld [vmem:[%s6783_s7 + $0xcd0] sm:$0xff] }
 0x36b   : > { %3932 = vmatprep.subr.mxu1 %v910_v63  ;;  %3790 = vmatprep.mubr.f32.mxu1 %v330_v17  ;;  %v392_v63 = vld [vmem:[#allocation2 + $0x4a8] sm:$0xff] }
 0x36c   : > { %3684 = vmatmul.mubr.f32.gmra.mxu0 %v327_v34  ;;  %3791 = vmatmul.mubr.f32.gmra.mxu1 %v329_v57  ;;  %v844_v17 = vld [vmem:[%s6783_s7 + $0xbc8] sm:$0xff]  ;;  %v846_v34 = vld [vmem:[%s6783_s7 + $0xbd8] sm:$0xff] }
 0x36d   : > { %3826 = vmatpush1.xpose.msra.mxu0 %v907_v58  ;;  %3933 = vmatpush1.xpose.msra.mxu1 %v909_v37  ;;  %v394_v57 = vld [vmem:[#allocation2 + $0x4b8] sm:$0xff]  ;;  %v391_v58 = vld [vmem:[#allocation2 + $0x4a0] sm:$0xff]  ;;  %v393_v37 = vld [vmem:[#allocation2 + $0x4b0] sm:$0xff] }
 0x36e   : > { %3689 = vmatprep.mubr.f32.mxu0 %v360_v36  ;;  %3827 = vmatprep.subr.mxu0 %v876_v43  ;;  %v843_v36 = vld [vmem:[%s6783_s7 + $0xbc0] sm:$0xff]  ;;  %v845_v43 = vld [vmem:[%s6783_s7 + $0xbd0] sm:$0xff] }
 0x36f   : > { %3934 = vmatprep.subr.mxu1 %v878_v28  ;;  %3796 = vmatprep.mubr.f32.mxu1 %v362_v32  ;;  %v424_v28 = vld [vmem:[#allocation2 + $0x5a8] sm:$0xff] }
 0x370   : > { %3690 = vmatmul.mubr.f32.gmra.mxu0 %v359_v29  ;;  %3797 = vmatmul.mubr.f32.gmra.mxu1 %v361_v25  ;;  %v812_v32 = vld [vmem:[%s6783_s7 + $0xac8] sm:$0xff]  ;;  %v814_v29 = vld [vmem:[%s6783_s7 + $0xad8] sm:$0xff] }
 0x371   : > { %3828 = vmatpush1.xpose.msra.mxu0 %v875_v60  ;;  %3935 = vmatpush1.xpose.msra.mxu1 %v877_v2  ;;  %v426_v25 = vld [vmem:[#allocation2 + $0x5b8] sm:$0xff]  ;;  %v423_v60 = vld [vmem:[#allocation2 + $0x5a0] sm:$0xff]  ;;  %v425_v2 = vld [vmem:[#allocation2 + $0x5b0] sm:$0xff] }
 0x372   : > { %3695 = vmatprep.mubr.f32.mxu0 %v392_v63  ;;  %3829 = vmatprep.subr.mxu0 %v844_v17  ;;  %v811_v63 = vld [vmem:[%s6783_s7 + $0xac0] sm:$0xff]  ;;  %v813_v17 = vld [vmem:[%s6783_s7 + $0xad0] sm:$0xff] }
 0x373   : > { %3936 = vmatprep.subr.mxu1 %v846_v34  ;;  %3802 = vmatprep.mubr.f32.mxu1 %v394_v57  ;;  %v456_v34 = vld [vmem:[#allocation2 + $0x6a8] sm:$0xff] }
 0x374   : > { %3696 = vmatmul.mubr.f32.gmra.mxu0 %v391_v58  ;;  %3803 = vmatmul.mubr.f32.gmra.mxu1 %v393_v37  ;;  %v780_v57 = vld [vmem:[%s6783_s7 + $0x9c8] sm:$0xff]  ;;  %v782_v58 = vld [vmem:[%s6783_s7 + $0x9d8] sm:$0xff] }
 0x375   : > { %3830 = vmatpush1.xpose.msra.mxu0 %v843_v36  ;;  %3937 = vmatpush1.xpose.msra.mxu1 %v845_v43  ;;  %v458_v37 = vld [vmem:[#allocation2 + $0x6b8] sm:$0xff]  ;;  %v455_v36 = vld [vmem:[#allocation2 + $0x6a0] sm:$0xff]  ;;  %v457_v43 = vld [vmem:[#allocation2 + $0x6b0] sm:$0xff] }
 0x376   : > { %3701 = vmatprep.mubr.f32.mxu0 %v424_v28  ;;  %3831 = vmatprep.subr.mxu0 %v812_v32  ;;  %v779_v28 = vld [vmem:[%s6783_s7 + $0x9c0] sm:$0xff]  ;;  %v781_v32 = vld [vmem:[%s6783_s7 + $0x9d0] sm:$0xff] }
 0x377   : > { %3938 = vmatprep.subr.mxu1 %v814_v29  ;;  %3808 = vmatprep.mubr.f32.mxu1 %v426_v25  ;;  %v748_v29 = vld [vmem:[%s6783_s7 + $0x8c8] sm:$0xff]  ;;  %v750_v25 = vld [vmem:[%s6783_s7 + $0x8d8] sm:$0xff] }
 0x378   : > { %3702 = vmatmul.mubr.f32.gmra.mxu0 %v423_v60  ;;  %3809 = vmatmul.mubr.f32.gmra.mxu1 %v425_v2  ;;  %v268_v60 = vld [vmem:[#allocation2 + $0xc8] sm:$0xff]  ;;  %v270_v2 = vld [vmem:[#allocation2 + $0xd8] sm:$0xff] }
 0x379   : > { %3832 = vmatpush1.xpose.msra.mxu0 %v811_v63  ;;  %3939 = vmatpush1.xpose.msra.mxu1 %v813_v17  ;;  %v747_v63 = vld [vmem:[%s6783_s7 + $0x8c0] sm:$0xff]  ;;  %v749_v17 = vld [vmem:[%s6783_s7 + $0x8d0] sm:$0xff] }
 0x37a   : > { %3707 = vmatprep.mubr.f32.mxu0 %v456_v34  ;;  %3833 = vmatprep.subr.mxu0 %v780_v57  ;;  %v716_v34 = vld [vmem:[%s6783_s7 + $0x7c8] sm:$0xff]  ;;  %v718_v57 = vld [vmem:[%s6783_s7 + $0x7d8] sm:$0xff] }
 0x37b   : > { %3940 = vmatprep.subr.mxu1 %v782_v58  ;;  %3814 = vmatprep.mubr.f32.mxu1 %v458_v37  ;;  %v715_v58 = vld [vmem:[%s6783_s7 + $0x7c0] sm:$0xff]  ;;  %v717_v37 = vld [vmem:[%s6783_s7 + $0x7d0] sm:$0xff] }
 0x37c   : > { %3708 = vmatmul.mubr.f32.gmra.mxu0 %v455_v36  ;;  %3815 = vmatmul.mubr.f32.gmra.mxu1 %v457_v43  ;;  %v684_v36 = vld [vmem:[%s6783_s7 + $0x6c8] sm:$0xff]  ;;  %v686_v43 = vld [vmem:[%s6783_s7 + $0x6d8] sm:$0xff] }
 0x37d   : > { %3834 = vmatpush1.xpose.msra.mxu0 %v779_v28  ;;  %3941 = vmatpush1.xpose.msra.mxu1 %v781_v32  ;;  %v683_v28 = vld [vmem:[%s6783_s7 + $0x6c0] sm:$0xff]  ;;  %v685_v32 = vld [vmem:[%s6783_s7 + $0x6d0] sm:$0xff] }
 0x37e   : > { %3835 = vmatprep.subr.mxu0 %v748_v29  ;;  %3942 = vmatprep.subr.mxu1 %v750_v25  ;;  %v652_v29 = vld [vmem:[%s6783_s7 + $0x5c8] sm:$0xff]  ;;  %v654_v25 = vld [vmem:[%s6783_s7 + $0x5d8] sm:$0xff] }
 0x37f   : > { %3885 = vmatprep.mubr.f32.mxu0 %v268_v60  ;;  %3992 = vmatprep.mubr.f32.mxu1 %v270_v2  ;;  %v651_v60 = vld [vmem:[%s6783_s7 + $0x5c0] sm:$0xff]  ;;  %v653_v2 = vld [vmem:[%s6783_s7 + $0x5d0] sm:$0xff] }
 0x381   : > { %3836 = vmatpush1.xpose.msra.mxu0 %v747_v63  ;;  %3943 = vmatpush1.xpose.msra.mxu1 %v749_v17  ;;  %v620_v63 = vld [vmem:[%s6783_s7 + $0x4c8] sm:$0xff]  ;;  %v622_v17 = vld [vmem:[%s6783_s7 + $0x4d8] sm:$0xff] }
 0x382   : > { %3837 = vmatprep.subr.mxu0 %v716_v34  ;;  %3944 = vmatprep.subr.mxu1 %v718_v57  ;;  %v619_v34 = vld [vmem:[%s6783_s7 + $0x4c0] sm:$0xff]  ;;  %v621_v57 = vld [vmem:[%s6783_s7 + $0x4d0] sm:$0xff] }
 0x385   : > { %3838 = vmatpush1.xpose.msra.mxu0 %v715_v58  ;;  %3945 = vmatpush1.xpose.msra.mxu1 %v717_v37  ;;  %v588_v58 = vld [vmem:[%s6783_s7 + $0x3c8] sm:$0xff]  ;;  %v590_v37 = vld [vmem:[%s6783_s7 + $0x3d8] sm:$0xff] }
 0x386   : > { %3839 = vmatprep.subr.mxu0 %v684_v36  ;;  %3946 = vmatprep.subr.mxu1 %v686_v43  ;;  %v587_v36 = vld [vmem:[%s6783_s7 + $0x3c0] sm:$0xff]  ;;  %v589_v43 = vld [vmem:[%s6783_s7 + $0x3d0] sm:$0xff] }
 0x389   : > { %3840 = vmatpush1.xpose.msra.mxu0 %v683_v28  ;;  %3947 = vmatpush1.xpose.msra.mxu1 %v685_v32  ;;  %v556_v28 = vld [vmem:[%s6783_s7 + $0x2c8] sm:$0xff]  ;;  %v558_v32 = vld [vmem:[%s6783_s7 + $0x2d8] sm:$0xff] }
 0x38a   : > { %3841 = vmatprep.subr.mxu0 %v652_v29  ;;  %3948 = vmatprep.subr.mxu1 %v654_v25  ;;  %v555_v29 = vld [vmem:[%s6783_s7 + $0x2c0] sm:$0xff]  ;;  %v557_v25 = vld [vmem:[%s6783_s7 + $0x2d0] sm:$0xff] }
 0x38d   : > { %3842 = vmatpush1.xpose.msra.mxu0 %v651_v60  ;;  %3949 = vmatpush1.xpose.msra.mxu1 %v653_v2  ;;  %v524_v60 = vld [vmem:[%s6783_s7 + $0x1c8] sm:$0xff]  ;;  %v526_v2 = vld [vmem:[%s6783_s7 + $0x1d8] sm:$0xff] }
 0x38e   : > { %3843 = vmatprep.subr.mxu0 %v620_v63  ;;  %3950 = vmatprep.subr.mxu1 %v622_v17  ;;  %v523_v63 = vld [vmem:[%s6783_s7 + $0x1c0] sm:$0xff]  ;;  %v525_v17 = vld [vmem:[%s6783_s7 + $0x1d0] sm:$0xff] }
 0x391   : > { %3844 = vmatpush1.xpose.msra.mxu0 %v619_v34  ;;  %3951 = vmatpush1.xpose.msra.mxu1 %v621_v57  ;;  %v492_v34 = vld [vmem:[%s6783_s7 + $0xc8] sm:$0xff]  ;;  %v494_v57 = vld [vmem:[%s6783_s7 + $0xd8] sm:$0xff] }
 0x392   : > { %3845 = vmatprep.subr.mxu0 %v588_v58  ;;  %3952 = vmatprep.subr.mxu1 %v590_v37  ;;  %v491_v58 = vld [vmem:[%s6783_s7 + $0xc0] sm:$0xff]  ;;  %v493_v37 = vld [vmem:[%s6783_s7 + $0xd0] sm:$0xff] }
 0x395   : > { %3846 = vmatpush1.xpose.msra.mxu0 %v587_v36  ;;  %3953 = vmatpush1.xpose.msra.mxu1 %v589_v43  ;;  %v1484_v36 = vld [vmem:[%s6783_s7 + $0x1fc8] sm:$0xff]  ;;  %v1486_v43 = vld [vmem:[%s6783_s7 + $0x1fd8] sm:$0xff] }
 0x396   : > { %3847 = vmatprep.subr.mxu0 %v556_v28  ;;  %3954 = vmatprep.subr.mxu1 %v558_v32  ;;  %v7824_v28 = vpop.f32.mrf.mxu0  ;;  %v7826_v32 = vpop.f32.mrf.mxu1 }
 0x397   : > { %9825 = vst [vmem:[#allocation26_spill] sm:$0xff] %v7824_v28  ;;  %9826 = vst [vmem:[#allocation27_spill] sm:$0xff] %v7826_v32  ;;  %v1420_v32 = vld [vmem:[%s6783_s7 + $0x1dc8] sm:$0xff]  ;;  %v1422_v28 = vld [vmem:[%s6783_s7 + $0x1dd8] sm:$0xff] }
 0x399   : > { %3848 = vmatpush1.xpose.msra.mxu0 %v555_v29  ;;  %3955 = vmatpush1.xpose.msra.mxu1 %v557_v25  ;;  %v1483_v29 = vld [vmem:[%s6783_s7 + $0x1fc0] sm:$0xff]  ;;  %v1485_v25 = vld [vmem:[%s6783_s7 + $0x1fd0] sm:$0xff] }
 0x39a   : > { %3849 = vmatprep.subr.mxu0 %v524_v60  ;;  %3956 = vmatprep.subr.mxu1 %v526_v2  ;;  %v1452_v60 = vld [vmem:[%s6783_s7 + $0x1ec8] sm:$0xff]  ;;  %v1454_v2 = vld [vmem:[%s6783_s7 + $0x1ed8] sm:$0xff] }
 0x39d   : > { %3850 = vmatpush1.xpose.msra.mxu0 %v523_v63  ;;  %3957 = vmatpush1.xpose.msra.mxu1 %v525_v17 }
 0x39e   : > { %3851 = vmatprep.subr.mxu0 %v492_v34  ;;  %3958 = vmatprep.subr.mxu1 %v494_v57 }
 0x3a1   : > { %3852 = vmatpush1.xpose.msra.mxu0 %v491_v58  ;;  %3959 = vmatpush1.xpose.msra.mxu1 %v493_v37  ;;  %v1451_v37 = vld [vmem:[%s6783_s7 + $0x1ec0] sm:$0xff] }
 0x3a2   : > { %3853 = vmatprep.subr.mxu0 %v1484_v36  ;;  %3960 = vmatprep.subr.mxu1 %v1486_v43  ;;  %v1453_v36 = vld [vmem:[%s6783_s7 + $0x1ed0] sm:$0xff] }
 0x3a4   : > { %v3459_v63 = vpop.f32.mrf.mxu0  ;;  %v3566_v17 = vpop.f32.mrf.mxu1 }
 0x3a5   : > { %v3460_v34 = vadd.f32 %v3459_v63, %v7662_v18  ;;  %3854 = vmatpush2.xpose.msra.mxu0 %v1483_v29  ;;  %3961 = vmatpush2.xpose.msra.mxu1 %v1485_v25  ;;  %v1421_v63 = vld [vmem:[%s6783_s7 + $0x1dd0] sm:$0xff] }
 0x3a6   : > { %v7833_v57 = vpop.f32.mrf.mxu0  ;;  %v7835_v58 = vpop.f32.mrf.mxu1  ;;  %3855 = vmatprep.subr.mxu0 %v1452_v60  ;;  %3962 = vmatprep.subr.mxu1 %v1454_v2  ;;  %v1419_v2 = vld [vmem:[%s6783_s7 + $0x1dc0] sm:$0xff] }
 0x3a7   : > { %9827 = vst [vmem:[#allocation28_spill] sm:$0xff] %v7835_v58  ;;  %v7839_v43 = vadd.f32 %v3566_v17, %v3460_v34  ;;  %v1388_v34 = vld [vmem:[%s6783_s7 + $0x1cc8] sm:$0xff] }
 0x3a8   : > { %v3465_v44 = vpop.f32.mrf.mxu0  ;;  %v3572_v18 = vpop.f32.mrf.mxu1 }
 0x3a9   : > { %9828 = vst [vmem:[#allocation29_spill] sm:$0xff] %v7839_v43  ;;  %v3466_v29 = vadd.f32 %v3465_v44, %v7673_v11  ;;  %3856 = vmatpush2.xpose.msra.mxu0 %v1451_v37  ;;  %3963 = vmatpush2.xpose.msra.mxu1 %v1453_v36  ;;  %v1390_v43 = vld [vmem:[%s6783_s7 + $0x1cd8] sm:$0xff]  ;;  %v1389_v36 = vld [vmem:[%s6783_s7 + $0x1cd0] sm:$0xff] }
 0x3aa   : > { %v7844_v25 = vpop.f32.mrf.mxu0  ;;  %v7846_v60 = vpop.f32.mrf.mxu1  ;;  %3857 = vmatprep.subr.mxu0 %v1420_v32  ;;  %3964 = vmatprep.subr.mxu1 %v1422_v28  ;;  %v1387_v28 = vld [vmem:[%s6783_s7 + $0x1cc0] sm:$0xff] }
 0x3ab   : > { %9829 = vst [vmem:[#allocation30_spill] sm:$0xff] %v7846_v60  ;;  %v7850_v17 = vadd.f32 %v3572_v18, %v3466_v29  ;;  %v1356_v29 = vld [vmem:[%s6783_s7 + $0x1bc8] sm:$0xff] }
 0x3ac   : > { %v3471_v58 = vpop.f32.mrf.mxu0  ;;  %v3578_v11 = vpop.f32.mrf.mxu1 }
 0x3ad   : > { %9830 = vst [vmem:[#allocation31_spill] sm:$0xff] %v7850_v17  ;;  %v3472_v44 = vadd.f32 %v3471_v58, %v7684_v55  ;;  %3858 = vmatpush2.xpose.msra.mxu0 %v1419_v2  ;;  %3965 = vmatpush2.xpose.msra.mxu1 %v1421_v63  ;;  %v1358_v17 = vld [vmem:[%s6783_s7 + $0x1bd8] sm:$0xff] }
 0x3ae   : > { %v7855_v37 = vpop.f32.mrf.mxu0  ;;  %v7857_v32 = vpop.f32.mrf.mxu1  ;;  %3859 = vmatprep.subr.mxu0 %v1388_v34  ;;  %3966 = vmatprep.subr.mxu1 %v1390_v43  ;;  %v1355_v43 = vld [vmem:[%s6783_s7 + $0x1bc0] sm:$0xff]  ;;  %v1357_v34 = vld [vmem:[%s6783_s7 + $0x1bd0] sm:$0xff] }
 0x3af   : > { %9831 = vst [vmem:[#allocation32_spill] sm:$0xff] %v7857_v32  ;;  %v7861_v18 = vadd.f32 %v3578_v11, %v3472_v44  ;;  %v1324_v44 = vld [vmem:[%s6783_s7 + $0x1ac8] sm:$0xff] }
 0x3b0   : > { %v3477_v60 = vpop.f32.mrf.mxu0  ;;  %v3584_v55 = vpop.f32.mrf.mxu1 }
 0x3b1   : > { %9832 = vst [vmem:[#allocation33_spill] sm:$0xff] %v7861_v18  ;;  %v3478_v58 = vadd.f32 %v3477_v60, %v7695_v24  ;;  %3860 = vmatpush2.xpose.msra.mxu0 %v1387_v28  ;;  %3967 = vmatpush2.xpose.msra.mxu1 %v1389_v36  ;;  %v1326_v18 = vld [vmem:[%s6783_s7 + $0x1ad8] sm:$0xff] }
 0x3b2   : > { %v7866_v2 = vpop.f32.mrf.mxu0  ;;  %v7868_v63 = vpop.f32.mrf.mxu1  ;;  %3861 = vmatprep.subr.mxu0 %v1356_v29  ;;  %3968 = vmatprep.subr.mxu1 %v1358_v17  ;;  %v1323_v17 = vld [vmem:[%s6783_s7 + $0x1ac0] sm:$0xff]  ;;  %v1325_v29 = vld [vmem:[%s6783_s7 + $0x1ad0] sm:$0xff] }
 0x3b3   : > { %9833 = vst [vmem:[#allocation34_spill] sm:$0xff] %v7866_v2  ;;  %9834 = vst [vmem:[#allocation35_spill] sm:$0xff] %v7868_v63  ;;  %v7872_v11 = vadd.f32 %v3584_v55, %v3478_v58  ;;  %v1292_v58 = vld [vmem:[%s6783_s7 + $0x19c8] sm:$0xff]  ;;  %v6201_v2 = vld [vmem:[#allocation2] sm:$0xff] }
 0x3b4   : > { %v3483_v32 = vpop.f32.mrf.mxu0  ;;  %v3590_v24 = vpop.f32.mrf.mxu1 }
 0x3b5   : > { %9835 = vst [vmem:[#allocation36_spill] sm:$0xff] %v7872_v11  ;;  %v3484_v60 = vadd.f32 %v3483_v32, %v7706_v59  ;;  %3862 = vmatpush2.xpose.msra.mxu0 %v1355_v43  ;;  %3969 = vmatpush2.xpose.msra.mxu1 %v1357_v34  ;;  %v1294_v11 = vld [vmem:[%s6783_s7 + $0x19d8] sm:$0xff] }
 0x3b6   : > { %v7877_v28 = vpop.f32.mrf.mxu0  ;;  %v7879_v36 = vpop.f32.mrf.mxu1  ;;  %3863 = vmatprep.subr.mxu0 %v1324_v44  ;;  %3970 = vmatprep.subr.mxu1 %v1326_v18  ;;  %v1291_v18 = vld [vmem:[%s6783_s7 + $0x19c0] sm:$0xff]  ;;  %v1293_v44 = vld [vmem:[%s6783_s7 + $0x19d0] sm:$0xff] }
 0x3b7   : > { %9836 = vst [vmem:[#allocation37_spill] sm:$0xff] %v7877_v28  ;;  %9837 = vst [vmem:[#allocation38_spill] sm:$0xff] %v7879_v36  ;;  %v7883_v55 = vadd.f32 %v3590_v24, %v3484_v60  ;;  %v1260_v60 = vld [vmem:[%s6783_s7 + $0x18c8] sm:$0xff] }
 0x3b8   : > { %v3489_v63 = vpop.f32.mrf.mxu0  ;;  %v3596_v59 = vpop.f32.mrf.mxu1 }
 0x3b9   : > { %9838 = vst [vmem:[#allocation39_spill] sm:$0xff] %v7883_v55  ;;  %v3490_v32 = vadd.f32 %v3489_v63, %v7717_v12  ;;  %3864 = vmatpush2.xpose.msra.mxu0 %v1323_v17  ;;  %3971 = vmatpush2.xpose.msra.mxu1 %v1325_v29  ;;  %v1262_v55 = vld [vmem:[%s6783_s7 + $0x18d8] sm:$0xff]  ;;  %v1261_v17 = vld [vmem:[%s6783_s7 + $0x18d0] sm:$0xff] }
 0x3ba   : > { %v7888_v43 = vpop.f32.mrf.mxu0  ;;  %v7890_v34 = vpop.f32.mrf.mxu1  ;;  %3865 = vmatprep.subr.mxu0 %v1292_v58  ;;  %3972 = vmatprep.subr.mxu1 %v1294_v11  ;;  %v1259_v11 = vld [vmem:[%s6783_s7 + $0x18c0] sm:$0xff]  ;;  %v1228_v58 = vld [vmem:[%s6783_s7 + $0x17c8] sm:$0xff] }
 0x3bb   : > { %9839 = vst [vmem:[#allocation40_spill] sm:$0xff] %v7888_v43  ;;  %9840 = vst [vmem:[#allocation41_spill] sm:$0xff] %v7890_v34  ;;  %v7894_v24 = vadd.f32 %v3596_v59, %v3490_v32  ;;  %v1230_v59 = vld [vmem:[%s6783_s7 + $0x17d8] sm:$0xff]  ;;  %v1196_v32 = vld [vmem:[%s6783_s7 + $0x16c8] sm:$0xff] }
 0x3bc   : > { %v3495_v36 = vpop.f32.mrf.mxu0  ;;  %v3602_v12 = vpop.f32.mrf.mxu1 }
 0x3bd   : > { %9841 = vst [vmem:[#allocation42_spill] sm:$0xff] %v7894_v24  ;;  %v3496_v63 = vadd.f32 %v3495_v36, %v7724_v46  ;;  %3866 = vmatpush2.xpose.msra.mxu0 %v1291_v18  ;;  %3973 = vmatpush2.xpose.msra.mxu1 %v1293_v44  ;;  %v1227_v46 = vld [vmem:[%s6783_s7 + $0x17c0] sm:$0xff]  ;;  %v1229_v36 = vld [vmem:[%s6783_s7 + $0x17d0] sm:$0xff] }
 0x3be   : > { %3867 = vmatprep.subr.mxu0 %v1260_v60  ;;  %3974 = vmatprep.subr.mxu1 %v1262_v55  ;;  %v1198_v55 = vld [vmem:[%s6783_s7 + $0x16d8] sm:$0xff]  ;;  %v1195_v18 = vld [vmem:[%s6783_s7 + $0x16c0] sm:$0xff]  ;;  %v1197_v44 = vld [vmem:[%s6783_s7 + $0x16d0] sm:$0xff] }
 0x3bf   : > { %v7901_v29 = vadd.f32 %v3602_v12, %v3496_v63  ;;  %v1164_v60 = vld [vmem:[%s6783_s7 + $0x15c8] sm:$0xff]  ;;  %v1166_v12 = vld [vmem:[%s6783_s7 + $0x15d8] sm:$0xff]  ;;  %v1163_v63 = vld [vmem:[%s6783_s7 + $0x15c0] sm:$0xff] }
 0x3c1   : > { %9842 = vst [vmem:[#allocation43_spill] sm:$0xff] %v7901_v29  ;;  %3868 = vmatpush2.xpose.msra.mxu0 %v1259_v11  ;;  %3975 = vmatpush2.xpose.msra.mxu1 %v1261_v17  ;;  %v1165_v11 = vld [vmem:[%s6783_s7 + $0x15d0] sm:$0xff]  ;;  %v1132_v17 = vld [vmem:[%s6783_s7 + $0x14c8] sm:$0xff] }
 0x3c2   : > { %3869 = vmatprep.subr.mxu0 %v1228_v58  ;;  %3976 = vmatprep.subr.mxu1 %v1230_v59  ;;  %v1134_v58 = vld [vmem:[%s6783_s7 + $0x14d8] sm:$0xff]  ;;  %v1131_v59 = vld [vmem:[%s6783_s7 + $0x14c0] sm:$0xff]  ;;  %v912_v29 = vld [vmem:[%s6783_s7 + $0xde8] sm:$0xff] }
 0x3c5   : > { %3870 = vmatpush2.xpose.msra.mxu0 %v1227_v46  ;;  %3977 = vmatpush2.xpose.msra.mxu1 %v1229_v36  ;;  %v1133_v46 = vld [vmem:[%s6783_s7 + $0x14d0] sm:$0xff]  ;;  %v1100_v36 = vld [vmem:[%s6783_s7 + $0x13c8] sm:$0xff] }
 0x3c6   : > { %3871 = vmatprep.subr.mxu0 %v1196_v32  ;;  %3978 = vmatprep.subr.mxu1 %v1198_v55  ;;  %v1102_v32 = vld [vmem:[%s6783_s7 + $0x13d8] sm:$0xff]  ;;  %v1099_v55 = vld [vmem:[%s6783_s7 + $0x13c0] sm:$0xff] }
 0x3c9   : > { %3872 = vmatpush2.xpose.msra.mxu0 %v1195_v18  ;;  %3979 = vmatpush2.xpose.msra.mxu1 %v1197_v44  ;;  %v1101_v18 = vld [vmem:[%s6783_s7 + $0x13d0] sm:$0xff]  ;;  %v1068_v44 = vld [vmem:[%s6783_s7 + $0x12c8] sm:$0xff] }
 0x3ca   : > { %3873 = vmatprep.subr.mxu0 %v1164_v60  ;;  %3980 = vmatprep.subr.mxu1 %v1166_v12  ;;  %v1070_v60 = vld [vmem:[%s6783_s7 + $0x12d8] sm:$0xff]  ;;  %v1067_v12 = vld [vmem:[%s6783_s7 + $0x12c0] sm:$0xff] }
 0x3cd   : > { %3874 = vmatpush2.xpose.msra.mxu0 %v1163_v63  ;;  %3981 = vmatpush2.xpose.msra.mxu1 %v1165_v11  ;;  %v1069_v63 = vld [vmem:[%s6783_s7 + $0x12d0] sm:$0xff]  ;;  %v1036_v11 = vld [vmem:[%s6783_s7 + $0x11c8] sm:$0xff] }
 0x3ce   : > { %3875 = vmatprep.subr.mxu0 %v1132_v17  ;;  %3982 = vmatprep.subr.mxu1 %v1134_v58  ;;  %v1038_v17 = vld [vmem:[%s6783_s7 + $0x11d8] sm:$0xff]  ;;  %v1035_v58 = vld [vmem:[%s6783_s7 + $0x11c0] sm:$0xff] }
 0x3d1   : > { %3876 = vmatpush2.xpose.msra.mxu0 %v1131_v59  ;;  %3983 = vmatpush2.xpose.msra.mxu1 %v1133_v46  ;;  %v1037_v59 = vld [vmem:[%s6783_s7 + $0x11d0] sm:$0xff]  ;;  %v1004_v46 = vld [vmem:[%s6783_s7 + $0x10c8] sm:$0xff] }
 0x3d2   : > { %3877 = vmatprep.subr.mxu0 %v1100_v36  ;;  %3984 = vmatprep.subr.mxu1 %v1102_v32  ;;  %v1006_v36 = vld [vmem:[%s6783_s7 + $0x10d8] sm:$0xff]  ;;  %v1003_v32 = vld [vmem:[%s6783_s7 + $0x10c0] sm:$0xff] }
 0x3d5   : > { %3878 = vmatpush2.xpose.msra.mxu0 %v1099_v55  ;;  %3985 = vmatpush2.xpose.msra.mxu1 %v1101_v18  ;;  %v1005_v55 = vld [vmem:[%s6783_s7 + $0x10d0] sm:$0xff]  ;;  %v976_v18 = vld [vmem:[%s6783_s7 + $0xfe8] sm:$0xff] }
 0x3d6   : > { %3879 = vmatprep.subr.mxu0 %v1068_v44  ;;  %3986 = vmatprep.subr.mxu1 %v1070_v60  ;;  %v978_v44 = vld [vmem:[%s6783_s7 + $0xff8] sm:$0xff]  ;;  %v267_v60 = vld [vmem:[#allocation2 + $0xc0] sm:$0xff] }
 0x3d9   : > { %3880 = vmatpush2.xpose.msra.mxu0 %v1067_v12  ;;  %3987 = vmatpush2.xpose.msra.mxu1 %v1069_v63  ;;  %v269_v12 = vld [vmem:[#allocation2 + $0xd0] sm:$0xff]  ;;  %v975_v63 = vld [vmem:[%s6783_s7 + $0xfe0] sm:$0xff] }
 0x3da   : > { %3881 = vmatprep.subr.mxu0 %v1036_v11  ;;  %3988 = vmatprep.subr.mxu1 %v1038_v17  ;;  %v977_v11 = vld [vmem:[%s6783_s7 + $0xff0] sm:$0xff]  ;;  %v300_v17 = vld [vmem:[#allocation2 + $0x1c8] sm:$0xff] }
 0x3dd   : > { %3882 = vmatpush2.xpose.msra.mxu0 %v1035_v58  ;;  %3989 = vmatpush2.xpose.msra.mxu1 %v1037_v59  ;;  %v944_v58 = vld [vmem:[%s6783_s7 + $0xee8] sm:$0xff]  ;;  %v946_v59 = vld [vmem:[%s6783_s7 + $0xef8] sm:$0xff] }
 0x3de   : > { %3883 = vmatprep.subr.mxu0 %v1004_v46  ;;  %3990 = vmatprep.subr.mxu1 %v1006_v36  ;;  %v302_v46 = vld [vmem:[#allocation2 + $0x1d8] sm:$0xff]  ;;  %v299_v36 = vld [vmem:[#allocation2 + $0x1c0] sm:$0xff] }
 0x3e1   : > { %3884 = vmatpush2.xpose.msra.mxu0 %v1003_v32  ;;  %3991 = vmatpush2.xpose.msra.mxu1 %v1005_v55  ;;  %v301_v32 = vld [vmem:[#allocation2 + $0x1d0] sm:$0xff]  ;;  %v943_v55 = vld [vmem:[%s6783_s7 + $0xee0] sm:$0xff] }
 0x3e2   : > { %4035 = vmatprep.subr.mxu0 %v976_v18  ;;  %4142 = vmatprep.subr.mxu1 %v978_v44  ;;  %v945_v18 = vld [vmem:[%s6783_s7 + $0xef0] sm:$0xff]  ;;  %v332_v44 = vld [vmem:[#allocation2 + $0x2c8] sm:$0xff] }
 0x3e4   : > { %3886 = vmatmul.mubr.f32.vlgmr.msra.gmra.mxu0 %v267_v60  ;;  %3993 = vmatmul.mubr.f32.vlgmr.msra.gmra.mxu1 %v269_v12  ;;  %v914_v60 = vld [vmem:[%s6783_s7 + $0xdf8] sm:$0xff] }
 0x3e5   : > { %4036 = vmatpush1.xpose.msra.mxu0 %v975_v63  ;;  %4143 = vmatpush1.xpose.msra.mxu1 %v977_v11  ;;  %v334_v12 = vld [vmem:[#allocation2 + $0x2d8] sm:$0xff]  ;;  %v331_v63 = vld [vmem:[#allocation2 + $0x2c0] sm:$0xff]  ;;  %v333_v11 = vld [vmem:[#allocation2 + $0x2d0] sm:$0xff] }
 0x3e6   : > { %3891 = vmatprep.mubr.f32.mxu0 %v300_v17  ;;  %4037 = vmatprep.subr.mxu0 %v944_v58  ;;  %v911_v17 = vld [vmem:[%s6783_s7 + $0xde0] sm:$0xff]  ;;  %v913_v58 = vld [vmem:[%s6783_s7 + $0xdf0] sm:$0xff] }
 0x3e7   : > { %4144 = vmatprep.subr.mxu1 %v946_v59  ;;  %3998 = vmatprep.mubr.f32.mxu1 %v302_v46  ;;  %v364_v59 = vld [vmem:[#allocation2 + $0x3c8] sm:$0xff] }
 0x3e8   : > { %3892 = vmatmul.mubr.f32.gmra.mxu0 %v299_v36  ;;  %3999 = vmatmul.mubr.f32.gmra.mxu1 %v301_v32  ;;  %v880_v46 = vld [vmem:[%s6783_s7 + $0xce8] sm:$0xff]  ;;  %v882_v36 = vld [vmem:[%s6783_s7 + $0xcf8] sm:$0xff] }
 0x3e9   : > { %4038 = vmatpush1.xpose.msra.mxu0 %v943_v55  ;;  %4145 = vmatpush1.xpose.msra.mxu1 %v945_v18  ;;  %v366_v32 = vld [vmem:[#allocation2 + $0x3d8] sm:$0xff]  ;;  %v363_v55 = vld [vmem:[#allocation2 + $0x3c0] sm:$0xff]  ;;  %v365_v18 = vld [vmem:[#allocation2 + $0x3d0] sm:$0xff] }
 0x3ea   : > { %3897 = vmatprep.mubr.f32.mxu0 %v332_v44  ;;  %4039 = vmatprep.subr.mxu0 %v912_v29  ;;  %v879_v29 = vld [vmem:[%s6783_s7 + $0xce0] sm:$0xff]  ;;  %v881_v44 = vld [vmem:[%s6783_s7 + $0xcf0] sm:$0xff] }
 0x3eb   : > { %4146 = vmatprep.subr.mxu1 %v914_v60  ;;  %4004 = vmatprep.mubr.f32.mxu1 %v334_v12  ;;  %v396_v60 = vld [vmem:[#allocation2 + $0x4c8] sm:$0xff] }
 0x3ec   : > { %3898 = vmatmul.mubr.f32.gmra.mxu0 %v331_v63  ;;  %4005 = vmatmul.mubr.f32.gmra.mxu1 %v333_v11  ;;  %v848_v12 = vld [vmem:[%s6783_s7 + $0xbe8] sm:$0xff]  ;;  %v850_v63 = vld [vmem:[%s6783_s7 + $0xbf8] sm:$0xff] }
 0x3ed   : > { %4040 = vmatpush1.xpose.msra.mxu0 %v911_v17  ;;  %4147 = vmatpush1.xpose.msra.mxu1 %v913_v58  ;;  %v398_v11 = vld [vmem:[#allocation2 + $0x4d8] sm:$0xff]  ;;  %v395_v17 = vld [vmem:[#allocation2 + $0x4c0] sm:$0xff]  ;;  %v397_v58 = vld [vmem:[#allocation2 + $0x4d0] sm:$0xff] }
 0x3ee   : > { %3903 = vmatprep.mubr.f32.mxu0 %v364_v59  ;;  %4041 = vmatprep.subr.mxu0 %v880_v46  ;;  %v847_v59 = vld [vmem:[%s6783_s7 + $0xbe0] sm:$0xff]  ;;  %v849_v46 = vld [vmem:[%s6783_s7 + $0xbf0] sm:$0xff] }
 0x3ef   : > { %4148 = vmatprep.subr.mxu1 %v882_v36  ;;  %4010 = vmatprep.mubr.f32.mxu1 %v366_v32  ;;  %v428_v36 = vld [vmem:[#allocation2 + $0x5c8] sm:$0xff] }
 0x3f0   : > { %3904 = vmatmul.mubr.f32.gmra.mxu0 %v363_v55  ;;  %4011 = vmatmul.mubr.f32.gmra.mxu1 %v365_v18  ;;  %v816_v32 = vld [vmem:[%s6783_s7 + $0xae8] sm:$0xff]  ;;  %v818_v55 = vld [vmem:[%s6783_s7 + $0xaf8] sm:$0xff] }
 0x3f1   : > { %4042 = vmatpush1.xpose.msra.mxu0 %v879_v29  ;;  %4149 = vmatpush1.xpose.msra.mxu1 %v881_v44  ;;  %v430_v18 = vld [vmem:[#allocation2 + $0x5d8] sm:$0xff]  ;;  %v427_v29 = vld [vmem:[#allocation2 + $0x5c0] sm:$0xff]  ;;  %v429_v44 = vld [vmem:[#allocation2 + $0x5d0] sm:$0xff] }
 0x3f2   : > { %3909 = vmatprep.mubr.f32.mxu0 %v396_v60  ;;  %4043 = vmatprep.subr.mxu0 %v848_v12  ;;  %v815_v60 = vld [vmem:[%s6783_s7 + $0xae0] sm:$0xff]  ;;  %v817_v12 = vld [vmem:[%s6783_s7 + $0xaf0] sm:$0xff] }
 0x3f3   : > { %4150 = vmatprep.subr.mxu1 %v850_v63  ;;  %4016 = vmatprep.mubr.f32.mxu1 %v398_v11  ;;  %v460_v63 = vld [vmem:[#allocation2 + $0x6c8] sm:$0xff] }
 0x3f4   : > { %3910 = vmatmul.mubr.f32.gmra.mxu0 %v395_v17  ;;  %4017 = vmatmul.mubr.f32.gmra.mxu1 %v397_v58  ;;  %v784_v11 = vld [vmem:[%s6783_s7 + $0x9e8] sm:$0xff]  ;;  %v786_v17 = vld [vmem:[%s6783_s7 + $0x9f8] sm:$0xff] }
 0x3f5   : > { %4044 = vmatpush1.xpose.msra.mxu0 %v847_v59  ;;  %4151 = vmatpush1.xpose.msra.mxu1 %v849_v46  ;;  %v462_v58 = vld [vmem:[#allocation2 + $0x6d8] sm:$0xff]  ;;  %v459_v59 = vld [vmem:[#allocation2 + $0x6c0] sm:$0xff]  ;;  %v461_v46 = vld [vmem:[#allocation2 + $0x6d0] sm:$0xff] }
 0x3f6   : > { %3915 = vmatprep.mubr.f32.mxu0 %v428_v36  ;;  %4045 = vmatprep.subr.mxu0 %v816_v32  ;;  %v783_v36 = vld [vmem:[%s6783_s7 + $0x9e0] sm:$0xff]  ;;  %v785_v32 = vld [vmem:[%s6783_s7 + $0x9f0] sm:$0xff] }
 0x3f7   : > { %4152 = vmatprep.subr.mxu1 %v818_v55  ;;  %4022 = vmatprep.mubr.f32.mxu1 %v430_v18  ;;  %v752_v55 = vld [vmem:[%s6783_s7 + $0x8e8] sm:$0xff]  ;;  %v754_v18 = vld [vmem:[%s6783_s7 + $0x8f8] sm:$0xff] }
 0x3f8   : > { %3916 = vmatmul.mubr.f32.gmra.mxu0 %v427_v29  ;;  %4023 = vmatmul.mubr.f32.gmra.mxu1 %v429_v44  ;;  %v272_v29 = vld [vmem:[#allocation2 + $0xe8] sm:$0xff]  ;;  %v274_v44 = vld [vmem:[#allocation2 + $0xf8] sm:$0xff] }
 0x3f9   : > { %4046 = vmatpush1.xpose.msra.mxu0 %v815_v60  ;;  %4153 = vmatpush1.xpose.msra.mxu1 %v817_v12  ;;  %v751_v60 = vld [vmem:[%s6783_s7 + $0x8e0] sm:$0xff]  ;;  %v753_v12 = vld [vmem:[%s6783_s7 + $0x8f0] sm:$0xff] }
 0x3fa   : > { %3921 = vmatprep.mubr.f32.mxu0 %v460_v63  ;;  %4047 = vmatprep.subr.mxu0 %v784_v11  ;;  %v720_v63 = vld [vmem:[%s6783_s7 + $0x7e8] sm:$0xff]  ;;  %v722_v11 = vld [vmem:[%s6783_s7 + $0x7f8] sm:$0xff] }
 0x3fb   : > { %4154 = vmatprep.subr.mxu1 %v786_v17  ;;  %4028 = vmatprep.mubr.f32.mxu1 %v462_v58  ;;  %v719_v17 = vld [vmem:[%s6783_s7 + $0x7e0] sm:$0xff]  ;;  %v721_v58 = vld [vmem:[%s6783_s7 + $0x7f0] sm:$0xff] }
 0x3fc   : > { %3922 = vmatmul.mubr.f32.gmra.mxu0 %v459_v59  ;;  %4029 = vmatmul.mubr.f32.gmra.mxu1 %v461_v46  ;;  %v688_v59 = vld [vmem:[%s6783_s7 + $0x6e8] sm:$0xff]  ;;  %v690_v46 = vld [vmem:[%s6783_s7 + $0x6f8] sm:$0xff] }
 0x3fd   : > { %4048 = vmatpush1.xpose.msra.mxu0 %v783_v36  ;;  %4155 = vmatpush1.xpose.msra.mxu1 %v785_v32  ;;  %v687_v36 = vld [vmem:[%s6783_s7 + $0x6e0] sm:$0xff]  ;;  %v689_v32 = vld [vmem:[%s6783_s7 + $0x6f0] sm:$0xff] }
 0x3fe   : > { %4049 = vmatprep.subr.mxu0 %v752_v55  ;;  %4156 = vmatprep.subr.mxu1 %v754_v18  ;;  %v656_v55 = vld [vmem:[%s6783_s7 + $0x5e8] sm:$0xff]  ;;  %v658_v18 = vld [vmem:[%s6783_s7 + $0x5f8] sm:$0xff] }
 0x3ff   : > { %4099 = vmatprep.mubr.f32.mxu0 %v272_v29  ;;  %4206 = vmatprep.mubr.f32.mxu1 %v274_v44  ;;  %v655_v29 = vld [vmem:[%s6783_s7 + $0x5e0] sm:$0xff]  ;;  %v657_v44 = vld [vmem:[%s6783_s7 + $0x5f0] sm:$0xff] }
 0x401   : > { %4050 = vmatpush1.xpose.msra.mxu0 %v751_v60  ;;  %4157 = vmatpush1.xpose.msra.mxu1 %v753_v12  ;;  %v624_v60 = vld [vmem:[%s6783_s7 + $0x4e8] sm:$0xff]  ;;  %v626_v12 = vld [vmem:[%s6783_s7 + $0x4f8] sm:$0xff] }
 0x402   : > { %4051 = vmatprep.subr.mxu0 %v720_v63  ;;  %4158 = vmatprep.subr.mxu1 %v722_v11  ;;  %v623_v63 = vld [vmem:[%s6783_s7 + $0x4e0] sm:$0xff]  ;;  %v625_v11 = vld [vmem:[%s6783_s7 + $0x4f0] sm:$0xff] }
 0x405   : > { %4052 = vmatpush1.xpose.msra.mxu0 %v719_v17  ;;  %4159 = vmatpush1.xpose.msra.mxu1 %v721_v58  ;;  %v592_v17 = vld [vmem:[%s6783_s7 + $0x3e8] sm:$0xff]  ;;  %v594_v58 = vld [vmem:[%s6783_s7 + $0x3f8] sm:$0xff] }
 0x406   : > { %4053 = vmatprep.subr.mxu0 %v688_v59  ;;  %4160 = vmatprep.subr.mxu1 %v690_v46  ;;  %v591_v59 = vld [vmem:[%s6783_s7 + $0x3e0] sm:$0xff]  ;;  %v593_v46 = vld [vmem:[%s6783_s7 + $0x3f0] sm:$0xff] }
 0x409   : > { %4054 = vmatpush1.xpose.msra.mxu0 %v687_v36  ;;  %4161 = vmatpush1.xpose.msra.mxu1 %v689_v32  ;;  %v560_v36 = vld [vmem:[%s6783_s7 + $0x2e8] sm:$0xff]  ;;  %v562_v32 = vld [vmem:[%s6783_s7 + $0x2f8] sm:$0xff] }
 0x40a   : > { %4055 = vmatprep.subr.mxu0 %v656_v55  ;;  %4162 = vmatprep.subr.mxu1 %v658_v18  ;;  %v559_v55 = vld [vmem:[%s6783_s7 + $0x2e0] sm:$0xff]  ;;  %v561_v18 = vld [vmem:[%s6783_s7 + $0x2f0] sm:$0xff] }
 0x40d   : > { %4056 = vmatpush1.xpose.msra.mxu0 %v655_v29  ;;  %4163 = vmatpush1.xpose.msra.mxu1 %v657_v44  ;;  %v528_v29 = vld [vmem:[%s6783_s7 + $0x1e8] sm:$0xff]  ;;  %v530_v44 = vld [vmem:[%s6783_s7 + $0x1f8] sm:$0xff] }
 0x40e   : > { %4057 = vmatprep.subr.mxu0 %v624_v60  ;;  %4164 = vmatprep.subr.mxu1 %v626_v12  ;;  %v527_v60 = vld [vmem:[%s6783_s7 + $0x1e0] sm:$0xff]  ;;  %v529_v12 = vld [vmem:[%s6783_s7 + $0x1f0] sm:$0xff] }
 0x411   : > { %4058 = vmatpush1.xpose.msra.mxu0 %v623_v63  ;;  %4165 = vmatpush1.xpose.msra.mxu1 %v625_v11  ;;  %v496_v63 = vld [vmem:[%s6783_s7 + $0xe8] sm:$0xff]  ;;  %v498_v11 = vld [vmem:[%s6783_s7 + $0xf8] sm:$0xff] }
 0x412   : > { %4059 = vmatprep.subr.mxu0 %v592_v17  ;;  %4166 = vmatprep.subr.mxu1 %v594_v58  ;;  %v495_v17 = vld [vmem:[%s6783_s7 + $0xe0] sm:$0xff]  ;;  %v497_v58 = vld [vmem:[%s6783_s7 + $0xf0] sm:$0xff] }
 0x415   : > { %4060 = vmatpush1.xpose.msra.mxu0 %v591_v59  ;;  %4167 = vmatpush1.xpose.msra.mxu1 %v593_v46  ;;  %v1488_v59 = vld [vmem:[%s6783_s7 + $0x1fe8] sm:$0xff]  ;;  %v1490_v46 = vld [vmem:[%s6783_s7 + $0x1ff8] sm:$0xff] }
 0x416   : > { %4061 = vmatprep.subr.mxu0 %v560_v36  ;;  %4168 = vmatprep.subr.mxu1 %v562_v32  ;;  %v1487_v36 = vld [vmem:[%s6783_s7 + $0x1fe0] sm:$0xff]  ;;  %v1489_v32 = vld [vmem:[%s6783_s7 + $0x1ff0] sm:$0xff] }
 0x419   : > { %4062 = vmatpush1.xpose.msra.mxu0 %v559_v55  ;;  %4169 = vmatpush1.xpose.msra.mxu1 %v561_v18  ;;  %v1456_v55 = vld [vmem:[%s6783_s7 + $0x1ee8] sm:$0xff]  ;;  %v1458_v18 = vld [vmem:[%s6783_s7 + $0x1ef8] sm:$0xff] }
 0x41a   : > { %4063 = vmatprep.subr.mxu0 %v528_v29  ;;  %4170 = vmatprep.subr.mxu1 %v530_v44  ;;  %v1455_v29 = vld [vmem:[%s6783_s7 + $0x1ee0] sm:$0xff]  ;;  %v1457_v44 = vld [vmem:[%s6783_s7 + $0x1ef0] sm:$0xff] }
 0x41d   : > { %4064 = vmatpush1.xpose.msra.mxu0 %v527_v60  ;;  %4171 = vmatpush1.xpose.msra.mxu1 %v529_v12  ;;  %v1424_v60 = vld [vmem:[%s6783_s7 + $0x1de8] sm:$0xff]  ;;  %v1426_v12 = vld [vmem:[%s6783_s7 + $0x1df8] sm:$0xff] }
 0x41e   : > { %4065 = vmatprep.subr.mxu0 %v496_v63  ;;  %4172 = vmatprep.subr.mxu1 %v498_v11  ;;  %v1423_v63 = vld [vmem:[%s6783_s7 + $0x1de0] sm:$0xff]  ;;  %v1425_v11 = vld [vmem:[%s6783_s7 + $0x1df0] sm:$0xff] }
 0x421   : > { %4066 = vmatpush1.xpose.msra.mxu0 %v495_v17  ;;  %4173 = vmatpush1.xpose.msra.mxu1 %v497_v58  ;;  %v1392_v17 = vld [vmem:[%s6783_s7 + $0x1ce8] sm:$0xff]  ;;  %v1394_v58 = vld [vmem:[%s6783_s7 + $0x1cf8] sm:$0xff] }
 0x422   : > { %4067 = vmatprep.subr.mxu0 %v1488_v59  ;;  %4174 = vmatprep.subr.mxu1 %v1490_v46  ;;  %v1391_v59 = vld [vmem:[%s6783_s7 + $0x1ce0] sm:$0xff]  ;;  %v1393_v46 = vld [vmem:[%s6783_s7 + $0x1cf0] sm:$0xff] }
 0x425   : > { %4068 = vmatpush2.xpose.msra.mxu0 %v1487_v36  ;;  %4175 = vmatpush2.xpose.msra.mxu1 %v1489_v32  ;;  %v1360_v36 = vld [vmem:[%s6783_s7 + $0x1be8] sm:$0xff]  ;;  %v1362_v32 = vld [vmem:[%s6783_s7 + $0x1bf8] sm:$0xff] }
 0x426   : > { %4069 = vmatprep.subr.mxu0 %v1456_v55  ;;  %4176 = vmatprep.subr.mxu1 %v1458_v18  ;;  %v1359_v55 = vld [vmem:[%s6783_s7 + $0x1be0] sm:$0xff]  ;;  %v1361_v18 = vld [vmem:[%s6783_s7 + $0x1bf0] sm:$0xff] }
 0x429   : > { %4070 = vmatpush2.xpose.msra.mxu0 %v1455_v29  ;;  %4177 = vmatpush2.xpose.msra.mxu1 %v1457_v44  ;;  %v1328_v29 = vld [vmem:[%s6783_s7 + $0x1ae8] sm:$0xff]  ;;  %v1330_v44 = vld [vmem:[%s6783_s7 + $0x1af8] sm:$0xff] }
 0x42a   : > { %4071 = vmatprep.subr.mxu0 %v1424_v60  ;;  %4178 = vmatprep.subr.mxu1 %v1426_v12  ;;  %v1327_v60 = vld [vmem:[%s6783_s7 + $0x1ae0] sm:$0xff]  ;;  %v1329_v12 = vld [vmem:[%s6783_s7 + $0x1af0] sm:$0xff] }
 0x42d   : > { %4072 = vmatpush2.xpose.msra.mxu0 %v1423_v63  ;;  %4179 = vmatpush2.xpose.msra.mxu1 %v1425_v11  ;;  %v1296_v63 = vld [vmem:[%s6783_s7 + $0x19e8] sm:$0xff]  ;;  %v1298_v11 = vld [vmem:[%s6783_s7 + $0x19f8] sm:$0xff] }
 0x42e   : > { %4073 = vmatprep.subr.mxu0 %v1392_v17  ;;  %4180 = vmatprep.subr.mxu1 %v1394_v58  ;;  %v1295_v17 = vld [vmem:[%s6783_s7 + $0x19e0] sm:$0xff]  ;;  %v1297_v58 = vld [vmem:[%s6783_s7 + $0x19f0] sm:$0xff] }
 0x431   : > { %4074 = vmatpush2.xpose.msra.mxu0 %v1391_v59  ;;  %4181 = vmatpush2.xpose.msra.mxu1 %v1393_v46  ;;  %v1264_v59 = vld [vmem:[%s6783_s7 + $0x18e8] sm:$0xff]  ;;  %v1266_v46 = vld [vmem:[%s6783_s7 + $0x18f8] sm:$0xff] }
 0x432   : > { %4075 = vmatprep.subr.mxu0 %v1360_v36  ;;  %4182 = vmatprep.subr.mxu1 %v1362_v32  ;;  %v1263_v36 = vld [vmem:[%s6783_s7 + $0x18e0] sm:$0xff]  ;;  %v1265_v32 = vld [vmem:[%s6783_s7 + $0x18f0] sm:$0xff] }
 0x435   : > { %4076 = vmatpush2.xpose.msra.mxu0 %v1359_v55  ;;  %4183 = vmatpush2.xpose.msra.mxu1 %v1361_v18  ;;  %v1232_v55 = vld [vmem:[%s6783_s7 + $0x17e8] sm:$0xff]  ;;  %v1234_v18 = vld [vmem:[%s6783_s7 + $0x17f8] sm:$0xff] }
 0x436   : > { %4077 = vmatprep.subr.mxu0 %v1328_v29  ;;  %4184 = vmatprep.subr.mxu1 %v1330_v44  ;;  %v1231_v29 = vld [vmem:[%s6783_s7 + $0x17e0] sm:$0xff]  ;;  %v1233_v44 = vld [vmem:[%s6783_s7 + $0x17f0] sm:$0xff] }
 0x439   : > { %4078 = vmatpush2.xpose.msra.mxu0 %v1327_v60  ;;  %4185 = vmatpush2.xpose.msra.mxu1 %v1329_v12  ;;  %v1200_v60 = vld [vmem:[%s6783_s7 + $0x16e8] sm:$0xff]  ;;  %v1202_v12 = vld [vmem:[%s6783_s7 + $0x16f8] sm:$0xff] }
 0x43a   : > { %4079 = vmatprep.subr.mxu0 %v1296_v63  ;;  %4186 = vmatprep.subr.mxu1 %v1298_v11  ;;  %v1199_v63 = vld [vmem:[%s6783_s7 + $0x16e0] sm:$0xff]  ;;  %v1201_v11 = vld [vmem:[%s6783_s7 + $0x16f0] sm:$0xff] }
 0x43d   : > { %4080 = vmatpush2.xpose.msra.mxu0 %v1295_v17  ;;  %4187 = vmatpush2.xpose.msra.mxu1 %v1297_v58  ;;  %v1168_v17 = vld [vmem:[%s6783_s7 + $0x15e8] sm:$0xff]  ;;  %v1170_v58 = vld [vmem:[%s6783_s7 + $0x15f8] sm:$0xff] }
 0x43e   : > { %4081 = vmatprep.subr.mxu0 %v1264_v59  ;;  %4188 = vmatprep.subr.mxu1 %v1266_v46  ;;  %v1167_v59 = vld [vmem:[%s6783_s7 + $0x15e0] sm:$0xff]  ;;  %v1169_v46 = vld [vmem:[%s6783_s7 + $0x15f0] sm:$0xff] }
 0x441   : > { %4082 = vmatpush2.xpose.msra.mxu0 %v1263_v36  ;;  %4189 = vmatpush2.xpose.msra.mxu1 %v1265_v32  ;;  %v1136_v36 = vld [vmem:[%s6783_s7 + $0x14e8] sm:$0xff]  ;;  %v1138_v32 = vld [vmem:[%s6783_s7 + $0x14f8] sm:$0xff] }
 0x442   : > { %4083 = vmatprep.subr.mxu0 %v1232_v55  ;;  %4190 = vmatprep.subr.mxu1 %v1234_v18  ;;  %v1135_v55 = vld [vmem:[%s6783_s7 + $0x14e0] sm:$0xff]  ;;  %v1137_v18 = vld [vmem:[%s6783_s7 + $0x14f0] sm:$0xff] }
 0x445   : > { %4084 = vmatpush2.xpose.msra.mxu0 %v1231_v29  ;;  %4191 = vmatpush2.xpose.msra.mxu1 %v1233_v44  ;;  %v1104_v29 = vld [vmem:[%s6783_s7 + $0x13e8] sm:$0xff]  ;;  %v1106_v44 = vld [vmem:[%s6783_s7 + $0x13f8] sm:$0xff] }
 0x446   : > { %4085 = vmatprep.subr.mxu0 %v1200_v60  ;;  %4192 = vmatprep.subr.mxu1 %v1202_v12  ;;  %v1103_v60 = vld [vmem:[%s6783_s7 + $0x13e0] sm:$0xff]  ;;  %v1105_v12 = vld [vmem:[%s6783_s7 + $0x13f0] sm:$0xff] }
 0x449   : > { %4086 = vmatpush2.xpose.msra.mxu0 %v1199_v63  ;;  %4193 = vmatpush2.xpose.msra.mxu1 %v1201_v11  ;;  %v1072_v63 = vld [vmem:[%s6783_s7 + $0x12e8] sm:$0xff]  ;;  %v1074_v11 = vld [vmem:[%s6783_s7 + $0x12f8] sm:$0xff] }
 0x44a   : > { %4087 = vmatprep.subr.mxu0 %v1168_v17  ;;  %4194 = vmatprep.subr.mxu1 %v1170_v58  ;;  %v1071_v17 = vld [vmem:[%s6783_s7 + $0x12e0] sm:$0xff]  ;;  %v1073_v58 = vld [vmem:[%s6783_s7 + $0x12f0] sm:$0xff] }
 0x44d   : > { %4088 = vmatpush2.xpose.msra.mxu0 %v1167_v59  ;;  %4195 = vmatpush2.xpose.msra.mxu1 %v1169_v46  ;;  %v1040_v59 = vld [vmem:[%s6783_s7 + $0x11e8] sm:$0xff]  ;;  %v1042_v46 = vld [vmem:[%s6783_s7 + $0x11f8] sm:$0xff] }
 0x44e   : > { %4089 = vmatprep.subr.mxu0 %v1136_v36  ;;  %4196 = vmatprep.subr.mxu1 %v1138_v32  ;;  %v1039_v36 = vld [vmem:[%s6783_s7 + $0x11e0] sm:$0xff]  ;;  %v1041_v32 = vld [vmem:[%s6783_s7 + $0x11f0] sm:$0xff] }
 0x451   : > { %4090 = vmatpush2.xpose.msra.mxu0 %v1135_v55  ;;  %4197 = vmatpush2.xpose.msra.mxu1 %v1137_v18  ;;  %v1008_v55 = vld [vmem:[%s6783_s7 + $0x10e8] sm:$0xff]  ;;  %v1010_v18 = vld [vmem:[%s6783_s7 + $0x10f8] sm:$0xff] }
 0x452   : > { %4091 = vmatprep.subr.mxu0 %v1104_v29  ;;  %4198 = vmatprep.subr.mxu1 %v1106_v44  ;;  %v1007_v29 = vld [vmem:[%s6783_s7 + $0x10e0] sm:$0xff]  ;;  %v1009_v44 = vld [vmem:[%s6783_s7 + $0x10f0] sm:$0xff] }
 0x455   : > { %4092 = vmatpush2.xpose.msra.mxu0 %v1103_v60  ;;  %4199 = vmatpush2.xpose.msra.mxu1 %v1105_v12  ;;  %v1972_v60 = vld [vmem:[%s6783_s7 + $0x2f08] sm:$0xff]  ;;  %v1974_v12 = vld [vmem:[%s6783_s7 + $0x2f18] sm:$0xff] }
 0x456   : > { %4093 = vmatprep.subr.mxu0 %v1072_v63  ;;  %4200 = vmatprep.subr.mxu1 %v1074_v11  ;;  %v271_v63 = vld [vmem:[#allocation2 + $0xe0] sm:$0xff]  ;;  %v273_v11 = vld [vmem:[#allocation2 + $0xf0] sm:$0xff] }
 0x459   : > { %4094 = vmatpush2.xpose.msra.mxu0 %v1071_v17  ;;  %4201 = vmatpush2.xpose.msra.mxu1 %v1073_v58  ;;  %v1971_v17 = vld [vmem:[%s6783_s7 + $0x2f00] sm:$0xff]  ;;  %v1973_v58 = vld [vmem:[%s6783_s7 + $0x2f10] sm:$0xff] }
 0x45a   : > { %4095 = vmatprep.subr.mxu0 %v1040_v59  ;;  %4202 = vmatprep.subr.mxu1 %v1042_v46  ;;  %v304_v59 = vld [vmem:[#allocation2 + $0x1e8] sm:$0xff] }
 0x45b   : > { %v1940_v46 = vld [vmem:[%s6783_s7 + $0x2e08] sm:$0xff] }
 0x45d   : > { %4096 = vmatpush2.xpose.msra.mxu0 %v1039_v36  ;;  %4203 = vmatpush2.xpose.msra.mxu1 %v1041_v32  ;;  %v1942_v36 = vld [vmem:[%s6783_s7 + $0x2e18] sm:$0xff] }
 0x45e   : > { %4097 = vmatprep.subr.mxu0 %v1008_v55  ;;  %4204 = vmatprep.subr.mxu1 %v1010_v18  ;;  %v306_v32 = vld [vmem:[#allocation2 + $0x1f8] sm:$0xff]  ;;  %v303_v55 = vld [vmem:[#allocation2 + $0x1e0] sm:$0xff]  ;;  %v305_v18 = vld [vmem:[#allocation2 + $0x1f0] sm:$0xff] }
 0x461   : > { %4098 = vmatpush2.xpose.msra.mxu0 %v1007_v29  ;;  %4205 = vmatpush2.xpose.msra.mxu1 %v1009_v44  ;;  %v1939_v29 = vld [vmem:[%s6783_s7 + $0x2e00] sm:$0xff]  ;;  %v1941_v44 = vld [vmem:[%s6783_s7 + $0x2e10] sm:$0xff] }
 0x462   : > { %4249 = vmatprep.subr.mxu0 %v1972_v60  ;;  %4356 = vmatprep.subr.mxu1 %v1974_v12  ;;  %v336_v60 = vld [vmem:[#allocation2 + $0x2e8] sm:$0xff] }
 0x463   : > { %v1908_v12 = vld [vmem:[%s6783_s7 + $0x2d08] sm:$0xff] }
 0x464   : > { %4100 = vmatmul.mubr.f32.vlgmr.msra.gmra.mxu0 %v271_v63  ;;  %4207 = vmatmul.mubr.f32.vlgmr.msra.gmra.mxu1 %v273_v11  ;;  %v1910_v63 = vld [vmem:[%s6783_s7 + $0x2d18] sm:$0xff] }
 0x465   : > { %4250 = vmatpush1.xpose.msra.mxu0 %v1971_v17  ;;  %4357 = vmatpush1.xpose.msra.mxu1 %v1973_v58  ;;  %v338_v11 = vld [vmem:[#allocation2 + $0x2f8] sm:$0xff]  ;;  %v335_v17 = vld [vmem:[#allocation2 + $0x2e0] sm:$0xff]  ;;  %v337_v58 = vld [vmem:[#allocation2 + $0x2f0] sm:$0xff] }
 0x466   : > { %4105 = vmatprep.mubr.f32.mxu0 %v304_v59  ;;  %4251 = vmatprep.subr.mxu0 %v1940_v46  ;;  %v1907_v59 = vld [vmem:[%s6783_s7 + $0x2d00] sm:$0xff]  ;;  %v1909_v46 = vld [vmem:[%s6783_s7 + $0x2d10] sm:$0xff] }
 0x467   : > { %4358 = vmatprep.subr.mxu1 %v1942_v36  ;;  %4212 = vmatprep.mubr.f32.mxu1 %v306_v32  ;;  %v368_v36 = vld [vmem:[#allocation2 + $0x3e8] sm:$0xff] }
 0x468   : > { %4106 = vmatmul.mubr.f32.gmra.mxu0 %v303_v55  ;;  %4213 = vmatmul.mubr.f32.gmra.mxu1 %v305_v18  ;;  %v1876_v32 = vld [vmem:[%s6783_s7 + $0x2c08] sm:$0xff]  ;;  %v1878_v55 = vld [vmem:[%s6783_s7 + $0x2c18] sm:$0xff] }
 0x469   : > { %4252 = vmatpush1.xpose.msra.mxu0 %v1939_v29  ;;  %4359 = vmatpush1.xpose.msra.mxu1 %v1941_v44  ;;  %v370_v18 = vld [vmem:[#allocation2 + $0x3f8] sm:$0xff]  ;;  %v367_v29 = vld [vmem:[#allocation2 + $0x3e0] sm:$0xff]  ;;  %v369_v44 = vld [vmem:[#allocation2 + $0x3f0] sm:$0xff] }
 0x46a   : > { %4111 = vmatprep.mubr.f32.mxu0 %v336_v60  ;;  %4253 = vmatprep.subr.mxu0 %v1908_v12  ;;  %v1875_v60 = vld [vmem:[%s6783_s7 + $0x2c00] sm:$0xff]  ;;  %v1877_v12 = vld [vmem:[%s6783_s7 + $0x2c10] sm:$0xff] }
 0x46b   : > { %4360 = vmatprep.subr.mxu1 %v1910_v63  ;;  %4218 = vmatprep.mubr.f32.mxu1 %v338_v11  ;;  %v400_v63 = vld [vmem:[#allocation2 + $0x4e8] sm:$0xff] }
 0x46c   : > { %4112 = vmatmul.mubr.f32.gmra.mxu0 %v335_v17  ;;  %4219 = vmatmul.mubr.f32.gmra.mxu1 %v337_v58  ;;  %v1844_v11 = vld [vmem:[%s6783_s7 + $0x2b08] sm:$0xff]  ;;  %v1846_v17 = vld [vmem:[%s6783_s7 + $0x2b18] sm:$0xff] }
 0x46d   : > { %4254 = vmatpush1.xpose.msra.mxu0 %v1907_v59  ;;  %4361 = vmatpush1.xpose.msra.mxu1 %v1909_v46  ;;  %v402_v58 = vld [vmem:[#allocation2 + $0x4f8] sm:$0xff]  ;;  %v399_v59 = vld [vmem:[#allocation2 + $0x4e0] sm:$0xff]  ;;  %v401_v46 = vld [vmem:[#allocation2 + $0x4f0] sm:$0xff] }
 0x46e   : > { %4117 = vmatprep.mubr.f32.mxu0 %v368_v36  ;;  %4255 = vmatprep.subr.mxu0 %v1876_v32  ;;  %v1843_v36 = vld [vmem:[%s6783_s7 + $0x2b00] sm:$0xff]  ;;  %v1845_v32 = vld [vmem:[%s6783_s7 + $0x2b10] sm:$0xff] }
 0x46f   : > { %4362 = vmatprep.subr.mxu1 %v1878_v55  ;;  %4224 = vmatprep.mubr.f32.mxu1 %v370_v18  ;;  %v432_v55 = vld [vmem:[#allocation2 + $0x5e8] sm:$0xff] }
 0x470   : > { %4118 = vmatmul.mubr.f32.gmra.mxu0 %v367_v29  ;;  %4225 = vmatmul.mubr.f32.gmra.mxu1 %v369_v44  ;;  %v1812_v18 = vld [vmem:[%s6783_s7 + $0x2a08] sm:$0xff]  ;;  %v1814_v29 = vld [vmem:[%s6783_s7 + $0x2a18] sm:$0xff] }
 0x471   : > { %4256 = vmatpush1.xpose.msra.mxu0 %v1875_v60  ;;  %4363 = vmatpush1.xpose.msra.mxu1 %v1877_v12  ;;  %v434_v44 = vld [vmem:[#allocation2 + $0x5f8] sm:$0xff]  ;;  %v431_v60 = vld [vmem:[#allocation2 + $0x5e0] sm:$0xff]  ;;  %v433_v12 = vld [vmem:[#allocation2 + $0x5f0] sm:$0xff] }
 0x472   : > { %4123 = vmatprep.mubr.f32.mxu0 %v400_v63  ;;  %4257 = vmatprep.subr.mxu0 %v1844_v11  ;;  %v1811_v63 = vld [vmem:[%s6783_s7 + $0x2a00] sm:$0xff]  ;;  %v1813_v11 = vld [vmem:[%s6783_s7 + $0x2a10] sm:$0xff] }
 0x473   : > { %4364 = vmatprep.subr.mxu1 %v1846_v17  ;;  %4230 = vmatprep.mubr.f32.mxu1 %v402_v58  ;;  %v464_v17 = vld [vmem:[#allocation2 + $0x6e8] sm:$0xff] }
 0x474   : > { %4124 = vmatmul.mubr.f32.gmra.mxu0 %v399_v59  ;;  %4231 = vmatmul.mubr.f32.gmra.mxu1 %v401_v46  ;;  %v1780_v58 = vld [vmem:[%s6783_s7 + $0x2908] sm:$0xff]  ;;  %v1782_v59 = vld [vmem:[%s6783_s7 + $0x2918] sm:$0xff] }
 0x475   : > { %4258 = vmatpush1.xpose.msra.mxu0 %v1843_v36  ;;  %4365 = vmatpush1.xpose.msra.mxu1 %v1845_v32  ;;  %v466_v46 = vld [vmem:[#allocation2 + $0x6f8] sm:$0xff]  ;;  %v463_v36 = vld [vmem:[#allocation2 + $0x6e0] sm:$0xff]  ;;  %v465_v32 = vld [vmem:[#allocation2 + $0x6f0] sm:$0xff] }
 0x476   : > { %4129 = vmatprep.mubr.f32.mxu0 %v432_v55  ;;  %4259 = vmatprep.subr.mxu0 %v1812_v18  ;;  %v1779_v55 = vld [vmem:[%s6783_s7 + $0x2900] sm:$0xff]  ;;  %v1781_v18 = vld [vmem:[%s6783_s7 + $0x2910] sm:$0xff] }
 0x477   : > { %4366 = vmatprep.subr.mxu1 %v1814_v29  ;;  %4236 = vmatprep.mubr.f32.mxu1 %v434_v44  ;;  %v1748_v29 = vld [vmem:[%s6783_s7 + $0x2808] sm:$0xff]  ;;  %v1750_v44 = vld [vmem:[%s6783_s7 + $0x2818] sm:$0xff] }
 0x478   : > { %4130 = vmatmul.mubr.f32.gmra.mxu0 %v431_v60  ;;  %4237 = vmatmul.mubr.f32.gmra.mxu1 %v433_v12  ;;  %v1747_v60 = vld [vmem:[%s6783_s7 + $0x2800] sm:$0xff]  ;;  %v1749_v12 = vld [vmem:[%s6783_s7 + $0x2810] sm:$0xff] }
 0x479   : > { %4260 = vmatpush1.xpose.msra.mxu0 %v1811_v63  ;;  %4367 = vmatpush1.xpose.msra.mxu1 %v1813_v11  ;;  %v1716_v63 = vld [vmem:[%s6783_s7 + $0x2708] sm:$0xff]  ;;  %v1718_v11 = vld [vmem:[%s6783_s7 + $0x2718] sm:$0xff] }
 0x47a   : > { %4135 = vmatprep.mubr.f32.mxu0 %v464_v17  ;;  %4261 = vmatprep.subr.mxu0 %v1780_v58  ;;  %v6199_v17 = vld [vmem:[#allocation2 + $0x8] sm:$0xff]  ;;  %v6200_v58 = vld [vmem:[#allocation2 + $0x18] sm:$0xff] }
 0x47b   : > { %4368 = vmatprep.subr.mxu1 %v1782_v59  ;;  %4242 = vmatprep.mubr.f32.mxu1 %v466_v46  ;;  %v1715_v59 = vld [vmem:[%s6783_s7 + $0x2700] sm:$0xff]  ;;  %v1717_v46 = vld [vmem:[%s6783_s7 + $0x2710] sm:$0xff] }
 0x47c   : > { %4136 = vmatmul.mubr.f32.gmra.mxu0 %v463_v36  ;;  %4243 = vmatmul.mubr.f32.gmra.mxu1 %v465_v32  ;;  %v1684_v36 = vld [vmem:[%s6783_s7 + $0x2608] sm:$0xff]  ;;  %v1686_v32 = vld [vmem:[%s6783_s7 + $0x2618] sm:$0xff] }
 0x47d   : > { %4262 = vmatpush1.xpose.msra.mxu0 %v1779_v55  ;;  %4369 = vmatpush1.xpose.msra.mxu1 %v1781_v18  ;;  %v1683_v55 = vld [vmem:[%s6783_s7 + $0x2600] sm:$0xff]  ;;  %v1685_v18 = vld [vmem:[%s6783_s7 + $0x2610] sm:$0xff] }
 0x47e   : > { %4263 = vmatprep.subr.mxu0 %v1748_v29  ;;  %4370 = vmatprep.subr.mxu1 %v1750_v44  ;;  %v1652_v29 = vld [vmem:[%s6783_s7 + $0x2508] sm:$0xff]  ;;  %v1654_v44 = vld [vmem:[%s6783_s7 + $0x2518] sm:$0xff] }
 0x47f   : > { %4313 = vmatprep.mubr.f32.mxu0 %v6199_v17  ;;  %4420 = vmatprep.mubr.f32.mxu1 %v6200_v58  ;;  %v1619_v17 = vld [vmem:[%s6783_s7 + $0x2400] sm:$0xff]  ;;  %v1621_v58 = vld [vmem:[%s6783_s7 + $0x2410] sm:$0xff] }
 0x481   : > { %4264 = vmatpush1.xpose.msra.mxu0 %v1747_v60  ;;  %4371 = vmatpush1.xpose.msra.mxu1 %v1749_v12  ;;  %v1651_v60 = vld [vmem:[%s6783_s7 + $0x2500] sm:$0xff]  ;;  %v1653_v12 = vld [vmem:[%s6783_s7 + $0x2510] sm:$0xff] }
 0x482   : > { %4265 = vmatprep.subr.mxu0 %v1716_v63  ;;  %4372 = vmatprep.subr.mxu1 %v1718_v11  ;;  %v1620_v63 = vld [vmem:[%s6783_s7 + $0x2408] sm:$0xff]  ;;  %v1622_v11 = vld [vmem:[%s6783_s7 + $0x2418] sm:$0xff] }
 0x485   : > { %4266 = vmatpush1.xpose.msra.mxu0 %v1715_v59  ;;  %4373 = vmatpush1.xpose.msra.mxu1 %v1717_v46  ;;  %v1588_v59 = vld [vmem:[%s6783_s7 + $0x2308] sm:$0xff]  ;;  %v1590_v46 = vld [vmem:[%s6783_s7 + $0x2318] sm:$0xff] }
 0x486   : > { %4267 = vmatprep.subr.mxu0 %v1684_v36  ;;  %4374 = vmatprep.subr.mxu1 %v1686_v32  ;;  %v1587_v36 = vld [vmem:[%s6783_s7 + $0x2300] sm:$0xff]  ;;  %v1589_v32 = vld [vmem:[%s6783_s7 + $0x2310] sm:$0xff] }
 0x489   : > { %4268 = vmatpush1.xpose.msra.mxu0 %v1683_v55  ;;  %4375 = vmatpush1.xpose.msra.mxu1 %v1685_v18  ;;  %v1556_v55 = vld [vmem:[%s6783_s7 + $0x2208] sm:$0xff]  ;;  %v1558_v18 = vld [vmem:[%s6783_s7 + $0x2218] sm:$0xff] }
 0x48a   : > { %4269 = vmatprep.subr.mxu0 %v1652_v29  ;;  %4376 = vmatprep.subr.mxu1 %v1654_v44  ;;  %v1555_v29 = vld [vmem:[%s6783_s7 + $0x2200] sm:$0xff]  ;;  %v1557_v44 = vld [vmem:[%s6783_s7 + $0x2210] sm:$0xff] }
 0x48d   : > { %4270 = vmatpush1.xpose.msra.mxu0 %v1651_v60  ;;  %4377 = vmatpush1.xpose.msra.mxu1 %v1653_v12  ;;  %v1524_v60 = vld [vmem:[%s6783_s7 + $0x2108] sm:$0xff]  ;;  %v1526_v12 = vld [vmem:[%s6783_s7 + $0x2118] sm:$0xff] }
 0x48e   : > { %4271 = vmatprep.subr.mxu0 %v1620_v63  ;;  %4378 = vmatprep.subr.mxu1 %v1622_v11  ;;  %v1523_v63 = vld [vmem:[%s6783_s7 + $0x2100] sm:$0xff]  ;;  %v1525_v11 = vld [vmem:[%s6783_s7 + $0x2110] sm:$0xff] }
 0x491   : > { %4272 = vmatpush1.xpose.msra.mxu0 %v1619_v17  ;;  %4379 = vmatpush1.xpose.msra.mxu1 %v1621_v58  ;;  %v1492_v17 = vld [vmem:[%s6783_s7 + $0x2008] sm:$0xff]  ;;  %v1494_v58 = vld [vmem:[%s6783_s7 + $0x2018] sm:$0xff] }
 0x492   : > { %4273 = vmatprep.subr.mxu0 %v1588_v59  ;;  %4380 = vmatprep.subr.mxu1 %v1590_v46  ;;  %v1491_v59 = vld [vmem:[%s6783_s7 + $0x2000] sm:$0xff]  ;;  %v1493_v46 = vld [vmem:[%s6783_s7 + $0x2010] sm:$0xff] }
 0x495   : > { %4274 = vmatpush1.xpose.msra.mxu0 %v1587_v36  ;;  %4381 = vmatpush1.xpose.msra.mxu1 %v1589_v32  ;;  %v2484_v36 = vld [vmem:[%s6783_s7 + $0x3f08] sm:$0xff]  ;;  %v2486_v32 = vld [vmem:[%s6783_s7 + $0x3f18] sm:$0xff] }
 0x496   : > { %4275 = vmatprep.subr.mxu0 %v1556_v55  ;;  %4382 = vmatprep.subr.mxu1 %v1558_v18  ;;  %v2483_v55 = vld [vmem:[%s6783_s7 + $0x3f00] sm:$0xff]  ;;  %v2485_v18 = vld [vmem:[%s6783_s7 + $0x3f10] sm:$0xff] }
 0x499   : > { %4276 = vmatpush1.xpose.msra.mxu0 %v1555_v29  ;;  %4383 = vmatpush1.xpose.msra.mxu1 %v1557_v44  ;;  %v2452_v29 = vld [vmem:[%s6783_s7 + $0x3e08] sm:$0xff]  ;;  %v2454_v44 = vld [vmem:[%s6783_s7 + $0x3e18] sm:$0xff] }
 0x49a   : > { %4277 = vmatprep.subr.mxu0 %v1524_v60  ;;  %4384 = vmatprep.subr.mxu1 %v1526_v12  ;;  %v2451_v60 = vld [vmem:[%s6783_s7 + $0x3e00] sm:$0xff]  ;;  %v2453_v12 = vld [vmem:[%s6783_s7 + $0x3e10] sm:$0xff] }
 0x49d   : > { %4278 = vmatpush1.xpose.msra.mxu0 %v1523_v63  ;;  %4385 = vmatpush1.xpose.msra.mxu1 %v1525_v11  ;;  %v2420_v63 = vld [vmem:[%s6783_s7 + $0x3d08] sm:$0xff]  ;;  %v2422_v11 = vld [vmem:[%s6783_s7 + $0x3d18] sm:$0xff] }
 0x49e   : > { %4279 = vmatprep.subr.mxu0 %v1492_v17  ;;  %4386 = vmatprep.subr.mxu1 %v1494_v58  ;;  %v2419_v17 = vld [vmem:[%s6783_s7 + $0x3d00] sm:$0xff]  ;;  %v2421_v58 = vld [vmem:[%s6783_s7 + $0x3d10] sm:$0xff] }
 0x4a1   : > { %4280 = vmatpush1.xpose.msra.mxu0 %v1491_v59  ;;  %4387 = vmatpush1.xpose.msra.mxu1 %v1493_v46  ;;  %v2388_v59 = vld [vmem:[%s6783_s7 + $0x3c08] sm:$0xff]  ;;  %v2390_v46 = vld [vmem:[%s6783_s7 + $0x3c18] sm:$0xff] }
 0x4a2   : > { %4281 = vmatprep.subr.mxu0 %v2484_v36  ;;  %4388 = vmatprep.subr.mxu1 %v2486_v32  ;;  %v2387_v36 = vld [vmem:[%s6783_s7 + $0x3c00] sm:$0xff]  ;;  %v2389_v32 = vld [vmem:[%s6783_s7 + $0x3c10] sm:$0xff] }
 0x4a5   : > { %4282 = vmatpush2.xpose.msra.mxu0 %v2483_v55  ;;  %4389 = vmatpush2.xpose.msra.mxu1 %v2485_v18  ;;  %v2356_v55 = vld [vmem:[%s6783_s7 + $0x3b08] sm:$0xff]  ;;  %v2358_v18 = vld [vmem:[%s6783_s7 + $0x3b18] sm:$0xff] }
 0x4a6   : > { %4283 = vmatprep.subr.mxu0 %v2452_v29  ;;  %4390 = vmatprep.subr.mxu1 %v2454_v44  ;;  %v2355_v29 = vld [vmem:[%s6783_s7 + $0x3b00] sm:$0xff]  ;;  %v2357_v44 = vld [vmem:[%s6783_s7 + $0x3b10] sm:$0xff] }
 0x4a9   : > { %4284 = vmatpush2.xpose.msra.mxu0 %v2451_v60  ;;  %4391 = vmatpush2.xpose.msra.mxu1 %v2453_v12  ;;  %v2324_v60 = vld [vmem:[%s6783_s7 + $0x3a08] sm:$0xff]  ;;  %v2326_v12 = vld [vmem:[%s6783_s7 + $0x3a18] sm:$0xff] }
 0x4aa   : > { %4285 = vmatprep.subr.mxu0 %v2420_v63  ;;  %4392 = vmatprep.subr.mxu1 %v2422_v11  ;;  %v8149_v63 = vpop.f32.mrf.mxu0  ;;  %v8151_v11 = vpop.f32.mrf.mxu1 }
 0x4ab   : > { %9843 = vst [vmem:[#allocation44_spill] sm:$0xff] %v8149_v63  ;;  %9844 = vst [vmem:[#allocation45_spill] sm:$0xff] %v8151_v11 }
 0x4ad   : > { %4286 = vmatpush2.xpose.msra.mxu0 %v2419_v17  ;;  %4393 = vmatpush2.xpose.msra.mxu1 %v2421_v58  ;;  %v2323_v17 = vld [vmem:[%s6783_s7 + $0x3a00] sm:$0xff]  ;;  %v2325_v58 = vld [vmem:[%s6783_s7 + $0x3a10] sm:$0xff] }
 0x4ae   : > { %4287 = vmatprep.subr.mxu0 %v2388_v59  ;;  %4394 = vmatprep.subr.mxu1 %v2390_v46  ;;  %v2292_v59 = vld [vmem:[%s6783_s7 + $0x3908] sm:$0xff]  ;;  %v2294_v46 = vld [vmem:[%s6783_s7 + $0x3918] sm:$0xff] }
 0x4b1   : > { %4288 = vmatpush2.xpose.msra.mxu0 %v2387_v36  ;;  %4395 = vmatpush2.xpose.msra.mxu1 %v2389_v32  ;;  %v8157_v36 = vpop.f32.mrf.mxu0  ;;  %v8159_v32 = vpop.f32.mrf.mxu1 }
 0x4b2   : > { %4289 = vmatprep.subr.mxu0 %v2356_v55  ;;  %4396 = vmatprep.subr.mxu1 %v2358_v18  ;;  %v2291_v55 = vld [vmem:[%s6783_s7 + $0x3900] sm:$0xff]  ;;  %v2293_v18 = vld [vmem:[%s6783_s7 + $0x3910] sm:$0xff] }
 0x4b5   : > { %4290 = vmatpush2.xpose.msra.mxu0 %v2355_v29  ;;  %4397 = vmatpush2.xpose.msra.mxu1 %v2357_v44  ;;  %v2260_v29 = vld [vmem:[%s6783_s7 + $0x3808] sm:$0xff]  ;;  %v2262_v44 = vld [vmem:[%s6783_s7 + $0x3818] sm:$0xff] }
 0x4b6   : > { %4291 = vmatprep.subr.mxu0 %v2324_v60  ;;  %4398 = vmatprep.subr.mxu1 %v2326_v12  ;;  %v8165_v60 = vpop.f32.mrf.mxu0  ;;  %v8167_v12 = vpop.f32.mrf.mxu1 }
 0x4b7   : > { %9845 = vst [vmem:[#allocation46_spill] sm:$0xff] %v8167_v12  ;;  %v1882_v12 = vld [vmem:[%s6783_s7 + $0x2c38] sm:$0xff] }
 0x4b8   : > { %v8173_v11 = vpop.f32.mrf.mxu0  ;;  %v8175_v24 = vpop.f32.mrf.mxu1 }
 0x4b9   : > { %4292 = vmatpush2.xpose.msra.mxu0 %v2323_v17  ;;  %4399 = vmatpush2.xpose.msra.mxu1 %v2325_v58  ;;  %v2259_v17 = vld [vmem:[%s6783_s7 + $0x3800] sm:$0xff]  ;;  %v2261_v58 = vld [vmem:[%s6783_s7 + $0x3810] sm:$0xff]  ;;  %9846 = vst [vmem:[#allocation47_spill] sm:$0xff] %v8175_v24 }
 0x4ba   : > { %4293 = vmatprep.subr.mxu0 %v2292_v59  ;;  %4400 = vmatprep.subr.mxu1 %v2294_v46  ;;  %v2228_v59 = vld [vmem:[%s6783_s7 + $0x3708] sm:$0xff]  ;;  %v2230_v46 = vld [vmem:[%s6783_s7 + $0x3718] sm:$0xff]  ;;  %v8181_v63 = vpop.f32.mrf.mxu0  ;;  %v8183_v34 = vpop.f32.mrf.mxu1 }
 0x4bb   : > { %9847 = vst [vmem:[#allocation48_spill] sm:$0xff] %v8181_v63  ;;  %9848 = vst [vmem:[#allocation49_spill] sm:$0xff] %v8183_v34  ;;  %v6224_v63 = vld [vmem:[#allocation2 + $0x608] sm:$0xff] }
 0x4bc   : > { %v8189_v43 = vpop.f32.mrf.mxu0  ;;  %v8191_v28 = vpop.f32.mrf.mxu1 }
 0x4bd   : > { %4294 = vmatpush2.xpose.msra.mxu0 %v2291_v55  ;;  %4401 = vmatpush2.xpose.msra.mxu1 %v2293_v18  ;;  %v2227_v55 = vld [vmem:[%s6783_s7 + $0x3700] sm:$0xff]  ;;  %v2229_v18 = vld [vmem:[%s6783_s7 + $0x3710] sm:$0xff]  ;;  %9849 = vst [vmem:[#allocation50_spill] sm:$0xff] %v8189_v43  ;;  %9850 = vst [vmem:[#allocation51_spill] sm:$0xff] %v8191_v28 }
 0x4be   : > { %4295 = vmatprep.subr.mxu0 %v2260_v29  ;;  %4402 = vmatprep.subr.mxu1 %v2262_v44  ;;  %v2196_v29 = vld [vmem:[%s6783_s7 + $0x3608] sm:$0xff]  ;;  %v2198_v44 = vld [vmem:[%s6783_s7 + $0x3618] sm:$0xff]  ;;  %v8197_v34 = vpop.f32.mrf.mxu0  ;;  %v8199_v24 = vpop.f32.mrf.mxu1 }
 0x4bf   : > { %9851 = vst [vmem:[#allocation52_spill] sm:$0xff] %v8197_v34  ;;  %9852 = vst [vmem:[#allocation53_spill] sm:$0xff] %v8199_v24 }
 0x4c0   : > { %v8205_v28 = vpop.f32.mrf.mxu0  ;;  %v8207_v43 = vpop.f32.mrf.mxu1 }
 0x4c1   : > { %4296 = vmatpush2.xpose.msra.mxu0 %v2259_v17  ;;  %4403 = vmatpush2.xpose.msra.mxu1 %v2261_v58  ;;  %v2195_v17 = vld [vmem:[%s6783_s7 + $0x3600] sm:$0xff]  ;;  %v2197_v58 = vld [vmem:[%s6783_s7 + $0x3610] sm:$0xff]  ;;  %9853 = vst [vmem:[#allocation54_spill] sm:$0xff] %v8205_v28  ;;  %9854 = vst [vmem:[#allocation55_spill] sm:$0xff] %v8207_v43 }
 0x4c2   : > { %4297 = vmatprep.subr.mxu0 %v2228_v59  ;;  %4404 = vmatprep.subr.mxu1 %v2230_v46  ;;  %v2164_v59 = vld [vmem:[%s6783_s7 + $0x3508] sm:$0xff]  ;;  %v2166_v46 = vld [vmem:[%s6783_s7 + $0x3518] sm:$0xff]  ;;  %v8213_v24 = vpop.f32.mrf.mxu0  ;;  %v8215_v34 = vpop.f32.mrf.mxu1 }
 0x4c3   : > { %9855 = vst [vmem:[#allocation56_spill] sm:$0xff] %v8213_v24  ;;  %9856 = vst [vmem:[#allocation57_spill] sm:$0xff] %v8215_v34 }
 0x4c4   : > { %v8221_v43 = vpop.f32.mrf.mxu0  ;;  %v8223_v28 = vpop.f32.mrf.mxu1 }
 0x4c5   : > { %4298 = vmatpush2.xpose.msra.mxu0 %v2227_v55  ;;  %4405 = vmatpush2.xpose.msra.mxu1 %v2229_v18  ;;  %v2163_v55 = vld [vmem:[%s6783_s7 + $0x3500] sm:$0xff]  ;;  %v2165_v18 = vld [vmem:[%s6783_s7 + $0x3510] sm:$0xff]  ;;  %9857 = vst [vmem:[#allocation58_spill] sm:$0xff] %v8221_v43  ;;  %9858 = vst [vmem:[#allocation59_spill] sm:$0xff] %v8223_v28 }
 0x4c6   : > { %4299 = vmatprep.subr.mxu0 %v2196_v29  ;;  %4406 = vmatprep.subr.mxu1 %v2198_v44  ;;  %v2132_v29 = vld [vmem:[%s6783_s7 + $0x3408] sm:$0xff]  ;;  %v2134_v44 = vld [vmem:[%s6783_s7 + $0x3418] sm:$0xff]  ;;  %v8229_v34 = vpop.f32.mrf.mxu0  ;;  %v8231_v24 = vpop.f32.mrf.mxu1 }
 0x4c7   : > { %9859 = vst [vmem:[#allocation60_spill] sm:$0xff] %v8229_v34  ;;  %9860 = vst [vmem:[#allocation61_spill] sm:$0xff] %v8231_v24 }
 0x4c8   : > { %v8237_v28 = vpop.f32.mrf.mxu0  ;;  %v8239_v43 = vpop.f32.mrf.mxu1 }
 0x4c9   : > { %4300 = vmatpush2.xpose.msra.mxu0 %v2195_v17  ;;  %4407 = vmatpush2.xpose.msra.mxu1 %v2197_v58  ;;  %v2131_v17 = vld [vmem:[%s6783_s7 + $0x3400] sm:$0xff]  ;;  %v2133_v58 = vld [vmem:[%s6783_s7 + $0x3410] sm:$0xff]  ;;  %9861 = vst [vmem:[#allocation62_spill] sm:$0xff] %v8237_v28  ;;  %9862 = vst [vmem:[#allocation63_spill] sm:$0xff] %v8239_v43 }
 0x4ca   : > { %4301 = vmatprep.subr.mxu0 %v2164_v59  ;;  %4408 = vmatprep.subr.mxu1 %v2166_v46  ;;  %v2100_v59 = vld [vmem:[%s6783_s7 + $0x3308] sm:$0xff]  ;;  %v2102_v46 = vld [vmem:[%s6783_s7 + $0x3318] sm:$0xff]  ;;  %v8245_v24 = vpop.f32.mrf.mxu0  ;;  %v8247_v34 = vpop.f32.mrf.mxu1  ;;  %v6202_v28 = vld [vmem:[#allocation2 + $0x10] sm:$0xff] }
 0x4cb   : > { %9863 = vst [vmem:[#allocation64_spill] sm:$0xff] %v8245_v24  ;;  %9864 = vst [vmem:[#allocation65_spill] sm:$0xff] %v8247_v34  ;;  %v6203_v43 = vld [vmem:[#allocation2 + $0x108] sm:$0xff]  ;;  %v6204_v24 = vld [vmem:[#allocation2 + $0x118] sm:$0xff] }
 0x4cc   : > { %v8253_v34 = vpop.f32.mrf.mxu0 }
 0x4cd   : > { %4302 = vmatpush2.xpose.msra.mxu0 %v2163_v55  ;;  %4409 = vmatpush2.xpose.msra.mxu1 %v2165_v18  ;;  %v2099_v55 = vld [vmem:[%s6783_s7 + $0x3300] sm:$0xff]  ;;  %v2101_v18 = vld [vmem:[%s6783_s7 + $0x3310] sm:$0xff]  ;;  %9865 = vst [vmem:[#allocation66_spill] sm:$0xff] %v8253_v34  ;;  %v1850_v34 = vld [vmem:[%s6783_s7 + $0x2b38] sm:$0xff] }
 0x4ce   : > { %4303 = vmatprep.subr.mxu0 %v2132_v29  ;;  %4410 = vmatprep.subr.mxu1 %v2134_v44  ;;  %v2068_v29 = vld [vmem:[%s6783_s7 + $0x3208] sm:$0xff]  ;;  %v2070_v44 = vld [vmem:[%s6783_s7 + $0x3218] sm:$0xff] }
 0x4d1   : > { %4304 = vmatpush2.xpose.msra.mxu0 %v2131_v17  ;;  %4411 = vmatpush2.xpose.msra.mxu1 %v2133_v58  ;;  %v2067_v17 = vld [vmem:[%s6783_s7 + $0x3200] sm:$0xff]  ;;  %v2069_v58 = vld [vmem:[%s6783_s7 + $0x3210] sm:$0xff] }
 0x4d2   : > { %4305 = vmatprep.subr.mxu0 %v2100_v59  ;;  %4412 = vmatprep.subr.mxu1 %v2102_v46  ;;  %v2036_v59 = vld [vmem:[%s6783_s7 + $0x3108] sm:$0xff]  ;;  %v2038_v46 = vld [vmem:[%s6783_s7 + $0x3118] sm:$0xff] }
 0x4d5   : > { %4306 = vmatpush2.xpose.msra.mxu0 %v2099_v55  ;;  %4413 = vmatpush2.xpose.msra.mxu1 %v2101_v18  ;;  %v2035_v55 = vld [vmem:[%s6783_s7 + $0x3100] sm:$0xff]  ;;  %v2037_v18 = vld [vmem:[%s6783_s7 + $0x3110] sm:$0xff] }
 0x4d6   : > { %4307 = vmatprep.subr.mxu0 %v2068_v29  ;;  %4414 = vmatprep.subr.mxu1 %v2070_v44  ;;  %v2004_v29 = vld [vmem:[%s6783_s7 + $0x3008] sm:$0xff]  ;;  %v2006_v44 = vld [vmem:[%s6783_s7 + $0x3018] sm:$0xff] }
 0x4d9   : > { %4308 = vmatpush2.xpose.msra.mxu0 %v2067_v17  ;;  %4415 = vmatpush2.xpose.msra.mxu1 %v2069_v58  ;;  %v2003_v17 = vld [vmem:[%s6783_s7 + $0x3000] sm:$0xff]  ;;  %v2005_v58 = vld [vmem:[%s6783_s7 + $0x3010] sm:$0xff] }
 0x4da   : > { %4309 = vmatprep.subr.mxu0 %v2036_v59  ;;  %4416 = vmatprep.subr.mxu1 %v2038_v46  ;;  %v1976_v59 = vld [vmem:[%s6783_s7 + $0x2f28] sm:$0xff]  ;;  %v1978_v46 = vld [vmem:[%s6783_s7 + $0x2f38] sm:$0xff] }
 0x4dd   : > { %4310 = vmatpush2.xpose.msra.mxu0 %v2035_v55  ;;  %4417 = vmatpush2.xpose.msra.mxu1 %v2037_v18  ;;  %v1975_v55 = vld [vmem:[%s6783_s7 + $0x2f20] sm:$0xff]  ;;  %v1977_v18 = vld [vmem:[%s6783_s7 + $0x2f30] sm:$0xff] }
 0x4de   : > { %4311 = vmatprep.subr.mxu0 %v2004_v29  ;;  %4418 = vmatprep.subr.mxu1 %v2006_v44  ;;  %v1944_v29 = vld [vmem:[%s6783_s7 + $0x2e28] sm:$0xff]  ;;  %v1946_v44 = vld [vmem:[%s6783_s7 + $0x2e38] sm:$0xff] }
 0x4e1   : > { %4312 = vmatpush2.xpose.msra.mxu0 %v2003_v17  ;;  %4419 = vmatpush2.xpose.msra.mxu1 %v2005_v58  ;;  %v1943_v17 = vld [vmem:[%s6783_s7 + $0x2e20] sm:$0xff]  ;;  %v1945_v58 = vld [vmem:[%s6783_s7 + $0x2e30] sm:$0xff] }
 0x4e2   : > { %4463 = vmatprep.subr.mxu0 %v1976_v59  ;;  %4570 = vmatprep.subr.mxu1 %v1978_v46  ;;  %v1912_v59 = vld [vmem:[%s6783_s7 + $0x2d28] sm:$0xff]  ;;  %v1914_v46 = vld [vmem:[%s6783_s7 + $0x2d38] sm:$0xff] }
 0x4e4   : > { %4314 = vmatmul.mubr.f32.vlgmr.msra.gmra.mxu0 %v6201_v2  ;;  %4421 = vmatmul.mubr.f32.vlgmr.msra.gmra.mxu1 %v6202_v28  ;;  %v8255_v2 = vpop.f32.mrf.mxu1  ;;  %v6205_v28 = vld [vmem:[#allocation2 + $0x100] sm:$0xff] }
 0x4e5   : > { %4464 = vmatpush1.xpose.msra.mxu0 %v1975_v55  ;;  %4571 = vmatpush1.xpose.msra.mxu1 %v1977_v18  ;;  %9866 = vst [vmem:[#allocation67_spill] sm:$0xff] %v8255_v2  ;;  %v6206_v55 = vld [vmem:[#allocation2 + $0x110] sm:$0xff]  ;;  %v1911_v18 = vld [vmem:[%s6783_s7 + $0x2d20] sm:$0xff]  ;;  %v8261_v2 = vpop.f32.mrf.mxu0 }
 0x4e6   : > { %4465 = vmatprep.subr.mxu0 %v1944_v29  ;;  %4572 = vmatprep.subr.mxu1 %v1946_v44  ;;  %v1913_v29 = vld [vmem:[%s6783_s7 + $0x2d30] sm:$0xff]  ;;  %v1880_v44 = vld [vmem:[%s6783_s7 + $0x2c28] sm:$0xff]  ;;  %9867 = vst [vmem:[#allocation68_spill] sm:$0xff] %v8261_v2 }
 0x4e7   : > { %4319 = vmatprep.mubr.f32.mxu0 %v6203_v43  ;;  %4426 = vmatprep.mubr.f32.mxu1 %v6204_v24  ;;  %v6207_v43 = vld [vmem:[#allocation2 + $0x208] sm:$0xff]  ;;  %v6208_v24 = vld [vmem:[#allocation2 + $0x218] sm:$0xff] }
 0x4e8   : > { %4320 = vmatmul.mubr.f32.gmra.mxu0 %v6205_v28  ;;  %4427 = vmatmul.mubr.f32.gmra.mxu1 %v6206_v55  ;;  %v8263_v28 = vpop.f32.mrf.mxu1  ;;  %v1879_v55 = vld [vmem:[%s6783_s7 + $0x2c20] sm:$0xff]  ;;  %v6211_v2 = vld [vmem:[#allocation2 + $0x308] sm:$0xff] }
 0x4e9   : > { %4466 = vmatpush1.xpose.msra.mxu0 %v1943_v17  ;;  %4573 = vmatpush1.xpose.msra.mxu1 %v1945_v58  ;;  %9868 = vst [vmem:[#allocation69_spill] sm:$0xff] %v8263_v28  ;;  %v6209_v17 = vld [vmem:[#allocation2 + $0x200] sm:$0xff]  ;;  %v6210_v58 = vld [vmem:[#allocation2 + $0x210] sm:$0xff] }
 0x4ea   : > { %4467 = vmatprep.subr.mxu0 %v1912_v59  ;;  %4574 = vmatprep.subr.mxu1 %v1914_v46  ;;  %v8265_v59 = vpop.f32.mrf.mxu0  ;;  %v8267_v46 = vpop.f32.mrf.mxu1  ;;  %v1849_v28 = vld [vmem:[%s6783_s7 + $0x2b30] sm:$0xff] }
 0x4eb   : > { %4325 = vmatprep.mubr.f32.mxu0 %v6207_v43  ;;  %4432 = vmatprep.mubr.f32.mxu1 %v6208_v24  ;;  %9869 = vst [vmem:[#allocation70_spill] sm:$0xff] %v8265_v59  ;;  %9870 = vst [vmem:[#allocation71_spill] sm:$0xff] %v8267_v46  ;;  %v1881_v43 = vld [vmem:[%s6783_s7 + $0x2c30] sm:$0xff]  ;;  %v1848_v24 = vld [vmem:[%s6783_s7 + $0x2b28] sm:$0xff] }
 0x4ec   : > { %4326 = vmatmul.mubr.f32.gmra.mxu0 %v6209_v17  ;;  %4433 = vmatmul.mubr.f32.gmra.mxu1 %v6210_v58  ;;  %v6212_v17 = vld [vmem:[#allocation2 + $0x318] sm:$0xff]  ;;  %v1847_v58 = vld [vmem:[%s6783_s7 + $0x2b20] sm:$0xff]  ;;  %v1816_v46 = vld [vmem:[%s6783_s7 + $0x2a28] sm:$0xff] }
 0x4ed   : > { %4468 = vmatpush1.xpose.msra.mxu0 %v1911_v18  ;;  %4575 = vmatpush1.xpose.msra.mxu1 %v1913_v29  ;;  %v6213_v18 = vld [vmem:[#allocation2 + $0x300] sm:$0xff]  ;;  %v6214_v29 = vld [vmem:[#allocation2 + $0x310] sm:$0xff]  ;;  %v1818_v59 = vld [vmem:[%s6783_s7 + $0x2a38] sm:$0xff] }
 0x4ee   : > { %4469 = vmatprep.subr.mxu0 %v1880_v44  ;;  %4576 = vmatprep.subr.mxu1 %v1882_v12  ;;  %v8273_v44 = vpop.f32.mrf.mxu0  ;;  %v8275_v12 = vpop.f32.mrf.mxu1 }
 0x4ef   : > { %4331 = vmatprep.mubr.f32.mxu0 %v6211_v2  ;;  %4438 = vmatprep.mubr.f32.mxu1 %v6212_v17  ;;  %9871 = vst [vmem:[#allocation72_spill] sm:$0xff] %v8273_v44  ;;  %9872 = vst [vmem:[#allocation73_spill] sm:$0xff] %v8275_v12  ;;  %v6215_v2 = vld [vmem:[#allocation2 + $0x408] sm:$0xff]  ;;  %v6216_v17 = vld [vmem:[#allocation2 + $0x418] sm:$0xff] }
 0x4f0   : > { %4332 = vmatmul.mubr.f32.gmra.mxu0 %v6213_v18  ;;  %4439 = vmatmul.mubr.f32.gmra.mxu1 %v6214_v29  ;;  %v2523_v18 = vsub.s32 1, %v7104_v53  ;;  %v1815_v29 = vld [vmem:[%s6783_s7 + $0x2a20] sm:$0xff]  ;;  %v1784_v12 = vld [vmem:[%s6783_s7 + $0x2928] sm:$0xff]  ;;  %v1786_v44 = vld [vmem:[%s6783_s7 + $0x2938] sm:$0xff] }
 0x4f1   : > { %4470 = vmatpush1.xpose.msra.mxu0 %v1879_v55  ;;  %4577 = vmatpush1.xpose.msra.mxu1 %v1881_v43  ;;  %v6217_v55 = vld [vmem:[#allocation2 + $0x400] sm:$0xff]  ;;  %v6218_v43 = vld [vmem:[#allocation2 + $0x410] sm:$0xff] }
 0x4f2   : > { %4471 = vmatprep.subr.mxu0 %v1848_v24  ;;  %4578 = vmatprep.subr.mxu1 %v1850_v34  ;;  %v8282_v34 = vpop.f32.mrf.mxu0  ;;  %v8284_v24 = vpop.f32.mrf.mxu1 }
 0x4f3   : > { %4337 = vmatprep.mubr.f32.mxu0 %v6215_v2  ;;  %4444 = vmatprep.mubr.f32.mxu1 %v6216_v17  ;;  %9873 = vst [vmem:[#allocation74_spill] sm:$0xff] %v8282_v34  ;;  %9874 = vst [vmem:[#allocation75_spill] sm:$0xff] %v8284_v24  ;;  %v1817_v2 = vld [vmem:[%s6783_s7 + $0x2a30] sm:$0xff]  ;;  %v6219_v17 = vld [vmem:[#allocation2 + $0x508] sm:$0xff] }
 0x4f4   : > { %4338 = vmatmul.mubr.f32.gmra.mxu0 %v6217_v55  ;;  %4445 = vmatmul.mubr.f32.gmra.mxu1 %v6218_v43  ;;  %v6220_v55 = vld [vmem:[#allocation2 + $0x518] sm:$0xff]  ;;  %v6223_v43 = vld [vmem:[%s7113_s25] sm:$0xf]  ;;  %v1785_v24 = vld [vmem:[%s6783_s7 + $0x2930] sm:$0xff] }
 0x4f5   : > { %4472 = vmatpush1.xpose.msra.mxu0 %v1847_v58  ;;  %4579 = vmatpush1.xpose.msra.mxu1 %v1849_v28  ;;  %v6221_v28 = vld [vmem:[#allocation2 + $0x500] sm:$0xff]  ;;  %v6222_v58 = vld [vmem:[#allocation2 + $0x510] sm:$0xff]  ;;  %v8291_v53 = vrot.slane %v6223_v43, %v2523_v18  ;;  %v1752_v34 = vld [vmem:[%s6783_s7 + $0x2828] sm:$0xff] }
 0x4f6   : > { %4473 = vmatprep.subr.mxu0 %v1816_v46  ;;  %4580 = vmatprep.subr.mxu1 %v1818_v59  ;;  %v8293_v59 = vpop.f32.mrf.mxu0  ;;  %v8295_v46 = vpop.f32.mrf.mxu1  ;;  %v6226_v18 = vld [vmem:[#allocation2 + $0x600] sm:$0xff]  ;;  %v1720_v43 = vld [vmem:[%s6783_s7 + $0x2728] sm:$0xff] }
 0x4f7   : > { %4343 = vmatprep.mubr.f32.mxu0 %v6219_v17  ;;  %4450 = vmatprep.mubr.f32.mxu1 %v6220_v55  ;;  %v1783_v17 = vld [vmem:[%s6783_s7 + $0x2920] sm:$0xff]  ;;  %v1754_v55 = vld [vmem:[%s6783_s7 + $0x2838] sm:$0xff] }
 0x4f8   : > { %4344 = vmatmul.mubr.f32.gmra.mxu0 %v6221_v28  ;;  %4451 = vmatmul.mubr.f32.gmra.mxu1 %v6222_v58  ;;  %v6225_v28 = vld [vmem:[#allocation2 + $0x618] sm:$0xff]  ;;  %v1753_v58 = vld [vmem:[%s6783_s7 + $0x2830] sm:$0xff] }
 0x4f9   : > { %4474 = vmatpush1.xpose.msra.mxu0 %v1815_v29  ;;  %4581 = vmatpush1.xpose.msra.mxu1 %v1817_v2  ;;  %v6227_v29 = vld [vmem:[#allocation2 + $0x610] sm:$0xff]  ;;  %v8305_v2 = vpop.f32.mrf.mxu1 }
 0x4fa   : > { %4475 = vmatprep.subr.mxu0 %v1784_v12  ;;  %4582 = vmatprep.subr.mxu1 %v1786_v44  ;;  %v2606_v12 = vadd.f32 %v7125_v8, %v8291_v53  ;;  %v8303_v44 = vpop.f32.mrf.mxu0  ;;  %9875 = vst [vmem:[#allocation76_spill] sm:$0xff] %v8305_v2  ;;  %v2612_v8 = vadd.f32 %v7138_v20, %v8291_v53  ;;  %v1721_v2 = vld [vmem:[%s6783_s7 + $0x2730] sm:$0xff]  ;;  %v1690_v20 = vld [vmem:[%s6783_s7 + $0x2638] sm:$0xff] }
 0x4fb   : > { %4349 = vmatprep.mubr.f32.mxu0 %v6224_v63  ;;  %4456 = vmatprep.mubr.f32.mxu1 %v6225_v28  ;;  %v1751_v63 = vld [vmem:[%s6783_s7 + $0x2820] sm:$0xff]  ;;  %v1722_v28 = vld [vmem:[%s6783_s7 + $0x2738] sm:$0xff] }
 0x4fc   : > { %4350 = vmatmul.mubr.f32.gmra.mxu0 %v6226_v18  ;;  %4457 = vmatmul.mubr.f32.gmra.mxu1 %v6227_v29  ;;  %v6228_v18 = vld [vmem:[#allocation2 + $0x28] sm:$0xff]  ;;  %v6229_v29 = vld [vmem:[#allocation2 + $0x38] sm:$0xff] }
 0x4fd   : > { %4476 = vmatpush1.xpose.msra.mxu0 %v1783_v17  ;;  %4583 = vmatpush1.xpose.msra.mxu1 %v1785_v24  ;;  %v2713_v24 = vadd.f32 %v7127_v9, %v2606_v12  ;;  %v8316_v17 = vpop.f32.mrf.mxu1  ;;  %v2719_v9 = vadd.f32 %v7140_v21, %v2612_v8  ;;  %v2618_v12 = vadd.f32 %v7149_v30, %v8291_v53  ;;  %v1656_v21 = vld [vmem:[%s6783_s7 + $0x2528] sm:$0xff]  ;;  %v1658_v8 = vld [vmem:[%s6783_s7 + $0x2538] sm:$0xff] }
 0x4fe   : > { %4477 = vmatprep.subr.mxu0 %v1752_v34  ;;  %4584 = vmatprep.subr.mxu1 %v1754_v55  ;;  %v8314_v34 = vpop.f32.mrf.mxu0  ;;  %v1719_v55 = vld [vmem:[%s6783_s7 + $0x2720] sm:$0xff] }
 0x4ff   : > { %4527 = vmatprep.mubr.f32.mxu0 %v6228_v18  ;;  %4634 = vmatprep.mubr.f32.mxu1 %v6229_v29  ;;  %v2820_v18 = vadd.f32 %v7302_v0, %v2713_v24  ;;  %v1688_v29 = vld [vmem:[%s6783_s7 + $0x2628] sm:$0xff]  ;;  %v1689_v0 = vld [vmem:[%s6783_s7 + $0x2630] sm:$0xff]  ;;  %v2725_v30 = vadd.f32 %v7151_v31, %v2618_v12  ;;  %v2630_v31 = vadd.f32 %v7171_v50, %v8291_v53 }
 0x501   : > { %4478 = vmatpush1.xpose.msra.mxu0 %v1751_v63  ;;  %4585 = vmatpush1.xpose.msra.mxu1 %v1753_v58  ;;  %v2826_v63 = vadd.f32 %v7313_v26, %v2719_v9  ;;  %v8327_v58 = vpop.f32.mrf.mxu0  ;;  %v2927_v24 = vadd.f32 %v7304_v15, %v2820_v18  ;;  %v2624_v26 = vadd.f32 %v7160_v40, %v8291_v53  ;;  %v1655_v18 = vld [vmem:[%s6783_s7 + $0x2520] sm:$0xff]  ;;  %v1657_v9 = vld [vmem:[%s6783_s7 + $0x2530] sm:$0xff]  ;;  %v1624_v40 = vld [vmem:[%s6783_s7 + $0x2428] sm:$0xff] }
 0x502   : > { %4479 = vmatprep.subr.mxu0 %v1720_v43  ;;  %4586 = vmatprep.subr.mxu1 %v1722_v28  ;;  %v8329_v43 = vpop.f32.mrf.mxu1  ;;  %v1687_v28 = vld [vmem:[%s6783_s7 + $0x2620] sm:$0xff] }
 0x503   : > { %v2731_v12 = vadd.f32 %v7162_v41, %v2624_v26 }
 0x504   : > { %v8344_v15 = vpop.f32.mrf.mxu1 }
 0x505   : > { %4480 = vmatpush1.xpose.msra.mxu0 %v1719_v55  ;;  %4587 = vmatpush1.xpose.msra.mxu1 %v1721_v2  ;;  %v3034_v2 = vadd.f32 %v7479_v10, %v2927_v24  ;;  %v2933_v55 = vadd.f32 %v7315_v27, %v2826_v63  ;;  %v1626_v10 = vld [vmem:[%s6783_s7 + $0x2438] sm:$0xff]  ;;  %v2636_v27 = vadd.f32 %v7182_v61, %v8291_v53  ;;  %v1623_v61 = vld [vmem:[%s6783_s7 + $0x2420] sm:$0xff] }
 0x506   : > { %4481 = vmatprep.subr.mxu0 %v1688_v29  ;;  %4588 = vmatprep.subr.mxu1 %v1690_v20  ;;  %v2832_v29 = vadd.f32 %v7324_v38, %v2725_v30  ;;  %v8342_v20 = vpop.f32.mrf.mxu0  ;;  %v2642_v63 = vadd.f32 %v7293_v1, %v8291_v53  ;;  %v8363_v41 = vpop.f32.mrf.mxu1  ;;  %v1592_v1 = vld [vmem:[%s6783_s7 + $0x2328] sm:$0xff] }
 0x507   : > { %v3040_v38 = vadd.f32 %v7490_v33, %v2933_v55  ;;  %v1625_v33 = vld [vmem:[%s6783_s7 + $0x2430] sm:$0xff] }
 0x508   : > { %v2939_v50 = vadd.f32 %v7326_v39, %v2832_v29  ;;  %v8361_v24 = vpop.f32.mrf.mxu0  ;;  %v2743_v39 = vadd.f32 %v7184_v62, %v2636_v27  ;;  %v2749_v30 = vadd.f32 %v7295_v3, %v2642_v63  ;;  %v8381_v62 = vpop.f32.mrf.mxu1  ;;  %v1560_v29 = vld [vmem:[%s6783_s7 + $0x2228] sm:$0xff] }
 0x509   : > { %4482 = vmatpush1.xpose.msra.mxu0 %v1687_v28  ;;  %4589 = vmatpush1.xpose.msra.mxu1 %v1689_v0  ;;  %v3141_v28 = vadd.f32 %v7481_v14, %v3034_v2  ;;  %v2838_v0 = vadd.f32 %v7335_v52, %v2731_v12  ;;  %v1594_v14 = vld [vmem:[%s6783_s7 + $0x2338] sm:$0xff]  ;;  %v3147_v52 = vadd.f32 %v7492_v35, %v3040_v38  ;;  %v1591_v35 = vld [vmem:[%s6783_s7 + $0x2320] sm:$0xff]  ;;  %v1528_v12 = vld [vmem:[%s6783_s7 + $0x2128] sm:$0xff] }
 0x50a   : > { %4483 = vmatprep.subr.mxu0 %v1656_v21  ;;  %4590 = vmatprep.subr.mxu1 %v1658_v8  ;;  %v2737_v21 = vadd.f32 %v7173_v51, %v2630_v31  ;;  %v3046_v8 = vadd.f32 %v7501_v47, %v2939_v50  ;;  %v8379_v55 = vpop.f32.mrf.mxu0  ;;  %v1593_v47 = vld [vmem:[%s6783_s7 + $0x2330] sm:$0xff]  ;;  %v2856_v3 = vadd.f32 %v7470_v49, %v2749_v30  ;;  %v9877_v38 = vld [vmem:[#allocation15_spill] sm:$0xff]  ;;  %v1496_v30 = vld [vmem:[%s6783_s7 + $0x2028] sm:$0xff] }
 0x50b   : > { %v3248_v53 = vadd.f32 %v7656_v45, %v3141_v28  ;;  %v2945_v51 = vadd.f32 %v7337_v54, %v2838_v0  ;;  %v2850_v45 = vadd.f32 %v7357_v22, %v2743_v39  ;;  %v3254_v2 = vadd.f32 %v7667_v13, %v3147_v52  ;;  %v1562_v54 = vld [vmem:[%s6783_s7 + $0x2238] sm:$0xff]  ;;  %v9878_v28 = vld [vmem:[#allocation17_spill] sm:$0xff]  ;;  %v9879_v0 = vld [vmem:[#allocation28_spill] sm:$0xff] }
 0x50c   : > { %v2844_v26 = vadd.f32 %v7346_v5, %v2737_v21  ;;  %v3153_v22 = vadd.f32 %v7503_v48, %v3046_v8  ;;  %v1559_v48 = vld [vmem:[%s6783_s7 + $0x2220] sm:$0xff]  ;;  %v1529_v52 = vld [vmem:[%s6783_s7 + $0x2130] sm:$0xff] }
 0x50d   : > { %4484 = vmatpush1.xpose.msra.mxu0 %v1655_v18  ;;  %4591 = vmatpush1.xpose.msra.mxu1 %v1657_v9  ;;  %v3355_v5 = vadd.f32 %v7658_v4, %v3248_v53  ;;  %v3052_v13 = vadd.f32 %v7512_v7, %v2945_v51  ;;  %v2957_v49 = vadd.f32 %v7359_v23, %v2850_v45  ;;  %v1561_v7 = vld [vmem:[%s6783_s7 + $0x2230] sm:$0xff]  ;;  %v9881_v21 = vld [vmem:[#allocation19_spill] sm:$0xff]  ;;  %v9882_v53 = vld [vmem:[#allocation20_spill] sm:$0xff] }
 0x50e   : > { %4485 = vmatprep.subr.mxu0 %v1624_v40  ;;  %4592 = vmatprep.subr.mxu1 %v1626_v10  ;;  %v2951_v18 = vadd.f32 %v7348_v6, %v2844_v26  ;;  %v3361_v4 = vadd.f32 %v7669_v42, %v3254_v2  ;;  %v3260_v31 = vadd.f32 %v7678_v19, %v3153_v22  ;;  %v8396_v40 = vpop.f32.mrf.mxu0  ;;  %v8398_v10 = vpop.f32.mrf.mxu1  ;;  %v9876_v23 = vld [vmem:[#allocation13_spill] sm:$0xff]  ;;  %v1498_v26 = vld [vmem:[%s6783_s7 + $0x2038] sm:$0xff]  ;;  %v9884_v45 = vld [vmem:[#allocation16_spill] sm:$0xff] }
 0x50f   : > { %v3462_v9 = vadd.f32 %v7833_v57, %v3355_v5  ;;  %v2963_v6 = vadd.f32 %v7472_v56, %v2856_v3  ;;  %v1530_v57 = vld [vmem:[%s6783_s7 + $0x2138] sm:$0xff]  ;;  %v3159_v27 = vadd.f32 %v7514_v16, %v3052_v13  ;;  %v3064_v19 = vadd.f32 %v9877_v38, %v2957_v49  ;;  %v9887_v22 = vld [vmem:[#allocation31_spill] sm:$0xff] }
 0x510   : > { %v3058_v42 = vadd.f32 %v9876_v23, %v2951_v18  ;;  %v3468_v63 = vadd.f32 %v7844_v25, %v3361_v4  ;;  %v3367_v16 = vadd.f32 %v9881_v21, %v3260_v31  ;;  %v8417_v39 = vpop.f32.mrf.mxu1  ;;  %v1527_v25 = vld [vmem:[%s6783_s7 + $0x2120] sm:$0xff]  ;;  %v9883_v51 = vld [vmem:[#allocation14_spill] sm:$0xff]  ;;  %v3680_v13 = vadd.f32 %v8173_v11, %v9887_v22  ;;  %v9890_v4 = vld [vmem:[#allocation48_spill] sm:$0xff] }
 0x511   : > { %4486 = vmatpush1.xpose.msra.mxu0 %v1623_v61  ;;  %4593 = vmatpush1.xpose.msra.mxu1 %v1625_v33  ;;  %v3070_v50 = vadd.f32 %v9878_v28, %v2963_v6  ;;  %v3569_v61 = vadd.f32 %v9879_v0, %v3462_v9  ;;  %v9880_v33 = vld [vmem:[#allocation29_spill] sm:$0xff]  ;;  %v3171_v2 = vadd.f32 %v9884_v45, %v3064_v19  ;;  %v9886_v5 = vld [vmem:[#allocation18_spill] sm:$0xff]  ;;  %v9891_v6 = vld [vmem:[#allocation24_spill] sm:$0xff] }
 0x512   : > { %4487 = vmatprep.subr.mxu0 %v1592_v1  ;;  %4594 = vmatprep.subr.mxu1 %v1594_v14  ;;  %v3674_v56 = vadd.f32 %v8157_v36, %v9880_v33  ;;  %v3266_v1 = vadd.f32 %v9882_v53, %v3159_v27  ;;  %v8415_v14 = vpop.f32.mrf.mxu0  ;;  %v3165_v36 = vadd.f32 %v9883_v51, %v3058_v42  ;;  %v9889_v9 = vld [vmem:[#allocation22_spill] sm:$0xff]  ;;  %v2488_v19 = vld [vmem:[%s6783_s7 + $0x3f28] sm:$0xff]  ;;  %v9897_v33 = vld [vmem:[#allocation47_spill] sm:$0xff] }
 0x513   : > { %v3676_v8 = vadd.f32 %v8165_v60, %v3569_v61  ;;  %v3474_v3 = vadd.f32 %v7855_v37, %v3367_v16  ;;  %v9888_v60 = vld [vmem:[#allocation21_spill] sm:$0xff]  ;;  %v8437_v37 = vpop.f32.mrf.mxu1  ;;  %v3278_v11 = vadd.f32 %v9891_v6, %v3171_v2  ;;  %v9893_v27 = vld [vmem:[#allocation46_spill] sm:$0xff]  ;;  %v9895_v28 = vld [vmem:[#allocation32_spill] sm:$0xff] }
 0x514   : > { %v3373_v18 = vadd.f32 %v9888_v60, %v3266_v1  ;;  %v3272_v49 = vadd.f32 %v9889_v9, %v3165_v36  ;;  %v9894_v42 = vld [vmem:[#allocation70_spill] sm:$0xff]  ;;  %v9898_v21 = vld [vmem:[#allocation33_spill] sm:$0xff]  ;;  %v9900_v1 = vld [vmem:[#allocation72_spill] sm:$0xff] }
 0x515   : > { %4488 = vmatpush1.xpose.msra.mxu0 %v1591_v35  ;;  %4595 = vmatpush1.xpose.msra.mxu1 %v1593_v47  ;;  %v9885_v35 = vld [vmem:[#allocation30_spill] sm:$0xff]  ;;  %v3783_v23 = vadd.f32 %v9893_v27, %v3676_v8  ;;  %v9903_v51 = vld [vmem:[#allocation52_spill] sm:$0xff]  ;;  %v8458_v2 = vpop.f32.mrf.mxu1  ;;  %v9906_v22 = vld [vmem:[#allocation71_spill] sm:$0xff] }
 0x516   : > { %4489 = vmatprep.subr.mxu0 %v1560_v29  ;;  %4596 = vmatprep.subr.mxu1 %v1562_v54  ;;  %v3575_v47 = vadd.f32 %v9885_v35, %v3468_v63  ;;  %v3177_v29 = vadd.f32 %v9886_v5, %v3070_v50  ;;  %v3781_v54 = vadd.f32 %v8159_v32, %v3674_v56  ;;  %v1495_v32 = vld [vmem:[%s6783_s7 + $0x2020] sm:$0xff]  ;;  %v2490_v63 = vld [vmem:[%s6783_s7 + $0x3f38] sm:$0xff]  ;;  %v2456_v9 = vld [vmem:[%s6783_s7 + $0x3e28] sm:$0xff] }
 0x517   : > { %v3581_v50 = vadd.f32 %v9895_v28, %v3474_v3  ;;  %v9896_v0 = vld [vmem:[#allocation34_spill] sm:$0xff]  ;;  %v3787_v56 = vadd.f32 %v9897_v33, %v3680_v13  ;;  %v2487_v35 = vld [vmem:[%s6783_s7 + $0x3f20] sm:$0xff]  ;;  %v9904_v3 = vld [vmem:[#allocation25_spill] sm:$0xff] }
 0x518   : > { %v3682_v31 = vadd.f32 %v9890_v4, %v3575_v47  ;;  %v3888_v38 = vadd.f32 %v9894_v42, %v3781_v54  ;;  %v3480_v61 = vadd.f32 %v9896_v0, %v3373_v18  ;;  %v9899_v16 = vld [vmem:[#allocation50_spill] sm:$0xff]  ;;  %v2489_v47 = vld [vmem:[%s6783_s7 + $0x3f30] sm:$0xff]  ;;  %v3385_v5 = vadd.f32 %v9904_v3, %v3278_v11  ;;  %v9908_v4 = vld [vmem:[#allocation35_spill] sm:$0xff] }
 0x519   : > { %4490 = vmatpush1.xpose.msra.mxu0 %v1559_v48  ;;  %4597 = vmatpush1.xpose.msra.mxu1 %v1561_v7  ;;  %v8435_v48 = vpop.f32.mrf.mxu0  ;;  %v1497_v7 = vld [vmem:[%s6783_s7 + $0x2030] sm:$0xff]  ;;  %v3686_v53 = vadd.f32 %v9899_v16, %v9898_v21  ;;  %v3688_v36 = vadd.f32 %v9903_v51, %v3581_v50  ;;  %v9907_v60 = vld [vmem:[#allocation74_spill] sm:$0xff]  ;;  %v9910_v6 = vld [vmem:[#allocation36_spill] sm:$0xff] }
 0x51a   : > { %4491 = vmatprep.subr.mxu0 %v1528_v12  ;;  %4598 = vmatprep.subr.mxu1 %v1530_v57  ;;  %v9892_v12 = vld [vmem:[#allocation26_spill] sm:$0xff]  ;;  %v3995_v13 = vadd.f32 %v9906_v22, %v3888_v38  ;;  %v3894_v18 = vadd.f32 %v9907_v60, %v3787_v56  ;;  %v9913_v38 = vld [vmem:[#allocation73_spill] sm:$0xff]  ;;  %v9914_v50 = vld [vmem:[#allocation40_spill] sm:$0xff] }
 0x51b   : > { %v3284_v57 = vadd.f32 %v9892_v12, %v3177_v29  ;;  %v8456_v45 = vpop.f32.mrf.mxu0  ;;  %v9905_v29 = vld [vmem:[#allocation27_spill] sm:$0xff]  ;;  %v9911_v12 = vld [vmem:[#allocation54_spill] sm:$0xff]  ;;  %v3492_v0 = vadd.f32 %v9914_v50, %v3385_v5  ;;  %v9916_v56 = vld [vmem:[#allocation56_spill] sm:$0xff] }
 0x51c   : > { %v3692_v27 = vadd.f32 %v9911_v12, %v9910_v6  ;;  %v2424_v51 = vld [vmem:[%s6783_s7 + $0x3d28] sm:$0xff]  ;;  %v9921_v22 = vld [vmem:[#allocation58_spill] sm:$0xff] }
 0x51d   : > { %4492 = vmatpush1.xpose.msra.mxu0 %v1527_v25  ;;  %4599 = vmatpush1.xpose.msra.mxu1 %v1529_v52  ;;  %v3890_v25 = vadd.f32 %v9900_v1, %v3783_v23  ;;  %v9901_v52 = vld [vmem:[#allocation23_spill] sm:$0xff]  ;;  %v3391_v54 = vadd.f32 %v9905_v29, %v3284_v57  ;;  %v9924_v6 = vld [vmem:[#allocation60_spill] sm:$0xff]  ;;  %v2394_v50 = vld [vmem:[%s6783_s7 + $0x3c38] sm:$0xff] }
 0x51e   : > { %4493 = vmatprep.subr.mxu0 %v1496_v30  ;;  %4600 = vmatprep.subr.mxu1 %v1498_v26  ;;  %v3379_v8 = vadd.f32 %v9901_v52, %v3272_v49  ;;  %v9902_v30 = vld [vmem:[#allocation49_spill] sm:$0xff]  ;;  %v2458_v49 = vld [vmem:[%s6783_s7 + $0x3e38] sm:$0xff]  ;;  %v9912_v57 = vld [vmem:[#allocation51_spill] sm:$0xff] }
 0x51f   : > { %v3789_v26 = vadd.f32 %v9902_v30, %v3682_v31  ;;  %v3587_v31 = vadd.f32 %v9908_v4, %v3480_v61  ;;  %v9915_v61 = vld [vmem:[#allocation53_spill] sm:$0xff]  ;;  %v2455_v1 = vld [vmem:[%s6783_s7 + $0x3e20] sm:$0xff] }
 0x520   : > { %v3795_v33 = vadd.f32 %v9915_v61, %v3688_v36  ;;  %v9917_v52 = vld [vmem:[#allocation75_spill] sm:$0xff] }
 0x521   : > { %4494 = vmatpush1.xpose.msra.mxu0 %v1495_v32  ;;  %4601 = vmatpush1.xpose.msra.mxu1 %v1497_v7  ;;  %v9909_v32 = vld [vmem:[#allocation37_spill] sm:$0xff]  ;;  %v3896_v23 = vadd.f32 %v8293_v59, %v3789_v26  ;;  %v3694_v21 = vadd.f32 %v9916_v56, %v3587_v31  ;;  %v9919_v36 = vld [vmem:[#allocation55_spill] sm:$0xff] }
 0x522   : > { %4495 = vmatprep.subr.mxu0 %v2488_v19  ;;  %4602 = vmatprep.subr.mxu1 %v2490_v63  ;;  %v3486_v7 = vadd.f32 %v9909_v32, %v3379_v8  ;;  %v3793_v19 = vadd.f32 %v9912_v57, %v3686_v53  ;;  %v3997_v63 = vadd.f32 %v9913_v38, %v3890_v25  ;;  %v2457_v53 = vld [vmem:[%s6783_s7 + $0x3e30] sm:$0xff]  ;;  %v9920_v29 = vld [vmem:[#allocation39_spill] sm:$0xff] }
 0x523   : > { %v4001_v25 = vadd.f32 %v9917_v52, %v3894_v18  ;;  %v3799_v5 = vadd.f32 %v9919_v36, %v3692_v27  ;;  %v4003_v60 = vadd.f32 %v8295_v46, %v3896_v23  ;;  %v3902_v18 = vadd.f32 %v8314_v34, %v3795_v33  ;;  %v9922_v31 = vld [vmem:[#allocation41_spill] sm:$0xff]  ;;  %v2423_v23 = vld [vmem:[%s6783_s7 + $0x3d20] sm:$0xff] }
 0x524   : > { %v4101_v11 = vpop.f32.mrf.mxu0  ;;  %v4208_v42 = vpop.f32.mrf.mxu1  ;;  %v3900_v8 = vadd.f32 %v8303_v44, %v3793_v19  ;;  %v3599_v46 = vadd.f32 %v9922_v31, %v3492_v0  ;;  %v9923_v32 = vld [vmem:[#allocation57_spill] sm:$0xff]  ;;  %v9926_v0 = vld [vmem:[#allocation44_spill] sm:$0xff]  ;;  %v9927_v33 = vld [vmem:[#allocation59_spill] sm:$0xff] }
 0x525   : > { %v4102_v28 = vadd.f32 %v4101_v11, %v3995_v13  ;;  %4496 = vmatpush2.xpose.msra.mxu0 %v2487_v35  ;;  %4603 = vmatpush2.xpose.msra.mxu1 %v2489_v47  ;;  %v2426_v35 = vld [vmem:[%s6783_s7 + $0x3d38] sm:$0xff]  ;;  %v3698_v13 = vadd.f32 %v9921_v22, %v9920_v29  ;;  %v2425_v11 = vld [vmem:[%s6783_s7 + $0x3d30] sm:$0xff]  ;;  %v3906_v19 = vadd.f32 %v8327_v58, %v3799_v5  ;;  %v2360_v22 = vld [vmem:[%s6783_s7 + $0x3b28] sm:$0xff] }
 0x526   : > { %v4103_v16 = vpop.f32.mrf.mxu0  ;;  %v4210_v59 = vpop.f32.mrf.mxu1  ;;  %4497 = vmatprep.subr.mxu0 %v2456_v9  ;;  %4604 = vmatprep.subr.mxu1 %v2458_v49  ;;  %v9918_v47 = vld [vmem:[#allocation38_spill] sm:$0xff]  ;;  %v3498_v61 = vadd.f32 %v9926_v0, %v3391_v54  ;;  %v4009_v58 = vadd.f32 %v8316_v17, %v3902_v18  ;;  %v9930_v54 = vld [vmem:[#allocation61_spill] sm:$0xff]  ;;  %v9938_v0 = vld [vmem:[#allocation67_spill] sm:$0xff] }
 0x527   : > { %v4209_v30 = vadd.f32 %v4208_v42, %v4102_v28  ;;  %v4104_v26 = vadd.f32 %v4103_v16, %v3997_v63  ;;  %v3593_v3 = vadd.f32 %v9918_v47, %v3486_v7  ;;  %v3801_v7 = vadd.f32 %v9923_v32, %v3694_v21  ;;  %v9925_v42 = vld [vmem:[#allocation76_spill] sm:$0xff]  ;;  %v9928_v21 = vld [vmem:[#allocation42_spill] sm:$0xff] }
 0x528   : > { %v4107_v9 = vpop.f32.mrf.mxu0  ;;  %v4214_v49 = vpop.f32.mrf.mxu1  ;;  %v4007_v57 = vadd.f32 %v9925_v42, %v3900_v8  ;;  %v2392_v28 = vld [vmem:[%s6783_s7 + $0x3c28] sm:$0xff]  ;;  %v3805_v56 = vadd.f32 %v9927_v33, %v3698_v13  ;;  %v9929_v16 = vld [vmem:[#allocation62_spill] sm:$0xff]  ;;  %v4013_v17 = vadd.f32 %v8329_v43, %v3906_v19 }
 0x529   : > { %5961 = vst [vmem:[%s8493_s6] sm:$0xff] %v4209_v30  ;;  %v4211_v44 = vadd.f32 %v4210_v59, %v4104_v26  ;;  %v4108_v4 = vadd.f32 %v4107_v9, %v4001_v25  ;;  %4498 = vmatpush2.xpose.msra.mxu0 %v2455_v1  ;;  %4605 = vmatpush2.xpose.msra.mxu1 %v2457_v53  ;;  %v9931_v26 = vld [vmem:[#allocation64_spill] sm:$0xff]  ;;  %v2362_v13 = vld [vmem:[%s6783_s7 + $0x3b38] sm:$0xff] }
 0x52a   : > { %v3700_v12 = vadd.f32 %v9924_v6, %v3593_v3  ;;  %v4109_v27 = vpop.f32.mrf.mxu0  ;;  %v4216_v34 = vpop.f32.mrf.mxu1  ;;  %4499 = vmatprep.subr.mxu0 %v2424_v51  ;;  %4606 = vmatprep.subr.mxu1 %v2426_v35  ;;  %v3704_v59 = vadd.f32 %v9929_v16, %v9928_v21  ;;  %v3908_v1 = vadd.f32 %v8342_v20, %v3801_v7  ;;  %v2391_v20 = vld [vmem:[%s6783_s7 + $0x3c20] sm:$0xff]  ;;  %v2393_v3 = vld [vmem:[%s6783_s7 + $0x3c30] sm:$0xff] }
 0x52b   : > { %5962 = vst [vmem:[%s8493_s6 + $0x8] sm:$0xff] %v4211_v44  ;;  %v4110_v38 = vadd.f32 %v4109_v27, %v4003_v60  ;;  %v4215_v63 = vadd.f32 %v4214_v49, %v4108_v4  ;;  %v3706_v51 = vadd.f32 %v9931_v26, %v3599_v46  ;;  %v3912_v36 = vadd.f32 %v8361_v24, %v3805_v56  ;;  %v9932_v60 = vld [vmem:[#allocation45_spill] sm:$0xff]  ;;  %v9933_v49 = vld [vmem:[#allocation63_spill] sm:$0xff]  ;;  %v9935_v4 = vld [vmem:[#allocation66_spill] sm:$0xff] }
 0x52c   : > { %v4113_v53 = vpop.f32.mrf.mxu0  ;;  %v4220_v52 = vpop.f32.mrf.mxu1  ;;  %v3807_v30 = vadd.f32 %v9930_v54, %v3700_v12  ;;  %v3605_v9 = vadd.f32 %v9932_v60, %v3498_v61  ;;  %v3811_v18 = vadd.f32 %v9933_v49, %v3704_v59  ;;  %v9934_v44 = vld [vmem:[#allocation43_spill] sm:$0xff]  ;;  %v4015_v46 = vadd.f32 %v8344_v15, %v3908_v1  ;;  %v9936_v12 = vld [vmem:[#allocation65_spill] sm:$0xff]  ;;  %v2298_v26 = vld [vmem:[%s6783_s7 + $0x3938] sm:$0xff] }
 0x52d   : > { %5965 = vst [vmem:[%s8493_s6 + $0x20] sm:$0xff] %v4215_v63  ;;  %v4114_v25 = vadd.f32 %v4113_v53, %v4007_v57  ;;  %v4217_v8 = vadd.f32 %v4216_v34, %v4110_v38  ;;  %4500 = vmatpush2.xpose.msra.mxu0 %v2423_v23  ;;  %4607 = vmatpush2.xpose.msra.mxu1 %v2425_v11  ;;  %v9937_v34 = vld [vmem:[#allocation68_spill] sm:$0xff]  ;;  %v2359_v15 = vld [vmem:[%s6783_s7 + $0x3b20] sm:$0xff]  ;;  %v2361_v57 = vld [vmem:[%s6783_s7 + $0x3b30] sm:$0xff] }
 0x52e   : > { %v4115_v35 = vpop.f32.mrf.mxu0  ;;  %v4222_v47 = vpop.f32.mrf.mxu1  ;;  %4501 = vmatprep.subr.mxu0 %v2392_v28  ;;  %4608 = vmatprep.subr.mxu1 %v2394_v50  ;;  %v3710_v31 = vadd.f32 %v9935_v4, %v9934_v44  ;;  %v3914_v24 = vadd.f32 %v8379_v55, %v3807_v30  ;;  %v3813_v27 = vadd.f32 %v9936_v12, %v3706_v51  ;;  %v2328_v28 = vld [vmem:[%s6783_s7 + $0x3a28] sm:$0xff]  ;;  %v2330_v50 = vld [vmem:[%s6783_s7 + $0x3a38] sm:$0xff]  ;;  %v9939_v59 = vld [vmem:[#allocation69_spill] sm:$0xff] }
 0x52f   : > { %5966 = vst [vmem:[%s8493_s6 + $0x28] sm:$0xff] %v4217_v8  ;;  %v4116_v5 = vadd.f32 %v4115_v35, %v4009_v58  ;;  %v4221_v29 = vadd.f32 %v4220_v52, %v4114_v25  ;;  %v3712_v23 = vadd.f32 %v9937_v34, %v3605_v9  ;;  %v4019_v55 = vadd.f32 %v8363_v41, %v3912_v36  ;;  %v2329_v58 = vld [vmem:[%s6783_s7 + $0x3a30] sm:$0xff]  ;;  %v2296_v30 = vld [vmem:[%s6783_s7 + $0x3928] sm:$0xff]  ;;  %v2295_v36 = vld [vmem:[%s6783_s7 + $0x3920] sm:$0xff] }
 0x530   : > { %v4119_v32 = vpop.f32.mrf.mxu0  ;;  %v4226_v43 = vpop.f32.mrf.mxu1  ;;  %v3918_v19 = vadd.f32 %v8396_v40, %v3811_v18  ;;  %v3817_v61 = vadd.f32 %v9938_v0, %v3710_v31  ;;  %v3920_v33 = vadd.f32 %v8415_v14, %v3813_v27  ;;  %v4021_v16 = vadd.f32 %v8381_v62, %v3914_v24  ;;  %v2327_v14 = vld [vmem:[%s6783_s7 + $0x3a20] sm:$0xff]  ;;  %v2234_v24 = vld [vmem:[%s6783_s7 + $0x3738] sm:$0xff]  ;;  %v2233_v12 = vld [vmem:[%s6783_s7 + $0x3730] sm:$0xff] }
 0x531   : > { %5969 = vst [vmem:[%s8493_s6 + $0x40] sm:$0xff] %v4221_v29  ;;  %v4120_v7 = vadd.f32 %v4119_v32, %v4013_v17  ;;  %v4223_v6 = vadd.f32 %v4222_v47, %v4116_v5  ;;  %4502 = vmatpush2.xpose.msra.mxu0 %v2391_v20  ;;  %4609 = vmatpush2.xpose.msra.mxu1 %v2393_v3  ;;  %v2297_v5 = vld [vmem:[%s6783_s7 + $0x3930] sm:$0xff]  ;;  %v2263_v31 = vld [vmem:[%s6783_s7 + $0x3820] sm:$0xff]  ;;  %v2200_v27 = vld [vmem:[%s6783_s7 + $0x3628] sm:$0xff] }
 0x532   : > { %v4121_v11 = vpop.f32.mrf.mxu0  ;;  %v4228_v42 = vpop.f32.mrf.mxu1  ;;  %4503 = vmatprep.subr.mxu0 %v2360_v22  ;;  %4610 = vmatprep.subr.mxu1 %v2362_v13  ;;  %v3819_v1 = vadd.f32 %v9939_v59, %v3712_v23  ;;  %v4025_v25 = vadd.f32 %v8398_v10, %v3918_v19  ;;  %v3924_v62 = vadd.f32 %v8435_v48, %v3817_v61  ;;  %v2264_v22 = vld [vmem:[%s6783_s7 + $0x3828] sm:$0xff]  ;;  %v2266_v13 = vld [vmem:[%s6783_s7 + $0x3838] sm:$0xff]  ;;  %v2199_v23 = vld [vmem:[%s6783_s7 + $0x3620] sm:$0xff] }
 0x533   : > { %5970 = vst [vmem:[%s8493_s6 + $0x48] sm:$0xff] %v4223_v6  ;;  %v4122_v38 = vadd.f32 %v4121_v11, %v4015_v46  ;;  %v4227_v63 = vadd.f32 %v4226_v43, %v4120_v7  ;;  %v4027_v51 = vadd.f32 %v8417_v39, %v3920_v33  ;;  %v2265_v46 = vld [vmem:[%s6783_s7 + $0x3830] sm:$0xff]  ;;  %v2232_v43 = vld [vmem:[%s6783_s7 + $0x3728] sm:$0xff]  ;;  %v2231_v6 = vld [vmem:[%s6783_s7 + $0x3720] sm:$0xff] }
 0x534   : > { %v4125_v56 = vpop.f32.mrf.mxu0  ;;  %v4232_v21 = vpop.f32.mrf.mxu1  ;;  %v3926_v20 = vadd.f32 %v8456_v45, %v3819_v1  ;;  %v4031_v39 = vadd.f32 %v8437_v37, %v3924_v62  ;;  %v2202_v34 = vld [vmem:[%s6783_s7 + $0x3638] sm:$0xff]  ;;  %v2201_v11 = vld [vmem:[%s6783_s7 + $0x3630] sm:$0xff]  ;;  %v2136_v19 = vld [vmem:[%s6783_s7 + $0x3428] sm:$0xff] }
 0x535   : > { %5973 = vst [vmem:[%s8493_s6 + $0x60] sm:$0xff] %v4227_v63  ;;  %v4126_v41 = vadd.f32 %v4125_v56, %v4019_v55  ;;  %v4229_v40 = vadd.f32 %v4228_v42, %v4122_v38  ;;  %4504 = vmatpush2.xpose.msra.mxu0 %v2359_v15  ;;  %4611 = vmatpush2.xpose.msra.mxu1 %v2361_v57  ;;  %v2168_v42 = vld [vmem:[%s6783_s7 + $0x3528] sm:$0xff]  ;;  %v2170_v15 = vld [vmem:[%s6783_s7 + $0x3538] sm:$0xff]  ;;  %v2167_v57 = vld [vmem:[%s6783_s7 + $0x3520] sm:$0xff] }
 0x536   : > { %v4127_v53 = vpop.f32.mrf.mxu0  ;;  %v4234_v52 = vpop.f32.mrf.mxu1  ;;  %4505 = vmatprep.subr.mxu0 %v2328_v28  ;;  %4612 = vmatprep.subr.mxu1 %v2330_v50  ;;  %v4033_v49 = vadd.f32 %v8458_v2, %v3926_v20  ;;  %v2169_v55 = vld [vmem:[%s6783_s7 + $0x3530] sm:$0xff]  ;;  %v2138_v38 = vld [vmem:[%s6783_s7 + $0x3438] sm:$0xff]  ;;  %v2135_v63 = vld [vmem:[%s6783_s7 + $0x3420] sm:$0xff] }
 0x537   : > { %5974 = vst [vmem:[%s8493_s6 + $0x68] sm:$0xff] %v4229_v40  ;;  %v4128_v8 = vadd.f32 %v4127_v53, %v4021_v16  ;;  %v4233_v54 = vadd.f32 %v4232_v21, %v4126_v41  ;;  %v2137_v28 = vld [vmem:[%s6783_s7 + $0x3430] sm:$0xff]  ;;  %v2104_v50 = vld [vmem:[%s6783_s7 + $0x3328] sm:$0xff]  ;;  %v2106_v0 = vld [vmem:[%s6783_s7 + $0x3338] sm:$0xff] }
 0x538   : > { %v4131_v35 = vpop.f32.mrf.mxu0  ;;  %v4238_v47 = vpop.f32.mrf.mxu1  ;;  %v2103_v61 = vld [vmem:[%s6783_s7 + $0x3320] sm:$0xff]  ;;  %v2105_v33 = vld [vmem:[%s6783_s7 + $0x3330] sm:$0xff]  ;;  %v2072_v56 = vld [vmem:[%s6783_s7 + $0x3228] sm:$0xff] }
 0x539   : > { %5977 = vst [vmem:[%s8493_s6 + $0x80] sm:$0xff] %v4233_v54  ;;  %v4132_v10 = vadd.f32 %v4131_v35, %v4025_v25  ;;  %v4235_v3 = vadd.f32 %v4234_v52, %v4128_v8  ;;  %4506 = vmatpush2.xpose.msra.mxu0 %v2327_v14  ;;  %4613 = vmatpush2.xpose.msra.mxu1 %v2329_v58  ;;  %v2074_v21 = vld [vmem:[%s6783_s7 + $0x3238] sm:$0xff]  ;;  %v2071_v16 = vld [vmem:[%s6783_s7 + $0x3220] sm:$0xff]  ;;  %v2073_v41 = vld [vmem:[%s6783_s7 + $0x3230] sm:$0xff] }
 0x53a   : > { %v4133_v48 = vpop.f32.mrf.mxu0  ;;  %v4240_v17 = vpop.f32.mrf.mxu1  ;;  %4507 = vmatprep.subr.mxu0 %v2296_v30  ;;  %4614 = vmatprep.subr.mxu1 %v2298_v26  ;;  %v2040_v40 = vld [vmem:[%s6783_s7 + $0x3128] sm:$0xff]  ;;  %v2042_v59 = vld [vmem:[%s6783_s7 + $0x3138] sm:$0xff]  ;;  %v2039_v1 = vld [vmem:[%s6783_s7 + $0x3120] sm:$0xff] }
 0x53b   : > { %5978 = vst [vmem:[%s8493_s6 + $0x88] sm:$0xff] %v4235_v3  ;;  %v4134_v29 = vadd.f32 %v4133_v48, %v4027_v51  ;;  %v4239_v45 = vadd.f32 %v4238_v47, %v4132_v10  ;;  %v2041_v53 = vld [vmem:[%s6783_s7 + $0x3130] sm:$0xff]  ;;  %v2008_v52 = vld [vmem:[%s6783_s7 + $0x3028] sm:$0xff]  ;;  %v2010_v14 = vld [vmem:[%s6783_s7 + $0x3038] sm:$0xff] }
 0x53c   : > { %v4137_v60 = vpop.f32.mrf.mxu0  ;;  %v4244_v9 = vpop.f32.mrf.mxu1  ;;  %v2007_v58 = vld [vmem:[%s6783_s7 + $0x3020] sm:$0xff]  ;;  %v2009_v25 = vld [vmem:[%s6783_s7 + $0x3030] sm:$0xff]  ;;  %v1980_v62 = vld [vmem:[%s6783_s7 + $0x2f48] sm:$0xff] }
 0x53d   : > { %5981 = vst [vmem:[%s8493_s6 + $0xa0] sm:$0xff] %v4239_v45  ;;  %v4138_v18 = vadd.f32 %v4137_v60, %v4031_v39  ;;  %v4241_v44 = vadd.f32 %v4240_v17, %v4134_v29  ;;  %4508 = vmatpush2.xpose.msra.mxu0 %v2295_v36  ;;  %4615 = vmatpush2.xpose.msra.mxu1 %v2297_v5  ;;  %v1982_v8 = vld [vmem:[%s6783_s7 + $0x2f58] sm:$0xff]  ;;  %v1979_v54 = vld [vmem:[%s6783_s7 + $0x2f40] sm:$0xff]  ;;  %v1981_v30 = vld [vmem:[%s6783_s7 + $0x2f50] sm:$0xff] }
 0x53e   : > { %v4139_v37 = vpop.f32.mrf.mxu0  ;;  %v4246_v4 = vpop.f32.mrf.mxu1  ;;  %4509 = vmatprep.subr.mxu0 %v2264_v22  ;;  %4616 = vmatprep.subr.mxu1 %v2266_v13  ;;  %v1948_v26 = vld [vmem:[%s6783_s7 + $0x2e48] sm:$0xff]  ;;  %v6230_v51 = vld [vmem:[#allocation2 + $0x20] sm:$0xff]  ;;  %v6231_v35 = vld [vmem:[#allocation2 + $0x30] sm:$0xff] }
 0x53f   : > { %5982 = vst [vmem:[%s8493_s6 + $0xa8] sm:$0xff] %v4241_v44  ;;  %v4140_v2 = vadd.f32 %v4139_v37, %v4033_v49  ;;  %v4245_v32 = vadd.f32 %v4244_v9, %v4138_v18  ;;  %v1950_v47 = vld [vmem:[%s6783_s7 + $0x2e58] sm:$0xff]  ;;  %v6232_v20 = vld [vmem:[#allocation2 + $0x128] sm:$0xff]  ;;  %v1947_v10 = vld [vmem:[%s6783_s7 + $0x2e40] sm:$0xff] }
 0x540   : > { %v1949_v3 = vld [vmem:[%s6783_s7 + $0x2e50] sm:$0xff]  ;;  %v6233_v48 = vld [vmem:[#allocation2 + $0x138] sm:$0xff]  ;;  %v1916_v17 = vld [vmem:[%s6783_s7 + $0x2d48] sm:$0xff] }
 0x541   : > { %5985 = vst [vmem:[%s8493_s6 + $0xc0] sm:$0xff] %v4245_v32  ;;  %v4247_v7 = vadd.f32 %v4246_v4, %v4140_v2  ;;  %4510 = vmatpush2.xpose.msra.mxu0 %v2263_v31  ;;  %4617 = vmatpush2.xpose.msra.mxu1 %v2265_v46  ;;  %v6234_v36 = vld [vmem:[#allocation2 + $0x120] sm:$0xff]  ;;  %v6235_v5 = vld [vmem:[#allocation2 + $0x130] sm:$0xff]  ;;  %v1918_v39 = vld [vmem:[%s6783_s7 + $0x2d58] sm:$0xff] }
 0x542   : > { %4511 = vmatprep.subr.mxu0 %v2232_v43  ;;  %4618 = vmatprep.subr.mxu1 %v2234_v24  ;;  %v6236_v29 = vld [vmem:[#allocation2 + $0x228] sm:$0xff]  ;;  %v1915_v45 = vld [vmem:[%s6783_s7 + $0x2d40] sm:$0xff]  ;;  %v1917_v22 = vld [vmem:[%s6783_s7 + $0x2d50] sm:$0xff] }
 0x543   : > { %5986 = vst [vmem:[%s8493_s6 + $0xc8] sm:$0xff] %v4247_v7  ;;  %v6237_v13 = vld [vmem:[#allocation2 + $0x238] sm:$0xff]  ;;  %v1884_v60 = vld [vmem:[%s6783_s7 + $0x2c48] sm:$0xff]  ;;  %v6238_v9 = vld [vmem:[#allocation2 + $0x220] sm:$0xff] }
 0x544   : > { %v6239_v49 = vld [vmem:[#allocation2 + $0x230] sm:$0xff]  ;;  %v1886_v18 = vld [vmem:[%s6783_s7 + $0x2c58] sm:$0xff]  ;;  %v6240_v44 = vld [vmem:[#allocation2 + $0x328] sm:$0xff] }
 0x545   : > { %4512 = vmatpush2.xpose.msra.mxu0 %v2231_v6  ;;  %4619 = vmatpush2.xpose.msra.mxu1 %v2233_v12  ;;  %v1883_v37 = vld [vmem:[%s6783_s7 + $0x2c40] sm:$0xff]  ;;  %v1885_v4 = vld [vmem:[%s6783_s7 + $0x2c50] sm:$0xff]  ;;  %v6241_v31 = vld [vmem:[#allocation2 + $0x338] sm:$0xff] }
 0x546   : > { %4513 = vmatprep.subr.mxu0 %v2200_v27  ;;  %4620 = vmatprep.subr.mxu1 %v2202_v34  ;;  %v1852_v46 = vld [vmem:[%s6783_s7 + $0x2b48] sm:$0xff]  ;;  %v6242_v2 = vld [vmem:[#allocation2 + $0x320] sm:$0xff]  ;;  %v6243_v32 = vld [vmem:[#allocation2 + $0x330] sm:$0xff] }
 0x547   : > { %v1854_v43 = vld [vmem:[%s6783_s7 + $0x2b58] sm:$0xff]  ;;  %v6244_v24 = vld [vmem:[#allocation2 + $0x428] sm:$0xff]  ;;  %v1851_v7 = vld [vmem:[%s6783_s7 + $0x2b40] sm:$0xff] }
 0x548   : > { %v1853_v6 = vld [vmem:[%s6783_s7 + $0x2b50] sm:$0xff]  ;;  %v6245_v12 = vld [vmem:[#allocation2 + $0x438] sm:$0xff]  ;;  %v1820_v27 = vld [vmem:[%s6783_s7 + $0x2a48] sm:$0xff] }
 0x549   : > { %4514 = vmatpush2.xpose.msra.mxu0 %v2199_v23  ;;  %4621 = vmatpush2.xpose.msra.mxu1 %v2201_v11  ;;  %v6246_v34 = vld [vmem:[#allocation2 + $0x420] sm:$0xff]  ;;  %v6247_v23 = vld [vmem:[#allocation2 + $0x430] sm:$0xff]  ;;  %v1822_v11 = vld [vmem:[%s6783_s7 + $0x2a58] sm:$0xff] }
 0x54a   : > { %4515 = vmatprep.subr.mxu0 %v2168_v42  ;;  %4622 = vmatprep.subr.mxu1 %v2170_v15  ;;  %v6248_v42 = vld [vmem:[#allocation2 + $0x528] sm:$0xff]  ;;  %v1819_v15 = vld [vmem:[%s6783_s7 + $0x2a40] sm:$0xff] }
 0x54d   : > { %4516 = vmatpush2.xpose.msra.mxu0 %v2167_v57  ;;  %4623 = vmatpush2.xpose.msra.mxu1 %v2169_v55  ;;  %v1821_v57 = vld [vmem:[%s6783_s7 + $0x2a50] sm:$0xff]  ;;  %v6249_v55 = vld [vmem:[#allocation2 + $0x538] sm:$0xff] }
 0x54e   : > { %4517 = vmatprep.subr.mxu0 %v2136_v19  ;;  %4624 = vmatprep.subr.mxu1 %v2138_v38  ;;  %v1788_v19 = vld [vmem:[%s6783_s7 + $0x2948] sm:$0xff]  ;;  %v6250_v38 = vld [vmem:[#allocation2 + $0x520] sm:$0xff] }
 0x551   : > { %4518 = vmatpush2.xpose.msra.mxu0 %v2135_v63  ;;  %4625 = vmatpush2.xpose.msra.mxu1 %v2137_v28  ;;  %v6251_v63 = vld [vmem:[#allocation2 + $0x530] sm:$0xff]  ;;  %v1790_v28 = vld [vmem:[%s6783_s7 + $0x2958] sm:$0xff] }
 0x552   : > { %4519 = vmatprep.subr.mxu0 %v2104_v50  ;;  %4626 = vmatprep.subr.mxu1 %v2106_v0  ;;  %v6252_v50 = vld [vmem:[#allocation2 + $0x628] sm:$0xff]  ;;  %v1787_v0 = vld [vmem:[%s6783_s7 + $0x2940] sm:$0xff] }
 0x555   : > { %4520 = vmatpush2.xpose.msra.mxu0 %v2103_v61  ;;  %4627 = vmatpush2.xpose.msra.mxu1 %v2105_v33  ;;  %v1789_v61 = vld [vmem:[%s6783_s7 + $0x2950] sm:$0xff]  ;;  %v6253_v33 = vld [vmem:[#allocation2 + $0x638] sm:$0xff] }
 0x556   : > { %4521 = vmatprep.subr.mxu0 %v2072_v56  ;;  %4628 = vmatprep.subr.mxu1 %v2074_v21  ;;  %v1756_v56 = vld [vmem:[%s6783_s7 + $0x2848] sm:$0xff]  ;;  %v1758_v21 = vld [vmem:[%s6783_s7 + $0x2858] sm:$0xff] }
 0x559   : > { %4522 = vmatpush2.xpose.msra.mxu0 %v2071_v16  ;;  %4629 = vmatpush2.xpose.msra.mxu1 %v2073_v41  ;;  %v6254_v16 = vld [vmem:[#allocation2 + $0x620] sm:$0xff]  ;;  %v6255_v41 = vld [vmem:[#allocation2 + $0x630] sm:$0xff] }
 0x55a   : > { %4523 = vmatprep.subr.mxu0 %v2040_v40  ;;  %4630 = vmatprep.subr.mxu1 %v2042_v59  ;;  %v1755_v40 = vld [vmem:[%s6783_s7 + $0x2840] sm:$0xff]  ;;  %v1757_v59 = vld [vmem:[%s6783_s7 + $0x2850] sm:$0xff] }
 0x55d   : > { %4524 = vmatpush2.xpose.msra.mxu0 %v2039_v1  ;;  %4631 = vmatpush2.xpose.msra.mxu1 %v2041_v53  ;;  %v1724_v1 = vld [vmem:[%s6783_s7 + $0x2748] sm:$0xff]  ;;  %v1726_v53 = vld [vmem:[%s6783_s7 + $0x2758] sm:$0xff] }
 0x55e   : > { %4525 = vmatprep.subr.mxu0 %v2008_v52  ;;  %4632 = vmatprep.subr.mxu1 %v2010_v14  ;;  %v6256_v52 = vld [vmem:[#allocation2 + $0x48] sm:$0xff]  ;;  %v6257_v14 = vld [vmem:[#allocation2 + $0x58] sm:$0xff] }
 0x561   : > { %4526 = vmatpush2.xpose.msra.mxu0 %v2007_v58  ;;  %4633 = vmatpush2.xpose.msra.mxu1 %v2009_v25  ;;  %v1723_v58 = vld [vmem:[%s6783_s7 + $0x2740] sm:$0xff]  ;;  %v1725_v25 = vld [vmem:[%s6783_s7 + $0x2750] sm:$0xff] }
 0x562   : > { %4677 = vmatprep.subr.mxu0 %v1980_v62  ;;  %4784 = vmatprep.subr.mxu1 %v1982_v8  ;;  %v1692_v62 = vld [vmem:[%s6783_s7 + $0x2648] sm:$0xff]  ;;  %v1694_v8 = vld [vmem:[%s6783_s7 + $0x2658] sm:$0xff] }
 0x564   : > { %4528 = vmatmul.mubr.f32.vlgmr.msra.gmra.mxu0 %v6230_v51  ;;  %4635 = vmatmul.mubr.f32.vlgmr.msra.gmra.mxu1 %v6231_v35  ;;  %v1662_v51 = vld [vmem:[%s6783_s7 + $0x2558] sm:$0xff]  ;;  %v1659_v35 = vld [vmem:[%s6783_s7 + $0x2540] sm:$0xff] }
 0x565   : > { %4678 = vmatpush1.xpose.msra.mxu0 %v1979_v54  ;;  %4785 = vmatpush1.xpose.msra.mxu1 %v1981_v30  ;;  %v1691_v54 = vld [vmem:[%s6783_s7 + $0x2640] sm:$0xff]  ;;  %v1693_v30 = vld [vmem:[%s6783_s7 + $0x2650] sm:$0xff] }
 0x566   : > { %4533 = vmatprep.mubr.f32.mxu0 %v6232_v20  ;;  %4679 = vmatprep.subr.mxu0 %v1948_v26  ;;  %v1660_v26 = vld [vmem:[%s6783_s7 + $0x2548] sm:$0xff] }
 0x567   : > { %4786 = vmatprep.subr.mxu1 %v1950_v47  ;;  %4640 = vmatprep.mubr.f32.mxu1 %v6233_v48  ;;  %v1661_v47 = vld [vmem:[%s6783_s7 + $0x2550] sm:$0xff]  ;;  %v1628_v20 = vld [vmem:[%s6783_s7 + $0x2448] sm:$0xff] }
 0x568   : > { %4534 = vmatmul.mubr.f32.gmra.mxu0 %v6234_v36  ;;  %4641 = vmatmul.mubr.f32.gmra.mxu1 %v6235_v5  ;;  %v1629_v48 = vld [vmem:[%s6783_s7 + $0x2450] sm:$0xff]  ;;  %v1598_v36 = vld [vmem:[%s6783_s7 + $0x2358] sm:$0xff]  ;;  %v1595_v5 = vld [vmem:[%s6783_s7 + $0x2340] sm:$0xff] }
 0x569   : > { %4680 = vmatpush1.xpose.msra.mxu0 %v1947_v10  ;;  %4787 = vmatpush1.xpose.msra.mxu1 %v1949_v3  ;;  %v1630_v10 = vld [vmem:[%s6783_s7 + $0x2458] sm:$0xff]  ;;  %v1627_v3 = vld [vmem:[%s6783_s7 + $0x2440] sm:$0xff] }
 0x56a   : > { %4539 = vmatprep.mubr.f32.mxu0 %v6236_v29  ;;  %4681 = vmatprep.subr.mxu0 %v1916_v17  ;;  %v1596_v17 = vld [vmem:[%s6783_s7 + $0x2348] sm:$0xff] }
 0x56b   : > { %4788 = vmatprep.subr.mxu1 %v1918_v39  ;;  %4646 = vmatprep.mubr.f32.mxu1 %v6237_v13  ;;  %v1597_v39 = vld [vmem:[%s6783_s7 + $0x2350] sm:$0xff]  ;;  %v1564_v29 = vld [vmem:[%s6783_s7 + $0x2248] sm:$0xff] }
 0x56c   : > { %4540 = vmatmul.mubr.f32.gmra.mxu0 %v6238_v9  ;;  %4647 = vmatmul.mubr.f32.gmra.mxu1 %v6239_v49  ;;  %v1565_v13 = vld [vmem:[%s6783_s7 + $0x2250] sm:$0xff]  ;;  %v1534_v9 = vld [vmem:[%s6783_s7 + $0x2158] sm:$0xff]  ;;  %v1531_v49 = vld [vmem:[%s6783_s7 + $0x2140] sm:$0xff] }
 0x56d   : > { %4682 = vmatpush1.xpose.msra.mxu0 %v1915_v45  ;;  %4789 = vmatpush1.xpose.msra.mxu1 %v1917_v22  ;;  %v1566_v45 = vld [vmem:[%s6783_s7 + $0x2258] sm:$0xff]  ;;  %v1563_v22 = vld [vmem:[%s6783_s7 + $0x2240] sm:$0xff] }
 0x56e   : > { %4545 = vmatprep.mubr.f32.mxu0 %v6240_v44  ;;  %4683 = vmatprep.subr.mxu0 %v1884_v60  ;;  %v1532_v60 = vld [vmem:[%s6783_s7 + $0x2148] sm:$0xff] }
 0x56f   : > { %4790 = vmatprep.subr.mxu1 %v1886_v18  ;;  %4652 = vmatprep.mubr.f32.mxu1 %v6241_v31  ;;  %v1533_v18 = vld [vmem:[%s6783_s7 + $0x2150] sm:$0xff]  ;;  %v1500_v44 = vld [vmem:[%s6783_s7 + $0x2048] sm:$0xff] }
 0x570   : > { %4546 = vmatmul.mubr.f32.gmra.mxu0 %v6242_v2  ;;  %4653 = vmatmul.mubr.f32.gmra.mxu1 %v6243_v32  ;;  %v1501_v2 = vld [vmem:[%s6783_s7 + $0x2050] sm:$0xff]  ;;  %v2492_v32 = vld [vmem:[%s6783_s7 + $0x3f48] sm:$0xff] }
 0x571   : > { %4684 = vmatpush1.xpose.msra.mxu0 %v1883_v37  ;;  %4791 = vmatpush1.xpose.msra.mxu1 %v1885_v4  ;;  %v1502_v37 = vld [vmem:[%s6783_s7 + $0x2058] sm:$0xff]  ;;  %v9940_v4 = vld [vmem:[#allocation12_spill] sm:$0xff] }
 0x572   : > { %4551 = vmatprep.mubr.f32.mxu0 %v6244_v24  ;;  %4685 = vmatprep.subr.mxu0 %v1852_v46  ;;  %v2527_v31 = vsub.s32 2, %v9940_v4  ;;  %v1499_v46 = vld [vmem:[%s6783_s7 + $0x2040] sm:$0xff]  ;;  %v2531_v24 = vsub.s32 3, %v9940_v4 }
 0x573   : > { %4792 = vmatprep.subr.mxu1 %v1854_v43  ;;  %4658 = vmatprep.mubr.f32.mxu1 %v6245_v12  ;;  %v2494_v43 = vld [vmem:[%s6783_s7 + $0x3f58] sm:$0xff]  ;;  %v2491_v12 = vld [vmem:[%s6783_s7 + $0x3f40] sm:$0xff] }
 0x574   : > { %4552 = vmatmul.mubr.f32.gmra.mxu0 %v6246_v34  ;;  %4659 = vmatmul.mubr.f32.gmra.mxu1 %v6247_v23  ;;  %v2460_v23 = vld [vmem:[%s6783_s7 + $0x3e48] sm:$0xff] }
 0x575   : > { %4686 = vmatpush1.xpose.msra.mxu0 %v1851_v7  ;;  %4793 = vmatpush1.xpose.msra.mxu1 %v1853_v6  ;;  %v6258_v7 = vld [vmem:[%s7113_s25] sm:$0xf] }
 0x576   : > { %4557 = vmatprep.mubr.f32.mxu0 %v6248_v42  ;;  %4687 = vmatprep.subr.mxu0 %v1820_v27  ;;  %v8667_v6 = vrot.slane %v6258_v7, %v2527_v31  ;;  %v2493_v27 = vld [vmem:[%s6783_s7 + $0x3f50] sm:$0xff]  ;;  %v8671_v34 = vrot.slane %v6258_v7, %v2531_v24  ;;  %v2331_v31 = vld [vmem:[%s6783_s7 + $0x3a40] sm:$0xff]  ;;  %v2302_v24 = vld [vmem:[%s6783_s7 + $0x3958] sm:$0xff] }
 0x577   : > { %4794 = vmatprep.subr.mxu1 %v1822_v11  ;;  %4664 = vmatprep.mubr.f32.mxu1 %v6249_v55  ;;  %v2462_v11 = vld [vmem:[%s6783_s7 + $0x3e58] sm:$0xff] }
 0x578   : > { %4558 = vmatmul.mubr.f32.gmra.mxu0 %v6250_v38  ;;  %4665 = vmatmul.mubr.f32.gmra.mxu1 %v6251_v63  ;;  %v2459_v38 = vld [vmem:[%s6783_s7 + $0x3e40] sm:$0xff]  ;;  %v2461_v63 = vld [vmem:[%s6783_s7 + $0x3e50] sm:$0xff] }
 0x579   : > { %4688 = vmatpush1.xpose.msra.mxu0 %v1819_v15  ;;  %4795 = vmatpush1.xpose.msra.mxu1 %v1821_v57 }
 0x57a   : > { %4563 = vmatprep.mubr.f32.mxu0 %v6252_v50  ;;  %4689 = vmatprep.subr.mxu0 %v1788_v19 }
 0x57b   : > { %4796 = vmatprep.subr.mxu1 %v1790_v28  ;;  %4670 = vmatprep.mubr.f32.mxu1 %v6253_v33 }
 0x57c   : > { %4564 = vmatmul.mubr.f32.gmra.mxu0 %v6254_v16  ;;  %4671 = vmatmul.mubr.f32.gmra.mxu1 %v6255_v41  ;;  %v2427_v41 = vld [vmem:[%s6783_s7 + $0x3d40] sm:$0xff] }
 0x57d   : > { %4690 = vmatpush1.xpose.msra.mxu0 %v1787_v0  ;;  %4797 = vmatpush1.xpose.msra.mxu1 %v1789_v61  ;;  %v2428_v0 = vld [vmem:[%s6783_s7 + $0x3d48] sm:$0xff]  ;;  %v2430_v61 = vld [vmem:[%s6783_s7 + $0x3d58] sm:$0xff] }
 0x57e   : > { %4691 = vmatprep.subr.mxu0 %v1756_v56  ;;  %4798 = vmatprep.subr.mxu1 %v1758_v21 }
 0x57f   : > { %4741 = vmatprep.mubr.f32.mxu0 %v6256_v52  ;;  %4848 = vmatprep.mubr.f32.mxu1 %v6257_v14  ;;  %v2398_v52 = vld [vmem:[%s6783_s7 + $0x3c58] sm:$0xff] }
 0x581   : > { %4692 = vmatpush1.xpose.msra.mxu0 %v1755_v40  ;;  %4799 = vmatpush1.xpose.msra.mxu1 %v1757_v59  ;;  %v2429_v40 = vld [vmem:[%s6783_s7 + $0x3d50] sm:$0xff] }
 0x582   : > { %4693 = vmatprep.subr.mxu0 %v1724_v1  ;;  %4800 = vmatprep.subr.mxu1 %v1726_v53  ;;  %v2396_v53 = vld [vmem:[%s6783_s7 + $0x3c48] sm:$0xff] }
 0x585   : > { %4694 = vmatpush1.xpose.msra.mxu0 %v1723_v58  ;;  %4801 = vmatpush1.xpose.msra.mxu1 %v1725_v25 }
 0x586   : > { %4695 = vmatprep.subr.mxu0 %v1692_v62  ;;  %4802 = vmatprep.subr.mxu1 %v1694_v8 }
 0x589   : > { %4696 = vmatpush1.xpose.msra.mxu0 %v1691_v54  ;;  %4803 = vmatpush1.xpose.msra.mxu1 %v1693_v30  ;;  %v2395_v30 = vld [vmem:[%s6783_s7 + $0x3c40] sm:$0xff] }
 0x58a   : > { %4697 = vmatprep.subr.mxu0 %v1660_v26  ;;  %4804 = vmatprep.subr.mxu1 %v1662_v51  ;;  %v2397_v26 = vld [vmem:[%s6783_s7 + $0x3c50] sm:$0xff] }
 0x58d   : > { %4698 = vmatpush1.xpose.msra.mxu0 %v1659_v35  ;;  %4805 = vmatpush1.xpose.msra.mxu1 %v1661_v47  ;;  %v2364_v47 = vld [vmem:[%s6783_s7 + $0x3b48] sm:$0xff] }
 0x58e   : > { %4699 = vmatprep.subr.mxu0 %v1628_v20  ;;  %4806 = vmatprep.subr.mxu1 %v1630_v10  ;;  %v2366_v20 = vld [vmem:[%s6783_s7 + $0x3b58] sm:$0xff] }
 0x591   : > { %4700 = vmatpush1.xpose.msra.mxu0 %v1627_v3  ;;  %4807 = vmatpush1.xpose.msra.mxu1 %v1629_v48 }
 0x592   : > { %4701 = vmatprep.subr.mxu0 %v1596_v17  ;;  %4808 = vmatprep.subr.mxu1 %v1598_v36 }
 0x595   : > { %4702 = vmatpush1.xpose.msra.mxu0 %v1595_v5  ;;  %4809 = vmatpush1.xpose.msra.mxu1 %v1597_v39  ;;  %v2363_v39 = vld [vmem:[%s6783_s7 + $0x3b40] sm:$0xff] }
 0x596   : > { %4703 = vmatprep.subr.mxu0 %v1564_v29  ;;  %4810 = vmatprep.subr.mxu1 %v1566_v45  ;;  %v2365_v29 = vld [vmem:[%s6783_s7 + $0x3b50] sm:$0xff] }
 0x599   : > { %4704 = vmatpush1.xpose.msra.mxu0 %v1563_v22  ;;  %4811 = vmatpush1.xpose.msra.mxu1 %v1565_v13  ;;  %v2332_v13 = vld [vmem:[%s6783_s7 + $0x3a48] sm:$0xff] }
 0x59a   : > { %4705 = vmatprep.subr.mxu0 %v1532_v60  ;;  %4812 = vmatprep.subr.mxu1 %v1534_v9  ;;  %v2334_v60 = vld [vmem:[%s6783_s7 + $0x3a58] sm:$0xff] }
 0x59d   : > { %4706 = vmatpush1.xpose.msra.mxu0 %v1531_v49  ;;  %4813 = vmatpush1.xpose.msra.mxu1 %v1533_v18 }
 0x59e   : > { %4707 = vmatprep.subr.mxu0 %v1500_v44  ;;  %4814 = vmatprep.subr.mxu1 %v1502_v37 }
 0x5a1   : > { %4708 = vmatpush1.xpose.msra.mxu0 %v1499_v46  ;;  %4815 = vmatpush1.xpose.msra.mxu1 %v1501_v2  ;;  %v2333_v46 = vld [vmem:[%s6783_s7 + $0x3a50] sm:$0xff] }
 0x5a2   : > { %4709 = vmatprep.subr.mxu0 %v2492_v32  ;;  %4816 = vmatprep.subr.mxu1 %v2494_v43  ;;  %v2300_v43 = vld [vmem:[%s6783_s7 + $0x3948] sm:$0xff] }
 0x5a4   : > { %v4315_v42 = vpop.f32.mrf.mxu0  ;;  %v4422_v15 = vpop.f32.mrf.mxu1 }
 0x5a5   : > { %v4316_v57 = vadd.f32 %v4315_v42, %v8667_v6  ;;  %4710 = vmatpush2.xpose.msra.mxu0 %v2491_v12  ;;  %4817 = vmatpush2.xpose.msra.mxu1 %v2493_v27 }
 0x5a6   : > { %v4317_v55 = vpop.f32.mrf.mxu0  ;;  %v4424_v19 = vpop.f32.mrf.mxu1  ;;  %4711 = vmatprep.subr.mxu0 %v2460_v23  ;;  %4818 = vmatprep.subr.mxu1 %v2462_v11 }
 0x5a7   : > { %v8678_v28 = vadd.f32 %v4422_v15, %v4316_v57  ;;  %v4318_v50 = vadd.f32 %v4317_v55, %v8671_v34  ;;  %v2299_v15 = vld [vmem:[%s6783_s7 + $0x3940] sm:$0xff]  ;;  %v2301_v57 = vld [vmem:[%s6783_s7 + $0x3950] sm:$0xff] }
 0x5a8   : > { %v4321_v33 = vpop.f32.mrf.mxu0  ;;  %v4428_v56 = vpop.f32.mrf.mxu1 }
 0x5a9   : > { %v8683_v21 = vadd.f32 %v4424_v19, %v4318_v50  ;;  %4712 = vmatpush2.xpose.msra.mxu0 %v2459_v38  ;;  %4819 = vmatpush2.xpose.msra.mxu1 %v2461_v63  ;;  %v4322_v16 = vadd.f32 %v4321_v33, %v8667_v6  ;;  %v2268_v38 = vld [vmem:[%s6783_s7 + $0x3848] sm:$0xff]  ;;  %v2270_v63 = vld [vmem:[%s6783_s7 + $0x3858] sm:$0xff] }
 0x5aa   : > { %4713 = vmatprep.subr.mxu0 %v2428_v0  ;;  %4820 = vmatprep.subr.mxu1 %v2430_v61  ;;  %v4323_v59 = vpop.f32.mrf.mxu0  ;;  %v4430_v1 = vpop.f32.mrf.mxu1 }
 0x5ab   : > { %v4324_v14 = vadd.f32 %v4323_v59, %v8671_v34  ;;  %v8691_v58 = vadd.f32 %v4428_v56, %v4322_v16  ;;  %v2267_v16 = vld [vmem:[%s6783_s7 + $0x3840] sm:$0xff]  ;;  %v2236_v59 = vld [vmem:[%s6783_s7 + $0x3748] sm:$0xff] }
 0x5ac   : > { %v4327_v25 = vpop.f32.mrf.mxu0  ;;  %v4434_v62 = vpop.f32.mrf.mxu1 }
 0x5ad   : > { %4714 = vmatpush2.xpose.msra.mxu0 %v2427_v41  ;;  %4821 = vmatpush2.xpose.msra.mxu1 %v2429_v40  ;;  %v4328_v8 = vadd.f32 %v4327_v25, %v8667_v6  ;;  %v8694_v54 = vadd.f32 %v4430_v1, %v4324_v14  ;;  %v2269_v41 = vld [vmem:[%s6783_s7 + $0x3850] sm:$0xff]  ;;  %v2238_v1 = vld [vmem:[%s6783_s7 + $0x3758] sm:$0xff]  ;;  %v2204_v14 = vld [vmem:[%s6783_s7 + $0x3648] sm:$0xff] }
 0x5ae   : > { %4715 = vmatprep.subr.mxu0 %v2396_v53  ;;  %4822 = vmatprep.subr.mxu1 %v2398_v52  ;;  %v4329_v51 = vpop.f32.mrf.mxu0  ;;  %v4436_v35 = vpop.f32.mrf.mxu1  ;;  %v2237_v52 = vld [vmem:[%s6783_s7 + $0x3750] sm:$0xff]  ;;  %v2206_v25 = vld [vmem:[%s6783_s7 + $0x3658] sm:$0xff] }
 0x5af   : > { %v4330_v10 = vadd.f32 %v4329_v51, %v8671_v34  ;;  %v8701_v3 = vadd.f32 %v4434_v62, %v4328_v8  ;;  %v2203_v62 = vld [vmem:[%s6783_s7 + $0x3640] sm:$0xff]  ;;  %v2205_v8 = vld [vmem:[%s6783_s7 + $0x3650] sm:$0xff] }
 0x5b0   : > { %v4333_v48 = vpop.f32.mrf.mxu0  ;;  %v4440_v17 = vpop.f32.mrf.mxu1  ;;  %v2171_v51 = vld [vmem:[%s6783_s7 + $0x3540] sm:$0xff] }
 0x5b1   : > { %4716 = vmatpush2.xpose.msra.mxu0 %v2395_v30  ;;  %4823 = vmatpush2.xpose.msra.mxu1 %v2397_v26  ;;  %v4334_v36 = vadd.f32 %v4333_v48, %v8667_v6  ;;  %v8704_v5 = vadd.f32 %v4436_v35, %v4330_v10  ;;  %v2172_v30 = vld [vmem:[%s6783_s7 + $0x3548] sm:$0xff]  ;;  %v2174_v26 = vld [vmem:[%s6783_s7 + $0x3558] sm:$0xff]  ;;  %v2173_v35 = vld [vmem:[%s6783_s7 + $0x3550] sm:$0xff] }
 0x5b2   : > { %4717 = vmatprep.subr.mxu0 %v2364_v47  ;;  %4824 = vmatprep.subr.mxu1 %v2366_v20  ;;  %v4335_v45 = vpop.f32.mrf.mxu0  ;;  %v4442_v22 = vpop.f32.mrf.mxu1  ;;  %v2140_v47 = vld [vmem:[%s6783_s7 + $0x3448] sm:$0xff]  ;;  %v2142_v20 = vld [vmem:[%s6783_s7 + $0x3458] sm:$0xff]  ;;  %v2139_v10 = vld [vmem:[%s6783_s7 + $0x3440] sm:$0xff] }
 0x5b3   : > { %v4336_v9 = vadd.f32 %v4335_v45, %v8671_v34  ;;  %v8711_v49 = vadd.f32 %v4440_v17, %v4334_v36  ;;  %v2141_v48 = vld [vmem:[%s6783_s7 + $0x3450] sm:$0xff]  ;;  %v2108_v17 = vld [vmem:[%s6783_s7 + $0x3348] sm:$0xff]  ;;  %v2110_v36 = vld [vmem:[%s6783_s7 + $0x3358] sm:$0xff] }
 0x5b4   : > { %v4339_v18 = vpop.f32.mrf.mxu0  ;;  %v4446_v44 = vpop.f32.mrf.mxu1  ;;  %v2076_v45 = vld [vmem:[%s6783_s7 + $0x3248] sm:$0xff] }
 0x5b5   : > { %4718 = vmatpush2.xpose.msra.mxu0 %v2363_v39  ;;  %4825 = vmatpush2.xpose.msra.mxu1 %v2365_v29  ;;  %v4340_v37 = vadd.f32 %v4339_v18, %v8667_v6  ;;  %v8714_v4 = vadd.f32 %v4442_v22, %v4336_v9  ;;  %v2107_v39 = vld [vmem:[%s6783_s7 + $0x3340] sm:$0xff]  ;;  %v2109_v29 = vld [vmem:[%s6783_s7 + $0x3350] sm:$0xff]  ;;  %v2078_v22 = vld [vmem:[%s6783_s7 + $0x3258] sm:$0xff] }
 0x5b6   : > { %4719 = vmatprep.subr.mxu0 %v2332_v13  ;;  %4826 = vmatprep.subr.mxu1 %v2334_v60  ;;  %v4341_v2 = vpop.f32.mrf.mxu0  ;;  %v4448_v32 = vpop.f32.mrf.mxu1  ;;  %v2075_v13 = vld [vmem:[%s6783_s7 + $0x3240] sm:$0xff]  ;;  %v2077_v60 = vld [vmem:[%s6783_s7 + $0x3250] sm:$0xff]  ;;  %v2044_v9 = vld [vmem:[%s6783_s7 + $0x3148] sm:$0xff] }
 0x5b7   : > { %v4342_v7 = vadd.f32 %v4341_v2, %v8671_v34  ;;  %v8721_v12 = vadd.f32 %v4446_v44, %v4340_v37  ;;  %v2046_v18 = vld [vmem:[%s6783_s7 + $0x3158] sm:$0xff]  ;;  %v2043_v44 = vld [vmem:[%s6783_s7 + $0x3140] sm:$0xff]  ;;  %v2045_v37 = vld [vmem:[%s6783_s7 + $0x3150] sm:$0xff] }
 0x5b8   : > { %v4345_v27 = vpop.f32.mrf.mxu0  ;;  %v4452_v23 = vpop.f32.mrf.mxu1  ;;  %v2011_v2 = vld [vmem:[%s6783_s7 + $0x3040] sm:$0xff] }
 0x5b9   : > { %4720 = vmatpush2.xpose.msra.mxu0 %v2331_v31  ;;  %4827 = vmatpush2.xpose.msra.mxu1 %v2333_v46  ;;  %v4346_v11 = vadd.f32 %v4345_v27, %v8667_v6  ;;  %v8724_v42 = vadd.f32 %v4448_v32, %v4342_v7  ;;  %v2012_v31 = vld [vmem:[%s6783_s7 + $0x3048] sm:$0xff]  ;;  %v2014_v46 = vld [vmem:[%s6783_s7 + $0x3058] sm:$0xff]  ;;  %v2013_v32 = vld [vmem:[%s6783_s7 + $0x3050] sm:$0xff] }
 0x5ba   : > { %4721 = vmatprep.subr.mxu0 %v2300_v43  ;;  %4828 = vmatprep.subr.mxu1 %v2302_v24  ;;  %v4347_v55 = vpop.f32.mrf.mxu0  ;;  %v4454_v19 = vpop.f32.mrf.mxu1  ;;  %v1984_v43 = vld [vmem:[%s6783_s7 + $0x2f68] sm:$0xff]  ;;  %v1986_v24 = vld [vmem:[%s6783_s7 + $0x2f78] sm:$0xff]  ;;  %v1983_v7 = vld [vmem:[%s6783_s7 + $0x2f60] sm:$0xff] }
 0x5bb   : > { %v4348_v50 = vadd.f32 %v4347_v55, %v8671_v34  ;;  %v8731_v0 = vadd.f32 %v4452_v23, %v4346_v11  ;;  %v1985_v27 = vld [vmem:[%s6783_s7 + $0x2f70] sm:$0xff]  ;;  %v1952_v23 = vld [vmem:[%s6783_s7 + $0x2e68] sm:$0xff]  ;;  %v6259_v11 = vld [vmem:[#allocation2 + $0x40] sm:$0xff] }
 0x5bc   : > { %v4351_v61 = vpop.f32.mrf.mxu0  ;;  %v4458_v40 = vpop.f32.mrf.mxu1  ;;  %v6261_v55 = vld [vmem:[#allocation2 + $0x148] sm:$0xff] }
 0x5bd   : > { %4722 = vmatpush2.xpose.msra.mxu0 %v2299_v15  ;;  %4829 = vmatpush2.xpose.msra.mxu1 %v2301_v57  ;;  %v4352_v33 = vadd.f32 %v4351_v61, %v8667_v6  ;;  %v8734_v56 = vadd.f32 %v4454_v19, %v4348_v50  ;;  %v2235_v6 = vld [vmem:[%s6783_s7 + $0x3740] sm:$0xff]  ;;  %v6260_v15 = vld [vmem:[#allocation2 + $0x50] sm:$0xff]  ;;  %v1954_v57 = vld [vmem:[%s6783_s7 + $0x2e78] sm:$0xff] }
 0x5be   : > { %4723 = vmatprep.subr.mxu0 %v2268_v38  ;;  %4830 = vmatprep.subr.mxu1 %v2270_v63  ;;  %v1951_v19 = vld [vmem:[%s6783_s7 + $0x2e60] sm:$0xff]  ;;  %v1953_v38 = vld [vmem:[%s6783_s7 + $0x2e70] sm:$0xff]  ;;  %v6262_v63 = vld [vmem:[#allocation2 + $0x158] sm:$0xff] }
 0x5bf   : > { %v8740_v53 = vadd.f32 %v4458_v40, %v4352_v33  ;;  %v1920_v50 = vld [vmem:[%s6783_s7 + $0x2d68] sm:$0xff]  ;;  %v6263_v61 = vld [vmem:[#allocation2 + $0x140] sm:$0xff]  ;;  %v6264_v33 = vld [vmem:[#allocation2 + $0x150] sm:$0xff] }
 0x5c0   : > { %v1919_v40 = vld [vmem:[%s6783_s7 + $0x2d60] sm:$0xff] }
 0x5c1   : > { %4724 = vmatpush2.xpose.msra.mxu0 %v2267_v16  ;;  %4831 = vmatpush2.xpose.msra.mxu1 %v2269_v41  ;;  %v1922_v16 = vld [vmem:[%s6783_s7 + $0x2d78] sm:$0xff]  ;;  %v6265_v41 = vld [vmem:[#allocation2 + $0x248] sm:$0xff] }
 0x5c2   : > { %4725 = vmatprep.subr.mxu0 %v2236_v59  ;;  %4832 = vmatprep.subr.mxu1 %v2238_v1  ;;  %v1921_v59 = vld [vmem:[%s6783_s7 + $0x2d70] sm:$0xff]  ;;  %v6266_v1 = vld [vmem:[#allocation2 + $0x258] sm:$0xff] }
 0x5c5   : > { %4726 = vmatpush2.xpose.msra.mxu0 %v2235_v6  ;;  %4833 = vmatpush2.xpose.msra.mxu1 %v2237_v52  ;;  %v1888_v6 = vld [vmem:[%s6783_s7 + $0x2c68] sm:$0xff]  ;;  %v6267_v52 = vld [vmem:[#allocation2 + $0x240] sm:$0xff] }
 0x5c6   : > { %4727 = vmatprep.subr.mxu0 %v2204_v14  ;;  %4834 = vmatprep.subr.mxu1 %v2206_v25  ;;  %v6268_v14 = vld [vmem:[#allocation2 + $0x250] sm:$0xff]  ;;  %v1890_v25 = vld [vmem:[%s6783_s7 + $0x2c78] sm:$0xff] }
 0x5c9   : > { %4728 = vmatpush2.xpose.msra.mxu0 %v2203_v62  ;;  %4835 = vmatpush2.xpose.msra.mxu1 %v2205_v8  ;;  %v6269_v62 = vld [vmem:[#allocation2 + $0x348] sm:$0xff]  ;;  %v1887_v8 = vld [vmem:[%s6783_s7 + $0x2c60] sm:$0xff] }
 0x5ca   : > { %4729 = vmatprep.subr.mxu0 %v2172_v30  ;;  %4836 = vmatprep.subr.mxu1 %v2174_v26  ;;  %v1889_v30 = vld [vmem:[%s6783_s7 + $0x2c70] sm:$0xff]  ;;  %v6270_v26 = vld [vmem:[#allocation2 + $0x358] sm:$0xff] }
 0x5cd   : > { %4730 = vmatpush2.xpose.msra.mxu0 %v2171_v51  ;;  %4837 = vmatpush2.xpose.msra.mxu1 %v2173_v35  ;;  %v1856_v51 = vld [vmem:[%s6783_s7 + $0x2b68] sm:$0xff]  ;;  %v6271_v35 = vld [vmem:[#allocation2 + $0x340] sm:$0xff] }
 0x5ce   : > { %4731 = vmatprep.subr.mxu0 %v2140_v47  ;;  %4838 = vmatprep.subr.mxu1 %v2142_v20  ;;  %v6272_v47 = vld [vmem:[#allocation2 + $0x350] sm:$0xff]  ;;  %v1858_v20 = vld [vmem:[%s6783_s7 + $0x2b78] sm:$0xff] }
 0x5d1   : > { %4732 = vmatpush2.xpose.msra.mxu0 %v2139_v10  ;;  %4839 = vmatpush2.xpose.msra.mxu1 %v2141_v48  ;;  %v6273_v10 = vld [vmem:[#allocation2 + $0x448] sm:$0xff]  ;;  %v1855_v48 = vld [vmem:[%s6783_s7 + $0x2b60] sm:$0xff] }
 0x5d2   : > { %4733 = vmatprep.subr.mxu0 %v2108_v17  ;;  %4840 = vmatprep.subr.mxu1 %v2110_v36  ;;  %v1857_v17 = vld [vmem:[%s6783_s7 + $0x2b70] sm:$0xff]  ;;  %v6274_v36 = vld [vmem:[#allocation2 + $0x458] sm:$0xff] }
 0x5d5   : > { %4734 = vmatpush2.xpose.msra.mxu0 %v2107_v39  ;;  %4841 = vmatpush2.xpose.msra.mxu1 %v2109_v29  ;;  %v1824_v39 = vld [vmem:[%s6783_s7 + $0x2a68] sm:$0xff]  ;;  %v6275_v29 = vld [vmem:[#allocation2 + $0x440] sm:$0xff] }
 0x5d6   : > { %4735 = vmatprep.subr.mxu0 %v2076_v45  ;;  %4842 = vmatprep.subr.mxu1 %v2078_v22  ;;  %v6276_v45 = vld [vmem:[#allocation2 + $0x450] sm:$0xff]  ;;  %v1826_v22 = vld [vmem:[%s6783_s7 + $0x2a78] sm:$0xff] }
 0x5d9   : > { %4736 = vmatpush2.xpose.msra.mxu0 %v2075_v13  ;;  %4843 = vmatpush2.xpose.msra.mxu1 %v2077_v60  ;;  %v6277_v13 = vld [vmem:[#allocation2 + $0x548] sm:$0xff]  ;;  %v1823_v60 = vld [vmem:[%s6783_s7 + $0x2a60] sm:$0xff] }
 0x5da   : > { %4737 = vmatprep.subr.mxu0 %v2044_v9  ;;  %4844 = vmatprep.subr.mxu1 %v2046_v18  ;;  %v1825_v9 = vld [vmem:[%s6783_s7 + $0x2a70] sm:$0xff]  ;;  %v6278_v18 = vld [vmem:[#allocation2 + $0x558] sm:$0xff] }
 0x5dd   : > { %4738 = vmatpush2.xpose.msra.mxu0 %v2043_v44  ;;  %4845 = vmatpush2.xpose.msra.mxu1 %v2045_v37  ;;  %v1792_v44 = vld [vmem:[%s6783_s7 + $0x2968] sm:$0xff]  ;;  %v6279_v37 = vld [vmem:[#allocation2 + $0x540] sm:$0xff] }
 0x5de   : > { %4739 = vmatprep.subr.mxu0 %v2012_v31  ;;  %4846 = vmatprep.subr.mxu1 %v2014_v46  ;;  %v6280_v31 = vld [vmem:[#allocation2 + $0x550] sm:$0xff]  ;;  %v1794_v46 = vld [vmem:[%s6783_s7 + $0x2978] sm:$0xff] }
 0x5e1   : > { %4740 = vmatpush2.xpose.msra.mxu0 %v2011_v2  ;;  %4847 = vmatpush2.xpose.msra.mxu1 %v2013_v32  ;;  %v6281_v2 = vld [vmem:[#allocation2 + $0x648] sm:$0xff]  ;;  %v1791_v32 = vld [vmem:[%s6783_s7 + $0x2960] sm:$0xff] }
 0x5e2   : > { %4891 = vmatprep.subr.mxu0 %v1984_v43  ;;  %4998 = vmatprep.subr.mxu1 %v1986_v24  ;;  %v1793_v43 = vld [vmem:[%s6783_s7 + $0x2970] sm:$0xff]  ;;  %v6282_v24 = vld [vmem:[#allocation2 + $0x658] sm:$0xff] }
 0x5e4   : > { %4742 = vmatmul.mubr.f32.vlgmr.msra.gmra.mxu0 %v6259_v11  ;;  %4849 = vmatmul.mubr.f32.vlgmr.msra.gmra.mxu1 %v6260_v15  ;;  %v6284_v11 = vld [vmem:[#allocation2 + $0x650] sm:$0xff]  ;;  %v1759_v15 = vld [vmem:[%s6783_s7 + $0x2860] sm:$0xff] }
 0x5e5   : > { %4892 = vmatpush1.xpose.msra.mxu0 %v1983_v7  ;;  %4999 = vmatpush1.xpose.msra.mxu1 %v1985_v27  ;;  %v1760_v7 = vld [vmem:[%s6783_s7 + $0x2868] sm:$0xff]  ;;  %v1762_v27 = vld [vmem:[%s6783_s7 + $0x2878] sm:$0xff] }
 0x5e6   : > { %4747 = vmatprep.mubr.f32.mxu0 %v6261_v55  ;;  %4893 = vmatprep.subr.mxu0 %v1952_v23  ;;  %v6283_v23 = vld [vmem:[#allocation2 + $0x640] sm:$0xff]  ;;  %v1728_v55 = vld [vmem:[%s6783_s7 + $0x2768] sm:$0xff] }
 0x5e7   : > { %5000 = vmatprep.subr.mxu1 %v1954_v57  ;;  %4854 = vmatprep.mubr.f32.mxu1 %v6262_v63  ;;  %v1761_v57 = vld [vmem:[%s6783_s7 + $0x2870] sm:$0xff]  ;;  %v6286_v63 = vld [vmem:[#allocation2 + $0x78] sm:$0xff] }
 0x5e8   : > { %4748 = vmatmul.mubr.f32.gmra.mxu0 %v6263_v61  ;;  %4855 = vmatmul.mubr.f32.gmra.mxu1 %v6264_v33  ;;  %v1729_v61 = vld [vmem:[%s6783_s7 + $0x2770] sm:$0xff]  ;;  %v1696_v33 = vld [vmem:[%s6783_s7 + $0x2668] sm:$0xff] }
 0x5e9   : > { %4894 = vmatpush1.xpose.msra.mxu0 %v1951_v19  ;;  %5001 = vmatpush1.xpose.msra.mxu1 %v1953_v38  ;;  %v1730_v19 = vld [vmem:[%s6783_s7 + $0x2778] sm:$0xff]  ;;  %v6285_v38 = vld [vmem:[#allocation2 + $0x68] sm:$0xff] }
 0x5ea   : > { %4753 = vmatprep.mubr.f32.mxu0 %v6265_v41  ;;  %4895 = vmatprep.subr.mxu0 %v1920_v50  ;;  %v1727_v50 = vld [vmem:[%s6783_s7 + $0x2760] sm:$0xff] }
 0x5eb   : > { %5002 = vmatprep.subr.mxu1 %v1922_v16  ;;  %4860 = vmatprep.mubr.f32.mxu1 %v6266_v1  ;;  %v1698_v16 = vld [vmem:[%s6783_s7 + $0x2678] sm:$0xff]  ;;  %v1695_v41 = vld [vmem:[%s6783_s7 + $0x2660] sm:$0xff] }
 0x5ec   : > { %4754 = vmatmul.mubr.f32.gmra.mxu0 %v6267_v52  ;;  %4861 = vmatmul.mubr.f32.gmra.mxu1 %v6268_v14  ;;  %v1666_v1 = vld [vmem:[%s6783_s7 + $0x2578] sm:$0xff]  ;;  %v1665_v52 = vld [vmem:[%s6783_s7 + $0x2570] sm:$0xff]  ;;  %v1632_v14 = vld [vmem:[%s6783_s7 + $0x2468] sm:$0xff] }
 0x5ed   : > { %4896 = vmatpush1.xpose.msra.mxu0 %v1919_v40  ;;  %5003 = vmatpush1.xpose.msra.mxu1 %v1921_v59  ;;  %v1697_v40 = vld [vmem:[%s6783_s7 + $0x2670] sm:$0xff]  ;;  %v1664_v59 = vld [vmem:[%s6783_s7 + $0x2568] sm:$0xff] }
 0x5ee   : > { %4759 = vmatprep.mubr.f32.mxu0 %v6269_v62  ;;  %4897 = vmatprep.subr.mxu0 %v1888_v6  ;;  %v1663_v6 = vld [vmem:[%s6783_s7 + $0x2560] sm:$0xff] }
 0x5ef   : > { %5004 = vmatprep.subr.mxu1 %v1890_v25  ;;  %4866 = vmatprep.mubr.f32.mxu1 %v6270_v26  ;;  %v1634_v25 = vld [vmem:[%s6783_s7 + $0x2478] sm:$0xff]  ;;  %v1631_v62 = vld [vmem:[%s6783_s7 + $0x2460] sm:$0xff] }
 0x5f0   : > { %4760 = vmatmul.mubr.f32.gmra.mxu0 %v6271_v35  ;;  %4867 = vmatmul.mubr.f32.gmra.mxu1 %v6272_v47  ;;  %v1602_v26 = vld [vmem:[%s6783_s7 + $0x2378] sm:$0xff]  ;;  %v1601_v35 = vld [vmem:[%s6783_s7 + $0x2370] sm:$0xff]  ;;  %v1568_v47 = vld [vmem:[%s6783_s7 + $0x2268] sm:$0xff] }
 0x5f1   : > { %4898 = vmatpush1.xpose.msra.mxu0 %v1887_v8  ;;  %5005 = vmatpush1.xpose.msra.mxu1 %v1889_v30  ;;  %v1633_v8 = vld [vmem:[%s6783_s7 + $0x2470] sm:$0xff]  ;;  %v1600_v30 = vld [vmem:[%s6783_s7 + $0x2368] sm:$0xff] }
 0x5f2   : > { %4765 = vmatprep.mubr.f32.mxu0 %v6273_v10  ;;  %4899 = vmatprep.subr.mxu0 %v1856_v51  ;;  %v1599_v51 = vld [vmem:[%s6783_s7 + $0x2360] sm:$0xff] }
 0x5f3   : > { %5006 = vmatprep.subr.mxu1 %v1858_v20  ;;  %4872 = vmatprep.mubr.f32.mxu1 %v6274_v36  ;;  %v1570_v20 = vld [vmem:[%s6783_s7 + $0x2278] sm:$0xff]  ;;  %v1567_v10 = vld [vmem:[%s6783_s7 + $0x2260] sm:$0xff] }
 0x5f4   : > { %4766 = vmatmul.mubr.f32.gmra.mxu0 %v6275_v29  ;;  %4873 = vmatmul.mubr.f32.gmra.mxu1 %v6276_v45  ;;  %v1538_v36 = vld [vmem:[%s6783_s7 + $0x2178] sm:$0xff]  ;;  %v1537_v29 = vld [vmem:[%s6783_s7 + $0x2170] sm:$0xff]  ;;  %v1504_v45 = vld [vmem:[%s6783_s7 + $0x2068] sm:$0xff] }
 0x5f5   : > { %4900 = vmatpush1.xpose.msra.mxu0 %v1855_v48  ;;  %5007 = vmatpush1.xpose.msra.mxu1 %v1857_v17  ;;  %v1569_v48 = vld [vmem:[%s6783_s7 + $0x2270] sm:$0xff]  ;;  %v1536_v17 = vld [vmem:[%s6783_s7 + $0x2168] sm:$0xff] }
 0x5f6   : > { %4771 = vmatprep.mubr.f32.mxu0 %v6277_v13  ;;  %4901 = vmatprep.subr.mxu0 %v1824_v39  ;;  %v1535_v39 = vld [vmem:[%s6783_s7 + $0x2160] sm:$0xff] }
 0x5f7   : > { %5008 = vmatprep.subr.mxu1 %v1826_v22  ;;  %4878 = vmatprep.mubr.f32.mxu1 %v6278_v18  ;;  %v1506_v22 = vld [vmem:[%s6783_s7 + $0x2078] sm:$0xff]  ;;  %v1503_v13 = vld [vmem:[%s6783_s7 + $0x2060] sm:$0xff] }
 0x5f8   : > { %4772 = vmatmul.mubr.f32.gmra.mxu0 %v6279_v37  ;;  %4879 = vmatmul.mubr.f32.gmra.mxu1 %v6280_v31  ;;  %v2498_v18 = vld [vmem:[%s6783_s7 + $0x3f78] sm:$0xff]  ;;  %v8840_v37 = vpop.f32.mrf.mxu1  ;;  %v2495_v31 = vld [vmem:[%s6783_s7 + $0x3f60] sm:$0xff] }
 0x5f9   : > { %4902 = vmatpush1.xpose.msra.mxu0 %v1823_v60  ;;  %5009 = vmatpush1.xpose.msra.mxu1 %v1825_v9  ;;  %v1505_v60 = vld [vmem:[%s6783_s7 + $0x2070] sm:$0xff]  ;;  %v2496_v9 = vld [vmem:[%s6783_s7 + $0x3f68] sm:$0xff] }
 0x5fa   : > { %4777 = vmatprep.mubr.f32.mxu0 %v6281_v2  ;;  %4903 = vmatprep.subr.mxu0 %v1792_v44  ;;  %v8838_v44 = vpop.f32.mrf.mxu0  ;;  %v2464_v2 = vld [vmem:[%s6783_s7 + $0x3e68] sm:$0xff] }
 0x5fb   : > { %5010 = vmatprep.subr.mxu1 %v1794_v46  ;;  %4884 = vmatprep.mubr.f32.mxu1 %v6282_v24  ;;  %v2497_v46 = vld [vmem:[%s6783_s7 + $0x3f70] sm:$0xff] }
 0x5fc   : > { %4778 = vmatmul.mubr.f32.gmra.mxu0 %v6283_v23  ;;  %4885 = vmatmul.mubr.f32.gmra.mxu1 %v6284_v11  ;;  %v2463_v11 = vld [vmem:[%s6783_s7 + $0x3e60] sm:$0xff] }
 0x5fd   : > { %4904 = vmatpush1.xpose.msra.mxu0 %v1791_v32  ;;  %5011 = vmatpush1.xpose.msra.mxu1 %v1793_v43  ;;  %v2466_v32 = vld [vmem:[%s6783_s7 + $0x3e78] sm:$0xff] }
 0x5fe   : > { %4905 = vmatprep.subr.mxu0 %v1760_v7  ;;  %5012 = vmatprep.subr.mxu1 %v1762_v27 }
 0x5ff   : > { %4955 = vmatprep.mubr.f32.mxu0 %v6285_v38  ;;  %5062 = vmatprep.mubr.f32.mxu1 %v6286_v63  ;;  %v2434_v38 = vld [vmem:[%s6783_s7 + $0x3d78] sm:$0xff] }
 0x601   : > { %4906 = vmatpush1.xpose.msra.mxu0 %v1759_v15  ;;  %5013 = vmatpush1.xpose.msra.mxu1 %v1761_v57  ;;  %v2465_v15 = vld [vmem:[%s6783_s7 + $0x3e70] sm:$0xff] }
 0x602   : > { %4907 = vmatprep.subr.mxu0 %v1728_v55  ;;  %5014 = vmatprep.subr.mxu1 %v1730_v19  ;;  %v2432_v19 = vld [vmem:[%s6783_s7 + $0x3d68] sm:$0xff] }
 0x605   : > { %4908 = vmatpush1.xpose.msra.mxu0 %v1727_v50  ;;  %5015 = vmatpush1.xpose.msra.mxu1 %v1729_v61 }
 0x606   : > { %4909 = vmatprep.subr.mxu0 %v1696_v33  ;;  %5016 = vmatprep.subr.mxu1 %v1698_v16 }
 0x609   : > { %4910 = vmatpush1.xpose.msra.mxu0 %v1695_v41  ;;  %5017 = vmatpush1.xpose.msra.mxu1 %v1697_v40  ;;  %v2431_v41 = vld [vmem:[%s6783_s7 + $0x3d60] sm:$0xff]  ;;  %v2433_v40 = vld [vmem:[%s6783_s7 + $0x3d70] sm:$0xff] }
 0x60a   : > { %4911 = vmatprep.subr.mxu0 %v1664_v59  ;;  %5018 = vmatprep.subr.mxu1 %v1666_v1  ;;  %v2400_v1 = vld [vmem:[%s6783_s7 + $0x3c68] sm:$0xff] }
 0x60d   : > { %4912 = vmatpush1.xpose.msra.mxu0 %v1663_v6  ;;  %5019 = vmatpush1.xpose.msra.mxu1 %v1665_v52  ;;  %v2402_v6 = vld [vmem:[%s6783_s7 + $0x3c78] sm:$0xff] }
 0x60e   : > { %4913 = vmatprep.subr.mxu0 %v1632_v14  ;;  %5020 = vmatprep.subr.mxu1 %v1634_v25 }
 0x611   : > { %4914 = vmatpush1.xpose.msra.mxu0 %v1631_v62  ;;  %5021 = vmatpush1.xpose.msra.mxu1 %v1633_v8 }
 0x612   : > { %4915 = vmatprep.subr.mxu0 %v1600_v30  ;;  %5022 = vmatprep.subr.mxu1 %v1602_v26  ;;  %v2399_v30 = vld [vmem:[%s6783_s7 + $0x3c60] sm:$0xff] }
 0x615   : > { %4916 = vmatpush1.xpose.msra.mxu0 %v1599_v51  ;;  %5023 = vmatpush1.xpose.msra.mxu1 %v1601_v35  ;;  %v2368_v35 = vld [vmem:[%s6783_s7 + $0x3b68] sm:$0xff] }
 0x616   : > { %4917 = vmatprep.subr.mxu0 %v1568_v47  ;;  %5024 = vmatprep.subr.mxu1 %v1570_v20  ;;  %v2370_v47 = vld [vmem:[%s6783_s7 + $0x3b78] sm:$0xff] }
 0x619   : > { %4918 = vmatpush1.xpose.msra.mxu0 %v1567_v10  ;;  %5025 = vmatpush1.xpose.msra.mxu1 %v1569_v48 }
 0x61a   : > { %4919 = vmatprep.subr.mxu0 %v1536_v17  ;;  %5026 = vmatprep.subr.mxu1 %v1538_v36 }
 0x61d   : > { %4920 = vmatpush1.xpose.msra.mxu0 %v1535_v39  ;;  %5027 = vmatpush1.xpose.msra.mxu1 %v1537_v29  ;;  %v2367_v39 = vld [vmem:[%s6783_s7 + $0x3b60] sm:$0xff] }
 0x61e   : > { %4921 = vmatprep.subr.mxu0 %v1504_v45  ;;  %5028 = vmatprep.subr.mxu1 %v1506_v22  ;;  %v2336_v22 = vld [vmem:[%s6783_s7 + $0x3a68] sm:$0xff] }
 0x621   : > { %4922 = vmatpush1.xpose.msra.mxu0 %v1503_v13  ;;  %5029 = vmatpush1.xpose.msra.mxu1 %v1505_v60  ;;  %v2338_v13 = vld [vmem:[%s6783_s7 + $0x3a78] sm:$0xff] }
 0x622   : > { %4923 = vmatprep.subr.mxu0 %v2496_v9  ;;  %5030 = vmatprep.subr.mxu1 %v2498_v18 }
 0x624   : > { %v4529_v43 = vpop.f32.mrf.mxu0  ;;  %v4636_v24 = vpop.f32.mrf.mxu1 }
 0x625   : > { %v4530_v7 = vadd.f32 %v4529_v43, %v8678_v28  ;;  %4924 = vmatpush2.xpose.msra.mxu0 %v2495_v31  ;;  %5031 = vmatpush2.xpose.msra.mxu1 %v2497_v46 }
 0x626   : > { %v4531_v27 = vpop.f32.mrf.mxu0  ;;  %v4638_v23 = vpop.f32.mrf.mxu1  ;;  %4925 = vmatprep.subr.mxu0 %v2464_v2  ;;  %5032 = vmatprep.subr.mxu1 %v2466_v32  ;;  %v2335_v2 = vld [vmem:[%s6783_s7 + $0x3a60] sm:$0xff] }
 0x627   : > { %v8849_v57 = vadd.f32 %v4636_v24, %v4530_v7  ;;  %v4532_v55 = vadd.f32 %v4531_v27, %v8683_v21  ;;  %v2304_v24 = vld [vmem:[%s6783_s7 + $0x3968] sm:$0xff]  ;;  %v2306_v7 = vld [vmem:[%s6783_s7 + $0x3978] sm:$0xff] }
 0x628   : > { %v4535_v63 = vpop.f32.mrf.mxu0  ;;  %v4642_v28 = vpop.f32.mrf.mxu1 }
 0x629   : > { %v8854_v50 = vadd.f32 %v4638_v23, %v4532_v55  ;;  %v4536_v61 = vadd.f32 %v4535_v63, %v8691_v58  ;;  %4926 = vmatpush2.xpose.msra.mxu0 %v2463_v11  ;;  %5033 = vmatpush2.xpose.msra.mxu1 %v2465_v15 }
 0x62a   : > { %v4537_v33 = vpop.f32.mrf.mxu0  ;;  %v4644_v16 = vpop.f32.mrf.mxu1  ;;  %4927 = vmatprep.subr.mxu0 %v2432_v19  ;;  %5034 = vmatprep.subr.mxu1 %v2434_v38  ;;  %v2305_v19 = vld [vmem:[%s6783_s7 + $0x3970] sm:$0xff] }
 0x62b   : > { %v4538_v21 = vadd.f32 %v4537_v33, %v8694_v54  ;;  %v8860_v59 = vadd.f32 %v4642_v28, %v4536_v61  ;;  %v2401_v54 = vld [vmem:[%s6783_s7 + $0x3c70] sm:$0xff]  ;;  %v2272_v28 = vld [vmem:[%s6783_s7 + $0x3868] sm:$0xff] }
 0x62c   : > { %v4541_v52 = vpop.f32.mrf.mxu0  ;;  %v4648_v58 = vpop.f32.mrf.mxu1 }
 0x62d   : > { %v4542_v14 = vadd.f32 %v4541_v52, %v8701_v3  ;;  %v8865_v25 = vadd.f32 %v4644_v16, %v4538_v21  ;;  %4928 = vmatpush2.xpose.msra.mxu0 %v2431_v41  ;;  %5035 = vmatpush2.xpose.msra.mxu1 %v2433_v40  ;;  %v2273_v40 = vld [vmem:[%s6783_s7 + $0x3870] sm:$0xff] }
 0x62e   : > { %v4543_v62 = vpop.f32.mrf.mxu0  ;;  %v4650_v8 = vpop.f32.mrf.mxu1  ;;  %4929 = vmatprep.subr.mxu0 %v2400_v1  ;;  %5036 = vmatprep.subr.mxu1 %v2402_v6  ;;  %v2240_v1 = vld [vmem:[%s6783_s7 + $0x3768] sm:$0xff]  ;;  %v2242_v6 = vld [vmem:[%s6783_s7 + $0x3778] sm:$0xff]  ;;  %v2241_v52 = vld [vmem:[%s6783_s7 + $0x3770] sm:$0xff] }
 0x62f   : > { %v4544_v26 = vadd.f32 %v4543_v62, %v8704_v5  ;;  %v8870_v51 = vadd.f32 %v4648_v58, %v4542_v14  ;;  %v2369_v5 = vld [vmem:[%s6783_s7 + $0x3b70] sm:$0xff]  ;;  %v2208_v58 = vld [vmem:[%s6783_s7 + $0x3668] sm:$0xff]  ;;  %v2210_v14 = vld [vmem:[%s6783_s7 + $0x3678] sm:$0xff] }
 0x630   : > { %v4547_v3 = vpop.f32.mrf.mxu0  ;;  %v4654_v20 = vpop.f32.mrf.mxu1  ;;  %v2207_v62 = vld [vmem:[%s6783_s7 + $0x3660] sm:$0xff] }
 0x631   : > { %v4548_v10 = vadd.f32 %v4547_v3, %v8711_v49  ;;  %v8875_v48 = vadd.f32 %v4650_v8, %v4544_v26  ;;  %4930 = vmatpush2.xpose.msra.mxu0 %v2399_v30  ;;  %5037 = vmatpush2.xpose.msra.mxu1 %v2401_v54  ;;  %v2209_v8 = vld [vmem:[%s6783_s7 + $0x3670] sm:$0xff]  ;;  %v2176_v30 = vld [vmem:[%s6783_s7 + $0x3568] sm:$0xff]  ;;  %v2178_v54 = vld [vmem:[%s6783_s7 + $0x3578] sm:$0xff] }
 0x632   : > { %v4549_v17 = vpop.f32.mrf.mxu0  ;;  %v4656_v36 = vpop.f32.mrf.mxu1  ;;  %4931 = vmatprep.subr.mxu0 %v2368_v35  ;;  %5038 = vmatprep.subr.mxu1 %v2370_v47  ;;  %v2175_v26 = vld [vmem:[%s6783_s7 + $0x3560] sm:$0xff]  ;;  %v2177_v35 = vld [vmem:[%s6783_s7 + $0x3570] sm:$0xff]  ;;  %v2144_v47 = vld [vmem:[%s6783_s7 + $0x3468] sm:$0xff] }
 0x633   : > { %v4550_v29 = vadd.f32 %v4549_v17, %v8714_v4  ;;  %v8880_v45 = vadd.f32 %v4654_v20, %v4548_v10  ;;  %v2337_v4 = vld [vmem:[%s6783_s7 + $0x3a70] sm:$0xff]  ;;  %v2146_v3 = vld [vmem:[%s6783_s7 + $0x3478] sm:$0xff]  ;;  %v2143_v20 = vld [vmem:[%s6783_s7 + $0x3460] sm:$0xff] }
 0x634   : > { %v4553_v49 = vpop.f32.mrf.mxu0  ;;  %v4660_v60 = vpop.f32.mrf.mxu1  ;;  %v2145_v10 = vld [vmem:[%s6783_s7 + $0x3470] sm:$0xff]  ;;  %v2112_v17 = vld [vmem:[%s6783_s7 + $0x3368] sm:$0xff] }
 0x635   : > { %v4554_v9 = vadd.f32 %v4553_v49, %v8721_v12  ;;  %v8885_v18 = vadd.f32 %v4656_v36, %v4550_v29  ;;  %4932 = vmatpush2.xpose.msra.mxu0 %v2367_v39  ;;  %5039 = vmatpush2.xpose.msra.mxu1 %v2369_v5  ;;  %v2114_v36 = vld [vmem:[%s6783_s7 + $0x3378] sm:$0xff]  ;;  %v2111_v39 = vld [vmem:[%s6783_s7 + $0x3360] sm:$0xff]  ;;  %v2113_v5 = vld [vmem:[%s6783_s7 + $0x3370] sm:$0xff] }
 0x636   : > { %v4555_v31 = vpop.f32.mrf.mxu0  ;;  %v4662_v46 = vpop.f32.mrf.mxu1  ;;  %4933 = vmatprep.subr.mxu0 %v2336_v22  ;;  %5040 = vmatprep.subr.mxu1 %v2338_v13  ;;  %v2080_v29 = vld [vmem:[%s6783_s7 + $0x3268] sm:$0xff]  ;;  %v2082_v22 = vld [vmem:[%s6783_s7 + $0x3278] sm:$0xff]  ;;  %v2079_v13 = vld [vmem:[%s6783_s7 + $0x3260] sm:$0xff] }
 0x637   : > { %v4556_v32 = vadd.f32 %v4555_v31, %v8724_v42  ;;  %v8890_v43 = vadd.f32 %v4660_v60, %v4554_v9  ;;  %v2303_v42 = vld [vmem:[%s6783_s7 + $0x3960] sm:$0xff]  ;;  %v2081_v49 = vld [vmem:[%s6783_s7 + $0x3270] sm:$0xff]  ;;  %v2048_v60 = vld [vmem:[%s6783_s7 + $0x3168] sm:$0xff] }
 0x638   : > { %v4559_v12 = vpop.f32.mrf.mxu0  ;;  %v4666_v27 = vpop.f32.mrf.mxu1  ;;  %v2050_v9 = vld [vmem:[%s6783_s7 + $0x3178] sm:$0xff]  ;;  %v2047_v31 = vld [vmem:[%s6783_s7 + $0x3160] sm:$0xff] }
 0x639   : > { %v4560_v23 = vadd.f32 %v4559_v12, %v8731_v0  ;;  %v8895_v11 = vadd.f32 %v4662_v46, %v4556_v32  ;;  %4934 = vmatpush2.xpose.msra.mxu0 %v2335_v2  ;;  %5041 = vmatpush2.xpose.msra.mxu1 %v2337_v4  ;;  %v2274_v0 = vld [vmem:[%s6783_s7 + $0x3878] sm:$0xff]  ;;  %v2049_v46 = vld [vmem:[%s6783_s7 + $0x3170] sm:$0xff]  ;;  %v2016_v2 = vld [vmem:[%s6783_s7 + $0x3068] sm:$0xff] }
 0x63a   : > { %v4561_v15 = vpop.f32.mrf.mxu0  ;;  %v4668_v55 = vpop.f32.mrf.mxu1  ;;  %4935 = vmatprep.subr.mxu0 %v2304_v24  ;;  %5042 = vmatprep.subr.mxu1 %v2306_v7  ;;  %v2018_v4 = vld [vmem:[%s6783_s7 + $0x3078] sm:$0xff]  ;;  %v2015_v32 = vld [vmem:[%s6783_s7 + $0x3060] sm:$0xff]  ;;  %v2017_v24 = vld [vmem:[%s6783_s7 + $0x3070] sm:$0xff] }
 0x63b   : > { %v4562_v38 = vadd.f32 %v4561_v15, %v8734_v56  ;;  %v8900_v63 = vadd.f32 %v4666_v27, %v4560_v23  ;;  %v2271_v56 = vld [vmem:[%s6783_s7 + $0x3860] sm:$0xff]  ;;  %v1988_v7 = vld [vmem:[%s6783_s7 + $0x2f88] sm:$0xff]  ;;  %v1990_v12 = vld [vmem:[%s6783_s7 + $0x2f98] sm:$0xff] }
 0x63c   : > { %v4565_v61 = vpop.f32.mrf.mxu0  ;;  %v4672_v33 = vpop.f32.mrf.mxu1  ;;  %v1987_v27 = vld [vmem:[%s6783_s7 + $0x2f80] sm:$0xff]  ;;  %v1989_v23 = vld [vmem:[%s6783_s7 + $0x2f90] sm:$0xff]  ;;  %v1956_v15 = vld [vmem:[%s6783_s7 + $0x2e88] sm:$0xff] }
 0x63d   : > { %v4566_v16 = vadd.f32 %v4565_v61, %v8740_v53  ;;  %v8905_v41 = vadd.f32 %v4668_v55, %v4562_v38  ;;  %4936 = vmatpush2.xpose.msra.mxu0 %v2303_v42  ;;  %5043 = vmatpush2.xpose.msra.mxu1 %v2305_v19  ;;  %v2239_v53 = vld [vmem:[%s6783_s7 + $0x3760] sm:$0xff]  ;;  %v6288_v42 = vld [vmem:[#allocation2 + $0x70] sm:$0xff]  ;;  %v1958_v19 = vld [vmem:[%s6783_s7 + $0x2e98] sm:$0xff] }
 0x63e   : > { %4937 = vmatprep.subr.mxu0 %v2272_v28  ;;  %5044 = vmatprep.subr.mxu1 %v2274_v0  ;;  %v6287_v55 = vld [vmem:[#allocation2 + $0x60] sm:$0xff]  ;;  %v6289_v38 = vld [vmem:[#allocation2 + $0x168] sm:$0xff]  ;;  %v1957_v0 = vld [vmem:[%s6783_s7 + $0x2e90] sm:$0xff] }
 0x63f   : > { %v8909_v21 = vadd.f32 %v4672_v33, %v4566_v16  ;;  %v1955_v28 = vld [vmem:[%s6783_s7 + $0x2e80] sm:$0xff]  ;;  %v6290_v61 = vld [vmem:[#allocation2 + $0x178] sm:$0xff]  ;;  %v1924_v33 = vld [vmem:[%s6783_s7 + $0x2d88] sm:$0xff] }
 0x640   : > { %v6291_v16 = vld [vmem:[#allocation2 + $0x160] sm:$0xff] }
 0x641   : > { %4938 = vmatpush2.xpose.msra.mxu0 %v2271_v56  ;;  %5045 = vmatpush2.xpose.msra.mxu1 %v2273_v40  ;;  %v6292_v56 = vld [vmem:[#allocation2 + $0x170] sm:$0xff]  ;;  %v1926_v40 = vld [vmem:[%s6783_s7 + $0x2d98] sm:$0xff] }
 0x642   : > { %4939 = vmatprep.subr.mxu0 %v2240_v1  ;;  %5046 = vmatprep.subr.mxu1 %v2242_v6  ;;  %v6293_v1 = vld [vmem:[#allocation2 + $0x268] sm:$0xff]  ;;  %v1923_v6 = vld [vmem:[%s6783_s7 + $0x2d80] sm:$0xff] }
 0x645   : > { %4940 = vmatpush2.xpose.msra.mxu0 %v2239_v53  ;;  %5047 = vmatpush2.xpose.msra.mxu1 %v2241_v52  ;;  %v1925_v53 = vld [vmem:[%s6783_s7 + $0x2d90] sm:$0xff]  ;;  %v6294_v52 = vld [vmem:[#allocation2 + $0x278] sm:$0xff] }
 0x646   : > { %4941 = vmatprep.subr.mxu0 %v2208_v58  ;;  %5048 = vmatprep.subr.mxu1 %v2210_v14  ;;  %v1892_v58 = vld [vmem:[%s6783_s7 + $0x2c88] sm:$0xff]  ;;  %v6295_v14 = vld [vmem:[#allocation2 + $0x260] sm:$0xff] }
 0x649   : > { %4942 = vmatpush2.xpose.msra.mxu0 %v2207_v62  ;;  %5049 = vmatpush2.xpose.msra.mxu1 %v2209_v8  ;;  %v6296_v62 = vld [vmem:[#allocation2 + $0x270] sm:$0xff]  ;;  %v1894_v8 = vld [vmem:[%s6783_s7 + $0x2c98] sm:$0xff] }
 0x64a   : > { %4943 = vmatprep.subr.mxu0 %v2176_v30  ;;  %5050 = vmatprep.subr.mxu1 %v2178_v54  ;;  %v6297_v30 = vld [vmem:[#allocation2 + $0x368] sm:$0xff]  ;;  %v1891_v54 = vld [vmem:[%s6783_s7 + $0x2c80] sm:$0xff] }
 0x64d   : > { %4944 = vmatpush2.xpose.msra.mxu0 %v2175_v26  ;;  %5051 = vmatpush2.xpose.msra.mxu1 %v2177_v35  ;;  %v1893_v26 = vld [vmem:[%s6783_s7 + $0x2c90] sm:$0xff]  ;;  %v6298_v35 = vld [vmem:[#allocation2 + $0x378] sm:$0xff] }
 0x64e   : > { %4945 = vmatprep.subr.mxu0 %v2144_v47  ;;  %5052 = vmatprep.subr.mxu1 %v2146_v3  ;;  %v1860_v47 = vld [vmem:[%s6783_s7 + $0x2b88] sm:$0xff]  ;;  %v6299_v3 = vld [vmem:[#allocation2 + $0x360] sm:$0xff] }
 0x651   : > { %4946 = vmatpush2.xpose.msra.mxu0 %v2143_v20  ;;  %5053 = vmatpush2.xpose.msra.mxu1 %v2145_v10  ;;  %v6300_v20 = vld [vmem:[#allocation2 + $0x370] sm:$0xff]  ;;  %v1862_v10 = vld [vmem:[%s6783_s7 + $0x2b98] sm:$0xff] }
 0x652   : > { %4947 = vmatprep.subr.mxu0 %v2112_v17  ;;  %5054 = vmatprep.subr.mxu1 %v2114_v36  ;;  %v6301_v17 = vld [vmem:[#allocation2 + $0x468] sm:$0xff]  ;;  %v1859_v36 = vld [vmem:[%s6783_s7 + $0x2b80] sm:$0xff] }
 0x655   : > { %4948 = vmatpush2.xpose.msra.mxu0 %v2111_v39  ;;  %5055 = vmatpush2.xpose.msra.mxu1 %v2113_v5  ;;  %v1861_v39 = vld [vmem:[%s6783_s7 + $0x2b90] sm:$0xff]  ;;  %v6302_v5 = vld [vmem:[#allocation2 + $0x478] sm:$0xff] }
 0x656   : > { %4949 = vmatprep.subr.mxu0 %v2080_v29  ;;  %5056 = vmatprep.subr.mxu1 %v2082_v22  ;;  %v1828_v29 = vld [vmem:[%s6783_s7 + $0x2a88] sm:$0xff]  ;;  %v6303_v22 = vld [vmem:[#allocation2 + $0x460] sm:$0xff] }
 0x659   : > { %4950 = vmatpush2.xpose.msra.mxu0 %v2079_v13  ;;  %5057 = vmatpush2.xpose.msra.mxu1 %v2081_v49  ;;  %v6304_v13 = vld [vmem:[#allocation2 + $0x470] sm:$0xff]  ;;  %v1830_v49 = vld [vmem:[%s6783_s7 + $0x2a98] sm:$0xff] }
 0x65a   : > { %4951 = vmatprep.subr.mxu0 %v2048_v60  ;;  %5058 = vmatprep.subr.mxu1 %v2050_v9  ;;  %v6305_v60 = vld [vmem:[#allocation2 + $0x568] sm:$0xff]  ;;  %v1827_v9 = vld [vmem:[%s6783_s7 + $0x2a80] sm:$0xff] }
 0x65d   : > { %4952 = vmatpush2.xpose.msra.mxu0 %v2047_v31  ;;  %5059 = vmatpush2.xpose.msra.mxu1 %v2049_v46  ;;  %v1829_v31 = vld [vmem:[%s6783_s7 + $0x2a90] sm:$0xff]  ;;  %v6306_v46 = vld [vmem:[#allocation2 + $0x578] sm:$0xff] }
 0x65e   : > { %4953 = vmatprep.subr.mxu0 %v2016_v2  ;;  %5060 = vmatprep.subr.mxu1 %v2018_v4  ;;  %v1796_v2 = vld [vmem:[%s6783_s7 + $0x2988] sm:$0xff]  ;;  %v6307_v4 = vld [vmem:[#allocation2 + $0x560] sm:$0xff] }
 0x661   : > { %4954 = vmatpush2.xpose.msra.mxu0 %v2015_v32  ;;  %5061 = vmatpush2.xpose.msra.mxu1 %v2017_v24  ;;  %v6308_v32 = vld [vmem:[#allocation2 + $0x570] sm:$0xff]  ;;  %v1798_v24 = vld [vmem:[%s6783_s7 + $0x2998] sm:$0xff] }
 0x662   : > { %5105 = vmatprep.subr.mxu0 %v1988_v7  ;;  %5212 = vmatprep.subr.mxu1 %v1990_v12  ;;  %v6309_v7 = vld [vmem:[#allocation2 + $0x668] sm:$0xff]  ;;  %v1795_v12 = vld [vmem:[%s6783_s7 + $0x2980] sm:$0xff] }
 0x664   : > { %4956 = vmatmul.mubr.f32.vlgmr.msra.gmra.mxu0 %v6287_v55  ;;  %5063 = vmatmul.mubr.f32.vlgmr.msra.gmra.mxu1 %v6288_v42  ;;  %v1766_v55 = vld [vmem:[%s6783_s7 + $0x2898] sm:$0xff]  ;;  %v6311_v42 = vld [vmem:[#allocation2 + $0x660] sm:$0xff] }
 0x665   : > { %5106 = vmatpush1.xpose.msra.mxu0 %v1987_v27  ;;  %5213 = vmatpush1.xpose.msra.mxu1 %v1989_v23  ;;  %v1797_v27 = vld [vmem:[%s6783_s7 + $0x2990] sm:$0xff]  ;;  %v6310_v23 = vld [vmem:[#allocation2 + $0x678] sm:$0xff] }
 0x666   : > { %4961 = vmatprep.mubr.f32.mxu0 %v6289_v38  ;;  %5107 = vmatprep.subr.mxu0 %v1956_v15  ;;  %v1764_v15 = vld [vmem:[%s6783_s7 + $0x2888] sm:$0xff]  ;;  %v1763_v38 = vld [vmem:[%s6783_s7 + $0x2880] sm:$0xff] }
 0x667   : > { %5214 = vmatprep.subr.mxu1 %v1958_v19  ;;  %5068 = vmatprep.mubr.f32.mxu1 %v6290_v61  ;;  %v6312_v19 = vld [vmem:[#allocation2 + $0x670] sm:$0xff]  ;;  %v1734_v61 = vld [vmem:[%s6783_s7 + $0x2798] sm:$0xff] }
 0x668   : > { %4962 = vmatmul.mubr.f32.gmra.mxu0 %v6291_v16  ;;  %5069 = vmatmul.mubr.f32.gmra.mxu1 %v6292_v56  ;;  %v6314_v16 = vld [vmem:[#allocation2 + $0x98] sm:$0xff]  ;;  %v1731_v56 = vld [vmem:[%s6783_s7 + $0x2780] sm:$0xff] }
 0x669   : > { %5108 = vmatpush1.xpose.msra.mxu0 %v1955_v28  ;;  %5215 = vmatpush1.xpose.msra.mxu1 %v1957_v0  ;;  %v1765_v28 = vld [vmem:[%s6783_s7 + $0x2890] sm:$0xff]  ;;  %v1732_v0 = vld [vmem:[%s6783_s7 + $0x2788] sm:$0xff] }
 0x66a   : > { %4967 = vmatprep.mubr.f32.mxu0 %v6293_v1  ;;  %5109 = vmatprep.subr.mxu0 %v1924_v33  ;;  %v6313_v33 = vld [vmem:[#allocation2 + $0x88] sm:$0xff] }
 0x66b   : > { %5216 = vmatprep.subr.mxu1 %v1926_v40  ;;  %5074 = vmatprep.mubr.f32.mxu1 %v6294_v52  ;;  %v1733_v40 = vld [vmem:[%s6783_s7 + $0x2790] sm:$0xff]  ;;  %v1700_v1 = vld [vmem:[%s6783_s7 + $0x2688] sm:$0xff] }
 0x66c   : > { %4968 = vmatmul.mubr.f32.gmra.mxu0 %v6295_v14  ;;  %5075 = vmatmul.mubr.f32.gmra.mxu1 %v6296_v62  ;;  %v1701_v52 = vld [vmem:[%s6783_s7 + $0x2690] sm:$0xff]  ;;  %v1670_v14 = vld [vmem:[%s6783_s7 + $0x2598] sm:$0xff]  ;;  %v1667_v62 = vld [vmem:[%s6783_s7 + $0x2580] sm:$0xff] }
 0x66d   : > { %5110 = vmatpush1.xpose.msra.mxu0 %v1923_v6  ;;  %5217 = vmatpush1.xpose.msra.mxu1 %v1925_v53  ;;  %v1702_v6 = vld [vmem:[%s6783_s7 + $0x2698] sm:$0xff]  ;;  %v1699_v53 = vld [vmem:[%s6783_s7 + $0x2680] sm:$0xff] }
 0x66e   : > { %4973 = vmatprep.mubr.f32.mxu0 %v6297_v30  ;;  %5111 = vmatprep.subr.mxu0 %v1892_v58  ;;  %v1668_v58 = vld [vmem:[%s6783_s7 + $0x2588] sm:$0xff] }
 0x66f   : > { %5218 = vmatprep.subr.mxu1 %v1894_v8  ;;  %5080 = vmatprep.mubr.f32.mxu1 %v6298_v35  ;;  %v1669_v8 = vld [vmem:[%s6783_s7 + $0x2590] sm:$0xff]  ;;  %v1636_v30 = vld [vmem:[%s6783_s7 + $0x2488] sm:$0xff] }
 0x670   : > { %4974 = vmatmul.mubr.f32.gmra.mxu0 %v6299_v3  ;;  %5081 = vmatmul.mubr.f32.gmra.mxu1 %v6300_v20  ;;  %v1637_v35 = vld [vmem:[%s6783_s7 + $0x2490] sm:$0xff]  ;;  %v1606_v3 = vld [vmem:[%s6783_s7 + $0x2398] sm:$0xff]  ;;  %v1603_v20 = vld [vmem:[%s6783_s7 + $0x2380] sm:$0xff] }
 0x671   : > { %5112 = vmatpush1.xpose.msra.mxu0 %v1891_v54  ;;  %5219 = vmatpush1.xpose.msra.mxu1 %v1893_v26  ;;  %v1638_v54 = vld [vmem:[%s6783_s7 + $0x2498] sm:$0xff]  ;;  %v1635_v26 = vld [vmem:[%s6783_s7 + $0x2480] sm:$0xff] }
 0x672   : > { %4979 = vmatprep.mubr.f32.mxu0 %v6301_v17  ;;  %5113 = vmatprep.subr.mxu0 %v1860_v47  ;;  %v1604_v47 = vld [vmem:[%s6783_s7 + $0x2388] sm:$0xff] }
 0x673   : > { %5220 = vmatprep.subr.mxu1 %v1862_v10  ;;  %5086 = vmatprep.mubr.f32.mxu1 %v6302_v5  ;;  %v1605_v10 = vld [vmem:[%s6783_s7 + $0x2390] sm:$0xff]  ;;  %v1572_v17 = vld [vmem:[%s6783_s7 + $0x2288] sm:$0xff] }
 0x674   : > { %4980 = vmatmul.mubr.f32.gmra.mxu0 %v6303_v22  ;;  %5087 = vmatmul.mubr.f32.gmra.mxu1 %v6304_v13  ;;  %v1573_v5 = vld [vmem:[%s6783_s7 + $0x2290] sm:$0xff]  ;;  %v1542_v22 = vld [vmem:[%s6783_s7 + $0x2198] sm:$0xff]  ;;  %v1539_v13 = vld [vmem:[%s6783_s7 + $0x2180] sm:$0xff] }
 0x675   : > { %5114 = vmatpush1.xpose.msra.mxu0 %v1859_v36  ;;  %5221 = vmatpush1.xpose.msra.mxu1 %v1861_v39  ;;  %v1574_v36 = vld [vmem:[%s6783_s7 + $0x2298] sm:$0xff]  ;;  %v1571_v39 = vld [vmem:[%s6783_s7 + $0x2280] sm:$0xff] }
 0x676   : > { %4985 = vmatprep.mubr.f32.mxu0 %v6305_v60  ;;  %5115 = vmatprep.subr.mxu0 %v1828_v29  ;;  %v1540_v29 = vld [vmem:[%s6783_s7 + $0x2188] sm:$0xff] }
 0x677   : > { %5222 = vmatprep.subr.mxu1 %v1830_v49  ;;  %5092 = vmatprep.mubr.f32.mxu1 %v6306_v46  ;;  %v1541_v49 = vld [vmem:[%s6783_s7 + $0x2190] sm:$0xff]  ;;  %v1508_v60 = vld [vmem:[%s6783_s7 + $0x2088] sm:$0xff] }
 0x678   : > { %4986 = vmatmul.mubr.f32.gmra.mxu0 %v6307_v4  ;;  %5093 = vmatmul.mubr.f32.gmra.mxu1 %v6308_v32  ;;  %v1509_v46 = vld [vmem:[%s6783_s7 + $0x2090] sm:$0xff]  ;;  %v2502_v4 = vld [vmem:[%s6783_s7 + $0x3f98] sm:$0xff]  ;;  %v9009_v32 = vpop.f32.mrf.mxu0 }
 0x679   : > { %5116 = vmatpush1.xpose.msra.mxu0 %v1827_v9  ;;  %5223 = vmatpush1.xpose.msra.mxu1 %v1829_v31  ;;  %v1510_v9 = vld [vmem:[%s6783_s7 + $0x2098] sm:$0xff]  ;;  %v1507_v31 = vld [vmem:[%s6783_s7 + $0x2080] sm:$0xff] }
 0x67a   : > { %4991 = vmatprep.mubr.f32.mxu0 %v6309_v7  ;;  %5117 = vmatprep.subr.mxu0 %v1796_v2  ;;  %v2500_v2 = vld [vmem:[%s6783_s7 + $0x3f88] sm:$0xff]  ;;  %v2499_v7 = vld [vmem:[%s6783_s7 + $0x3f80] sm:$0xff] }
 0x67b   : > { %5224 = vmatprep.subr.mxu1 %v1798_v24  ;;  %5098 = vmatprep.mubr.f32.mxu1 %v6310_v23  ;;  %v9011_v24 = vpop.f32.mrf.mxu1  ;;  %v2470_v23 = vld [vmem:[%s6783_s7 + $0x3e98] sm:$0xff] }
 0x67c   : > { %4992 = vmatmul.mubr.f32.gmra.mxu0 %v6311_v42  ;;  %5099 = vmatmul.mubr.f32.gmra.mxu1 %v6312_v19 }
 0x67d   : > { %5118 = vmatpush1.xpose.msra.mxu0 %v1795_v12  ;;  %5225 = vmatpush1.xpose.msra.mxu1 %v1797_v27  ;;  %v2501_v12 = vld [vmem:[%s6783_s7 + $0x3f90] sm:$0xff]  ;;  %v2468_v27 = vld [vmem:[%s6783_s7 + $0x3e88] sm:$0xff] }
 0x67e   : > { %5119 = vmatprep.subr.mxu0 %v1764_v15  ;;  %5226 = vmatprep.subr.mxu1 %v1766_v55 }
 0x67f   : > { %5169 = vmatprep.mubr.f32.mxu0 %v6313_v33  ;;  %5276 = vmatprep.mubr.f32.mxu1 %v6314_v16  ;;  %v2436_v16 = vld [vmem:[%s6783_s7 + $0x3d88] sm:$0xff] }
 0x681   : > { %5120 = vmatpush1.xpose.msra.mxu0 %v1763_v38  ;;  %5227 = vmatpush1.xpose.msra.mxu1 %v1765_v28  ;;  %v2467_v28 = vld [vmem:[%s6783_s7 + $0x3e80] sm:$0xff] }
 0x682   : > { %5121 = vmatprep.subr.mxu0 %v1732_v0  ;;  %5228 = vmatprep.subr.mxu1 %v1734_v61  ;;  %v2469_v0 = vld [vmem:[%s6783_s7 + $0x3e90] sm:$0xff] }
 0x685   : > { %5122 = vmatpush1.xpose.msra.mxu0 %v1731_v56  ;;  %5229 = vmatpush1.xpose.msra.mxu1 %v1733_v40  ;;  %v2438_v56 = vld [vmem:[%s6783_s7 + $0x3d98] sm:$0xff] }
 0x686   : > { %5123 = vmatprep.subr.mxu0 %v1700_v1  ;;  %5230 = vmatprep.subr.mxu1 %v1702_v6 }
 0x689   : > { %5124 = vmatpush1.xpose.msra.mxu0 %v1699_v53  ;;  %5231 = vmatpush1.xpose.msra.mxu1 %v1701_v52 }
 0x68a   : > { %5125 = vmatprep.subr.mxu0 %v1668_v58  ;;  %5232 = vmatprep.subr.mxu1 %v1670_v14  ;;  %v2435_v58 = vld [vmem:[%s6783_s7 + $0x3d80] sm:$0xff]  ;;  %v2437_v14 = vld [vmem:[%s6783_s7 + $0x3d90] sm:$0xff] }
 0x68d   : > { %5126 = vmatpush1.xpose.msra.mxu0 %v1667_v62  ;;  %5233 = vmatpush1.xpose.msra.mxu1 %v1669_v8  ;;  %v2404_v8 = vld [vmem:[%s6783_s7 + $0x3c88] sm:$0xff] }
 0x68e   : > { %5127 = vmatprep.subr.mxu0 %v1636_v30  ;;  %5234 = vmatprep.subr.mxu1 %v1638_v54  ;;  %v2406_v30 = vld [vmem:[%s6783_s7 + $0x3c98] sm:$0xff] }
 0x691   : > { %5128 = vmatpush1.xpose.msra.mxu0 %v1635_v26  ;;  %5235 = vmatpush1.xpose.msra.mxu1 %v1637_v35 }
 0x692   : > { %5129 = vmatprep.subr.mxu0 %v1604_v47  ;;  %5236 = vmatprep.subr.mxu1 %v1606_v3 }
 0x695   : > { %5130 = vmatpush1.xpose.msra.mxu0 %v1603_v20  ;;  %5237 = vmatpush1.xpose.msra.mxu1 %v1605_v10  ;;  %v2403_v20 = vld [vmem:[%s6783_s7 + $0x3c80] sm:$0xff] }
 0x696   : > { %5131 = vmatprep.subr.mxu0 %v1572_v17  ;;  %5238 = vmatprep.subr.mxu1 %v1574_v36  ;;  %v2372_v36 = vld [vmem:[%s6783_s7 + $0x3b88] sm:$0xff] }
 0x699   : > { %5132 = vmatpush1.xpose.msra.mxu0 %v1571_v39  ;;  %5239 = vmatpush1.xpose.msra.mxu1 %v1573_v5  ;;  %v2374_v39 = vld [vmem:[%s6783_s7 + $0x3b98] sm:$0xff] }
 0x69a   : > { %5133 = vmatprep.subr.mxu0 %v1540_v29  ;;  %5240 = vmatprep.subr.mxu1 %v1542_v22 }
 0x69d   : > { %5134 = vmatpush1.xpose.msra.mxu0 %v1539_v13  ;;  %5241 = vmatpush1.xpose.msra.mxu1 %v1541_v49 }
 0x69e   : > { %5135 = vmatprep.subr.mxu0 %v1508_v60  ;;  %5242 = vmatprep.subr.mxu1 %v1510_v9  ;;  %v2371_v60 = vld [vmem:[%s6783_s7 + $0x3b80] sm:$0xff] }
 0x6a1   : > { %5136 = vmatpush1.xpose.msra.mxu0 %v1507_v31  ;;  %5243 = vmatpush1.xpose.msra.mxu1 %v1509_v46  ;;  %v2340_v46 = vld [vmem:[%s6783_s7 + $0x3a88] sm:$0xff] }
 0x6a2   : > { %5137 = vmatprep.subr.mxu0 %v2500_v2  ;;  %5244 = vmatprep.subr.mxu1 %v2502_v4  ;;  %v2342_v2 = vld [vmem:[%s6783_s7 + $0x3a98] sm:$0xff] }
 0x6a4   : > { %v4743_v15 = vpop.f32.mrf.mxu0  ;;  %v4850_v55 = vpop.f32.mrf.mxu1 }
 0x6a5   : > { %v4744_v42 = vadd.f32 %v4743_v15, %v8849_v57  ;;  %5138 = vmatpush2.xpose.msra.mxu0 %v2499_v7  ;;  %5245 = vmatpush2.xpose.msra.mxu1 %v2501_v12  ;;  %v2339_v15 = vld [vmem:[%s6783_s7 + $0x3a80] sm:$0xff] }
 0x6a6   : > { %v4745_v19 = vpop.f32.mrf.mxu0  ;;  %v4852_v38 = vpop.f32.mrf.mxu1  ;;  %5139 = vmatprep.subr.mxu0 %v2468_v27  ;;  %5246 = vmatprep.subr.mxu1 %v2470_v23 }
 0x6a7   : > { %v9020_v61 = vadd.f32 %v4850_v55, %v4744_v42  ;;  %v4746_v33 = vadd.f32 %v4745_v19, %v8854_v50  ;;  %v2308_v19 = vld [vmem:[%s6783_s7 + $0x3988] sm:$0xff] }
 0x6a8   : > { %v4749_v40 = vpop.f32.mrf.mxu0  ;;  %v4856_v57 = vpop.f32.mrf.mxu1 }
 0x6a9   : > { %v9025_v1 = vadd.f32 %v4852_v38, %v4746_v33  ;;  %v4750_v6 = vadd.f32 %v4749_v40, %v8860_v59  ;;  %5140 = vmatpush2.xpose.msra.mxu0 %v2467_v28  ;;  %5247 = vmatpush2.xpose.msra.mxu1 %v2469_v0  ;;  %v2310_v38 = vld [vmem:[%s6783_s7 + $0x3998] sm:$0xff]  ;;  %v2309_v40 = vld [vmem:[%s6783_s7 + $0x3990] sm:$0xff] }
 0x6aa   : > { %v4751_v53 = vpop.f32.mrf.mxu0  ;;  %v4858_v52 = vpop.f32.mrf.mxu1  ;;  %5141 = vmatprep.subr.mxu0 %v2436_v16  ;;  %5248 = vmatprep.subr.mxu1 %v2438_v56 }
 0x6ab   : > { %v4752_v50 = vadd.f32 %v4751_v53, %v8865_v25  ;;  %v9031_v62 = vadd.f32 %v4856_v57, %v4750_v6  ;;  %v2405_v25 = vld [vmem:[%s6783_s7 + $0x3c90] sm:$0xff]  ;;  %v2276_v53 = vld [vmem:[%s6783_s7 + $0x3888] sm:$0xff] }
 0x6ac   : > { %v4755_v54 = vpop.f32.mrf.mxu0  ;;  %v4862_v59 = vpop.f32.mrf.mxu1 }
 0x6ad   : > { %v4756_v26 = vadd.f32 %v4755_v54, %v8870_v51  ;;  %v9036_v35 = vadd.f32 %v4858_v52, %v4752_v50  ;;  %5142 = vmatpush2.xpose.msra.mxu0 %v2435_v58  ;;  %5249 = vmatpush2.xpose.msra.mxu1 %v2437_v14  ;;  %v2244_v54 = vld [vmem:[%s6783_s7 + $0x3788] sm:$0xff] }
 0x6ae   : > { %v4757_v47 = vpop.f32.mrf.mxu0  ;;  %v4864_v3 = vpop.f32.mrf.mxu1  ;;  %5143 = vmatprep.subr.mxu0 %v2404_v8  ;;  %5250 = vmatprep.subr.mxu1 %v2406_v30  ;;  %v2277_v8 = vld [vmem:[%s6783_s7 + $0x3890] sm:$0xff] }
 0x6af   : > { %v4758_v10 = vadd.f32 %v4757_v47, %v8875_v48  ;;  %v9041_v17 = vadd.f32 %v4862_v59, %v4756_v26  ;;  %v2373_v48 = vld [vmem:[%s6783_s7 + $0x3b90] sm:$0xff]  ;;  %v2246_v59 = vld [vmem:[%s6783_s7 + $0x3798] sm:$0xff]  ;;  %v2212_v47 = vld [vmem:[%s6783_s7 + $0x3688] sm:$0xff] }
 0x6b0   : > { %v4761_v51 = vpop.f32.mrf.mxu0  ;;  %v4868_v5 = vpop.f32.mrf.mxu1  ;;  %v2245_v26 = vld [vmem:[%s6783_s7 + $0x3790] sm:$0xff] }
 0x6b1   : > { %v4762_v29 = vadd.f32 %v4761_v51, %v8880_v45  ;;  %v9046_v22 = vadd.f32 %v4864_v3, %v4758_v10  ;;  %5144 = vmatpush2.xpose.msra.mxu0 %v2403_v20  ;;  %5251 = vmatpush2.xpose.msra.mxu1 %v2405_v25  ;;  %v2214_v3 = vld [vmem:[%s6783_s7 + $0x3698] sm:$0xff]  ;;  %v2211_v20 = vld [vmem:[%s6783_s7 + $0x3680] sm:$0xff]  ;;  %v2213_v25 = vld [vmem:[%s6783_s7 + $0x3690] sm:$0xff] }
 0x6b2   : > { %v4763_v13 = vpop.f32.mrf.mxu0  ;;  %v4870_v49 = vpop.f32.mrf.mxu1  ;;  %5145 = vmatprep.subr.mxu0 %v2372_v36  ;;  %5252 = vmatprep.subr.mxu1 %v2374_v39  ;;  %v2180_v10 = vld [vmem:[%s6783_s7 + $0x3588] sm:$0xff]  ;;  %v2182_v36 = vld [vmem:[%s6783_s7 + $0x3598] sm:$0xff]  ;;  %v2179_v39 = vld [vmem:[%s6783_s7 + $0x3580] sm:$0xff] }
 0x6b3   : > { %v4764_v9 = vadd.f32 %v4763_v13, %v8885_v18  ;;  %v9051_v31 = vadd.f32 %v4868_v5, %v4762_v29  ;;  %v2341_v18 = vld [vmem:[%s6783_s7 + $0x3a90] sm:$0xff]  ;;  %v2148_v5 = vld [vmem:[%s6783_s7 + $0x3488] sm:$0xff]  ;;  %v2150_v29 = vld [vmem:[%s6783_s7 + $0x3498] sm:$0xff] }
 0x6b4   : > { %v4767_v45 = vpop.f32.mrf.mxu0  ;;  %v4874_v4 = vpop.f32.mrf.mxu1  ;;  %v2181_v51 = vld [vmem:[%s6783_s7 + $0x3590] sm:$0xff]  ;;  %v2147_v13 = vld [vmem:[%s6783_s7 + $0x3480] sm:$0xff] }
 0x6b5   : > { %v4768_v7 = vadd.f32 %v4767_v45, %v8890_v43  ;;  %v9056_v12 = vadd.f32 %v4870_v49, %v4764_v9  ;;  %5146 = vmatpush2.xpose.msra.mxu0 %v2371_v60  ;;  %5253 = vmatpush2.xpose.msra.mxu1 %v2373_v48  ;;  %v2149_v49 = vld [vmem:[%s6783_s7 + $0x3490] sm:$0xff]  ;;  %v2116_v60 = vld [vmem:[%s6783_s7 + $0x3388] sm:$0xff]  ;;  %v2118_v48 = vld [vmem:[%s6783_s7 + $0x3398] sm:$0xff] }
 0x6b6   : > { %v4769_v27 = vpop.f32.mrf.mxu0  ;;  %v4876_v23 = vpop.f32.mrf.mxu1  ;;  %5147 = vmatprep.subr.mxu0 %v2340_v46  ;;  %5254 = vmatprep.subr.mxu1 %v2342_v2  ;;  %v2115_v9 = vld [vmem:[%s6783_s7 + $0x3380] sm:$0xff]  ;;  %v2117_v46 = vld [vmem:[%s6783_s7 + $0x3390] sm:$0xff]  ;;  %v2084_v2 = vld [vmem:[%s6783_s7 + $0x3288] sm:$0xff] }
 0x6b7   : > { %v4770_v55 = vadd.f32 %v4769_v27, %v8895_v11  ;;  %v9061_v42 = vadd.f32 %v4874_v4, %v4768_v7  ;;  %v2307_v11 = vld [vmem:[%s6783_s7 + $0x3980] sm:$0xff]  ;;  %v2086_v45 = vld [vmem:[%s6783_s7 + $0x3298] sm:$0xff]  ;;  %v2085_v7 = vld [vmem:[%s6783_s7 + $0x3290] sm:$0xff] }
 0x6b8   : > { %v4773_v43 = vpop.f32.mrf.mxu0  ;;  %v4880_v28 = vpop.f32.mrf.mxu1  ;;  %v2083_v4 = vld [vmem:[%s6783_s7 + $0x3280] sm:$0xff]  ;;  %v2052_v27 = vld [vmem:[%s6783_s7 + $0x3188] sm:$0xff] }
 0x6b9   : > { %v4774_v0 = vadd.f32 %v4773_v43, %v8900_v63  ;;  %v9066_v33 = vadd.f32 %v4876_v23, %v4770_v55  ;;  %5148 = vmatpush2.xpose.msra.mxu0 %v2339_v15  ;;  %5255 = vmatpush2.xpose.msra.mxu1 %v2341_v18  ;;  %v2278_v63 = vld [vmem:[%s6783_s7 + $0x3898] sm:$0xff]  ;;  %v2051_v15 = vld [vmem:[%s6783_s7 + $0x3180] sm:$0xff]  ;;  %v2053_v18 = vld [vmem:[%s6783_s7 + $0x3190] sm:$0xff] }
 0x6ba   : > { %v4775_v16 = vpop.f32.mrf.mxu0  ;;  %v4882_v56 = vpop.f32.mrf.mxu1  ;;  %5149 = vmatprep.subr.mxu0 %v2308_v19  ;;  %5256 = vmatprep.subr.mxu1 %v2310_v38  ;;  %v2054_v23 = vld [vmem:[%s6783_s7 + $0x3198] sm:$0xff]  ;;  %v2020_v55 = vld [vmem:[%s6783_s7 + $0x3088] sm:$0xff]  ;;  %v2019_v38 = vld [vmem:[%s6783_s7 + $0x3080] sm:$0xff] }
 0x6bb   : > { %v4776_v57 = vadd.f32 %v4775_v16, %v8905_v41  ;;  %v9071_v6 = vadd.f32 %v4880_v28, %v4774_v0  ;;  %v2275_v41 = vld [vmem:[%s6783_s7 + $0x3880] sm:$0xff]  ;;  %v2022_v19 = vld [vmem:[%s6783_s7 + $0x3098] sm:$0xff]  ;;  %v2021_v43 = vld [vmem:[%s6783_s7 + $0x3090] sm:$0xff] }
 0x6bc   : > { %v4779_v52 = vpop.f32.mrf.mxu0  ;;  %v4886_v58 = vpop.f32.mrf.mxu1  ;;  %v1992_v28 = vld [vmem:[%s6783_s7 + $0x2fa8] sm:$0xff]  ;;  %v1994_v0 = vld [vmem:[%s6783_s7 + $0x2fb8] sm:$0xff]  ;;  %v1991_v16 = vld [vmem:[%s6783_s7 + $0x2fa0] sm:$0xff] }
 0x6bd   : > { %v4780_v14 = vadd.f32 %v4779_v52, %v8909_v21  ;;  %v9076_v50 = vadd.f32 %v4882_v56, %v4776_v57  ;;  %5150 = vmatpush2.xpose.msra.mxu0 %v2307_v11  ;;  %5257 = vmatpush2.xpose.msra.mxu1 %v2309_v40  ;;  %v2243_v21 = vld [vmem:[%s6783_s7 + $0x3780] sm:$0xff]  ;;  %v1993_v56 = vld [vmem:[%s6783_s7 + $0x2fb0] sm:$0xff]  ;;  %v1960_v11 = vld [vmem:[%s6783_s7 + $0x2ea8] sm:$0xff] }
 0x6be   : > { %5151 = vmatprep.subr.mxu0 %v2276_v53  ;;  %5258 = vmatprep.subr.mxu1 %v2278_v63  ;;  %v6315_v40 = vld [vmem:[#allocation2 + $0x80] sm:$0xff]  ;;  %v6316_v57 = vld [vmem:[#allocation2 + $0x90] sm:$0xff]  ;;  %v1962_v53 = vld [vmem:[%s6783_s7 + $0x2eb8] sm:$0xff] }
 0x6bf   : > { %v9080_v30 = vadd.f32 %v4886_v58, %v4780_v14  ;;  %v6317_v63 = vld [vmem:[#allocation2 + $0x188] sm:$0xff]  ;;  %v1959_v52 = vld [vmem:[%s6783_s7 + $0x2ea0] sm:$0xff]  ;;  %v1961_v58 = vld [vmem:[%s6783_s7 + $0x2eb0] sm:$0xff] }
 0x6c0   : > { %v6318_v14 = vld [vmem:[#allocation2 + $0x198] sm:$0xff] }
 0x6c1   : > { %5152 = vmatpush2.xpose.msra.mxu0 %v2275_v41  ;;  %5259 = vmatpush2.xpose.msra.mxu1 %v2277_v8  ;;  %v1928_v41 = vld [vmem:[%s6783_s7 + $0x2da8] sm:$0xff]  ;;  %v6319_v8 = vld [vmem:[#allocation2 + $0x180] sm:$0xff] }
 0x6c2   : > { %5153 = vmatprep.subr.mxu0 %v2244_v54  ;;  %5260 = vmatprep.subr.mxu1 %v2246_v59  ;;  %v6320_v54 = vld [vmem:[#allocation2 + $0x190] sm:$0xff]  ;;  %v1930_v59 = vld [vmem:[%s6783_s7 + $0x2db8] sm:$0xff] }
 0x6c5   : > { %5154 = vmatpush2.xpose.msra.mxu0 %v2243_v21  ;;  %5261 = vmatpush2.xpose.msra.mxu1 %v2245_v26  ;;  %v6321_v21 = vld [vmem:[#allocation2 + $0x288] sm:$0xff]  ;;  %v1927_v26 = vld [vmem:[%s6783_s7 + $0x2da0] sm:$0xff] }
 0x6c6   : > { %5155 = vmatprep.subr.mxu0 %v2212_v47  ;;  %5262 = vmatprep.subr.mxu1 %v2214_v3  ;;  %v1929_v47 = vld [vmem:[%s6783_s7 + $0x2db0] sm:$0xff]  ;;  %v6322_v3 = vld [vmem:[#allocation2 + $0x298] sm:$0xff] }
 0x6c9   : > { %5156 = vmatpush2.xpose.msra.mxu0 %v2211_v20  ;;  %5263 = vmatpush2.xpose.msra.mxu1 %v2213_v25  ;;  %v1896_v20 = vld [vmem:[%s6783_s7 + $0x2ca8] sm:$0xff]  ;;  %v6323_v25 = vld [vmem:[#allocation2 + $0x280] sm:$0xff] }
 0x6ca   : > { %5157 = vmatprep.subr.mxu0 %v2180_v10  ;;  %5264 = vmatprep.subr.mxu1 %v2182_v36  ;;  %v6324_v10 = vld [vmem:[#allocation2 + $0x290] sm:$0xff]  ;;  %v1898_v36 = vld [vmem:[%s6783_s7 + $0x2cb8] sm:$0xff] }
 0x6cd   : > { %5158 = vmatpush2.xpose.msra.mxu0 %v2179_v39  ;;  %5265 = vmatpush2.xpose.msra.mxu1 %v2181_v51  ;;  %v6325_v39 = vld [vmem:[#allocation2 + $0x388] sm:$0xff]  ;;  %v1895_v51 = vld [vmem:[%s6783_s7 + $0x2ca0] sm:$0xff] }
 0x6ce   : > { %5159 = vmatprep.subr.mxu0 %v2148_v5  ;;  %5266 = vmatprep.subr.mxu1 %v2150_v29  ;;  %v1897_v5 = vld [vmem:[%s6783_s7 + $0x2cb0] sm:$0xff]  ;;  %v6326_v29 = vld [vmem:[#allocation2 + $0x398] sm:$0xff] }
 0x6d1   : > { %5160 = vmatpush2.xpose.msra.mxu0 %v2147_v13  ;;  %5267 = vmatpush2.xpose.msra.mxu1 %v2149_v49  ;;  %v1864_v13 = vld [vmem:[%s6783_s7 + $0x2ba8] sm:$0xff]  ;;  %v6327_v49 = vld [vmem:[#allocation2 + $0x380] sm:$0xff] }
 0x6d2   : > { %5161 = vmatprep.subr.mxu0 %v2116_v60  ;;  %5268 = vmatprep.subr.mxu1 %v2118_v48  ;;  %v6328_v60 = vld [vmem:[#allocation2 + $0x390] sm:$0xff]  ;;  %v1866_v48 = vld [vmem:[%s6783_s7 + $0x2bb8] sm:$0xff] }
 0x6d5   : > { %5162 = vmatpush2.xpose.msra.mxu0 %v2115_v9  ;;  %5269 = vmatpush2.xpose.msra.mxu1 %v2117_v46  ;;  %v6329_v9 = vld [vmem:[#allocation2 + $0x488] sm:$0xff]  ;;  %v1863_v46 = vld [vmem:[%s6783_s7 + $0x2ba0] sm:$0xff] }
 0x6d6   : > { %5163 = vmatprep.subr.mxu0 %v2084_v2  ;;  %5270 = vmatprep.subr.mxu1 %v2086_v45  ;;  %v1865_v2 = vld [vmem:[%s6783_s7 + $0x2bb0] sm:$0xff]  ;;  %v6330_v45 = vld [vmem:[#allocation2 + $0x498] sm:$0xff] }
 0x6d9   : > { %5164 = vmatpush2.xpose.msra.mxu0 %v2083_v4  ;;  %5271 = vmatpush2.xpose.msra.mxu1 %v2085_v7  ;;  %v1832_v4 = vld [vmem:[%s6783_s7 + $0x2aa8] sm:$0xff]  ;;  %v6331_v7 = vld [vmem:[#allocation2 + $0x480] sm:$0xff] }
 0x6da   : > { %5165 = vmatprep.subr.mxu0 %v2052_v27  ;;  %5272 = vmatprep.subr.mxu1 %v2054_v23  ;;  %v6332_v27 = vld [vmem:[#allocation2 + $0x490] sm:$0xff]  ;;  %v1834_v23 = vld [vmem:[%s6783_s7 + $0x2ab8] sm:$0xff] }
 0x6dd   : > { %5166 = vmatpush2.xpose.msra.mxu0 %v2051_v15  ;;  %5273 = vmatpush2.xpose.msra.mxu1 %v2053_v18  ;;  %v6333_v15 = vld [vmem:[#allocation2 + $0x588] sm:$0xff]  ;;  %v1831_v18 = vld [vmem:[%s6783_s7 + $0x2aa0] sm:$0xff] }
 0x6de   : > { %5167 = vmatprep.subr.mxu0 %v2020_v55  ;;  %5274 = vmatprep.subr.mxu1 %v2022_v19  ;;  %v1833_v55 = vld [vmem:[%s6783_s7 + $0x2ab0] sm:$0xff]  ;;  %v6334_v19 = vld [vmem:[#allocation2 + $0x598] sm:$0xff] }
 0x6e1   : > { %5168 = vmatpush2.xpose.msra.mxu0 %v2019_v38  ;;  %5275 = vmatpush2.xpose.msra.mxu1 %v2021_v43  ;;  %v1800_v38 = vld [vmem:[%s6783_s7 + $0x29a8] sm:$0xff]  ;;  %v6335_v43 = vld [vmem:[#allocation2 + $0x580] sm:$0xff] }
 0x6e2   : > { %5319 = vmatprep.subr.mxu0 %v1992_v28  ;;  %5426 = vmatprep.subr.mxu1 %v1994_v0  ;;  %v6336_v28 = vld [vmem:[#allocation2 + $0x590] sm:$0xff]  ;;  %v1802_v0 = vld [vmem:[%s6783_s7 + $0x29b8] sm:$0xff] }
 0x6e4   : > { %5170 = vmatmul.mubr.f32.vlgmr.msra.gmra.mxu0 %v6315_v40  ;;  %5277 = vmatmul.mubr.f32.vlgmr.msra.gmra.mxu1 %v6316_v57  ;;  %v6338_v40 = vld [vmem:[#allocation2 + $0x698] sm:$0xff]  ;;  %v1768_v57 = vld [vmem:[%s6783_s7 + $0x28a8] sm:$0xff] }
 0x6e5   : > { %5320 = vmatpush1.xpose.msra.mxu0 %v1991_v16  ;;  %5427 = vmatpush1.xpose.msra.mxu1 %v1993_v56  ;;  %v6337_v16 = vld [vmem:[#allocation2 + $0x688] sm:$0xff]  ;;  %v1799_v56 = vld [vmem:[%s6783_s7 + $0x29a0] sm:$0xff] }
 0x6e6   : > { %5175 = vmatprep.mubr.f32.mxu0 %v6317_v63  ;;  %5321 = vmatprep.subr.mxu0 %v1960_v11  ;;  %v1801_v11 = vld [vmem:[%s6783_s7 + $0x29b0] sm:$0xff]  ;;  %v6339_v63 = vld [vmem:[#allocation2 + $0x680] sm:$0xff] }
 0x6e7   : > { %5428 = vmatprep.subr.mxu1 %v1962_v53  ;;  %5282 = vmatprep.mubr.f32.mxu1 %v6318_v14  ;;  %v1770_v53 = vld [vmem:[%s6783_s7 + $0x28b8] sm:$0xff]  ;;  %v1769_v14 = vld [vmem:[%s6783_s7 + $0x28b0] sm:$0xff] }
 0x6e8   : > { %5176 = vmatmul.mubr.f32.gmra.mxu0 %v6319_v8  ;;  %5283 = vmatmul.mubr.f32.gmra.mxu1 %v6320_v54  ;;  %v1738_v8 = vld [vmem:[%s6783_s7 + $0x27b8] sm:$0xff]  ;;  %v6341_v54 = vld [vmem:[#allocation2 + $0xa8] sm:$0xff] }
 0x6e9   : > { %5322 = vmatpush1.xpose.msra.mxu0 %v1959_v52  ;;  %5429 = vmatpush1.xpose.msra.mxu1 %v1961_v58  ;;  %v6340_v52 = vld [vmem:[#allocation2 + $0x690] sm:$0xff]  ;;  %v1767_v58 = vld [vmem:[%s6783_s7 + $0x28a0] sm:$0xff] }
 0x6ea   : > { %5181 = vmatprep.mubr.f32.mxu0 %v6321_v21  ;;  %5323 = vmatprep.subr.mxu0 %v1928_v41  ;;  %v1736_v41 = vld [vmem:[%s6783_s7 + $0x27a8] sm:$0xff]  ;;  %v1735_v21 = vld [vmem:[%s6783_s7 + $0x27a0] sm:$0xff] }
 0x6eb   : > { %5430 = vmatprep.subr.mxu1 %v1930_v59  ;;  %5288 = vmatprep.mubr.f32.mxu1 %v6322_v3  ;;  %v6342_v59 = vld [vmem:[#allocation2 + $0xb8] sm:$0xff] }
 0x6ec   : > { %5182 = vmatmul.mubr.f32.gmra.mxu0 %v6323_v25  ;;  %5289 = vmatmul.mubr.f32.gmra.mxu1 %v6324_v10  ;;  %v1706_v3 = vld [vmem:[%s6783_s7 + $0x26b8] sm:$0xff]  ;;  %v1705_v25 = vld [vmem:[%s6783_s7 + $0x26b0] sm:$0xff]  ;;  %v1672_v10 = vld [vmem:[%s6783_s7 + $0x25a8] sm:$0xff] }
 0x6ed   : > { %5324 = vmatpush1.xpose.msra.mxu0 %v1927_v26  ;;  %5431 = vmatpush1.xpose.msra.mxu1 %v1929_v47  ;;  %v1737_v26 = vld [vmem:[%s6783_s7 + $0x27b0] sm:$0xff]  ;;  %v1704_v47 = vld [vmem:[%s6783_s7 + $0x26a8] sm:$0xff] }
 0x6ee   : > { %5187 = vmatprep.mubr.f32.mxu0 %v6325_v39  ;;  %5325 = vmatprep.subr.mxu0 %v1896_v20  ;;  %v1703_v20 = vld [vmem:[%s6783_s7 + $0x26a0] sm:$0xff] }
 0x6ef   : > { %5432 = vmatprep.subr.mxu1 %v1898_v36  ;;  %5294 = vmatprep.mubr.f32.mxu1 %v6326_v29  ;;  %v1674_v36 = vld [vmem:[%s6783_s7 + $0x25b8] sm:$0xff]  ;;  %v1671_v39 = vld [vmem:[%s6783_s7 + $0x25a0] sm:$0xff] }
 0x6f0   : > { %5188 = vmatmul.mubr.f32.gmra.mxu0 %v6327_v49  ;;  %5295 = vmatmul.mubr.f32.gmra.mxu1 %v6328_v60  ;;  %v1642_v29 = vld [vmem:[%s6783_s7 + $0x24b8] sm:$0xff]  ;;  %v1641_v49 = vld [vmem:[%s6783_s7 + $0x24b0] sm:$0xff]  ;;  %v1608_v60 = vld [vmem:[%s6783_s7 + $0x23a8] sm:$0xff] }
 0x6f1   : > { %5326 = vmatpush1.xpose.msra.mxu0 %v1895_v51  ;;  %5433 = vmatpush1.xpose.msra.mxu1 %v1897_v5  ;;  %v1673_v51 = vld [vmem:[%s6783_s7 + $0x25b0] sm:$0xff]  ;;  %v1640_v5 = vld [vmem:[%s6783_s7 + $0x24a8] sm:$0xff] }
 0x6f2   : > { %5193 = vmatprep.mubr.f32.mxu0 %v6329_v9  ;;  %5327 = vmatprep.subr.mxu0 %v1864_v13  ;;  %v1639_v13 = vld [vmem:[%s6783_s7 + $0x24a0] sm:$0xff] }
 0x6f3   : > { %5434 = vmatprep.subr.mxu1 %v1866_v48  ;;  %5300 = vmatprep.mubr.f32.mxu1 %v6330_v45  ;;  %v1610_v48 = vld [vmem:[%s6783_s7 + $0x23b8] sm:$0xff]  ;;  %v1607_v9 = vld [vmem:[%s6783_s7 + $0x23a0] sm:$0xff] }
 0x6f4   : > { %5194 = vmatmul.mubr.f32.gmra.mxu0 %v6331_v7  ;;  %5301 = vmatmul.mubr.f32.gmra.mxu1 %v6332_v27  ;;  %v1578_v45 = vld [vmem:[%s6783_s7 + $0x22b8] sm:$0xff]  ;;  %v1577_v7 = vld [vmem:[%s6783_s7 + $0x22b0] sm:$0xff]  ;;  %v1544_v27 = vld [vmem:[%s6783_s7 + $0x21a8] sm:$0xff] }
 0x6f5   : > { %5328 = vmatpush1.xpose.msra.mxu0 %v1863_v46  ;;  %5435 = vmatpush1.xpose.msra.mxu1 %v1865_v2  ;;  %v1609_v46 = vld [vmem:[%s6783_s7 + $0x23b0] sm:$0xff]  ;;  %v1576_v2 = vld [vmem:[%s6783_s7 + $0x22a8] sm:$0xff] }
 0x6f6   : > { %5199 = vmatprep.mubr.f32.mxu0 %v6333_v15  ;;  %5329 = vmatprep.subr.mxu0 %v1832_v4  ;;  %v1575_v4 = vld [vmem:[%s6783_s7 + $0x22a0] sm:$0xff] }
 0x6f7   : > { %5436 = vmatprep.subr.mxu1 %v1834_v23  ;;  %5306 = vmatprep.mubr.f32.mxu1 %v6334_v19  ;;  %v1546_v23 = vld [vmem:[%s6783_s7 + $0x21b8] sm:$0xff]  ;;  %v1543_v15 = vld [vmem:[%s6783_s7 + $0x21a0] sm:$0xff] }
 0x6f8   : > { %5200 = vmatmul.mubr.f32.gmra.mxu0 %v6335_v43  ;;  %5307 = vmatmul.mubr.f32.gmra.mxu1 %v6336_v28  ;;  %v1514_v19 = vld [vmem:[%s6783_s7 + $0x20b8] sm:$0xff]  ;;  %v1513_v43 = vld [vmem:[%s6783_s7 + $0x20b0] sm:$0xff]  ;;  %v2504_v28 = vld [vmem:[%s6783_s7 + $0x3fa8] sm:$0xff] }
 0x6f9   : > { %5330 = vmatpush1.xpose.msra.mxu0 %v1831_v18  ;;  %5437 = vmatpush1.xpose.msra.mxu1 %v1833_v55  ;;  %v1545_v18 = vld [vmem:[%s6783_s7 + $0x21b0] sm:$0xff]  ;;  %v1512_v55 = vld [vmem:[%s6783_s7 + $0x20a8] sm:$0xff] }
 0x6fa   : > { %5205 = vmatprep.mubr.f32.mxu0 %v6337_v16  ;;  %5331 = vmatprep.subr.mxu0 %v1800_v38  ;;  %v1511_v38 = vld [vmem:[%s6783_s7 + $0x20a0] sm:$0xff]  ;;  %v9180_v16 = vpop.f32.mrf.mxu0 }
 0x6fb   : > { %5438 = vmatprep.subr.mxu1 %v1802_v0  ;;  %5312 = vmatprep.mubr.f32.mxu1 %v6338_v40  ;;  %v2506_v0 = vld [vmem:[%s6783_s7 + $0x3fb8] sm:$0xff]  ;;  %v2505_v40 = vld [vmem:[%s6783_s7 + $0x3fb0] sm:$0xff] }
 0x6fc   : > { %5206 = vmatmul.mubr.f32.gmra.mxu0 %v6339_v63  ;;  %5313 = vmatmul.mubr.f32.gmra.mxu1 %v6340_v52 }
 0x6fd   : > { %5332 = vmatpush1.xpose.msra.mxu0 %v1799_v56  ;;  %5439 = vmatpush1.xpose.msra.mxu1 %v1801_v11  ;;  %v9182_v56 = vpop.f32.mrf.mxu1  ;;  %v2503_v11 = vld [vmem:[%s6783_s7 + $0x3fa0] sm:$0xff] }
 0x6fe   : > { %5333 = vmatprep.subr.mxu0 %v1768_v57  ;;  %5440 = vmatprep.subr.mxu1 %v1770_v53  ;;  %v2472_v57 = vld [vmem:[%s6783_s7 + $0x3ea8] sm:$0xff]  ;;  %v2474_v53 = vld [vmem:[%s6783_s7 + $0x3eb8] sm:$0xff] }
 0x6ff   : > { %5383 = vmatprep.mubr.f32.mxu0 %v6341_v54  ;;  %5490 = vmatprep.mubr.f32.mxu1 %v6342_v59  ;;  %v2473_v54 = vld [vmem:[%s6783_s7 + $0x3eb0] sm:$0xff] }
 0x701   : > { %5334 = vmatpush1.xpose.msra.mxu0 %v1767_v58  ;;  %5441 = vmatpush1.xpose.msra.mxu1 %v1769_v14 }
 0x702   : > { %5335 = vmatprep.subr.mxu0 %v1736_v41  ;;  %5442 = vmatprep.subr.mxu1 %v1738_v8  ;;  %v2471_v8 = vld [vmem:[%s6783_s7 + $0x3ea0] sm:$0xff] }
 0x705   : > { %5336 = vmatpush1.xpose.msra.mxu0 %v1735_v21  ;;  %5443 = vmatpush1.xpose.msra.mxu1 %v1737_v26  ;;  %v2440_v26 = vld [vmem:[%s6783_s7 + $0x3da8] sm:$0xff] }
 0x706   : > { %5337 = vmatprep.subr.mxu0 %v1704_v47  ;;  %5444 = vmatprep.subr.mxu1 %v1706_v3  ;;  %v2442_v47 = vld [vmem:[%s6783_s7 + $0x3db8] sm:$0xff] }
 0x709   : > { %5338 = vmatpush1.xpose.msra.mxu0 %v1703_v20  ;;  %5445 = vmatpush1.xpose.msra.mxu1 %v1705_v25 }
 0x70a   : > { %5339 = vmatprep.subr.mxu0 %v1672_v10  ;;  %5446 = vmatprep.subr.mxu1 %v1674_v36 }
 0x70d   : > { %5340 = vmatpush1.xpose.msra.mxu0 %v1671_v39  ;;  %5447 = vmatpush1.xpose.msra.mxu1 %v1673_v51  ;;  %v2439_v39 = vld [vmem:[%s6783_s7 + $0x3da0] sm:$0xff]  ;;  %v2441_v51 = vld [vmem:[%s6783_s7 + $0x3db0] sm:$0xff] }
 0x70e   : > { %5341 = vmatprep.subr.mxu0 %v1640_v5  ;;  %5448 = vmatprep.subr.mxu1 %v1642_v29  ;;  %v2408_v29 = vld [vmem:[%s6783_s7 + $0x3ca8] sm:$0xff] }
 0x711   : > { %5342 = vmatpush1.xpose.msra.mxu0 %v1639_v13  ;;  %5449 = vmatpush1.xpose.msra.mxu1 %v1641_v49  ;;  %v2410_v13 = vld [vmem:[%s6783_s7 + $0x3cb8] sm:$0xff] }
 0x712   : > { %5343 = vmatprep.subr.mxu0 %v1608_v60  ;;  %5450 = vmatprep.subr.mxu1 %v1610_v48 }
 0x715   : > { %5344 = vmatpush1.xpose.msra.mxu0 %v1607_v9  ;;  %5451 = vmatpush1.xpose.msra.mxu1 %v1609_v46 }
 0x716   : > { %5345 = vmatprep.subr.mxu0 %v1576_v2  ;;  %5452 = vmatprep.subr.mxu1 %v1578_v45  ;;  %v2407_v2 = vld [vmem:[%s6783_s7 + $0x3ca0] sm:$0xff] }
 0x719   : > { %5346 = vmatpush1.xpose.msra.mxu0 %v1575_v4  ;;  %5453 = vmatpush1.xpose.msra.mxu1 %v1577_v7  ;;  %v2376_v7 = vld [vmem:[%s6783_s7 + $0x3ba8] sm:$0xff] }
 0x71a   : > { %5347 = vmatprep.subr.mxu0 %v1544_v27  ;;  %5454 = vmatprep.subr.mxu1 %v1546_v23  ;;  %v2378_v27 = vld [vmem:[%s6783_s7 + $0x3bb8] sm:$0xff] }
 0x71d   : > { %5348 = vmatpush1.xpose.msra.mxu0 %v1543_v15  ;;  %5455 = vmatpush1.xpose.msra.mxu1 %v1545_v18 }
 0x71e   : > { %5349 = vmatprep.subr.mxu0 %v1512_v55  ;;  %5456 = vmatprep.subr.mxu1 %v1514_v19 }
 0x721   : > { %5350 = vmatpush1.xpose.msra.mxu0 %v1511_v38  ;;  %5457 = vmatpush1.xpose.msra.mxu1 %v1513_v43  ;;  %v2375_v38 = vld [vmem:[%s6783_s7 + $0x3ba0] sm:$0xff] }
 0x722   : > { %5351 = vmatprep.subr.mxu0 %v2504_v28  ;;  %5458 = vmatprep.subr.mxu1 %v2506_v0  ;;  %v2344_v0 = vld [vmem:[%s6783_s7 + $0x3aa8] sm:$0xff] }
 0x724   : > { %v4957_v63 = vpop.f32.mrf.mxu0  ;;  %v5064_v52 = vpop.f32.mrf.mxu1 }
 0x725   : > { %v4958_v58 = vadd.f32 %v4957_v63, %v9020_v61  ;;  %5352 = vmatpush2.xpose.msra.mxu0 %v2503_v11  ;;  %5459 = vmatpush2.xpose.msra.mxu1 %v2505_v40  ;;  %v2346_v11 = vld [vmem:[%s6783_s7 + $0x3ab8] sm:$0xff] }
 0x726   : > { %v4959_v14 = vpop.f32.mrf.mxu0  ;;  %v5066_v41 = vpop.f32.mrf.mxu1  ;;  %5353 = vmatprep.subr.mxu0 %v2472_v57  ;;  %5460 = vmatprep.subr.mxu1 %v2474_v53 }
 0x727   : > { %v9191_v59 = vadd.f32 %v5064_v52, %v4958_v58  ;;  %v4960_v21 = vadd.f32 %v4959_v14, %v9025_v1  ;;  %v2343_v58 = vld [vmem:[%s6783_s7 + $0x3aa0] sm:$0xff] }
 0x728   : > { %v4963_v3 = vpop.f32.mrf.mxu0  ;;  %v5070_v61 = vpop.f32.mrf.mxu1 }
 0x729   : > { %v9196_v20 = vadd.f32 %v5066_v41, %v4960_v21  ;;  %v4964_v25 = vadd.f32 %v4963_v3, %v9031_v62  ;;  %5354 = vmatpush2.xpose.msra.mxu0 %v2471_v8  ;;  %5461 = vmatpush2.xpose.msra.mxu1 %v2473_v54  ;;  %v2312_v8 = vld [vmem:[%s6783_s7 + $0x39a8] sm:$0xff]  ;;  %v2314_v54 = vld [vmem:[%s6783_s7 + $0x39b8] sm:$0xff] }
 0x72a   : > { %v4965_v10 = vpop.f32.mrf.mxu0  ;;  %v5072_v36 = vpop.f32.mrf.mxu1  ;;  %5355 = vmatprep.subr.mxu0 %v2440_v26  ;;  %5462 = vmatprep.subr.mxu1 %v2442_v47 }
 0x72b   : > { %v4966_v1 = vadd.f32 %v4965_v10, %v9036_v35  ;;  %v9202_v5 = vadd.f32 %v5070_v61, %v4964_v25  ;;  %v2409_v35 = vld [vmem:[%s6783_s7 + $0x3cb0] sm:$0xff] }
 0x72c   : > { %v4969_v49 = vpop.f32.mrf.mxu0  ;;  %v5076_v62 = vpop.f32.mrf.mxu1  ;;  %v2313_v25 = vld [vmem:[%s6783_s7 + $0x39b0] sm:$0xff] }
 0x72d   : > { %v4970_v60 = vadd.f32 %v4969_v49, %v9041_v17  ;;  %v9207_v48 = vadd.f32 %v5072_v36, %v4966_v1  ;;  %5356 = vmatpush2.xpose.msra.mxu0 %v2439_v39  ;;  %5463 = vmatpush2.xpose.msra.mxu1 %v2441_v51  ;;  %v2280_v39 = vld [vmem:[%s6783_s7 + $0x38a8] sm:$0xff]  ;;  %v2281_v49 = vld [vmem:[%s6783_s7 + $0x38b0] sm:$0xff] }
 0x72e   : > { %v4971_v9 = vpop.f32.mrf.mxu0  ;;  %v5078_v46 = vpop.f32.mrf.mxu1  ;;  %5357 = vmatprep.subr.mxu0 %v2408_v29  ;;  %5464 = vmatprep.subr.mxu1 %v2410_v13 }
 0x72f   : > { %v4972_v45 = vadd.f32 %v4971_v9, %v9046_v22  ;;  %v9212_v4 = vadd.f32 %v5076_v62, %v4970_v60  ;;  %v2377_v22 = vld [vmem:[%s6783_s7 + $0x3bb0] sm:$0xff]  ;;  %v2248_v60 = vld [vmem:[%s6783_s7 + $0x37a8] sm:$0xff]  ;;  %v2250_v9 = vld [vmem:[%s6783_s7 + $0x37b8] sm:$0xff] }
 0x730   : > { %v4975_v17 = vpop.f32.mrf.mxu0  ;;  %v5082_v23 = vpop.f32.mrf.mxu1 }
 0x731   : > { %v4976_v15 = vadd.f32 %v4975_v17, %v9051_v31  ;;  %v9217_v18 = vadd.f32 %v5078_v46, %v4972_v45  ;;  %5358 = vmatpush2.xpose.msra.mxu0 %v2407_v2  ;;  %5465 = vmatpush2.xpose.msra.mxu1 %v2409_v35  ;;  %v2249_v46 = vld [vmem:[%s6783_s7 + $0x37b0] sm:$0xff]  ;;  %v2216_v2 = vld [vmem:[%s6783_s7 + $0x36a8] sm:$0xff]  ;;  %v2218_v35 = vld [vmem:[%s6783_s7 + $0x36b8] sm:$0xff] }
 0x732   : > { %v4977_v55 = vpop.f32.mrf.mxu0  ;;  %v5084_v19 = vpop.f32.mrf.mxu1  ;;  %5359 = vmatprep.subr.mxu0 %v2376_v7  ;;  %5466 = vmatprep.subr.mxu1 %v2378_v27  ;;  %v2215_v45 = vld [vmem:[%s6783_s7 + $0x36a0] sm:$0xff]  ;;  %v2217_v7 = vld [vmem:[%s6783_s7 + $0x36b0] sm:$0xff]  ;;  %v2184_v27 = vld [vmem:[%s6783_s7 + $0x35a8] sm:$0xff] }
 0x733   : > { %v4978_v43 = vadd.f32 %v4977_v55, %v9056_v12  ;;  %v9222_v28 = vadd.f32 %v5082_v23, %v4976_v15  ;;  %v2345_v12 = vld [vmem:[%s6783_s7 + $0x3ab0] sm:$0xff]  ;;  %v2186_v17 = vld [vmem:[%s6783_s7 + $0x35b8] sm:$0xff]  ;;  %v2183_v23 = vld [vmem:[%s6783_s7 + $0x35a0] sm:$0xff] }
 0x734   : > { %v4981_v31 = vpop.f32.mrf.mxu0  ;;  %v5088_v40 = vpop.f32.mrf.mxu1  ;;  %v2185_v15 = vld [vmem:[%s6783_s7 + $0x35b0] sm:$0xff]  ;;  %v2152_v55 = vld [vmem:[%s6783_s7 + $0x34a8] sm:$0xff] }
 0x735   : > { %v4982_v57 = vadd.f32 %v4981_v31, %v9061_v42  ;;  %v9227_v53 = vadd.f32 %v5084_v19, %v4978_v43  ;;  %5360 = vmatpush2.xpose.msra.mxu0 %v2375_v38  ;;  %5467 = vmatpush2.xpose.msra.mxu1 %v2377_v22  ;;  %v2154_v19 = vld [vmem:[%s6783_s7 + $0x34b8] sm:$0xff]  ;;  %v2151_v38 = vld [vmem:[%s6783_s7 + $0x34a0] sm:$0xff]  ;;  %v2153_v22 = vld [vmem:[%s6783_s7 + $0x34b0] sm:$0xff] }
 0x736   : > { %v4983_v63 = vpop.f32.mrf.mxu0  ;;  %v5090_v52 = vpop.f32.mrf.mxu1  ;;  %5361 = vmatprep.subr.mxu0 %v2344_v0  ;;  %5468 = vmatprep.subr.mxu1 %v2346_v11  ;;  %v2120_v43 = vld [vmem:[%s6783_s7 + $0x33a8] sm:$0xff]  ;;  %v2122_v0 = vld [vmem:[%s6783_s7 + $0x33b8] sm:$0xff]  ;;  %v2119_v11 = vld [vmem:[%s6783_s7 + $0x33a0] sm:$0xff] }
 0x737   : > { %v4984_v14 = vadd.f32 %v4983_v63, %v9066_v33  ;;  %v9232_v41 = vadd.f32 %v5088_v40, %v4982_v57  ;;  %v2311_v33 = vld [vmem:[%s6783_s7 + $0x39a0] sm:$0xff]  ;;  %v2121_v31 = vld [vmem:[%s6783_s7 + $0x33b0] sm:$0xff]  ;;  %v2088_v40 = vld [vmem:[%s6783_s7 + $0x32a8] sm:$0xff] }
 0x738   : > { %v4987_v42 = vpop.f32.mrf.mxu0  ;;  %v5094_v21 = vpop.f32.mrf.mxu1  ;;  %v2090_v57 = vld [vmem:[%s6783_s7 + $0x32b8] sm:$0xff]  ;;  %v2087_v63 = vld [vmem:[%s6783_s7 + $0x32a0] sm:$0xff] }
 0x739   : > { %v4988_v26 = vadd.f32 %v4987_v42, %v9071_v6  ;;  %v9237_v47 = vadd.f32 %v5090_v52, %v4984_v14  ;;  %5362 = vmatpush2.xpose.msra.mxu0 %v2343_v58  ;;  %5469 = vmatpush2.xpose.msra.mxu1 %v2345_v12  ;;  %v2282_v6 = vld [vmem:[%s6783_s7 + $0x38b8] sm:$0xff]  ;;  %v2089_v52 = vld [vmem:[%s6783_s7 + $0x32b0] sm:$0xff]  ;;  %v2056_v58 = vld [vmem:[%s6783_s7 + $0x31a8] sm:$0xff] }
 0x73a   : > { %v4989_v3 = vpop.f32.mrf.mxu0  ;;  %v5096_v61 = vpop.f32.mrf.mxu1  ;;  %5363 = vmatprep.subr.mxu0 %v2312_v8  ;;  %5470 = vmatprep.subr.mxu1 %v2314_v54  ;;  %v2058_v12 = vld [vmem:[%s6783_s7 + $0x31b8] sm:$0xff]  ;;  %v2055_v14 = vld [vmem:[%s6783_s7 + $0x31a0] sm:$0xff]  ;;  %v2057_v8 = vld [vmem:[%s6783_s7 + $0x31b0] sm:$0xff] }
 0x73b   : > { %v4990_v10 = vadd.f32 %v4989_v3, %v9076_v50  ;;  %v9242_v36 = vadd.f32 %v5094_v21, %v4988_v26  ;;  %v2279_v50 = vld [vmem:[%s6783_s7 + $0x38a0] sm:$0xff]  ;;  %v2024_v54 = vld [vmem:[%s6783_s7 + $0x30a8] sm:$0xff]  ;;  %v2026_v42 = vld [vmem:[%s6783_s7 + $0x30b8] sm:$0xff] }
 0x73c   : > { %v4993_v51 = vpop.f32.mrf.mxu0  ;;  %v5100_v1 = vpop.f32.mrf.mxu1  ;;  %v2023_v21 = vld [vmem:[%s6783_s7 + $0x30a0] sm:$0xff]  ;;  %v2025_v26 = vld [vmem:[%s6783_s7 + $0x30b0] sm:$0xff]  ;;  %v1996_v3 = vld [vmem:[%s6783_s7 + $0x2fc8] sm:$0xff] }
 0x73d   : > { %v4994_v29 = vadd.f32 %v4993_v51, %v9080_v30  ;;  %v9247_v13 = vadd.f32 %v5096_v61, %v4990_v10  ;;  %5364 = vmatpush2.xpose.msra.mxu0 %v2311_v33  ;;  %5471 = vmatpush2.xpose.msra.mxu1 %v2313_v25  ;;  %v2247_v30 = vld [vmem:[%s6783_s7 + $0x37a0] sm:$0xff]  ;;  %v1998_v61 = vld [vmem:[%s6783_s7 + $0x2fd8] sm:$0xff]  ;;  %v1997_v25 = vld [vmem:[%s6783_s7 + $0x2fd0] sm:$0xff] }
 0x73e   : > { %5365 = vmatprep.subr.mxu0 %v2280_v39  ;;  %5472 = vmatprep.subr.mxu1 %v2282_v6  ;;  %v1995_v33 = vld [vmem:[%s6783_s7 + $0x2fc0] sm:$0xff]  ;;  %v1964_v10 = vld [vmem:[%s6783_s7 + $0x2ec8] sm:$0xff]  ;;  %v6344_v6 = vld [vmem:[#allocation2 + $0xb0] sm:$0xff] }
 0x73f   : > { %v9251_v62 = vadd.f32 %v5100_v1, %v4994_v29  ;;  %v6343_v39 = vld [vmem:[#allocation2 + $0xa0] sm:$0xff]  ;;  %v1966_v51 = vld [vmem:[%s6783_s7 + $0x2ed8] sm:$0xff]  ;;  %v6345_v1 = vld [vmem:[#allocation2 + $0x1a8] sm:$0xff] }
 0x740   : > { %v1963_v29 = vld [vmem:[%s6783_s7 + $0x2ec0] sm:$0xff] }
 0x741   : > { %5366 = vmatpush2.xpose.msra.mxu0 %v2279_v50  ;;  %5473 = vmatpush2.xpose.msra.mxu1 %v2281_v49  ;;  %v1965_v50 = vld [vmem:[%s6783_s7 + $0x2ed0] sm:$0xff]  ;;  %v6346_v49 = vld [vmem:[#allocation2 + $0x1b8] sm:$0xff] }
 0x742   : > { %5367 = vmatprep.subr.mxu0 %v2248_v60  ;;  %5474 = vmatprep.subr.mxu1 %v2250_v9  ;;  %v1932_v60 = vld [vmem:[%s6783_s7 + $0x2dc8] sm:$0xff]  ;;  %v6347_v9 = vld [vmem:[#allocation2 + $0x1a0] sm:$0xff] }
 0x745   : > { %5368 = vmatpush2.xpose.msra.mxu0 %v2247_v30  ;;  %5475 = vmatpush2.xpose.msra.mxu1 %v2249_v46  ;;  %v6348_v30 = vld [vmem:[#allocation2 + $0x1b0] sm:$0xff]  ;;  %v1934_v46 = vld [vmem:[%s6783_s7 + $0x2dd8] sm:$0xff] }
 0x746   : > { %5369 = vmatprep.subr.mxu0 %v2216_v2  ;;  %5476 = vmatprep.subr.mxu1 %v2218_v35  ;;  %v6349_v2 = vld [vmem:[#allocation2 + $0x2a8] sm:$0xff]  ;;  %v1931_v35 = vld [vmem:[%s6783_s7 + $0x2dc0] sm:$0xff] }
 0x749   : > { %5370 = vmatpush2.xpose.msra.mxu0 %v2215_v45  ;;  %5477 = vmatpush2.xpose.msra.mxu1 %v2217_v7  ;;  %v1933_v45 = vld [vmem:[%s6783_s7 + $0x2dd0] sm:$0xff]  ;;  %v6350_v7 = vld [vmem:[#allocation2 + $0x2b8] sm:$0xff] }
 0x74a   : > { %5371 = vmatprep.subr.mxu0 %v2184_v27  ;;  %5478 = vmatprep.subr.mxu1 %v2186_v17  ;;  %v1900_v27 = vld [vmem:[%s6783_s7 + $0x2cc8] sm:$0xff]  ;;  %v6351_v17 = vld [vmem:[#allocation2 + $0x2a0] sm:$0xff] }
 0x74d   : > { %5372 = vmatpush2.xpose.msra.mxu0 %v2183_v23  ;;  %5479 = vmatpush2.xpose.msra.mxu1 %v2185_v15  ;;  %v6352_v23 = vld [vmem:[#allocation2 + $0x2b0] sm:$0xff]  ;;  %v1902_v15 = vld [vmem:[%s6783_s7 + $0x2cd8] sm:$0xff] }
 0x74e   : > { %5373 = vmatprep.subr.mxu0 %v2152_v55  ;;  %5480 = vmatprep.subr.mxu1 %v2154_v19  ;;  %v6353_v55 = vld [vmem:[#allocation2 + $0x3a8] sm:$0xff]  ;;  %v1899_v19 = vld [vmem:[%s6783_s7 + $0x2cc0] sm:$0xff] }
 0x751   : > { %5374 = vmatpush2.xpose.msra.mxu0 %v2151_v38  ;;  %5481 = vmatpush2.xpose.msra.mxu1 %v2153_v22  ;;  %v1901_v38 = vld [vmem:[%s6783_s7 + $0x2cd0] sm:$0xff]  ;;  %v6354_v22 = vld [vmem:[#allocation2 + $0x3b8] sm:$0xff] }
 0x752   : > { %5375 = vmatprep.subr.mxu0 %v2120_v43  ;;  %5482 = vmatprep.subr.mxu1 %v2122_v0  ;;  %v1868_v43 = vld [vmem:[%s6783_s7 + $0x2bc8] sm:$0xff]  ;;  %v6355_v0 = vld [vmem:[#allocation2 + $0x3a0] sm:$0xff] }
 0x755   : > { %5376 = vmatpush2.xpose.msra.mxu0 %v2119_v11  ;;  %5483 = vmatpush2.xpose.msra.mxu1 %v2121_v31  ;;  %v6356_v11 = vld [vmem:[#allocation2 + $0x3b0] sm:$0xff]  ;;  %v1870_v31 = vld [vmem:[%s6783_s7 + $0x2bd8] sm:$0xff] }
 0x756   : > { %5377 = vmatprep.subr.mxu0 %v2088_v40  ;;  %5484 = vmatprep.subr.mxu1 %v2090_v57  ;;  %v6357_v40 = vld [vmem:[#allocation2 + $0x4a8] sm:$0xff]  ;;  %v1867_v57 = vld [vmem:[%s6783_s7 + $0x2bc0] sm:$0xff] }
 0x759   : > { %5378 = vmatpush2.xpose.msra.mxu0 %v2087_v63  ;;  %5485 = vmatpush2.xpose.msra.mxu1 %v2089_v52  ;;  %v1869_v63 = vld [vmem:[%s6783_s7 + $0x2bd0] sm:$0xff]  ;;  %v6358_v52 = vld [vmem:[#allocation2 + $0x4b8] sm:$0xff] }
 0x75a   : > { %5379 = vmatprep.subr.mxu0 %v2056_v58  ;;  %5486 = vmatprep.subr.mxu1 %v2058_v12  ;;  %v1836_v58 = vld [vmem:[%s6783_s7 + $0x2ac8] sm:$0xff]  ;;  %v6359_v12 = vld [vmem:[#allocation2 + $0x4a0] sm:$0xff] }
 0x75d   : > { %5380 = vmatpush2.xpose.msra.mxu0 %v2055_v14  ;;  %5487 = vmatpush2.xpose.msra.mxu1 %v2057_v8  ;;  %v6360_v14 = vld [vmem:[#allocation2 + $0x4b0] sm:$0xff]  ;;  %v1838_v8 = vld [vmem:[%s6783_s7 + $0x2ad8] sm:$0xff] }
 0x75e   : > { %5381 = vmatprep.subr.mxu0 %v2024_v54  ;;  %5488 = vmatprep.subr.mxu1 %v2026_v42  ;;  %v6361_v54 = vld [vmem:[#allocation2 + $0x5a8] sm:$0xff]  ;;  %v1835_v42 = vld [vmem:[%s6783_s7 + $0x2ac0] sm:$0xff] }
 0x761   : > { %5382 = vmatpush2.xpose.msra.mxu0 %v2023_v21  ;;  %5489 = vmatpush2.xpose.msra.mxu1 %v2025_v26  ;;  %v1837_v21 = vld [vmem:[%s6783_s7 + $0x2ad0] sm:$0xff]  ;;  %v6362_v26 = vld [vmem:[#allocation2 + $0x5b8] sm:$0xff] }
 0x762   : > { %5533 = vmatprep.subr.mxu0 %v1996_v3  ;;  %5640 = vmatprep.subr.mxu1 %v1998_v61  ;;  %v1804_v3 = vld [vmem:[%s6783_s7 + $0x29c8] sm:$0xff]  ;;  %v6363_v61 = vld [vmem:[#allocation2 + $0x5a0] sm:$0xff] }
 0x764   : > { %5384 = vmatmul.mubr.f32.vlgmr.msra.gmra.mxu0 %v6343_v39  ;;  %5491 = vmatmul.mubr.f32.vlgmr.msra.gmra.mxu1 %v6344_v6  ;;  %v1803_v39 = vld [vmem:[%s6783_s7 + $0x29c0] sm:$0xff]  ;;  %v1805_v6 = vld [vmem:[%s6783_s7 + $0x29d0] sm:$0xff] }
 0x765   : > { %5534 = vmatpush1.xpose.msra.mxu0 %v1995_v33  ;;  %5641 = vmatpush1.xpose.msra.mxu1 %v1997_v25  ;;  %v6364_v33 = vld [vmem:[#allocation2 + $0x5b0] sm:$0xff]  ;;  %v1806_v25 = vld [vmem:[%s6783_s7 + $0x29d8] sm:$0xff] }
 0x766   : > { %5389 = vmatprep.mubr.f32.mxu0 %v6345_v1  ;;  %5535 = vmatprep.subr.mxu0 %v1964_v10  ;;  %v6365_v10 = vld [vmem:[#allocation2 + $0x6a8] sm:$0xff] }
 0x767   : > { %5642 = vmatprep.subr.mxu1 %v1966_v51  ;;  %5496 = vmatprep.mubr.f32.mxu1 %v6346_v49  ;;  %v6366_v51 = vld [vmem:[#allocation2 + $0x6b8] sm:$0xff]  ;;  %v1772_v1 = vld [vmem:[%s6783_s7 + $0x28c8] sm:$0xff]  ;;  %v6368_v49 = vld [vmem:[#allocation2 + $0x6b0] sm:$0xff] }
 0x768   : > { %5390 = vmatmul.mubr.f32.gmra.mxu0 %v6347_v9  ;;  %5497 = vmatmul.mubr.f32.gmra.mxu1 %v6348_v30  ;;  %v1773_v9 = vld [vmem:[%s6783_s7 + $0x28d0] sm:$0xff]  ;;  %v1740_v30 = vld [vmem:[%s6783_s7 + $0x27c8] sm:$0xff] }
 0x769   : > { %5536 = vmatpush1.xpose.msra.mxu0 %v1963_v29  ;;  %5643 = vmatpush1.xpose.msra.mxu1 %v1965_v50  ;;  %v1774_v29 = vld [vmem:[%s6783_s7 + $0x28d8] sm:$0xff]  ;;  %v6367_v50 = vld [vmem:[#allocation2 + $0x6a0] sm:$0xff] }
 0x76a   : > { %5395 = vmatprep.mubr.f32.mxu0 %v6349_v2  ;;  %5537 = vmatprep.subr.mxu0 %v1932_v60  ;;  %v1771_v60 = vld [vmem:[%s6783_s7 + $0x28c0] sm:$0xff]  ;;  %v6369_v2 = vld [vmem:[#allocation2 + $0xc8] sm:$0xff] }
 0x76b   : > { %5644 = vmatprep.subr.mxu1 %v1934_v46  ;;  %5502 = vmatprep.mubr.f32.mxu1 %v6350_v7  ;;  %v1742_v46 = vld [vmem:[%s6783_s7 + $0x27d8] sm:$0xff]  ;;  %v1741_v7 = vld [vmem:[%s6783_s7 + $0x27d0] sm:$0xff] }
 0x76c   : > { %5396 = vmatmul.mubr.f32.gmra.mxu0 %v6351_v17  ;;  %5503 = vmatmul.mubr.f32.gmra.mxu1 %v6352_v23  ;;  %v1710_v17 = vld [vmem:[%s6783_s7 + $0x26d8] sm:$0xff]  ;;  %v1707_v23 = vld [vmem:[%s6783_s7 + $0x26c0] sm:$0xff] }
 0x76d   : > { %5538 = vmatpush1.xpose.msra.mxu0 %v1931_v35  ;;  %5645 = vmatpush1.xpose.msra.mxu1 %v1933_v45  ;;  %v6370_v35 = vld [vmem:[#allocation2 + $0xd8] sm:$0xff]  ;;  %v1739_v45 = vld [vmem:[%s6783_s7 + $0x27c0] sm:$0xff] }
 0x76e   : > { %5401 = vmatprep.mubr.f32.mxu0 %v6353_v55  ;;  %5539 = vmatprep.subr.mxu0 %v1900_v27  ;;  %v1708_v27 = vld [vmem:[%s6783_s7 + $0x26c8] sm:$0xff] }
 0x76f   : > { %5646 = vmatprep.subr.mxu1 %v1902_v15  ;;  %5508 = vmatprep.mubr.f32.mxu1 %v6354_v22  ;;  %v1709_v15 = vld [vmem:[%s6783_s7 + $0x26d0] sm:$0xff]  ;;  %v1676_v55 = vld [vmem:[%s6783_s7 + $0x25c8] sm:$0xff] }
 0x770   : > { %5402 = vmatmul.mubr.f32.gmra.mxu0 %v6355_v0  ;;  %5509 = vmatmul.mubr.f32.gmra.mxu1 %v6356_v11  ;;  %v1677_v22 = vld [vmem:[%s6783_s7 + $0x25d0] sm:$0xff]  ;;  %v1646_v0 = vld [vmem:[%s6783_s7 + $0x24d8] sm:$0xff]  ;;  %v1643_v11 = vld [vmem:[%s6783_s7 + $0x24c0] sm:$0xff] }
 0x771   : > { %5540 = vmatpush1.xpose.msra.mxu0 %v1899_v19  ;;  %5647 = vmatpush1.xpose.msra.mxu1 %v1901_v38  ;;  %v1678_v19 = vld [vmem:[%s6783_s7 + $0x25d8] sm:$0xff]  ;;  %v1675_v38 = vld [vmem:[%s6783_s7 + $0x25c0] sm:$0xff] }
 0x772   : > { %5407 = vmatprep.mubr.f32.mxu0 %v6357_v40  ;;  %5541 = vmatprep.subr.mxu0 %v1868_v43  ;;  %v1644_v43 = vld [vmem:[%s6783_s7 + $0x24c8] sm:$0xff] }
 0x773   : > { %5648 = vmatprep.subr.mxu1 %v1870_v31  ;;  %5514 = vmatprep.mubr.f32.mxu1 %v6358_v52  ;;  %v1645_v31 = vld [vmem:[%s6783_s7 + $0x24d0] sm:$0xff]  ;;  %v1612_v40 = vld [vmem:[%s6783_s7 + $0x23c8] sm:$0xff] }
 0x774   : > { %5408 = vmatmul.mubr.f32.gmra.mxu0 %v6359_v12  ;;  %5515 = vmatmul.mubr.f32.gmra.mxu1 %v6360_v14  ;;  %v1613_v52 = vld [vmem:[%s6783_s7 + $0x23d0] sm:$0xff]  ;;  %v1582_v12 = vld [vmem:[%s6783_s7 + $0x22d8] sm:$0xff]  ;;  %v1579_v14 = vld [vmem:[%s6783_s7 + $0x22c0] sm:$0xff] }
 0x775   : > { %5542 = vmatpush1.xpose.msra.mxu0 %v1867_v57  ;;  %5649 = vmatpush1.xpose.msra.mxu1 %v1869_v63  ;;  %v1614_v57 = vld [vmem:[%s6783_s7 + $0x23d8] sm:$0xff]  ;;  %v1611_v63 = vld [vmem:[%s6783_s7 + $0x23c0] sm:$0xff] }
 0x776   : > { %5413 = vmatprep.mubr.f32.mxu0 %v6361_v54  ;;  %5543 = vmatprep.subr.mxu0 %v1836_v58  ;;  %v1580_v58 = vld [vmem:[%s6783_s7 + $0x22c8] sm:$0xff] }
 0x777   : > { %5650 = vmatprep.subr.mxu1 %v1838_v8  ;;  %5520 = vmatprep.mubr.f32.mxu1 %v6362_v26  ;;  %v1581_v8 = vld [vmem:[%s6783_s7 + $0x22d0] sm:$0xff]  ;;  %v1548_v54 = vld [vmem:[%s6783_s7 + $0x21c8] sm:$0xff] }
 0x778   : > { %5414 = vmatmul.mubr.f32.gmra.mxu0 %v6363_v61  ;;  %5521 = vmatmul.mubr.f32.gmra.mxu1 %v6364_v33  ;;  %v1549_v26 = vld [vmem:[%s6783_s7 + $0x21d0] sm:$0xff]  ;;  %v1518_v61 = vld [vmem:[%s6783_s7 + $0x20d8] sm:$0xff]  ;;  %v1515_v33 = vld [vmem:[%s6783_s7 + $0x20c0] sm:$0xff] }
 0x779   : > { %5544 = vmatpush1.xpose.msra.mxu0 %v1835_v42  ;;  %5651 = vmatpush1.xpose.msra.mxu1 %v1837_v21  ;;  %v1550_v42 = vld [vmem:[%s6783_s7 + $0x21d8] sm:$0xff]  ;;  %v1547_v21 = vld [vmem:[%s6783_s7 + $0x21c0] sm:$0xff] }
 0x77a   : > { %5419 = vmatprep.mubr.f32.mxu0 %v6365_v10  ;;  %5545 = vmatprep.subr.mxu0 %v1804_v3  ;;  %v1516_v3 = vld [vmem:[%s6783_s7 + $0x20c8] sm:$0xff] }
 0x77b   : > { %5652 = vmatprep.subr.mxu1 %v1806_v25  ;;  %5526 = vmatprep.mubr.f32.mxu1 %v6366_v51  ;;  %v1517_v25 = vld [vmem:[%s6783_s7 + $0x20d0] sm:$0xff]  ;;  %v2508_v10 = vld [vmem:[%s6783_s7 + $0x3fc8] sm:$0xff]  ;;  %v9353_v51 = vpop.f32.mrf.mxu1 }
 0x77c   : > { %5420 = vmatmul.mubr.f32.gmra.mxu0 %v6367_v50  ;;  %5527 = vmatmul.mubr.f32.gmra.mxu1 %v6368_v49  ;;  %v2476_v50 = vld [vmem:[%s6783_s7 + $0x3ec8] sm:$0xff]  ;;  %v2478_v49 = vld [vmem:[%s6783_s7 + $0x3ed8] sm:$0xff] }
 0x77d   : > { %5546 = vmatpush1.xpose.msra.mxu0 %v1803_v39  ;;  %5653 = vmatpush1.xpose.msra.mxu1 %v1805_v6  ;;  %v2510_v39 = vld [vmem:[%s6783_s7 + $0x3fd8] sm:$0xff]  ;;  %v9351_v6 = vpop.f32.mrf.mxu0 }
 0x77e   : > { %5547 = vmatprep.subr.mxu0 %v1772_v1  ;;  %5654 = vmatprep.subr.mxu1 %v1774_v29  ;;  %v2507_v1 = vld [vmem:[%s6783_s7 + $0x3fc0] sm:$0xff]  ;;  %v2509_v29 = vld [vmem:[%s6783_s7 + $0x3fd0] sm:$0xff] }
 0x77f   : > { %5597 = vmatprep.mubr.f32.mxu0 %v6369_v2  ;;  %5704 = vmatprep.mubr.f32.mxu1 %v6370_v35  ;;  %v2475_v35 = vld [vmem:[%s6783_s7 + $0x3ec0] sm:$0xff] }
 0x781   : > { %5548 = vmatpush1.xpose.msra.mxu0 %v1771_v60  ;;  %5655 = vmatpush1.xpose.msra.mxu1 %v1773_v9 }
 0x782   : > { %5549 = vmatprep.subr.mxu0 %v1740_v30  ;;  %5656 = vmatprep.subr.mxu1 %v1742_v46 }
 0x785   : > { %5550 = vmatpush1.xpose.msra.mxu0 %v1739_v45  ;;  %5657 = vmatpush1.xpose.msra.mxu1 %v1741_v7  ;;  %v2477_v45 = vld [vmem:[%s6783_s7 + $0x3ed0] sm:$0xff] }
 0x786   : > { %5551 = vmatprep.subr.mxu0 %v1708_v27  ;;  %5658 = vmatprep.subr.mxu1 %v1710_v17  ;;  %v2444_v17 = vld [vmem:[%s6783_s7 + $0x3dc8] sm:$0xff] }
 0x789   : > { %5552 = vmatpush1.xpose.msra.mxu0 %v1707_v23  ;;  %5659 = vmatpush1.xpose.msra.mxu1 %v1709_v15  ;;  %v2446_v23 = vld [vmem:[%s6783_s7 + $0x3dd8] sm:$0xff] }
 0x78a   : > { %5553 = vmatprep.subr.mxu0 %v1676_v55  ;;  %5660 = vmatprep.subr.mxu1 %v1678_v19 }
 0x78d   : > { %5554 = vmatpush1.xpose.msra.mxu0 %v1675_v38  ;;  %5661 = vmatpush1.xpose.msra.mxu1 %v1677_v22 }
 0x78e   : > { %5555 = vmatprep.subr.mxu0 %v1644_v43  ;;  %5662 = vmatprep.subr.mxu1 %v1646_v0  ;;  %v2443_v43 = vld [vmem:[%s6783_s7 + $0x3dc0] sm:$0xff]  ;;  %v2445_v0 = vld [vmem:[%s6783_s7 + $0x3dd0] sm:$0xff] }
 0x791   : > { %5556 = vmatpush1.xpose.msra.mxu0 %v1643_v11  ;;  %5663 = vmatpush1.xpose.msra.mxu1 %v1645_v31  ;;  %v2412_v31 = vld [vmem:[%s6783_s7 + $0x3cc8] sm:$0xff] }
 0x792   : > { %5557 = vmatprep.subr.mxu0 %v1612_v40  ;;  %5664 = vmatprep.subr.mxu1 %v1614_v57  ;;  %v2414_v40 = vld [vmem:[%s6783_s7 + $0x3cd8] sm:$0xff] }
 0x795   : > { %5558 = vmatpush1.xpose.msra.mxu0 %v1611_v63  ;;  %5665 = vmatpush1.xpose.msra.mxu1 %v1613_v52 }
 0x796   : > { %5559 = vmatprep.subr.mxu0 %v1580_v58  ;;  %5666 = vmatprep.subr.mxu1 %v1582_v12 }
 0x799   : > { %5560 = vmatpush1.xpose.msra.mxu0 %v1579_v14  ;;  %5667 = vmatpush1.xpose.msra.mxu1 %v1581_v8  ;;  %v2411_v14 = vld [vmem:[%s6783_s7 + $0x3cc0] sm:$0xff] }
 0x79a   : > { %5561 = vmatprep.subr.mxu0 %v1548_v54  ;;  %5668 = vmatprep.subr.mxu1 %v1550_v42  ;;  %v2380_v42 = vld [vmem:[%s6783_s7 + $0x3bc8] sm:$0xff] }
 0x79d   : > { %5562 = vmatpush1.xpose.msra.mxu0 %v1547_v21  ;;  %5669 = vmatpush1.xpose.msra.mxu1 %v1549_v26  ;;  %v2382_v21 = vld [vmem:[%s6783_s7 + $0x3bd8] sm:$0xff] }
 0x79e   : > { %5563 = vmatprep.subr.mxu0 %v1516_v3  ;;  %5670 = vmatprep.subr.mxu1 %v1518_v61 }
 0x7a1   : > { %5564 = vmatpush1.xpose.msra.mxu0 %v1515_v33  ;;  %5671 = vmatpush1.xpose.msra.mxu1 %v1517_v25 }
 0x7a2   : > { %5565 = vmatprep.subr.mxu0 %v2508_v10  ;;  %5672 = vmatprep.subr.mxu1 %v2510_v39  ;;  %v2379_v10 = vld [vmem:[%s6783_s7 + $0x3bc0] sm:$0xff] }
 0x7a4   : > { %v5171_v60 = vpop.f32.mrf.mxu0  ;;  %v5278_v9 = vpop.f32.mrf.mxu1 }
 0x7a5   : > { %v5172_v30 = vadd.f32 %v5171_v60, %v9191_v59  ;;  %5566 = vmatpush2.xpose.msra.mxu0 %v2507_v1  ;;  %5673 = vmatpush2.xpose.msra.mxu1 %v2509_v29  ;;  %v2348_v29 = vld [vmem:[%s6783_s7 + $0x3ac8] sm:$0xff] }
 0x7a6   : > { %v5173_v46 = vpop.f32.mrf.mxu0  ;;  %v5280_v2 = vpop.f32.mrf.mxu1  ;;  %5567 = vmatprep.subr.mxu0 %v2476_v50  ;;  %5674 = vmatprep.subr.mxu1 %v2478_v49  ;;  %v2350_v50 = vld [vmem:[%s6783_s7 + $0x3ad8] sm:$0xff] }
 0x7a7   : > { %v9362_v7 = vadd.f32 %v5278_v9, %v5172_v30  ;;  %v5174_v27 = vadd.f32 %v5173_v46, %v9196_v20 }
 0x7a8   : > { %v5177_v15 = vpop.f32.mrf.mxu0  ;;  %v5284_v59 = vpop.f32.mrf.mxu1 }
 0x7a9   : > { %v9367_v55 = vadd.f32 %v5280_v2, %v5174_v27  ;;  %v5178_v19 = vadd.f32 %v5177_v15, %v9202_v5  ;;  %5568 = vmatpush2.xpose.msra.mxu0 %v2475_v35  ;;  %5675 = vmatpush2.xpose.msra.mxu1 %v2477_v45  ;;  %v2347_v2 = vld [vmem:[%s6783_s7 + $0x3ac0] sm:$0xff]  ;;  %v2316_v27 = vld [vmem:[%s6783_s7 + $0x39c8] sm:$0xff] }
 0x7aa   : > { %v5179_v38 = vpop.f32.mrf.mxu0  ;;  %v5286_v22 = vpop.f32.mrf.mxu1  ;;  %5569 = vmatprep.subr.mxu0 %v2444_v17  ;;  %5676 = vmatprep.subr.mxu1 %v2446_v23  ;;  %v2318_v17 = vld [vmem:[%s6783_s7 + $0x39d8] sm:$0xff] }
 0x7ab   : > { %v5180_v20 = vadd.f32 %v5179_v38, %v9207_v48  ;;  %v9373_v11 = vadd.f32 %v5284_v59, %v5178_v19  ;;  %v2413_v48 = vld [vmem:[%s6783_s7 + $0x3cd0] sm:$0xff] }
 0x7ac   : > { %v5183_v57 = vpop.f32.mrf.mxu0  ;;  %v5290_v5 = vpop.f32.mrf.mxu1 }
 0x7ad   : > { %v5184_v63 = vadd.f32 %v5183_v57, %v9212_v4  ;;  %v9378_v52 = vadd.f32 %v5286_v22, %v5180_v20  ;;  %5570 = vmatpush2.xpose.msra.mxu0 %v2443_v43  ;;  %5677 = vmatpush2.xpose.msra.mxu1 %v2445_v0  ;;  %v2317_v22 = vld [vmem:[%s6783_s7 + $0x39d0] sm:$0xff]  ;;  %v2284_v20 = vld [vmem:[%s6783_s7 + $0x38c8] sm:$0xff] }
 0x7ae   : > { %v5185_v58 = vpop.f32.mrf.mxu0  ;;  %v5292_v12 = vpop.f32.mrf.mxu1  ;;  %5571 = vmatprep.subr.mxu0 %v2412_v31  ;;  %5678 = vmatprep.subr.mxu1 %v2414_v40 }
 0x7af   : > { %v5186_v8 = vadd.f32 %v5185_v58, %v9217_v18  ;;  %v9383_v54 = vadd.f32 %v5290_v5, %v5184_v63  ;;  %v2381_v18 = vld [vmem:[%s6783_s7 + $0x3bd0] sm:$0xff] }
 0x7b0   : > { %v5189_v4 = vpop.f32.mrf.mxu0  ;;  %v5296_v26 = vpop.f32.mrf.mxu1  ;;  %v2285_v63 = vld [vmem:[%s6783_s7 + $0x38d0] sm:$0xff] }
 0x7b1   : > { %v5190_v3 = vadd.f32 %v5189_v4, %v9222_v28  ;;  %v9388_v61 = vadd.f32 %v5292_v12, %v5186_v8  ;;  %5572 = vmatpush2.xpose.msra.mxu0 %v2411_v14  ;;  %5679 = vmatpush2.xpose.msra.mxu1 %v2413_v48  ;;  %v2252_v12 = vld [vmem:[%s6783_s7 + $0x37c8] sm:$0xff]  ;;  %v2254_v14 = vld [vmem:[%s6783_s7 + $0x37d8] sm:$0xff]  ;;  %v2253_v48 = vld [vmem:[%s6783_s7 + $0x37d0] sm:$0xff] }
 0x7b2   : > { %v5191_v33 = vpop.f32.mrf.mxu0  ;;  %v5298_v25 = vpop.f32.mrf.mxu1  ;;  %5573 = vmatprep.subr.mxu0 %v2380_v42  ;;  %5680 = vmatprep.subr.mxu1 %v2382_v21  ;;  %v2220_v8 = vld [vmem:[%s6783_s7 + $0x36c8] sm:$0xff]  ;;  %v2222_v42 = vld [vmem:[%s6783_s7 + $0x36d8] sm:$0xff]  ;;  %v2219_v21 = vld [vmem:[%s6783_s7 + $0x36c0] sm:$0xff] }
 0x7b3   : > { %v5192_v39 = vadd.f32 %v5191_v33, %v9227_v53  ;;  %v9393_v1 = vadd.f32 %v5296_v26, %v5190_v3  ;;  %v2349_v53 = vld [vmem:[%s6783_s7 + $0x3ad0] sm:$0xff]  ;;  %v2188_v26 = vld [vmem:[%s6783_s7 + $0x35c8] sm:$0xff]  ;;  %v2190_v3 = vld [vmem:[%s6783_s7 + $0x35d8] sm:$0xff] }
 0x7b4   : > { %v5195_v28 = vpop.f32.mrf.mxu0  ;;  %v5302_v49 = vpop.f32.mrf.mxu1  ;;  %v2221_v4 = vld [vmem:[%s6783_s7 + $0x36d0] sm:$0xff]  ;;  %v2187_v33 = vld [vmem:[%s6783_s7 + $0x35c0] sm:$0xff] }
 0x7b5   : > { %v5196_v60 = vadd.f32 %v5195_v28, %v9232_v41  ;;  %v9398_v9 = vadd.f32 %v5298_v25, %v5192_v39  ;;  %5574 = vmatpush2.xpose.msra.mxu0 %v2379_v10  ;;  %5681 = vmatpush2.xpose.msra.mxu1 %v2381_v18  ;;  %v2189_v25 = vld [vmem:[%s6783_s7 + $0x35d0] sm:$0xff]  ;;  %v2156_v10 = vld [vmem:[%s6783_s7 + $0x34c8] sm:$0xff]  ;;  %v2158_v18 = vld [vmem:[%s6783_s7 + $0x34d8] sm:$0xff] }
 0x7b6   : > { %v5197_v30 = vpop.f32.mrf.mxu0  ;;  %v5304_v46 = vpop.f32.mrf.mxu1  ;;  %5575 = vmatprep.subr.mxu0 %v2348_v29  ;;  %5682 = vmatprep.subr.mxu1 %v2350_v50  ;;  %v2155_v39 = vld [vmem:[%s6783_s7 + $0x34c0] sm:$0xff]  ;;  %v2157_v29 = vld [vmem:[%s6783_s7 + $0x34d0] sm:$0xff]  ;;  %v2124_v50 = vld [vmem:[%s6783_s7 + $0x33c8] sm:$0xff] }
 0x7b7   : > { %v5198_v35 = vadd.f32 %v5197_v30, %v9237_v47  ;;  %v9403_v45 = vadd.f32 %v5302_v49, %v5196_v60  ;;  %v2315_v47 = vld [vmem:[%s6783_s7 + $0x39c0] sm:$0xff]  ;;  %v2126_v28 = vld [vmem:[%s6783_s7 + $0x33d8] sm:$0xff]  ;;  %v2125_v60 = vld [vmem:[%s6783_s7 + $0x33d0] sm:$0xff] }
 0x7b8   : > { %v5201_v41 = vpop.f32.mrf.mxu0  ;;  %v5308_v23 = vpop.f32.mrf.mxu1  ;;  %v2123_v49 = vld [vmem:[%s6783_s7 + $0x33c0] sm:$0xff]  ;;  %v2092_v30 = vld [vmem:[%s6783_s7 + $0x32c8] sm:$0xff] }
 0x7b9   : > { %v5202_v15 = vadd.f32 %v5201_v41, %v9242_v36  ;;  %v9408_v59 = vadd.f32 %v5304_v46, %v5198_v35  ;;  %5576 = vmatpush2.xpose.msra.mxu0 %v2347_v2  ;;  %5683 = vmatpush2.xpose.msra.mxu1 %v2349_v53  ;;  %v2286_v36 = vld [vmem:[%s6783_s7 + $0x38d8] sm:$0xff]  ;;  %v2091_v2 = vld [vmem:[%s6783_s7 + $0x32c0] sm:$0xff]  ;;  %v2093_v53 = vld [vmem:[%s6783_s7 + $0x32d0] sm:$0xff] }
 0x7ba   : > { %v5203_v19 = vpop.f32.mrf.mxu0  ;;  %v5310_v38 = vpop.f32.mrf.mxu1  ;;  %5577 = vmatprep.subr.mxu0 %v2316_v27  ;;  %5684 = vmatprep.subr.mxu1 %v2318_v17  ;;  %v2094_v46 = vld [vmem:[%s6783_s7 + $0x32d8] sm:$0xff]  ;;  %v2060_v35 = vld [vmem:[%s6783_s7 + $0x31c8] sm:$0xff]  ;;  %v2059_v17 = vld [vmem:[%s6783_s7 + $0x31c0] sm:$0xff] }
 0x7bb   : > { %v5204_v43 = vadd.f32 %v5203_v19, %v9247_v13  ;;  %v9413_v0 = vadd.f32 %v5308_v23, %v5202_v15  ;;  %v2283_v13 = vld [vmem:[%s6783_s7 + $0x38c0] sm:$0xff]  ;;  %v2062_v27 = vld [vmem:[%s6783_s7 + $0x31d8] sm:$0xff]  ;;  %v2061_v41 = vld [vmem:[%s6783_s7 + $0x31d0] sm:$0xff] }
 0x7bc   : > { %v5207_v31 = vpop.f32.mrf.mxu0  ;;  %v5314_v40 = vpop.f32.mrf.mxu1  ;;  %v2028_v23 = vld [vmem:[%s6783_s7 + $0x30c8] sm:$0xff]  ;;  %v2030_v15 = vld [vmem:[%s6783_s7 + $0x30d8] sm:$0xff]  ;;  %v2027_v19 = vld [vmem:[%s6783_s7 + $0x30c0] sm:$0xff] }
 0x7bd   : > { %v5208_v57 = vadd.f32 %v5207_v31, %v9251_v62  ;;  %v9418_v5 = vadd.f32 %v5310_v38, %v5204_v43  ;;  %5578 = vmatpush2.xpose.msra.mxu0 %v2315_v47  ;;  %5685 = vmatpush2.xpose.msra.mxu1 %v2317_v22  ;;  %v2251_v62 = vld [vmem:[%s6783_s7 + $0x37c0] sm:$0xff]  ;;  %v2029_v38 = vld [vmem:[%s6783_s7 + $0x30d0] sm:$0xff]  ;;  %v2000_v47 = vld [vmem:[%s6783_s7 + $0x2fe8] sm:$0xff] }
 0x7be   : > { %5579 = vmatprep.subr.mxu0 %v2284_v20  ;;  %5686 = vmatprep.subr.mxu1 %v2286_v36  ;;  %v2002_v22 = vld [vmem:[%s6783_s7 + $0x2ff8] sm:$0xff]  ;;  %v1999_v43 = vld [vmem:[%s6783_s7 + $0x2fe0] sm:$0xff]  ;;  %v2001_v20 = vld [vmem:[%s6783_s7 + $0x2ff0] sm:$0xff] }
 0x7bf   : > { %9941 = vst [vmem:[#allocation13_spill] sm:$0xff] %v9418_v5  ;;  %v9422_v58 = vadd.f32 %v5314_v40, %v5208_v57  ;;  %v1968_v36 = vld [vmem:[%s6783_s7 + $0x2ee8] sm:$0xff]  ;;  %v6371_v31 = vld [vmem:[#allocation2 + $0xc0] sm:$0xff]  ;;  %v6372_v40 = vld [vmem:[#allocation2 + $0xd0] sm:$0xff] }
 0x7c0   : > { %v1970_v57 = vld [vmem:[%s6783_s7 + $0x2ef8] sm:$0xff] }
 0x7c1   : > { %9942 = vst [vmem:[#allocation15_spill] sm:$0xff] %v9422_v58  ;;  %5580 = vmatpush2.xpose.msra.mxu0 %v2283_v13  ;;  %5687 = vmatpush2.xpose.msra.mxu1 %v2285_v63  ;;  %v6373_v13 = vld [vmem:[#allocation2 + $0x1c8] sm:$0xff]  ;;  %v1967_v63 = vld [vmem:[%s6783_s7 + $0x2ee0] sm:$0xff] }
 0x7c2   : > { %5581 = vmatprep.subr.mxu0 %v2252_v12  ;;  %5688 = vmatprep.subr.mxu1 %v2254_v14  ;;  %v1969_v12 = vld [vmem:[%s6783_s7 + $0x2ef0] sm:$0xff]  ;;  %v6374_v14 = vld [vmem:[#allocation2 + $0x1d8] sm:$0xff] }
 0x7c5   : > { %5582 = vmatpush2.xpose.msra.mxu0 %v2251_v62  ;;  %5689 = vmatpush2.xpose.msra.mxu1 %v2253_v48  ;;  %v1936_v62 = vld [vmem:[%s6783_s7 + $0x2de8] sm:$0xff]  ;;  %v6375_v48 = vld [vmem:[#allocation2 + $0x1c0] sm:$0xff] }
 0x7c6   : > { %5583 = vmatprep.subr.mxu0 %v2220_v8  ;;  %5690 = vmatprep.subr.mxu1 %v2222_v42  ;;  %v6376_v8 = vld [vmem:[#allocation2 + $0x1d0] sm:$0xff]  ;;  %v1938_v42 = vld [vmem:[%s6783_s7 + $0x2df8] sm:$0xff] }
 0x7c9   : > { %5584 = vmatpush2.xpose.msra.mxu0 %v2219_v21  ;;  %5691 = vmatpush2.xpose.msra.mxu1 %v2221_v4  ;;  %v6377_v21 = vld [vmem:[#allocation2 + $0x2c8] sm:$0xff]  ;;  %v1935_v4 = vld [vmem:[%s6783_s7 + $0x2de0] sm:$0xff] }
 0x7ca   : > { %5585 = vmatprep.subr.mxu0 %v2188_v26  ;;  %5692 = vmatprep.subr.mxu1 %v2190_v3  ;;  %v1937_v26 = vld [vmem:[%s6783_s7 + $0x2df0] sm:$0xff]  ;;  %v6378_v3 = vld [vmem:[#allocation2 + $0x2d8] sm:$0xff] }
 0x7cd   : > { %5586 = vmatpush2.xpose.msra.mxu0 %v2187_v33  ;;  %5693 = vmatpush2.xpose.msra.mxu1 %v2189_v25  ;;  %v1904_v33 = vld [vmem:[%s6783_s7 + $0x2ce8] sm:$0xff]  ;;  %v6379_v25 = vld [vmem:[#allocation2 + $0x2c0] sm:$0xff] }
 0x7ce   : > { %5587 = vmatprep.subr.mxu0 %v2156_v10  ;;  %5694 = vmatprep.subr.mxu1 %v2158_v18  ;;  %v6380_v10 = vld [vmem:[#allocation2 + $0x2d0] sm:$0xff]  ;;  %v1906_v18 = vld [vmem:[%s6783_s7 + $0x2cf8] sm:$0xff] }
 0x7d1   : > { %5588 = vmatpush2.xpose.msra.mxu0 %v2155_v39  ;;  %5695 = vmatpush2.xpose.msra.mxu1 %v2157_v29  ;;  %v6381_v39 = vld [vmem:[#allocation2 + $0x3c8] sm:$0xff]  ;;  %v1903_v29 = vld [vmem:[%s6783_s7 + $0x2ce0] sm:$0xff] }
 0x7d2   : > { %5589 = vmatprep.subr.mxu0 %v2124_v50  ;;  %5696 = vmatprep.subr.mxu1 %v2126_v28  ;;  %v1905_v50 = vld [vmem:[%s6783_s7 + $0x2cf0] sm:$0xff]  ;;  %v6382_v28 = vld [vmem:[#allocation2 + $0x3d8] sm:$0xff] }
 0x7d5   : > { %5590 = vmatpush2.xpose.msra.mxu0 %v2123_v49  ;;  %5697 = vmatpush2.xpose.msra.mxu1 %v2125_v60  ;;  %v1872_v49 = vld [vmem:[%s6783_s7 + $0x2be8] sm:$0xff]  ;;  %v6383_v60 = vld [vmem:[#allocation2 + $0x3c0] sm:$0xff] }
 0x7d6   : > { %5591 = vmatprep.subr.mxu0 %v2092_v30  ;;  %5698 = vmatprep.subr.mxu1 %v2094_v46  ;;  %v6384_v30 = vld [vmem:[#allocation2 + $0x3d0] sm:$0xff]  ;;  %v1874_v46 = vld [vmem:[%s6783_s7 + $0x2bf8] sm:$0xff] }
 0x7d9   : > { %5592 = vmatpush2.xpose.msra.mxu0 %v2091_v2  ;;  %5699 = vmatpush2.xpose.msra.mxu1 %v2093_v53  ;;  %v6385_v2 = vld [vmem:[#allocation2 + $0x4c8] sm:$0xff]  ;;  %v1871_v53 = vld [vmem:[%s6783_s7 + $0x2be0] sm:$0xff] }
 0x7da   : > { %5593 = vmatprep.subr.mxu0 %v2060_v35  ;;  %5700 = vmatprep.subr.mxu1 %v2062_v27  ;;  %v1873_v35 = vld [vmem:[%s6783_s7 + $0x2bf0] sm:$0xff]  ;;  %v6386_v27 = vld [vmem:[#allocation2 + $0x4d8] sm:$0xff] }
 0x7dd   : > { %5594 = vmatpush2.xpose.msra.mxu0 %v2059_v17  ;;  %5701 = vmatpush2.xpose.msra.mxu1 %v2061_v41  ;;  %v1840_v17 = vld [vmem:[%s6783_s7 + $0x2ae8] sm:$0xff]  ;;  %v6387_v41 = vld [vmem:[#allocation2 + $0x4c0] sm:$0xff] }
 0x7de   : > { %5595 = vmatprep.subr.mxu0 %v2028_v23  ;;  %5702 = vmatprep.subr.mxu1 %v2030_v15  ;;  %v6388_v23 = vld [vmem:[#allocation2 + $0x4d0] sm:$0xff]  ;;  %v1842_v15 = vld [vmem:[%s6783_s7 + $0x2af8] sm:$0xff] }
 0x7e1   : > { %5596 = vmatpush2.xpose.msra.mxu0 %v2027_v19  ;;  %5703 = vmatpush2.xpose.msra.mxu1 %v2029_v38  ;;  %v6389_v19 = vld [vmem:[#allocation2 + $0x5c8] sm:$0xff]  ;;  %v1839_v38 = vld [vmem:[%s6783_s7 + $0x2ae0] sm:$0xff] }
 0x7e2   : > { %5747 = vmatprep.subr.mxu0 %v2000_v47  ;;  %5854 = vmatprep.subr.mxu1 %v2002_v22  ;;  %v1841_v47 = vld [vmem:[%s6783_s7 + $0x2af0] sm:$0xff]  ;;  %v6390_v22 = vld [vmem:[#allocation2 + $0x5d8] sm:$0xff] }
 0x7e4   : > { %5598 = vmatmul.mubr.f32.vlgmr.msra.gmra.mxu0 %v6371_v31  ;;  %5705 = vmatmul.mubr.f32.vlgmr.msra.gmra.mxu1 %v6372_v40  ;;  %v1810_v31 = vld [vmem:[%s6783_s7 + $0x29f8] sm:$0xff]  ;;  %v6393_v40 = vld [vmem:[#allocation2 + $0x6c8] sm:$0xff] }
 0x7e5   : > { %5748 = vmatpush1.xpose.msra.mxu0 %v1999_v43  ;;  %5855 = vmatpush1.xpose.msra.mxu1 %v2001_v20  ;;  %v1808_v43 = vld [vmem:[%s6783_s7 + $0x29e8] sm:$0xff]  ;;  %v6391_v20 = vld [vmem:[#allocation2 + $0x5c0] sm:$0xff] }
 0x7e6   : > { %5603 = vmatprep.mubr.f32.mxu0 %v6373_v13  ;;  %5749 = vmatprep.subr.mxu0 %v1968_v36  ;;  %v6392_v36 = vld [vmem:[#allocation2 + $0x5d0] sm:$0xff] }
 0x7e7   : > { %5856 = vmatprep.subr.mxu1 %v1970_v57  ;;  %5710 = vmatprep.mubr.f32.mxu1 %v6374_v14  ;;  %v1807_v57 = vld [vmem:[%s6783_s7 + $0x29e0] sm:$0xff]  ;;  %v1809_v13 = vld [vmem:[%s6783_s7 + $0x29f0] sm:$0xff]  ;;  %v1778_v14 = vld [vmem:[%s6783_s7 + $0x28f8] sm:$0xff] }
 0x7e8   : > { %5604 = vmatmul.mubr.f32.gmra.mxu0 %v6375_v48  ;;  %5711 = vmatmul.mubr.f32.gmra.mxu1 %v6376_v8  ;;  %v6396_v48 = vld [vmem:[#allocation2 + $0x6d0] sm:$0xff]  ;;  %v1775_v8 = vld [vmem:[%s6783_s7 + $0x28e0] sm:$0xff] }
 0x7e9   : > { %5750 = vmatpush1.xpose.msra.mxu0 %v1967_v63  ;;  %5857 = vmatpush1.xpose.msra.mxu1 %v1969_v12  ;;  %v6394_v63 = vld [vmem:[#allocation2 + $0x6d8] sm:$0xff]  ;;  %v1776_v12 = vld [vmem:[%s6783_s7 + $0x28e8] sm:$0xff] }
 0x7ea   : > { %5609 = vmatprep.mubr.f32.mxu0 %v6377_v21  ;;  %5751 = vmatprep.subr.mxu0 %v1936_v62  ;;  %v6395_v62 = vld [vmem:[#allocation2 + $0x6c0] sm:$0xff]  ;;  %v1744_v21 = vld [vmem:[%s6783_s7 + $0x27e8] sm:$0xff] }
 0x7eb   : > { %5858 = vmatprep.subr.mxu1 %v1938_v42  ;;  %5716 = vmatprep.mubr.f32.mxu1 %v6378_v3  ;;  %v1777_v42 = vld [vmem:[%s6783_s7 + $0x28f0] sm:$0xff]  ;;  %v6398_v3 = vld [vmem:[#allocation2 + $0xf8] sm:$0xff] }
 0x7ec   : > { %5610 = vmatmul.mubr.f32.gmra.mxu0 %v6379_v25  ;;  %5717 = vmatmul.mubr.f32.gmra.mxu1 %v6380_v10  ;;  %v1745_v25 = vld [vmem:[%s6783_s7 + $0x27f0] sm:$0xff]  ;;  %v1712_v10 = vld [vmem:[%s6783_s7 + $0x26e8] sm:$0xff] }
 0x7ed   : > { %5752 = vmatpush1.xpose.msra.mxu0 %v1935_v4  ;;  %5859 = vmatpush1.xpose.msra.mxu1 %v1937_v26  ;;  %v1746_v4 = vld [vmem:[%s6783_s7 + $0x27f8] sm:$0xff]  ;;  %v6397_v26 = vld [vmem:[#allocation2 + $0xe8] sm:$0xff] }
 0x7ee   : > { %5615 = vmatprep.mubr.f32.mxu0 %v6381_v39  ;;  %5753 = vmatprep.subr.mxu0 %v1904_v33  ;;  %v1743_v33 = vld [vmem:[%s6783_s7 + $0x27e0] sm:$0xff] }
 0x7ef   : > { %5860 = vmatprep.subr.mxu1 %v1906_v18  ;;  %5722 = vmatprep.mubr.f32.mxu1 %v6382_v28  ;;  %v1714_v18 = vld [vmem:[%s6783_s7 + $0x26f8] sm:$0xff]  ;;  %v1711_v39 = vld [vmem:[%s6783_s7 + $0x26e0] sm:$0xff] }
 0x7f0   : > { %5616 = vmatmul.mubr.f32.gmra.mxu0 %v6383_v60  ;;  %5723 = vmatmul.mubr.f32.gmra.mxu1 %v6384_v30  ;;  %v1682_v28 = vld [vmem:[%s6783_s7 + $0x25f8] sm:$0xff]  ;;  %v1681_v60 = vld [vmem:[%s6783_s7 + $0x25f0] sm:$0xff]  ;;  %v1648_v30 = vld [vmem:[%s6783_s7 + $0x24e8] sm:$0xff] }
 0x7f1   : > { %5754 = vmatpush1.xpose.msra.mxu0 %v1903_v29  ;;  %5861 = vmatpush1.xpose.msra.mxu1 %v1905_v50  ;;  %v1713_v29 = vld [vmem:[%s6783_s7 + $0x26f0] sm:$0xff]  ;;  %v1680_v50 = vld [vmem:[%s6783_s7 + $0x25e8] sm:$0xff] }
 0x7f2   : > { %5621 = vmatprep.mubr.f32.mxu0 %v6385_v2  ;;  %5755 = vmatprep.subr.mxu0 %v1872_v49  ;;  %v1679_v49 = vld [vmem:[%s6783_s7 + $0x25e0] sm:$0xff] }
 0x7f3   : > { %5862 = vmatprep.subr.mxu1 %v1874_v46  ;;  %5728 = vmatprep.mubr.f32.mxu1 %v6386_v27  ;;  %v1650_v46 = vld [vmem:[%s6783_s7 + $0x24f8] sm:$0xff]  ;;  %v1647_v2 = vld [vmem:[%s6783_s7 + $0x24e0] sm:$0xff] }
 0x7f4   : > { %5622 = vmatmul.mubr.f32.gmra.mxu0 %v6387_v41  ;;  %5729 = vmatmul.mubr.f32.gmra.mxu1 %v6388_v23  ;;  %v1618_v27 = vld [vmem:[%s6783_s7 + $0x23f8] sm:$0xff]  ;;  %v1617_v41 = vld [vmem:[%s6783_s7 + $0x23f0] sm:$0xff]  ;;  %v1584_v23 = vld [vmem:[%s6783_s7 + $0x22e8] sm:$0xff] }
 0x7f5   : > { %5756 = vmatpush1.xpose.msra.mxu0 %v1871_v53  ;;  %5863 = vmatpush1.xpose.msra.mxu1 %v1873_v35  ;;  %v1649_v53 = vld [vmem:[%s6783_s7 + $0x24f0] sm:$0xff]  ;;  %v1616_v35 = vld [vmem:[%s6783_s7 + $0x23e8] sm:$0xff] }
 0x7f6   : > { %5627 = vmatprep.mubr.f32.mxu0 %v6389_v19  ;;  %5757 = vmatprep.subr.mxu0 %v1840_v17  ;;  %v1615_v17 = vld [vmem:[%s6783_s7 + $0x23e0] sm:$0xff] }
 0x7f7   : > { %5864 = vmatprep.subr.mxu1 %v1842_v15  ;;  %5734 = vmatprep.mubr.f32.mxu1 %v6390_v22  ;;  %v1586_v15 = vld [vmem:[%s6783_s7 + $0x22f8] sm:$0xff]  ;;  %v1583_v19 = vld [vmem:[%s6783_s7 + $0x22e0] sm:$0xff] }
 0x7f8   : > { %5628 = vmatmul.mubr.f32.gmra.mxu0 %v6391_v20  ;;  %5735 = vmatmul.mubr.f32.gmra.mxu1 %v6392_v36  ;;  %v1554_v22 = vld [vmem:[%s6783_s7 + $0x21f8] sm:$0xff]  ;;  %v1553_v20 = vld [vmem:[%s6783_s7 + $0x21f0] sm:$0xff]  ;;  %v1520_v36 = vld [vmem:[%s6783_s7 + $0x20e8] sm:$0xff] }
 0x7f9   : > { %5758 = vmatpush1.xpose.msra.mxu0 %v1839_v38  ;;  %5865 = vmatpush1.xpose.msra.mxu1 %v1841_v47  ;;  %v1585_v38 = vld [vmem:[%s6783_s7 + $0x22f0] sm:$0xff]  ;;  %v1552_v47 = vld [vmem:[%s6783_s7 + $0x21e8] sm:$0xff] }
 0x7fa   : > { %5633 = vmatprep.mubr.f32.mxu0 %v6393_v40  ;;  %5759 = vmatprep.subr.mxu0 %v1808_v43  ;;  %v1551_v43 = vld [vmem:[%s6783_s7 + $0x21e0] sm:$0xff] }
 0x7fb   : > { %5866 = vmatprep.subr.mxu1 %v1810_v31  ;;  %5740 = vmatprep.mubr.f32.mxu1 %v6394_v63  ;;  %v1522_v31 = vld [vmem:[%s6783_s7 + $0x20f8] sm:$0xff]  ;;  %v1519_v40 = vld [vmem:[%s6783_s7 + $0x20e0] sm:$0xff] }
 0x7fc   : > { %5634 = vmatmul.mubr.f32.gmra.mxu0 %v6395_v62  ;;  %5741 = vmatmul.mubr.f32.gmra.mxu1 %v6396_v48  ;;  %v2514_v63 = vld [vmem:[%s6783_s7 + $0x3ff8] sm:$0xff]  ;;  %v2480_v62 = vld [vmem:[%s6783_s7 + $0x3ee8] sm:$0xff] }
 0x7fd   : > { %5760 = vmatpush1.xpose.msra.mxu0 %v1807_v57  ;;  %5867 = vmatpush1.xpose.msra.mxu1 %v1809_v13  ;;  %v1521_v57 = vld [vmem:[%s6783_s7 + $0x20f0] sm:$0xff]  ;;  %v2512_v13 = vld [vmem:[%s6783_s7 + $0x3fe8] sm:$0xff]  ;;  %v2482_v48 = vld [vmem:[%s6783_s7 + $0x3ef8] sm:$0xff] }
 0x7fe   : > { %5761 = vmatprep.subr.mxu0 %v1776_v12  ;;  %5868 = vmatprep.subr.mxu1 %v1778_v14  ;;  %v2511_v12 = vld [vmem:[%s6783_s7 + $0x3fe0] sm:$0xff]  ;;  %v2513_v14 = vld [vmem:[%s6783_s7 + $0x3ff0] sm:$0xff] }
 0x7ff   : > { %5811 = vmatprep.mubr.f32.mxu0 %v6397_v26  ;;  %5918 = vmatprep.mubr.f32.mxu1 %v6398_v3  ;;  %v2447_v26 = vld [vmem:[%s6783_s7 + $0x3de0] sm:$0xff]  ;;  %v2449_v3 = vld [vmem:[%s6783_s7 + $0x3df0] sm:$0xff] }
 0x801   : > { %5762 = vmatpush1.xpose.msra.mxu0 %v1775_v8  ;;  %5869 = vmatpush1.xpose.msra.mxu1 %v1777_v42  ;;  %v2479_v8 = vld [vmem:[%s6783_s7 + $0x3ee0] sm:$0xff]  ;;  %v2481_v42 = vld [vmem:[%s6783_s7 + $0x3ef0] sm:$0xff] }
 0x802   : > { %5763 = vmatprep.subr.mxu0 %v1744_v21  ;;  %5870 = vmatprep.subr.mxu1 %v1746_v4  ;;  %v2448_v21 = vld [vmem:[%s6783_s7 + $0x3de8] sm:$0xff]  ;;  %v2450_v4 = vld [vmem:[%s6783_s7 + $0x3df8] sm:$0xff] }
 0x805   : > { %5764 = vmatpush1.xpose.msra.mxu0 %v1743_v33  ;;  %5871 = vmatpush1.xpose.msra.mxu1 %v1745_v25  ;;  %v2416_v33 = vld [vmem:[%s6783_s7 + $0x3ce8] sm:$0xff]  ;;  %v2418_v25 = vld [vmem:[%s6783_s7 + $0x3cf8] sm:$0xff] }
 0x806   : > { %5765 = vmatprep.subr.mxu0 %v1712_v10  ;;  %5872 = vmatprep.subr.mxu1 %v1714_v18  ;;  %v2415_v10 = vld [vmem:[%s6783_s7 + $0x3ce0] sm:$0xff]  ;;  %v2417_v18 = vld [vmem:[%s6783_s7 + $0x3cf0] sm:$0xff] }
 0x809   : > { %5766 = vmatpush1.xpose.msra.mxu0 %v1711_v39  ;;  %5873 = vmatpush1.xpose.msra.mxu1 %v1713_v29  ;;  %v2384_v39 = vld [vmem:[%s6783_s7 + $0x3be8] sm:$0xff]  ;;  %v2386_v29 = vld [vmem:[%s6783_s7 + $0x3bf8] sm:$0xff] }
 0x80a   : > { %5767 = vmatprep.subr.mxu0 %v1680_v50  ;;  %5874 = vmatprep.subr.mxu1 %v1682_v28  ;;  %v2383_v50 = vld [vmem:[%s6783_s7 + $0x3be0] sm:$0xff]  ;;  %v2385_v28 = vld [vmem:[%s6783_s7 + $0x3bf0] sm:$0xff] }
 0x80d   : > { %5768 = vmatpush1.xpose.msra.mxu0 %v1679_v49  ;;  %5875 = vmatpush1.xpose.msra.mxu1 %v1681_v60  ;;  %v2352_v49 = vld [vmem:[%s6783_s7 + $0x3ae8] sm:$0xff]  ;;  %v2354_v60 = vld [vmem:[%s6783_s7 + $0x3af8] sm:$0xff] }
 0x80e   : > { %5769 = vmatprep.subr.mxu0 %v1648_v30  ;;  %5876 = vmatprep.subr.mxu1 %v1650_v46  ;;  %v2351_v30 = vld [vmem:[%s6783_s7 + $0x3ae0] sm:$0xff]  ;;  %v2353_v46 = vld [vmem:[%s6783_s7 + $0x3af0] sm:$0xff] }
 0x811   : > { %5770 = vmatpush1.xpose.msra.mxu0 %v1647_v2  ;;  %5877 = vmatpush1.xpose.msra.mxu1 %v1649_v53  ;;  %v2320_v2 = vld [vmem:[%s6783_s7 + $0x39e8] sm:$0xff]  ;;  %v2322_v53 = vld [vmem:[%s6783_s7 + $0x39f8] sm:$0xff] }
 0x812   : > { %5771 = vmatprep.subr.mxu0 %v1616_v35  ;;  %5878 = vmatprep.subr.mxu1 %v1618_v27  ;;  %v2319_v35 = vld [vmem:[%s6783_s7 + $0x39e0] sm:$0xff]  ;;  %v2321_v27 = vld [vmem:[%s6783_s7 + $0x39f0] sm:$0xff] }
 0x815   : > { %5772 = vmatpush1.xpose.msra.mxu0 %v1615_v17  ;;  %5879 = vmatpush1.xpose.msra.mxu1 %v1617_v41  ;;  %v2288_v17 = vld [vmem:[%s6783_s7 + $0x38e8] sm:$0xff]  ;;  %v2290_v41 = vld [vmem:[%s6783_s7 + $0x38f8] sm:$0xff] }
 0x816   : > { %5773 = vmatprep.subr.mxu0 %v1584_v23  ;;  %5880 = vmatprep.subr.mxu1 %v1586_v15  ;;  %v2287_v23 = vld [vmem:[%s6783_s7 + $0x38e0] sm:$0xff]  ;;  %v2289_v15 = vld [vmem:[%s6783_s7 + $0x38f0] sm:$0xff] }
 0x819   : > { %5774 = vmatpush1.xpose.msra.mxu0 %v1583_v19  ;;  %5881 = vmatpush1.xpose.msra.mxu1 %v1585_v38  ;;  %v2256_v19 = vld [vmem:[%s6783_s7 + $0x37e8] sm:$0xff]  ;;  %v2258_v38 = vld [vmem:[%s6783_s7 + $0x37f8] sm:$0xff] }
 0x81a   : > { %5775 = vmatprep.subr.mxu0 %v1552_v47  ;;  %5882 = vmatprep.subr.mxu1 %v1554_v22  ;;  %v2255_v47 = vld [vmem:[%s6783_s7 + $0x37e0] sm:$0xff]  ;;  %v2257_v22 = vld [vmem:[%s6783_s7 + $0x37f0] sm:$0xff] }
 0x81d   : > { %5776 = vmatpush1.xpose.msra.mxu0 %v1551_v43  ;;  %5883 = vmatpush1.xpose.msra.mxu1 %v1553_v20  ;;  %v2224_v43 = vld [vmem:[%s6783_s7 + $0x36e8] sm:$0xff]  ;;  %v2226_v20 = vld [vmem:[%s6783_s7 + $0x36f8] sm:$0xff] }
 0x81e   : > { %5777 = vmatprep.subr.mxu0 %v1520_v36  ;;  %5884 = vmatprep.subr.mxu1 %v1522_v31  ;;  %v2223_v36 = vld [vmem:[%s6783_s7 + $0x36e0] sm:$0xff]  ;;  %v2225_v31 = vld [vmem:[%s6783_s7 + $0x36f0] sm:$0xff] }
 0x821   : > { %5778 = vmatpush1.xpose.msra.mxu0 %v1519_v40  ;;  %5885 = vmatpush1.xpose.msra.mxu1 %v1521_v57  ;;  %v2192_v40 = vld [vmem:[%s6783_s7 + $0x35e8] sm:$0xff]  ;;  %v2194_v57 = vld [vmem:[%s6783_s7 + $0x35f8] sm:$0xff] }
 0x822   : > { %5779 = vmatprep.subr.mxu0 %v2512_v13  ;;  %5886 = vmatprep.subr.mxu1 %v2514_v63  ;;  %v2191_v13 = vld [vmem:[%s6783_s7 + $0x35e0] sm:$0xff]  ;;  %v2193_v63 = vld [vmem:[%s6783_s7 + $0x35f0] sm:$0xff] }
 0x825   : > { %5780 = vmatpush2.xpose.msra.mxu0 %v2511_v12  ;;  %5887 = vmatpush2.xpose.msra.mxu1 %v2513_v14  ;;  %v2160_v12 = vld [vmem:[%s6783_s7 + $0x34e8] sm:$0xff]  ;;  %v2162_v14 = vld [vmem:[%s6783_s7 + $0x34f8] sm:$0xff] }
 0x826   : > { %5781 = vmatprep.subr.mxu0 %v2480_v62  ;;  %5888 = vmatprep.subr.mxu1 %v2482_v48  ;;  %v2159_v62 = vld [vmem:[%s6783_s7 + $0x34e0] sm:$0xff]  ;;  %v2161_v48 = vld [vmem:[%s6783_s7 + $0x34f0] sm:$0xff] }
 0x829   : > { %5782 = vmatpush2.xpose.msra.mxu0 %v2479_v8  ;;  %5889 = vmatpush2.xpose.msra.mxu1 %v2481_v42  ;;  %v2128_v8 = vld [vmem:[%s6783_s7 + $0x33e8] sm:$0xff]  ;;  %v2130_v42 = vld [vmem:[%s6783_s7 + $0x33f8] sm:$0xff] }
 0x82a   : > { %5783 = vmatprep.subr.mxu0 %v2448_v21  ;;  %5890 = vmatprep.subr.mxu1 %v2450_v4  ;;  %v2127_v21 = vld [vmem:[%s6783_s7 + $0x33e0] sm:$0xff]  ;;  %v2129_v4 = vld [vmem:[%s6783_s7 + $0x33f0] sm:$0xff] }
 0x82d   : > { %5784 = vmatpush2.xpose.msra.mxu0 %v2447_v26  ;;  %5891 = vmatpush2.xpose.msra.mxu1 %v2449_v3  ;;  %v2096_v26 = vld [vmem:[%s6783_s7 + $0x32e8] sm:$0xff]  ;;  %v2098_v3 = vld [vmem:[%s6783_s7 + $0x32f8] sm:$0xff] }
 0x82e   : > { %5785 = vmatprep.subr.mxu0 %v2416_v33  ;;  %5892 = vmatprep.subr.mxu1 %v2418_v25  ;;  %v2095_v33 = vld [vmem:[%s6783_s7 + $0x32e0] sm:$0xff]  ;;  %v2097_v25 = vld [vmem:[%s6783_s7 + $0x32f0] sm:$0xff] }
 0x831   : > { %5786 = vmatpush2.xpose.msra.mxu0 %v2415_v10  ;;  %5893 = vmatpush2.xpose.msra.mxu1 %v2417_v18  ;;  %v2064_v10 = vld [vmem:[%s6783_s7 + $0x31e8] sm:$0xff]  ;;  %v2066_v18 = vld [vmem:[%s6783_s7 + $0x31f8] sm:$0xff] }
 0x832   : > { %5787 = vmatprep.subr.mxu0 %v2384_v39  ;;  %5894 = vmatprep.subr.mxu1 %v2386_v29  ;;  %v2063_v39 = vld [vmem:[%s6783_s7 + $0x31e0] sm:$0xff]  ;;  %v2065_v29 = vld [vmem:[%s6783_s7 + $0x31f0] sm:$0xff] }
 0x835   : > { %5788 = vmatpush2.xpose.msra.mxu0 %v2383_v50  ;;  %5895 = vmatpush2.xpose.msra.mxu1 %v2385_v28  ;;  %v2032_v50 = vld [vmem:[%s6783_s7 + $0x30e8] sm:$0xff]  ;;  %v2034_v28 = vld [vmem:[%s6783_s7 + $0x30f8] sm:$0xff] }
 0x836   : > { %5789 = vmatprep.subr.mxu0 %v2352_v49  ;;  %5896 = vmatprep.subr.mxu1 %v2354_v60  ;;  %v2031_v49 = vld [vmem:[%s6783_s7 + $0x30e0] sm:$0xff]  ;;  %v2033_v60 = vld [vmem:[%s6783_s7 + $0x30f0] sm:$0xff] }
 0x839   : > { %5790 = vmatpush2.xpose.msra.mxu0 %v2351_v30  ;;  %5897 = vmatpush2.xpose.msra.mxu1 %v2353_v46  ;;  %v6399_v30 = vld [vmem:[#allocation2 + $0xe0] sm:$0xff]  ;;  %v6400_v46 = vld [vmem:[#allocation2 + $0xf0] sm:$0xff] }
 0x83a   : > { %5791 = vmatprep.subr.mxu0 %v2320_v2  ;;  %5898 = vmatprep.subr.mxu1 %v2322_v53  ;;  %v6401_v2 = vld [vmem:[#allocation2 + $0x1e8] sm:$0xff]  ;;  %v6402_v53 = vld [vmem:[#allocation2 + $0x1f8] sm:$0xff] }
 0x83d   : > { %5792 = vmatpush2.xpose.msra.mxu0 %v2319_v35  ;;  %5899 = vmatpush2.xpose.msra.mxu1 %v2321_v27  ;;  %v6403_v35 = vld [vmem:[#allocation2 + $0x1e0] sm:$0xff]  ;;  %v6404_v27 = vld [vmem:[#allocation2 + $0x1f0] sm:$0xff] }
 0x83e   : > { %5793 = vmatprep.subr.mxu0 %v2288_v17  ;;  %5900 = vmatprep.subr.mxu1 %v2290_v41  ;;  %v6405_v17 = vld [vmem:[#allocation2 + $0x2e8] sm:$0xff]  ;;  %v6406_v41 = vld [vmem:[#allocation2 + $0x2f8] sm:$0xff] }
 0x841   : > { %5794 = vmatpush2.xpose.msra.mxu0 %v2287_v23  ;;  %5901 = vmatpush2.xpose.msra.mxu1 %v2289_v15  ;;  %v6407_v23 = vld [vmem:[#allocation2 + $0x2e0] sm:$0xff]  ;;  %v6408_v15 = vld [vmem:[#allocation2 + $0x2f0] sm:$0xff] }
 0x842   : > { %5795 = vmatprep.subr.mxu0 %v2256_v19  ;;  %5902 = vmatprep.subr.mxu1 %v2258_v38  ;;  %v6409_v19 = vld [vmem:[#allocation2 + $0x3e8] sm:$0xff]  ;;  %v6410_v38 = vld [vmem:[#allocation2 + $0x3f8] sm:$0xff] }
 0x845   : > { %5796 = vmatpush2.xpose.msra.mxu0 %v2255_v47  ;;  %5903 = vmatpush2.xpose.msra.mxu1 %v2257_v22  ;;  %v6411_v47 = vld [vmem:[#allocation2 + $0x3e0] sm:$0xff]  ;;  %v6412_v22 = vld [vmem:[#allocation2 + $0x3f0] sm:$0xff] }
 0x846   : > { %5797 = vmatprep.subr.mxu0 %v2224_v43  ;;  %5904 = vmatprep.subr.mxu1 %v2226_v20  ;;  %v6413_v43 = vld [vmem:[#allocation2 + $0x4e8] sm:$0xff]  ;;  %v6414_v20 = vld [vmem:[#allocation2 + $0x4f8] sm:$0xff] }
 0x849   : > { %5798 = vmatpush2.xpose.msra.mxu0 %v2223_v36  ;;  %5905 = vmatpush2.xpose.msra.mxu1 %v2225_v31  ;;  %v6415_v36 = vld [vmem:[#allocation2 + $0x4e0] sm:$0xff]  ;;  %v6416_v31 = vld [vmem:[#allocation2 + $0x4f0] sm:$0xff] }
 0x84a   : > { %5799 = vmatprep.subr.mxu0 %v2192_v40  ;;  %5906 = vmatprep.subr.mxu1 %v2194_v57  ;;  %v6417_v40 = vld [vmem:[#allocation2 + $0x5e8] sm:$0xff]  ;;  %v6418_v57 = vld [vmem:[#allocation2 + $0x5f8] sm:$0xff] }
 0x84d   : > { %5800 = vmatpush2.xpose.msra.mxu0 %v2191_v13  ;;  %5907 = vmatpush2.xpose.msra.mxu1 %v2193_v63  ;;  %v6419_v13 = vld [vmem:[#allocation2 + $0x5e0] sm:$0xff]  ;;  %v6420_v63 = vld [vmem:[#allocation2 + $0x5f0] sm:$0xff] }
 0x84e   : > { %5801 = vmatprep.subr.mxu0 %v2160_v12  ;;  %5908 = vmatprep.subr.mxu1 %v2162_v14  ;;  %v6421_v12 = vld [vmem:[#allocation2 + $0x6e8] sm:$0xff]  ;;  %v6422_v14 = vld [vmem:[#allocation2 + $0x6f8] sm:$0xff] }
 0x851   : > { %5802 = vmatpush2.xpose.msra.mxu0 %v2159_v62  ;;  %5909 = vmatpush2.xpose.msra.mxu1 %v2161_v48  ;;  %v6423_v62 = vld [vmem:[#allocation2 + $0x6e0] sm:$0xff]  ;;  %v6424_v48 = vld [vmem:[#allocation2 + $0x6f0] sm:$0xff] }
 0x852   : > { %5803 = vmatprep.subr.mxu0 %v2128_v8  ;;  %5910 = vmatprep.subr.mxu1 %v2130_v42  ;;  %v9584_v8 = vpop.f32.mrf.mxu0  ;;  %v9586_v42 = vpop.f32.mrf.mxu1 }
 0x853   : > { %9943 = vst [vmem:[#allocation17_spill] sm:$0xff] %v9586_v42 }
 0x855   : > { %5804 = vmatpush2.xpose.msra.mxu0 %v2127_v21  ;;  %5911 = vmatpush2.xpose.msra.mxu1 %v2129_v4  ;;  %v5385_v21 = vpop.f32.mrf.mxu0  ;;  %v5492_v4 = vpop.f32.mrf.mxu1 }
 0x856   : > { %5805 = vmatprep.subr.mxu0 %v2096_v26  ;;  %5912 = vmatprep.subr.mxu1 %v2098_v3 }
 0x857   : > { %v5387_v26 = vpop.f32.mrf.mxu0  ;;  %v5494_v3 = vpop.f32.mrf.mxu1 }
 0x859   : > { %5806 = vmatpush2.xpose.msra.mxu0 %v2095_v33  ;;  %5913 = vmatpush2.xpose.msra.mxu1 %v2097_v25  ;;  %v5391_v33 = vpop.f32.mrf.mxu0  ;;  %v5498_v25 = vpop.f32.mrf.mxu1 }
 0x85a   : > { %5807 = vmatprep.subr.mxu0 %v2064_v10  ;;  %5914 = vmatprep.subr.mxu1 %v2066_v18 }
 0x85b   : > { %v5393_v10 = vpop.f32.mrf.mxu0  ;;  %v9588_v18 = vpop.f32.mrf.mxu1 }
 0x85d   : > { %5808 = vmatpush2.xpose.msra.mxu0 %v2063_v39  ;;  %5915 = vmatpush2.xpose.msra.mxu1 %v2065_v29  ;;  %v5397_v39 = vpop.f32.mrf.mxu0  ;;  %v9590_v29 = vpop.f32.mrf.mxu1 }
 0x85e   : > { %5809 = vmatprep.subr.mxu0 %v2032_v50  ;;  %5916 = vmatprep.subr.mxu1 %v2034_v28 }
 0x85f   : > { %v5399_v50 = vpop.f32.mrf.mxu0  ;;  %v9592_v28 = vpop.f32.mrf.mxu1 }
 0x861   : > { %5810 = vmatpush2.xpose.msra.mxu0 %v2031_v49  ;;  %5917 = vmatpush2.xpose.msra.mxu1 %v2033_v60  ;;  %v9594_v49 = vpop.f32.mrf.mxu0  ;;  %v9596_v60 = vpop.f32.mrf.mxu1 }
 0x864   : > { %5812 = vmatmul.mubr.f32.vlgmr.msra.gmra.mxu0 %v6399_v30  ;;  %5919 = vmatmul.mubr.f32.vlgmr.msra.gmra.mxu1 %v6400_v46  ;;  %v9598_v30 = vpop.f32.mrf.mxu0  ;;  %v9600_v46 = vpop.f32.mrf.mxu1 }
 0x865   : > { %5817 = vmatprep.mubr.f32.mxu0 %v6401_v2  ;;  %5924 = vmatprep.mubr.f32.mxu1 %v6402_v53 }
 0x866   : > { %v9602_v2 = vpop.f32.mrf.mxu0  ;;  %v9604_v53 = vpop.f32.mrf.mxu1 }
 0x868   : > { %5818 = vmatmul.mubr.f32.gmra.mxu0 %v6403_v35  ;;  %5925 = vmatmul.mubr.f32.gmra.mxu1 %v6404_v27  ;;  %v9606_v35 = vpop.f32.mrf.mxu0  ;;  %v9608_v27 = vpop.f32.mrf.mxu1 }
 0x869   : > { %5823 = vmatprep.mubr.f32.mxu0 %v6405_v17  ;;  %5930 = vmatprep.mubr.f32.mxu1 %v6406_v41  ;;  %9944 = vst [vmem:[#allocation28_spill] sm:$0xff] %v9608_v27 }
 0x86a   : > { %v9610_v17 = vpop.f32.mrf.mxu0  ;;  %v9612_v41 = vpop.f32.mrf.mxu1 }
 0x86b   : > { %9945 = vst [vmem:[#allocation29_spill] sm:$0xff] %v9612_v41 }
 0x86c   : > { %5824 = vmatmul.mubr.f32.gmra.mxu0 %v6407_v23  ;;  %5931 = vmatmul.mubr.f32.gmra.mxu1 %v6408_v15  ;;  %v9614_v23 = vpop.f32.mrf.mxu0  ;;  %v9616_v15 = vpop.f32.mrf.mxu1 }
 0x86d   : > { %5829 = vmatprep.mubr.f32.mxu0 %v6409_v19  ;;  %5936 = vmatprep.mubr.f32.mxu1 %v6410_v38  ;;  %9946 = vst [vmem:[#allocation19_spill] sm:$0xff] %v9614_v23  ;;  %9947 = vst [vmem:[#allocation20_spill] sm:$0xff] %v9616_v15  ;;  %v4354_v23 = vadd.f32 %v8838_v44, %v8671_v34 }
 0x86e   : > { %v9618_v19 = vpop.f32.mrf.mxu0  ;;  %v9620_v38 = vpop.f32.mrf.mxu1 }
 0x86f   : > { %9948 = vst [vmem:[#allocation14_spill] sm:$0xff] %v9618_v19  ;;  %9949 = vst [vmem:[#allocation16_spill] sm:$0xff] %v9620_v38 }
 0x870   : > { %5830 = vmatmul.mubr.f32.gmra.mxu0 %v6411_v47  ;;  %5937 = vmatmul.mubr.f32.gmra.mxu1 %v6412_v22  ;;  %v9622_v47 = vpop.f32.mrf.mxu0  ;;  %v9624_v22 = vpop.f32.mrf.mxu1 }
 0x871   : > { %5835 = vmatprep.mubr.f32.mxu0 %v6413_v43  ;;  %5942 = vmatprep.mubr.f32.mxu1 %v6414_v20  ;;  %9950 = vst [vmem:[#allocation30_spill] sm:$0xff] %v9622_v47  ;;  %9951 = vst [vmem:[#allocation18_spill] sm:$0xff] %v9624_v22 }
 0x874   : > { %5836 = vmatmul.mubr.f32.gmra.mxu0 %v6415_v36  ;;  %5943 = vmatmul.mubr.f32.gmra.mxu1 %v6416_v31 }
 0x875   : > { %5841 = vmatprep.mubr.f32.mxu0 %v6417_v40  ;;  %5948 = vmatprep.mubr.f32.mxu1 %v6418_v57 }
 0x878   : > { %5842 = vmatmul.mubr.f32.gmra.mxu0 %v6419_v13  ;;  %5949 = vmatmul.mubr.f32.gmra.mxu1 %v6420_v63 }
 0x879   : > { %5847 = vmatprep.mubr.f32.mxu0 %v6421_v12  ;;  %5954 = vmatprep.mubr.f32.mxu1 %v6422_v14 }
 0x87c   : > { %5848 = vmatmul.mubr.f32.gmra.mxu0 %v6423_v62  ;;  %5955 = vmatmul.mubr.f32.gmra.mxu1 %v6424_v48 }
 0x8a4   : > { %v5599_v43 = vpop.f32.mrf.mxu0  ;;  %v5706_v20 = vpop.f32.mrf.mxu1 }
 0x8a6   : > { %v5601_v36 = vpop.f32.mrf.mxu0  ;;  %v5708_v31 = vpop.f32.mrf.mxu1 }
 0x8a8   : > { %v5605_v40 = vpop.f32.mrf.mxu0  ;;  %v5712_v57 = vpop.f32.mrf.mxu1 }
 0x8aa   : > { %v5607_v13 = vpop.f32.mrf.mxu0  ;;  %v5714_v63 = vpop.f32.mrf.mxu1 }
 0x8ac   : > { %v5611_v12 = vpop.f32.mrf.mxu0  ;;  %v9626_v14 = vpop.f32.mrf.mxu1 }
 0x8ae   : > { %v5613_v62 = vpop.f32.mrf.mxu0  ;;  %v9628_v48 = vpop.f32.mrf.mxu1 }
 0x8af   : > { %9952 = vst [vmem:[#allocation31_spill] sm:$0xff] %v9628_v48  ;;  %v5392_v48 = vadd.f32 %v5391_v33, %v9373_v11 }
 0x8b0   : > { %v9630_v15 = vpop.f32.mrf.mxu0  ;;  %v9632_v38 = vpop.f32.mrf.mxu1 }
 0x8b1   : > { %9953 = vst [vmem:[#allocation21_spill] sm:$0xff] %v9632_v38  ;;  %v4461_v38 = vadd.f32 %v8840_v37, %v4354_v23  ;;  %v5499_v23 = vadd.f32 %v5498_v25, %v5392_v48 }
 0x8b2   : > { %v9634_v47 = vpop.f32.mrf.mxu0  ;;  %v9636_v22 = vpop.f32.mrf.mxu1 }
 0x8b3   : > { %9954 = vst [vmem:[#allocation22_spill] sm:$0xff] %v9634_v47  ;;  %9955 = vst [vmem:[#allocation48_spill] sm:$0xff] %v9636_v22  ;;  %v5386_v47 = vadd.f32 %v5385_v21, %v9362_v7  ;;  %v4568_v22 = vadd.f32 %v9009_v32, %v4461_v38  ;;  %v5394_v7 = vadd.f32 %v5393_v10, %v9378_v52 }
 0x8b4   : > { %v9638_v19 = vpop.f32.mrf.mxu0  ;;  %v9640_v58 = vpop.f32.mrf.mxu1  ;;  %v5398_v38 = vadd.f32 %v5397_v39, %v9383_v54  ;;  %v5606_v33 = vadd.f32 %v5605_v40, %v5499_v23  ;;  %v5404_v52 = vadd.f32 %v9594_v49, %v9393_v1  ;;  %v5412_v40 = vadd.f32 %v9606_v35, %v9408_v59  ;;  %v9966_v23 = vld [vmem:[#allocation19_spill] sm:$0xff] }
 0x8b5   : > { %9956 = vst [vmem:[#allocation24_spill] sm:$0xff] %v9638_v19  ;;  %9957 = vst [vmem:[#allocation26_spill] sm:$0xff] %v9640_v58  ;;  %v4675_v34 = vadd.f32 %v9011_v24, %v4568_v22  ;;  %v5501_v24 = vadd.f32 %v9588_v18, %v5394_v7  ;;  %v5406_v18 = vadd.f32 %v9598_v30, %v9398_v9  ;;  %v9964_v7 = vld [vmem:[#allocation28_spill] sm:$0xff] }
 0x8b6   : > { %v9642_v41 = vpop.f32.mrf.mxu0  ;;  %v9644_v42 = vpop.f32.mrf.mxu1  ;;  %v5505_v54 = vadd.f32 %v9590_v29, %v5398_v38  ;;  %v9962_v59 = vld [vmem:[#allocation31_spill] sm:$0xff] }
 0x8b7   : > { %9958 = vst [vmem:[#allocation46_spill] sm:$0xff] %v9642_v41  ;;  %9959 = vst [vmem:[#allocation70_spill] sm:$0xff] %v9644_v42  ;;  %v5388_v41 = vadd.f32 %v5387_v26, %v9367_v55  ;;  %v5493_v42 = vadd.f32 %v5492_v4, %v5386_v47  ;;  %v4782_v32 = vadd.f32 %v9180_v16, %v4675_v34 }
 0x8b8   : > { %v9648_v5 = vpop.f32.mrf.mxu0  ;;  %v9650_v27 = vpop.f32.mrf.mxu1  ;;  %v5400_v55 = vadd.f32 %v5399_v50, %v9388_v61  ;;  %v5608_v10 = vadd.f32 %v5607_v13, %v5501_v24  ;;  %v5713_v47 = vadd.f32 %v5712_v57, %v5606_v33  ;;  %v5612_v22 = vadd.f32 %v5611_v12, %v5505_v54  ;;  %v9971_v54 = vld [vmem:[#allocation15_spill] sm:$0xff] }
 0x8b9   : > { %9960 = vst [vmem:[#allocation32_spill] sm:$0xff] %v9650_v27  ;;  %v5495_v37 = vadd.f32 %v5494_v3, %v5388_v41  ;;  %v5600_v21 = vadd.f32 %v5599_v43, %v5493_v42  ;;  %v4889_v3 = vadd.f32 %v9182_v56, %v4782_v32  ;;  %v5511_v43 = vadd.f32 %v9596_v60, %v5404_v52  ;;  %v9965_v32 = vld [vmem:[#allocation13_spill] sm:$0xff] }
 0x8ba   : > { %v9655_v19 = vpop.f32.mrf.mxu0  ;;  %v9657_v58 = vpop.f32.mrf.mxu1  ;;  %v5507_v50 = vadd.f32 %v9592_v28, %v5400_v55  ;;  %v5513_v30 = vadd.f32 %v9600_v46, %v5406_v18  ;;  %v5719_v13 = vadd.f32 %v9626_v14, %v5612_v22  ;;  %v5416_v46 = vadd.f32 %v9610_v17, %v9413_v0  ;;  %v9963_v34 = vld [vmem:[#allocation22_spill] sm:$0xff]  ;;  %v9967_v55 = vld [vmem:[#allocation21_spill] sm:$0xff] }
 0x8bb   : > { %9961 = vst [vmem:[#allocation34_spill] sm:$0xff] %v9657_v58  ;;  %v5602_v58 = vadd.f32 %v5601_v36, %v5495_v37  ;;  %v5707_v26 = vadd.f32 %v5706_v20, %v5600_v21  ;;  %v4996_v39 = vadd.f32 %v9351_v6, %v4889_v3  ;;  %v5715_v6 = vadd.f32 %v5714_v63, %v5608_v10  ;;  %v9969_v3 = vld [vmem:[#allocation17_spill] sm:$0xff] }
 0x8bc   : > { %v9662_v44 = vpop.f32.mrf.mxu0  ;;  %v9664_v27 = vpop.f32.mrf.mxu1  ;;  %v5614_v36 = vadd.f32 %v5613_v62, %v5507_v50  ;;  %v5620_v37 = vadd.f32 %v9963_v34, %v5513_v30  ;;  %v5519_v21 = vadd.f32 %v9964_v7, %v5412_v40  ;;  %v9968_v0 = vld [vmem:[#allocation24_spill] sm:$0xff] }
 0x8bd   : > { %v5709_v25 = vadd.f32 %v5708_v31, %v5602_v58  ;;  %v5410_v58 = vadd.f32 %v9602_v2, %v9403_v45  ;;  %v5103_v9 = vadd.f32 %v9353_v51, %v4996_v39  ;;  %v5618_v45 = vadd.f32 %v9630_v15, %v5511_v43  ;;  %v9973_v50 = vld [vmem:[#allocation48_spill] sm:$0xff]  ;;  %v9976_v43 = vld [vmem:[#allocation30_spill] sm:$0xff] }
 0x8be   : > { %v9670_v4 = vpop.f32.mrf.mxu0  ;;  %v9672_v11 = vpop.f32.mrf.mxu1  ;;  %v5721_v35 = vadd.f32 %v9962_v59, %v5614_v36  ;;  %v5727_v18 = vadd.f32 %v9973_v50, %v5620_v37  ;;  %v9978_v30 = vld [vmem:[#allocation16_spill] sm:$0xff] }
 0x8bf   : > { %v5210_v12 = vadd.f32 %v9584_v8, %v5103_v9  ;;  %v5517_v51 = vadd.f32 %v9604_v53, %v5410_v58  ;;  %v5418_v8 = vadd.f32 %v9966_v23, %v9965_v32  ;;  %v5725_v24 = vadd.f32 %v9967_v55, %v5618_v45 }
 0x8c1   : > { %v5624_v17 = vadd.f32 %v9968_v0, %v5517_v51  ;;  %v5317_v52 = vadd.f32 %v9969_v3, %v5210_v12  ;;  %v9980_v51 = vld [vmem:[#allocation18_spill] sm:$0xff] }
 0x8c3   : > { %v5424_v58 = vadd.f32 %v9976_v43, %v5317_v52 }
 0x924   : > { %v5813_v16 = vpop.f32.mrf.mxu0  ;;  %v5920_v42 = vpop.f32.mrf.mxu1 }
 0x925   : > { %v5814_v61 = vadd.f32 %v5813_v16, %v5707_v26  ;;  %v9970_v16 = vld [vmem:[#allocation29_spill] sm:$0xff] }
 0x926   : > { %v5815_v41 = vpop.f32.mrf.mxu0  ;;  %v5922_v56 = vpop.f32.mrf.mxu1 }
 0x927   : > { %v5921_v1 = vadd.f32 %v5920_v42, %v5814_v61  ;;  %v5816_v49 = vadd.f32 %v5815_v41, %v5709_v25  ;;  %v5523_v42 = vadd.f32 %v9970_v16, %v5416_v46  ;;  %v9972_v25 = vld [vmem:[#allocation14_spill] sm:$0xff]  ;;  %v5531_v46 = vadd.f32 %v9980_v51, %v5424_v58 }
 0x928   : > { %v5819_v29 = vpop.f32.mrf.mxu0  ;;  %v5926_v20 = vpop.f32.mrf.mxu1  ;;  %v5422_v10 = vadd.f32 %v9972_v25, %v9971_v54  ;;  %v9974_v41 = vld [vmem:[#allocation46_spill] sm:$0xff] }
 0x929   : > { %5963 = vst [vmem:[%s8493_s6 + $0x10] sm:$0xff] %v5921_v1  ;;  %v5923_v28 = vadd.f32 %v5922_v56, %v5816_v49  ;;  %v5820_v31 = vadd.f32 %v5819_v29, %v5713_v47  ;;  %v5626_v56 = vadd.f32 %v9974_v41, %v5519_v21  ;;  %v9975_v1 = vld [vmem:[#allocation20_spill] sm:$0xff]  ;;  %v5638_v21 = vadd.f32 %v9670_v4, %v5531_v46 }
 0x92a   : > { %v5821_v60 = vpop.f32.mrf.mxu0  ;;  %v5928_v57 = vpop.f32.mrf.mxu1  ;;  %v5525_v49 = vadd.f32 %v9975_v1, %v5418_v8  ;;  %v5529_v40 = vadd.f32 %v9978_v30, %v5422_v10 }
 0x92b   : > { %5964 = vst [vmem:[%s8493_s6 + $0x18] sm:$0xff] %v5923_v28  ;;  %v5927_v2 = vadd.f32 %v5926_v20, %v5820_v31  ;;  %v5822_v63 = vadd.f32 %v5821_v60, %v5715_v6  ;;  %v9977_v6 = vld [vmem:[#allocation26_spill] sm:$0xff]  ;;  %v5630_v28 = vadd.f32 %v9648_v5, %v5523_v42  ;;  %v5745_v4 = vadd.f32 %v9672_v11, %v5638_v21 }
 0x92c   : > { %v5825_v62 = vpop.f32.mrf.mxu0  ;;  %v5932_v48 = vpop.f32.mrf.mxu1  ;;  %v5731_v36 = vadd.f32 %v9977_v6, %v5624_v17 }
 0x92d   : > { %5967 = vst [vmem:[%s8493_s6 + $0x30] sm:$0xff] %v5927_v2  ;;  %v5929_v14 = vadd.f32 %v5928_v57, %v5822_v63  ;;  %v5826_v15 = vadd.f32 %v5825_v62, %v5719_v13  ;;  %v9979_v13 = vld [vmem:[#allocation70_spill] sm:$0xff]  ;;  %v5632_v2 = vadd.f32 %v9655_v19, %v5525_v49 }
 0x92e   : > { %v5827_v38 = vpop.f32.mrf.mxu0  ;;  %v5934_v53 = vpop.f32.mrf.mxu1  ;;  %v5733_v45 = vadd.f32 %v9979_v13, %v5626_v56  ;;  %v9982_v19 = vld [vmem:[#allocation34_spill] sm:$0xff] }
 0x92f   : > { %5968 = vst [vmem:[%s8493_s6 + $0x38] sm:$0xff] %v5929_v14  ;;  %v5933_v26 = vadd.f32 %v5932_v48, %v5826_v15  ;;  %v5828_v33 = vadd.f32 %v5827_v38, %v5721_v35  ;;  %v9981_v48 = vld [vmem:[#allocation32_spill] sm:$0xff]  ;;  %v5636_v35 = vadd.f32 %v9662_v44, %v5529_v40  ;;  %v5739_v7 = vadd.f32 %v9982_v19, %v5632_v2 }
 0x930   : > { %v5831_v61 = vpop.f32.mrf.mxu0  ;;  %v5938_v39 = vpop.f32.mrf.mxu1  ;;  %v5737_v59 = vadd.f32 %v9981_v48, %v5630_v28 }
 0x931   : > { %5971 = vst [vmem:[%s8493_s6 + $0x50] sm:$0xff] %v5933_v26  ;;  %v5935_v47 = vadd.f32 %v5934_v53, %v5828_v33  ;;  %v5832_v22 = vadd.f32 %v5831_v61, %v5725_v24  ;;  %v5743_v44 = vadd.f32 %v9664_v27, %v5636_v35 }
 0x932   : > { %v5833_v29 = vpop.f32.mrf.mxu0  ;;  %v5940_v20 = vpop.f32.mrf.mxu1 }
 0x933   : > { %5972 = vst [vmem:[%s8493_s6 + $0x58] sm:$0xff] %v5935_v47  ;;  %v5939_v31 = vadd.f32 %v5938_v39, %v5832_v22  ;;  %v5834_v9 = vadd.f32 %v5833_v29, %v5727_v18 }
 0x934   : > { %v5837_v60 = vpop.f32.mrf.mxu0  ;;  %v5944_v57 = vpop.f32.mrf.mxu1 }
 0x935   : > { %5975 = vst [vmem:[%s8493_s6 + $0x70] sm:$0xff] %v5939_v31  ;;  %v5941_v63 = vadd.f32 %v5940_v20, %v5834_v9  ;;  %v5838_v12 = vadd.f32 %v5837_v60, %v5731_v36 }
 0x936   : > { %v5839_v62 = vpop.f32.mrf.mxu0  ;;  %v5946_v5 = vpop.f32.mrf.mxu1 }
 0x937   : > { %5976 = vst [vmem:[%s8493_s6 + $0x78] sm:$0xff] %v5941_v63  ;;  %v5945_v34 = vadd.f32 %v5944_v57, %v5838_v12  ;;  %v5840_v37 = vadd.f32 %v5839_v62, %v5733_v45 }
 0x938   : > { %v5843_v14 = vpop.f32.mrf.mxu0  ;;  %v5950_v15 = vpop.f32.mrf.mxu1 }
 0x939   : > { %5979 = vst [vmem:[%s8493_s6 + $0x90] sm:$0xff] %v5945_v34  ;;  %v5947_v32 = vadd.f32 %v5946_v5, %v5840_v37  ;;  %v5844_v23 = vadd.f32 %v5843_v14, %v5737_v59 }
 0x93a   : > { %v5845_v8 = vpop.f32.mrf.mxu0  ;;  %v5952_v38 = vpop.f32.mrf.mxu1 }
 0x93b   : > { %5980 = vst [vmem:[%s8493_s6 + $0x98] sm:$0xff] %v5947_v32  ;;  %v5951_v53 = vadd.f32 %v5950_v15, %v5844_v23  ;;  %v5846_v55 = vadd.f32 %v5845_v8, %v5739_v7 }
 0x93c   : > { %v5849_v24 = vpop.f32.mrf.mxu0  ;;  %v5956_v0 = vpop.f32.mrf.mxu1 }
 0x93d   : > { %5983 = vst [vmem:[%s8493_s6 + $0xb0] sm:$0xff] %v5951_v53  ;;  %v5953_v17 = vadd.f32 %v5952_v38, %v5846_v55  ;;  %v5850_v26 = vadd.f32 %v5849_v24, %v5743_v44 }
 0x93e   : > { %v5851_v33 = vpop.f32.mrf.mxu0  ;;  %v5958_v52 = vpop.f32.mrf.mxu1 }
 0x93f   : > { %5984 = vst [vmem:[%s8493_s6 + $0xb8] sm:$0xff] %v5953_v17  ;;  %v5957_v3 = vadd.f32 %v5956_v0, %v5850_v26  ;;  %v5852_v27 = vadd.f32 %v5851_v33, %v5745_v4 }
 0x941   : > { %5987 = vst [vmem:[%s8493_s6 + $0xd0] sm:$0xff] %v5957_v3  ;;  %v5959_v11 = vadd.f32 %v5958_v52, %v5852_v27 }
 0x943   : > { %5988 = vst [vmem:[%s8493_s6 + $0xd8] sm:$0xff] %v5959_v11 }
 0x944   : > { %6520 = shalt.err (!%p6517_p1)
}
 0x945   : > { %s6521_s10 = scalar_lea.hbm %s9740_s24, 3584  ;;  %s6525_s7 = scalar_lea.hbm %s9790_s3, 7168 }
 0x946   : > { %p6522_p9 = scmp.ne.s32.totalorder %s9740_s24, %s6521_s10  ;;  %p6526_p7 = scmp.lt.s32.totalorder %s9740_s24, %s9790_s3 }
 0x947   : > { %p6527_p0 = scmp.lt.s32.totalorder %s6525_s7, %s6521_s10 }
 0x948   : > { %p6523_p11 = pnand %p6522_p9, %p9983_p8 }
 0x949   : > { %p6528_p4 = por %p6527_p0, %p6526_p7 }
 0x94a   : > { %p6524_p6 = pneg %p6523_p11 }
 0x94c   : > { %p6529_p12 = pnand %p6528_p4, %p6524_p6 }
 0x94e   : > { %6532 = shalt.err (!%p6529_p12)
}
 0x94f   : > { %s6583_s4 = smov 512   ;;  %s6584_s6 = smov 1024  }
 0x950   : > { %s6585_s8 = smov 32  }
 0x951   : > { %6140 = dma.vmem_to_hbm [thread:$0]  (%p9983_p8), %s9742_s9, 3584, %s9740_s24, %s5990_s23, %s6583_s4, %s6584_s6, %s6585_s8  }
 0x952 PF: > { %s6018_s28 = sand.u32 1, %s6563_s12   ;;  %p9984_p10 = scmp.ne.s32.totalorder %s9802_s27, 0 }
 0x953   : > { %p9985_p3 = scmp.ge.s32.totalorder %s6575_s15, 2  ;;  %s6019_s21 = scalar_lea.sflag [#allocation4], %s6018_s28 }
 0x955   : > { %p6154_p5 = pnand %p9985_p3, %p9984_p10 }
 0x957   : > { %p6155_p13 = pneg %p6154_p5 }
 0x959   : > { %6558 = dma.done.wait (%p6155_p13), %s6019_s21, 3584  }
 0x95a   : > { %6560 = vsyncadd (%p6155_p13), %s6019_s21, 4294963712  ;;  %p17_p2 = scmp.ge.s32.totalorder %s6627_s16, 4   ;;  %s9986_s12 = smov %s6567_s13 }
 0x95b   : > { %s9987_s13 = smov %s6571_s14  ;;  %s9988_s14 = smov %s6636_s19 }
 0x95c   : > { %s9989_s15 = smov %s6627_s16  ;;  %19 = sbr.rel (!%p17_p2) target bundleno = 6 (0x6), region = 93 }
 0x961   :  { %6024 = vsyncpa [#allocation3], 1 }
 0x962   :  { %6026 = vsyncpa [#allocation3 + $0x1], 1 }
 0x963   :  { %6027 = vsyncpa [#allocation6], 1 }
 0x964   :  { %6029 = vsyncpa [#allocation6 + $0x1], 1 }
 0x965   :  { %6030 = vsyncpa [#allocation4], 1 }
 0x966   :  { %6032 = vsyncpa [#allocation4 + $0x1], 1 }

</bundles_post_ra>
